<compile_context>
chip_gen: v7x
topology: tpu7x:2x2x1
jax: 0.10.0
libtpu: 0.0.40
codegen_flags: <defaults>
</compile_context>

<pallas_src>
import functools

import jax
import jax.numpy as jnp
from jax.experimental import pallas as pl
from jax.experimental.pallas import tpu as pltpu


def _round_up(x, m):
    return (x + m - 1) // m * m


def _pick_dst_tile(n_pad):
    # Largest tile that divides n_pad AND leaves >= 2 grid steps (v7x: 2 TCs).
    for t in (512, 256, 128):
        if n_pad % t == 0 and n_pad // t >= 2:
            return t
    return 128


def _pick_src_chunk(n_pad):
    for t in (512, 256, 128):
        if n_pad % t == 0:
            return t
    return n_pad


# --------------------------------------------------------------------------
# Kernel A: fused feature projection.  One bf16 matmul yields [feat | el | er].
# --------------------------------------------------------------------------
def _proj_kernel(x_ref, w_ref, o_ref):
    o_ref[...] = jnp.dot(x_ref[...], w_ref[...],
                         preferred_element_type=jnp.float32)


# --------------------------------------------------------------------------
# Kernel B: online-softmax attention + aggregation, tiled over (dst, src).
# --------------------------------------------------------------------------
def _attn_kernel(mask_ref, feat_ref, el_ref, er_ref, b_ref, out_ref,
                 m_sc, l_sc, acc_sc, *,
                 num_heads, out_feats, use_elu, mean_heads, out_w, out_pad):
    H, F = num_heads, out_feats
    j = pl.program_id(1)

    @pl.when(j == 0)
    def _():
        m_sc[...] = jnp.full(m_sc.shape, -1e30, jnp.float32)
        l_sc[...] = jnp.zeros(l_sc.shape, jnp.float32)
        acc_sc[...] = jnp.zeros(acc_sc.shape, jnp.float32)

    # int8 adjacency chunk -> additive bias: 0 on edges, -1e9 off-edges.
    edge_bias = (mask_ref[...].astype(jnp.float32) - 1.0) * 1e9   # (Td, Ts)
    el = el_ref[...]                                              # (H, Ts)
    er = er_ref[...]                                              # (Td, H)

    for h in range(H):                       # static, H <= 4
        s = er[:, h:h + 1] + el[h:h + 1, :]  # (Td, Ts) outer sum
        s = jnp.maximum(s, 0.2 * s)          # leaky_relu, slope 0.2
        e = s + edge_bias

        m_prev = m_sc[h]                     # (Td, 1)
        m_new = jnp.maximum(m_prev, jnp.max(e, axis=-1, keepdims=True))
        alpha = jnp.exp(m_prev - m_new)      # rescale of previous stats
        p = jnp.exp(e - m_new)               # f32 exp (v5e-safe)

        l_sc[h] = alpha * l_sc[h] + jnp.sum(p, axis=-1, keepdims=True)
        acc_sc[h] = alpha * acc_sc[h] + jnp.dot(
            p.astype(jnp.bfloat16), feat_ref[h],        # bf16 MXU operands
            preferred_element_type=jnp.float32)          # f32 accumulate
        m_sc[h] = m_new

    @pl.when(j == pl.num_programs(1) - 1)
    def _():
        outs = []
        for h in range(H):
            inv = 1.0 / jnp.maximum(l_sc[h], 1e-9)       # exact; zero-deg guard
            outs.append(acc_sc[h] * inv)                 # (Td, F)
        if mean_heads:                                   # layer-1: h.mean(1)
            y = outs[0]
            for o in outs[1:]:
                y = y + o
            y = y * (1.0 / H)
        else:                                            # layer-0: h.flatten(1)
            y = outs[0] if H == 1 else jnp.concatenate(outs, axis=-1)
        y = y + b_ref[...]
        if use_elu:                                      # F.elu, alpha=1
            y = jnp.where(y > 0, y, jnp.exp(y) - 1.0)
        pad_cols = out_pad - out_w
        if pad_cols > 0:                                 # lane-dense 128 store
            y = jnp.concatenate(
                [y, jnp.zeros((y.shape[0], pad_cols), jnp.float32)], axis=-1)
        out_ref[...] = y


# --------------------------------------------------------------------------
# One GATConv layer on row/lane-padded inputs.
# --------------------------------------------------------------------------
def _gat_conv(x_p, mask_p, w, attn_l, attn_r, bias, *, use_elu, mean_heads,
              td, ts):
    n_pad, fin = x_p.shape
    fin_w, HF = w.shape
    H, F = attn_l.shape
    assert HF == H * F

    # Fold attention projections into the fc weight:  x @ [W | Wl | Wr]
    w3 = w.reshape(fin_w, H, F)
    wl = jnp.einsum("ihf,hf->ih", w3, attn_l)            # (fin_w, H) -> el cols
    wr = jnp.einsum("ihf,hf->ih", w3, attn_r)            # (fin_w, H) -> er cols
    pcols = _round_up(HF + 2 * H, 128)                   # lane-dense proj output
    w_big = jnp.concatenate(
        [w, wl, wr, jnp.zeros((fin_w, pcols - HF - 2 * H), jnp.float32)],
        axis=1)
    if fin_w < fin:                                      # lane-padded prev layer
        w_big = jnp.pad(w_big, ((0, fin - fin_w), (0, 0)))

    x_b = x_p.astype(jnp.bfloat16)                       # bf16 MXU operands
    w_b = w_big.astype(jnp.bfloat16)

    n_dst = n_pad // td
    n_src = n_pad // ts

    proj = pl.pallas_call(
        _proj_kernel,
        out_shape=jax.ShapeDtypeStruct((n_pad, pcols), jnp.float32),
        grid=(n_dst,),
        in_specs=[pl.BlockSpec((td, fin), lambda i: (i, 0)),
                  pl.BlockSpec((fin, pcols), lambda i: (0, 0))],
        out_specs=pl.BlockSpec((td, pcols), lambda i: (i, 0)),
        compiler_params=pltpu.CompilerParams(
            dimension_semantics=("parallel",)),
    )(x_b, w_b)

    # Layout plumbing in the wrapper (cheap O(N*H*F) XLA ops):
    feat_hm = (proj[:, :HF].reshape(n_pad, H, F)
               .transpose(1, 0, 2).astype(jnp.bfloat16))  # (H, N_pad, F)
    el_t = jnp.transpose(proj[:, HF:HF + H])              # (H, N_pad) src scores
    er_m = proj[:, HF + H:HF + 2 * H]                     # (N_pad, H) dst scores

    out_w = F if mean_heads else HF
    out_pad = _round_up(out_w, 128)
    bias_eff = (bias.reshape(H, F).mean(axis=0, keepdims=True)
                if mean_heads else bias.reshape(1, HF))   # (1, out_w)

    kernel = functools.partial(
        _attn_kernel, num_heads=H, out_feats=F, use_elu=use_elu,
        mean_heads=mean_heads, out_w=out_w, out_pad=out_pad)

    out = pl.pallas_call(
        kernel,
        out_shape=jax.ShapeDtypeStruct((n_pad, out_pad), jnp.float32),
        grid=(n_dst, n_src),
        in_specs=[
            pl.BlockSpec((td, ts), lambda i, j: (i, j)),       # int8 adjacency
            pl.BlockSpec((H, ts, F), lambda i, j: (0, j, 0)),  # bf16 feat (head-major)
            pl.BlockSpec((H, ts), lambda i, j: (0, j)),        # el[src] chunk
            pl.BlockSpec((td, H), lambda i, j: (i, 0)),        # er[dst] tile
            pl.BlockSpec((1, out_w), lambda i, j: (0, 0)),     # effective bias
        ],
        out_specs=pl.BlockSpec((td, out_pad), lambda i, j: (i, 0)),
        scratch_shapes=[pltpu.VMEM((H, td, 1), jnp.float32),   # running max
                        pltpu.VMEM((H, td, 1), jnp.float32),   # running denom
                        pltpu.VMEM((H, td, F), jnp.float32)],  # accumulator
        compiler_params=pltpu.CompilerParams(
            dimension_semantics=("parallel", "arbitrary"),
            vmem_limit_bytes=48 * 1024 * 1024),                # safe on v7x 64MiB
    )(mask_p, feat_hm, el_t, er_m, bias_eff)
    return out       # (N_pad, out_pad): stays row- AND lane-padded for layer 1


@jax.jit
def gat_forward(x, adj, params):
    """Matches GAT.forward: layer0 -> flatten(1) (+elu), layer1 -> mean(1)."""
    (w0, al0, ar0, b0), (w1, al1, ar1, b1) = params
    n = x.shape[0]
    n_pad = _round_up(n, 256)        # lane-dense and >= 2 dst grid steps
    td = _pick_dst_tile(n_pad)
    ts = _pick_src_chunk(n_pad)
    pad = n_pad - n

    # Adjacency as int8 (dominant O(N^2) HBM stream); padding rows/cols = no-edge.
    mask = jnp.pad((adj > 0.5).astype(jnp.int8), ((0, pad), (0, pad)))
    x_p = jnp.pad(x, ((0, pad), (0, 0)))

    h = _gat_conv(x_p, mask, w0, al0, ar0, b0,
                  use_elu=True, mean_heads=False, td=td, ts=ts)   # (N_pad, 128)
    h = _gat_conv(h, mask, w1, al1, ar1, b1,
                  use_elu=False, mean_heads=True, td=td, ts=ts)   # (N_pad, 128)
    out_size = al1.shape[1]
    return h[:n, :out_size]


# ---------------- pure-JAX reference (sanity check) ----------------
def _gat_conv_ref(x, adj, w, al, ar, b, use_elu, mean_heads):
    H, F = al.shape
    N = x.shape[0]
    feat = (x @ w).reshape(N, H, F)
    el = jnp.sum(feat * al[None], -1)                  # (N, H)
    er = jnp.sum(feat * ar[None], -1)                  # (N, H)
    e = er[:, None, :] + el[None, :, :]                # (dst, src, H)
    e = jnp.where(e > 0, e, 0.2 * e)
    mask = (adj > 0.5)[:, :, None]
    e = jnp.where(mask, e, -1e9)
    p = jnp.exp(e - e.max(axis=1, keepdims=True))
    p = jnp.where(mask, p, 0.0)
    alpha = p / p.sum(axis=1, keepdims=True)
    out = jnp.einsum("dsh,shf->dhf", alpha, feat) + b.reshape(1, H, F)
    if use_elu:
        out = jnp.where(out > 0, out, jnp.exp(out) - 1.0)
    return out.mean(1) if mean_heads else out.reshape(N, H * F)


def _gat_forward_ref(x, adj, params):
    (w0, al0, ar0, b0), (w1, al1, ar1, b1) = params
    h = _gat_conv_ref(x, adj, w0, al0, ar0, b0, True, False)
    return _gat_conv_ref(h, adj, w1, al1, ar1, b1, False, True)


if __name__ == "__main__":
    key = jax.random.PRNGKey(0)
    N, IN_SIZE, HID_SIZE, OUT_SIZE = 64, 16, 8, 7
    HEADS = (4, 1)

    ks = jax.random.split(key, 10)
    x = jax.random.normal(ks[0], (N, IN_SIZE), jnp.float32)
    adj = (jax.random.uniform(ks[1], (N, N)) < 0.15).astype(jnp.float32)
    adj = jnp.maximum(adj, jnp.eye(N, dtype=jnp.float32))  # add self-loops

    def init(k, shape, scale=0.3):
        return scale * jax.random.normal(k, shape, jnp.float32)

    # layer 0: GATConv(IN_SIZE, HID_SIZE, HEADS[0])
    w0 = init(ks[2], (IN_SIZE, HEADS[0] * HID_SIZE))
    al0 = init(ks[3], (HEADS[0], HID_SIZE))
    ar0 = init(ks[4], (HEADS[0], HID_SIZE))
    b0 = init(ks[5], (1, HEADS[0] * HID_SIZE), scale=0.05)
    # layer 1: GATConv(HID_SIZE*HEADS[0], OUT_SIZE, HEADS[1])
    w1 = init(ks[6], (HEADS[0] * HID_SIZE, HEADS[1] * OUT_SIZE))
    al1 = init(ks[7], (HEADS[1], OUT_SIZE))
    ar1 = init(ks[8], (HEADS[1], OUT_SIZE))
    b1 = init(ks[9], (1, HEADS[1] * OUT_SIZE), scale=0.05)

    params = ((w0, al0, ar0, b0), (w1, al1, ar1, b1))

    out = jax.block_until_ready(gat_forward(x, adj, params))
    assert out.shape == (N, OUT_SIZE), out.shape
    assert bool(jnp.all(jnp.isfinite(out)))

    ref = _gat_forward_ref(x, adj, params)
    err = float(jnp.max(jnp.abs(out - ref)))
    # bf16 MXU operands (projection + aggregation) trade a little precision
    # for ~3x MXU throughput; tolerance sized accordingly.
    assert jnp.allclose(out, ref, rtol=5e-2, atol=5e-2), err

    print("KERNEL_OK")
</pallas_src>

<mosaic_0001>
module attributes {stable_mosaic.version = 11 : i64} {
  func.func @_proj_kernel(%arg0: i32, %arg1: memref<128x16xbf16, #tpu.memory_space<vmem>>, %arg2: memref<16x128xbf16, #tpu.memory_space<vmem>>, %arg3: memref<128x128xf32, #tpu.memory_space<vmem>>) attributes {dimension_semantics = [#tpu.dimension_semantics<parallel>], iteration_bounds = array<i64: 2>, scalar_prefetch = 0 : i64, scratch_operands = 0 : i64, tpu.core_type = #tpu.core_type<tc>, window_params = [{transform_indices = @transform_0, window_bounds = array<i64: 128, 16>}, {pipeline_mode = #tpu.pipeline_mode<synchronous>, transform_indices = @transform_1, window_bounds = array<i64: 16, 128>}, {transform_indices = @transform_2, window_bounds = array<i64: 128, 128>}]} {
    %c0 = arith.constant 0 : index
    %c0_0 = arith.constant 0 : index
    %0 = vector.load %arg1[%c0, %c0_0] : memref<128x16xbf16, #tpu.memory_space<vmem>>, vector<128x16xbf16>
    %c0_1 = arith.constant 0 : index
    %c0_2 = arith.constant 0 : index
    %1 = vector.load %arg2[%c0_1, %c0_2] : memref<16x128xbf16, #tpu.memory_space<vmem>>, vector<16x128xbf16>
    %cst = arith.constant dense<0.000000e+00> : vector<128x128xf32>
    %2 = tpu.matmul %0, %1, %cst {dimension_numbers = #tpu.dot_dimension_numbers<[1], [0], [0], [1], [0, 0, 1, 1], [], []>} : vector<128x16xbf16>, vector<16x128xbf16>, vector<128x128xf32> -> vector<128x128xf32>
    %c0_3 = arith.constant 0 : index
    %c0_4 = arith.constant 0 : index
    %3 = vector.load %arg3[%c0_3, %c0_4] : memref<128x128xf32, #tpu.memory_space<vmem>>, vector<128x128xf32>
    tpu.vector_store %arg3[%c0_3, %c0_4], %2 {strides = array<i32>} : memref<128x128xf32, #tpu.memory_space<vmem>>, vector<128x128xf32>,
    return
  }
  func.func @transform_0(%arg0: i32) -> (i32, i32) {
    %c0_i32 = arith.constant 0 : i32
    %c0_i32_0 = arith.constant 0 : i32
    return %arg0, %c0_i32 : i32, i32
  }
  func.func @transform_1(%arg0: i32) -> (i32, i32) {
    %c0_i32 = arith.constant 0 : i32
    %c0_i32_0 = arith.constant 0 : i32
    %c0_i32_1 = arith.constant 0 : i32
    return %c0_i32, %c0_i32_0 : i32, i32
  }
  func.func @transform_2(%arg0: i32) -> (i32, i32) {
    %c0_i32 = arith.constant 0 : i32
    %c0_i32_0 = arith.constant 0 : i32
    return %arg0, %c0_i32 : i32, i32
  }
}

module attributes {stable_mosaic.version = 11 : i64} {
  func.func @_attn_kernel(%arg0: i32, %arg1: i32, %arg2: memref<128x256xi8, #tpu.memory_space<vmem>>, %arg3: memref<4x256x8xbf16, #tpu.memory_space<vmem>>, %arg4: memref<4x256xf32, #tpu.memory_space<vmem>>, %arg5: memref<128x4xf32, #tpu.memory_space<vmem>>, %arg6: memref<1x32xf32, #tpu.memory_space<vmem>>, %arg7: memref<128x128xf32, #tpu.memory_space<vmem>>, %arg8: memref<4x128x1xf32, #tpu.memory_space<vmem>>, %arg9: memref<4x128x1xf32, #tpu.memory_space<vmem>>, %arg10: memref<4x128x8xf32, #tpu.memory_space<vmem>>) attributes {dimension_semantics = [#tpu.dimension_semantics<parallel>, #tpu.dimension_semantics<arbitrary>], iteration_bounds = array<i64: 2, 1>, scalar_prefetch = 0 : i64, scratch_operands = 3 : i64, tpu.core_type = #tpu.core_type<tc>, window_params = [{transform_indices = @transform_0, window_bounds = array<i64: 128, 256>}, {transform_indices = @transform_1, window_bounds = array<i64: 4, 256, 8>}, {transform_indices = @transform_2, window_bounds = array<i64: 4, 256>}, {transform_indices = @transform_3, window_bounds = array<i64: 128, 4>}, {pipeline_mode = #tpu.pipeline_mode<synchronous>, transform_indices = @transform_4, window_bounds = array<i64: 1, 32>}, {transform_indices = @transform_5, window_bounds = array<i64: 128, 128>}]} {
    %c0_i32 = arith.constant 0 : i32
    %0 = arith.cmpi eq, %arg1, %c0_i32 : i32
    %1 = arith.extui %0 : i1 to i32
    %c0_i32_0 = arith.constant 0 : i32
    %2 = arith.cmpi ne, %1, %c0_i32_0 : i32
    scf.if %2 {
      %cst_106 = arith.constant -1.000000e+30 : f32
      %186 = vector.broadcast %cst_106 : f32 to vector<4x128x1xf32>
      %c0_107 = arith.constant 0 : index
      %c0_108 = arith.constant 0 : index
      %c0_109 = arith.constant 0 : index
      %187 = vector.load %arg8[%c0_107, %c0_108, %c0_109] : memref<4x128x1xf32, #tpu.memory_space<vmem>>, vector<4x128x1xf32>
      tpu.vector_store %arg8[%c0_107, %c0_108, %c0_109], %186 {strides = array<i32>} : memref<4x128x1xf32, #tpu.memory_space<vmem>>, vector<4x128x1xf32>,
      %cst_110 = arith.constant 0.000000e+00 : f32
      %188 = vector.broadcast %cst_110 : f32 to vector<4x128x1xf32>
      %c0_111 = arith.constant 0 : index
      %c0_112 = arith.constant 0 : index
      %c0_113 = arith.constant 0 : index
      %189 = vector.load %arg9[%c0_111, %c0_112, %c0_113] : memref<4x128x1xf32, #tpu.memory_space<vmem>>, vector<4x128x1xf32>
      tpu.vector_store %arg9[%c0_111, %c0_112, %c0_113], %188 {strides = array<i32>} : memref<4x128x1xf32, #tpu.memory_space<vmem>>, vector<4x128x1xf32>,
      %cst_114 = arith.constant 0.000000e+00 : f32
      %190 = vector.broadcast %cst_114 : f32 to vector<4x128x8xf32>
      %c0_115 = arith.constant 0 : index
      %c0_116 = arith.constant 0 : index
      %c0_117 = arith.constant 0 : index
      %191 = vector.load %arg10[%c0_115, %c0_116, %c0_117] : memref<4x128x8xf32, #tpu.memory_space<vmem>>, vector<4x128x8xf32>
      tpu.vector_store %arg10[%c0_115, %c0_116, %c0_117], %190 {strides = array<i32>} : memref<4x128x8xf32, #tpu.memory_space<vmem>>, vector<4x128x8xf32>,
    } else {
    }
    %c0 = arith.constant 0 : index
    %c0_1 = arith.constant 0 : index
    %3 = vector.load %arg2[%c0, %c0_1] : memref<128x256xi8, #tpu.memory_space<vmem>>, vector<128x256xi8>
    %4 = arith.sitofp %3 : vector<128x256xi8> to vector<128x256xf32>
    %cst = arith.constant 1.000000e+00 : f32
    %5 = vector.broadcast %cst : f32 to vector<128x256xf32>
    %6 = arith.subf %4, %5 : vector<128x256xf32>
    %cst_2 = arith.constant 1.000000e+09 : f32
    %7 = vector.broadcast %cst_2 : f32 to vector<128x256xf32>
    %8 = arith.mulf %6, %7 : vector<128x256xf32>
    %c0_3 = arith.constant 0 : index
    %c0_4 = arith.constant 0 : index
    %9 = vector.load %arg4[%c0_3, %c0_4] : memref<4x256xf32, #tpu.memory_space<vmem>>, vector<4x256xf32>
    %c0_5 = arith.constant 0 : index
    %c0_6 = arith.constant 0 : index
    %10 = vector.load %arg5[%c0_5, %c0_6] : memref<128x4xf32, #tpu.memory_space<vmem>>, vector<128x4xf32>
    %11 = vector.extract_strided_slice %10 {offsets = [0, 0], sizes = [128, 1], strides = [1, 1]} : vector<128x4xf32> to vector<128x1xf32>
    %12 = vector.extract_strided_slice %9 {offsets = [0, 0], sizes = [1, 256], strides = [1, 1]} : vector<4x256xf32> to vector<1x256xf32>
    %13 = vector.broadcast %11 : vector<128x1xf32> to vector<128x256xf32>
    %14 = vector.broadcast %12 : vector<1x256xf32> to vector<128x256xf32>
    %15 = arith.addf %13, %14 : vector<128x256xf32>
    %cst_7 = arith.constant 2.000000e-01 : f32
    %16 = vector.broadcast %cst_7 : f32 to vector<128x256xf32>
    %17 = arith.mulf %16, %15 : vector<128x256xf32>
    %18 = arith.maximumf %15, %17 : vector<128x256xf32>
    %19 = arith.addf %18, %8 : vector<128x256xf32>
    %c0_8 = arith.constant 0 : index
    %c0_9 = arith.constant 0 : index
    %c0_10 = arith.constant 0 : index
    %20 = vector.load %arg8[%c0_8, %c0_9, %c0_10] : memref<4x128x1xf32, #tpu.memory_space<vmem>>, vector<1x128x1xf32>
    %21 = vector.shape_cast %20 : vector<1x128x1xf32> to vector<128x1xf32>
    %cst_11 = arith.constant dense<0xFF800000> : vector<128xf32>
    %22 = vector.multi_reduction <maximumf>, %19, %cst_11 [1] : vector<128x256xf32> to vector<128xf32>
    %23 = vector.shape_cast %22 : vector<128xf32> to vector<128x1xf32>
    %24 = arith.maximumf %21, %23 : vector<128x1xf32>
    %25 = arith.subf %21, %24 : vector<128x1xf32>
    %26 = math.exp %25 : vector<128x1xf32>
    %27 = vector.broadcast %24 : vector<128x1xf32> to vector<128x256xf32>
    %28 = arith.subf %19, %27 : vector<128x256xf32>
    %29 = math.exp %28 : vector<128x256xf32>
    %c0_12 = arith.constant 0 : index
    %c0_13 = arith.constant 0 : index
    %c0_14 = arith.constant 0 : index
    %30 = vector.load %arg9[%c0_12, %c0_13, %c0_14] : memref<4x128x1xf32, #tpu.memory_space<vmem>>, vector<1x128x1xf32>
    %31 = vector.shape_cast %30 : vector<1x128x1xf32> to vector<128x1xf32>
    %32 = arith.mulf %26, %31 : vector<128x1xf32>
    %cst_15 = arith.constant dense<0.000000e+00> : vector<128xf32>
    %33 = vector.multi_reduction <add>, %29, %cst_15 [1] : vector<128x256xf32> to vector<128xf32>
    %34 = vector.shape_cast %33 : vector<128xf32> to vector<128x1xf32>
    %35 = arith.addf %32, %34 : vector<128x1xf32>
    %c0_16 = arith.constant 0 : index
    %c0_17 = arith.constant 0 : index
    %c0_18 = arith.constant 0 : index
    %36 = vector.load %arg9[%c0_16, %c0_17, %c0_18] : memref<4x128x1xf32, #tpu.memory_space<vmem>>, vector<1x128x1xf32>
    %37 = vector.shape_cast %36 : vector<1x128x1xf32> to vector<128x1xf32>
    %38 = vector.shape_cast %35 : vector<128x1xf32> to vector<1x128x1xf32>
    tpu.vector_store %arg9[%c0_16, %c0_17, %c0_18], %38 {strides = array<i32>} : memref<4x128x1xf32, #tpu.memory_space<vmem>>, vector<1x128x1xf32>,
    %c0_19 = arith.constant 0 : index
    %c0_20 = arith.constant 0 : index
    %c0_21 = arith.constant 0 : index
    %39 = vector.load %arg10[%c0_19, %c0_20, %c0_21] : memref<4x128x8xf32, #tpu.memory_space<vmem>>, vector<1x128x8xf32>
    %40 = vector.shape_cast %39 : vector<1x128x8xf32> to vector<128x8xf32>
    %41 = vector.broadcast %26 : vector<128x1xf32> to vector<128x8xf32>
    %42 = arith.mulf %41, %40 : vector<128x8xf32>
    %43 = arith.truncf %29 : vector<128x256xf32> to vector<128x256xbf16>
    %c0_22 = arith.constant 0 : index
    %c0_23 = arith.constant 0 : index
    %c0_24 = arith.constant 0 : index
    %44 = vector.load %arg3[%c0_22, %c0_23, %c0_24] : memref<4x256x8xbf16, #tpu.memory_space<vmem>>, vector<1x256x8xbf16>
    %45 = vector.shape_cast %44 : vector<1x256x8xbf16> to vector<256x8xbf16>
    %cst_25 = arith.constant dense<0.000000e+00> : vector<128x8xf32>
    %46 = tpu.matmul %43, %45, %cst_25 {dimension_numbers = #tpu.dot_dimension_numbers<[1], [0], [0], [1], [0, 0, 1, 1], [], []>} : vector<128x256xbf16>, vector<256x8xbf16>, vector<128x8xf32> -> vector<128x8xf32>
    %47 = arith.addf %42, %46 : vector<128x8xf32>
    %c0_26 = arith.constant 0 : index
    %c0_27 = arith.constant 0 : index
    %c0_28 = arith.constant 0 : index
    %48 = vector.load %arg10[%c0_26, %c0_27, %c0_28] : memref<4x128x8xf32, #tpu.memory_space<vmem>>, vector<1x128x8xf32>
    %49 = vector.shape_cast %48 : vector<1x128x8xf32> to vector<128x8xf32>
    %50 = vector.shape_cast %47 : vector<128x8xf32> to vector<1x128x8xf32>
    tpu.vector_store %arg10[%c0_26, %c0_27, %c0_28], %50 {strides = array<i32>} : memref<4x128x8xf32, #tpu.memory_space<vmem>>, vector<1x128x8xf32>,
    %c0_29 = arith.constant 0 : index
    %c0_30 = arith.constant 0 : index
    %c0_31 = arith.constant 0 : index
    %51 = vector.load %arg8[%c0_29, %c0_30, %c0_31] : memref<4x128x1xf32, #tpu.memory_space<vmem>>, vector<1x128x1xf32>
    %52 = vector.shape_cast %51 : vector<1x128x1xf32> to vector<128x1xf32>
    %53 = vector.shape_cast %24 : vector<128x1xf32> to vector<1x128x1xf32>
    tpu.vector_store %arg8[%c0_29, %c0_30, %c0_31], %53 {strides = array<i32>} : memref<4x128x1xf32, #tpu.memory_space<vmem>>, vector<1x128x1xf32>,
    %54 = vector.extract_strided_slice %10 {offsets = [0, 1], sizes = [128, 1], strides = [1, 1]} : vector<128x4xf32> to vector<128x1xf32>
    %55 = vector.extract_strided_slice %9 {offsets = [1, 0], sizes = [1, 256], strides = [1, 1]} : vector<4x256xf32> to vector<1x256xf32>
    %56 = vector.broadcast %54 : vector<128x1xf32> to vector<128x256xf32>
    %57 = vector.broadcast %55 : vector<1x256xf32> to vector<128x256xf32>
    %58 = arith.addf %56, %57 : vector<128x256xf32>
    %cst_32 = arith.constant 2.000000e-01 : f32
    %59 = vector.broadcast %cst_32 : f32 to vector<128x256xf32>
    %60 = arith.mulf %59, %58 : vector<128x256xf32>
    %61 = arith.maximumf %58, %60 : vector<128x256xf32>
    %62 = arith.addf %61, %8 : vector<128x256xf32>
    %c1 = arith.constant 1 : index
    %c0_33 = arith.constant 0 : index
    %c0_34 = arith.constant 0 : index
    %63 = vector.load %arg8[%c1, %c0_33, %c0_34] : memref<4x128x1xf32, #tpu.memory_space<vmem>>, vector<1x128x1xf32>
    %64 = vector.shape_cast %63 : vector<1x128x1xf32> to vector<128x1xf32>
    %cst_35 = arith.constant dense<0xFF800000> : vector<128xf32>
    %65 = vector.multi_reduction <maximumf>, %62, %cst_35 [1] : vector<128x256xf32> to vector<128xf32>
    %66 = vector.shape_cast %65 : vector<128xf32> to vector<128x1xf32>
    %67 = arith.maximumf %64, %66 : vector<128x1xf32>
    %68 = arith.subf %64, %67 : vector<128x1xf32>
    %69 = math.exp %68 : vector<128x1xf32>
    %70 = vector.broadcast %67 : vector<128x1xf32> to vector<128x256xf32>
    %71 = arith.subf %62, %70 : vector<128x256xf32>
    %72 = math.exp %71 : vector<128x256xf32>
    %c1_36 = arith.constant 1 : index
    %c0_37 = arith.constant 0 : index
    %c0_38 = arith.constant 0 : index
    %73 = vector.load %arg9[%c1_36, %c0_37, %c0_38] : memref<4x128x1xf32, #tpu.memory_space<vmem>>, vector<1x128x1xf32>
    %74 = vector.shape_cast %73 : vector<1x128x1xf32> to vector<128x1xf32>
    %75 = arith.mulf %69, %74 : vector<128x1xf32>
    %cst_39 = arith.constant dense<0.000000e+00> : vector<128xf32>
    %76 = vector.multi_reduction <add>, %72, %cst_39 [1] : vector<128x256xf32> to vector<128xf32>
    %77 = vector.shape_cast %76 : vector<128xf32> to vector<128x1xf32>
    %78 = arith.addf %75, %77 : vector<128x1xf32>
    %c1_40 = arith.constant 1 : index
    %c0_41 = arith.constant 0 : index
    %c0_42 = arith.constant 0 : index
    %79 = vector.load %arg9[%c1_40, %c0_41, %c0_42] : memref<4x128x1xf32, #tpu.memory_space<vmem>>, vector<1x128x1xf32>
    %80 = vector.shape_cast %79 : vector<1x128x1xf32> to vector<128x1xf32>
    %81 = vector.shape_cast %78 : vector<128x1xf32> to vector<1x128x1xf32>
    tpu.vector_store %arg9[%c1_40, %c0_41, %c0_42], %81 {strides = array<i32>} : memref<4x128x1xf32, #tpu.memory_space<vmem>>, vector<1x128x1xf32>,
    %c1_43 = arith.constant 1 : index
    %c0_44 = arith.constant 0 : index
    %c0_45 = arith.constant 0 : index
    %82 = vector.load %arg10[%c1_43, %c0_44, %c0_45] : memref<4x128x8xf32, #tpu.memory_space<vmem>>, vector<1x128x8xf32>
    %83 = vector.shape_cast %82 : vector<1x128x8xf32> to vector<128x8xf32>
    %84 = vector.broadcast %69 : vector<128x1xf32> to vector<128x8xf32>
    %85 = arith.mulf %84, %83 : vector<128x8xf32>
    %86 = arith.truncf %72 : vector<128x256xf32> to vector<128x256xbf16>
    %c1_46 = arith.constant 1 : index
    %c0_47 = arith.constant 0 : index
    %c0_48 = arith.constant 0 : index
    %87 = vector.load %arg3[%c1_46, %c0_47, %c0_48] : memref<4x256x8xbf16, #tpu.memory_space<vmem>>, vector<1x256x8xbf16>
    %88 = vector.shape_cast %87 : vector<1x256x8xbf16> to vector<256x8xbf16>
    %cst_49 = arith.constant dense<0.000000e+00> : vector<128x8xf32>
    %89 = tpu.matmul %86, %88, %cst_49 {dimension_numbers = #tpu.dot_dimension_numbers<[1], [0], [0], [1], [0, 0, 1, 1], [], []>} : vector<128x256xbf16>, vector<256x8xbf16>, vector<128x8xf32> -> vector<128x8xf32>
    %90 = arith.addf %85, %89 : vector<128x8xf32>
    %c1_50 = arith.constant 1 : index
    %c0_51 = arith.constant 0 : index
    %c0_52 = arith.constant 0 : index
    %91 = vector.load %arg10[%c1_50, %c0_51, %c0_52] : memref<4x128x8xf32, #tpu.memory_space<vmem>>, vector<1x128x8xf32>
    %92 = vector.shape_cast %91 : vector<1x128x8xf32> to vector<128x8xf32>
    %93 = vector.shape_cast %90 : vector<128x8xf32> to vector<1x128x8xf32>
    tpu.vector_store %arg10[%c1_50, %c0_51, %c0_52], %93 {strides = array<i32>} : memref<4x128x8xf32, #tpu.memory_space<vmem>>, vector<1x128x8xf32>,
    %c1_53 = arith.constant 1 : index
    %c0_54 = arith.constant 0 : index
    %c0_55 = arith.constant 0 : index
    %94 = vector.load %arg8[%c1_53, %c0_54, %c0_55] : memref<4x128x1xf32, #tpu.memory_space<vmem>>, vector<1x128x1xf32>
    %95 = vector.shape_cast %94 : vector<1x128x1xf32> to vector<128x1xf32>
    %96 = vector.shape_cast %67 : vector<128x1xf32> to vector<1x128x1xf32>
    tpu.vector_store %arg8[%c1_53, %c0_54, %c0_55], %96 {strides = array<i32>} : memref<4x128x1xf32, #tpu.memory_space<vmem>>, vector<1x128x1xf32>,
    %97 = vector.extract_strided_slice %10 {offsets = [0, 2], sizes = [128, 1], strides = [1, 1]} : vector<128x4xf32> to vector<128x1xf32>
    %98 = vector.extract_strided_slice %9 {offsets = [2, 0], sizes = [1, 256], strides = [1, 1]} : vector<4x256xf32> to vector<1x256xf32>
    %99 = vector.broadcast %97 : vector<128x1xf32> to vector<128x256xf32>
    %100 = vector.broadcast %98 : vector<1x256xf32> to vector<128x256xf32>
    %101 = arith.addf %99, %100 : vector<128x256xf32>
    %cst_56 = arith.constant 2.000000e-01 : f32
    %102 = vector.broadcast %cst_56 : f32 to vector<128x256xf32>
    %103 = arith.mulf %102, %101 : vector<128x256xf32>
    %104 = arith.maximumf %101, %103 : vector<128x256xf32>
    %105 = arith.addf %104, %8 : vector<128x256xf32>
    %c2 = arith.constant 2 : index
    %c0_57 = arith.constant 0 : index
    %c0_58 = arith.constant 0 : index
    %106 = vector.load %arg8[%c2, %c0_57, %c0_58] : memref<4x128x1xf32, #tpu.memory_space<vmem>>, vector<1x128x1xf32>
    %107 = vector.shape_cast %106 : vector<1x128x1xf32> to vector<128x1xf32>
    %cst_59 = arith.constant dense<0xFF800000> : vector<128xf32>
    %108 = vector.multi_reduction <maximumf>, %105, %cst_59 [1] : vector<128x256xf32> to vector<128xf32>
    %109 = vector.shape_cast %108 : vector<128xf32> to vector<128x1xf32>
    %110 = arith.maximumf %107, %109 : vector<128x1xf32>
    %111 = arith.subf %107, %110 : vector<128x1xf32>
    %112 = math.exp %111 : vector<128x1xf32>
    %113 = vector.broadcast %110 : vector<128x1xf32> to vector<128x256xf32>
    %114 = arith.subf %105, %113 : vector<128x256xf32>
    %115 = math.exp %114 : vector<128x256xf32>
    %c2_60 = arith.constant 2 : index
    %c0_61 = arith.constant 0 : index
    %c0_62 = arith.constant 0 : index
    %116 = vector.load %arg9[%c2_60, %c0_61, %c0_62] : memref<4x128x1xf32, #tpu.memory_space<vmem>>, vector<1x128x1xf32>
    %117 = vector.shape_cast %116 : vector<1x128x1xf32> to vector<128x1xf32>
    %118 = arith.mulf %112, %117 : vector<128x1xf32>
    %cst_63 = arith.constant dense<0.000000e+00> : vector<128xf32>
    %119 = vector.multi_reduction <add>, %115, %cst_63 [1] : vector<128x256xf32> to vector<128xf32>
    %120 = vector.shape_cast %119 : vector<128xf32> to vector<128x1xf32>
    %121 = arith.addf %118, %120 : vector<128x1xf32>
    %c2_64 = arith.constant 2 : index
    %c0_65 = arith.constant 0 : index
    %c0_66 = arith.constant 0 : index
    %122 = vector.load %arg9[%c2_64, %c0_65, %c0_66] : memref<4x128x1xf32, #tpu.memory_space<vmem>>, vector<1x128x1xf32>
    %123 = vector.shape_cast %122 : vector<1x128x1xf32> to vector<128x1xf32>
    %124 = vector.shape_cast %121 : vector<128x1xf32> to vector<1x128x1xf32>
    tpu.vector_store %arg9[%c2_64, %c0_65, %c0_66], %124 {strides = array<i32>} : memref<4x128x1xf32, #tpu.memory_space<vmem>>, vector<1x128x1xf32>,
    %c2_67 = arith.constant 2 : index
    %c0_68 = arith.constant 0 : index
    %c0_69 = arith.constant 0 : index
    %125 = vector.load %arg10[%c2_67, %c0_68, %c0_69] : memref<4x128x8xf32, #tpu.memory_space<vmem>>, vector<1x128x8xf32>
    %126 = vector.shape_cast %125 : vector<1x128x8xf32> to vector<128x8xf32>
    %127 = vector.broadcast %112 : vector<128x1xf32> to vector<128x8xf32>
    %128 = arith.mulf %127, %126 : vector<128x8xf32>
    %129 = arith.truncf %115 : vector<128x256xf32> to vector<128x256xbf16>
    %c2_70 = arith.constant 2 : index
    %c0_71 = arith.constant 0 : index
    %c0_72 = arith.constant 0 : index
    %130 = vector.load %arg3[%c2_70, %c0_71, %c0_72] : memref<4x256x8xbf16, #tpu.memory_space<vmem>>, vector<1x256x8xbf16>
    %131 = vector.shape_cast %130 : vector<1x256x8xbf16> to vector<256x8xbf16>
    %cst_73 = arith.constant dense<0.000000e+00> : vector<128x8xf32>
    %132 = tpu.matmul %129, %131, %cst_73 {dimension_numbers = #tpu.dot_dimension_numbers<[1], [0], [0], [1], [0, 0, 1, 1], [], []>} : vector<128x256xbf16>, vector<256x8xbf16>, vector<128x8xf32> -> vector<128x8xf32>
    %133 = arith.addf %128, %132 : vector<128x8xf32>
    %c2_74 = arith.constant 2 : index
    %c0_75 = arith.constant 0 : index
    %c0_76 = arith.constant 0 : index
    %134 = vector.load %arg10[%c2_74, %c0_75, %c0_76] : memref<4x128x8xf32, #tpu.memory_space<vmem>>, vector<1x128x8xf32>
    %135 = vector.shape_cast %134 : vector<1x128x8xf32> to vector<128x8xf32>
    %136 = vector.shape_cast %133 : vector<128x8xf32> to vector<1x128x8xf32>
    tpu.vector_store %arg10[%c2_74, %c0_75, %c0_76], %136 {strides = array<i32>} : memref<4x128x8xf32, #tpu.memory_space<vmem>>, vector<1x128x8xf32>,
    %c2_77 = arith.constant 2 : index
    %c0_78 = arith.constant 0 : index
    %c0_79 = arith.constant 0 : index
    %137 = vector.load %arg8[%c2_77, %c0_78, %c0_79] : memref<4x128x1xf32, #tpu.memory_space<vmem>>, vector<1x128x1xf32>
    %138 = vector.shape_cast %137 : vector<1x128x1xf32> to vector<128x1xf32>
    %139 = vector.shape_cast %110 : vector<128x1xf32> to vector<1x128x1xf32>
    tpu.vector_store %arg8[%c2_77, %c0_78, %c0_79], %139 {strides = array<i32>} : memref<4x128x1xf32, #tpu.memory_space<vmem>>, vector<1x128x1xf32>,
    %140 = vector.extract_strided_slice %10 {offsets = [0, 3], sizes = [128, 1], strides = [1, 1]} : vector<128x4xf32> to vector<128x1xf32>
    %141 = vector.extract_strided_slice %9 {offsets = [3, 0], sizes = [1, 256], strides = [1, 1]} : vector<4x256xf32> to vector<1x256xf32>
    %142 = vector.broadcast %140 : vector<128x1xf32> to vector<128x256xf32>
    %143 = vector.broadcast %141 : vector<1x256xf32> to vector<128x256xf32>
    %144 = arith.addf %142, %143 : vector<128x256xf32>
    %cst_80 = arith.constant 2.000000e-01 : f32
    %145 = vector.broadcast %cst_80 : f32 to vector<128x256xf32>
    %146 = arith.mulf %145, %144 : vector<128x256xf32>
    %147 = arith.maximumf %144, %146 : vector<128x256xf32>
    %148 = arith.addf %147, %8 : vector<128x256xf32>
    %c3 = arith.constant 3 : index
    %c0_81 = arith.constant 0 : index
    %c0_82 = arith.constant 0 : index
    %149 = vector.load %arg8[%c3, %c0_81, %c0_82] : memref<4x128x1xf32, #tpu.memory_space<vmem>>, vector<1x128x1xf32>
    %150 = vector.shape_cast %149 : vector<1x128x1xf32> to vector<128x1xf32>
    %cst_83 = arith.constant dense<0xFF800000> : vector<128xf32>
    %151 = vector.multi_reduction <maximumf>, %148, %cst_83 [1] : vector<128x256xf32> to vector<128xf32>
    %152 = vector.shape_cast %151 : vector<128xf32> to vector<128x1xf32>
    %153 = arith.maximumf %150, %152 : vector<128x1xf32>
    %154 = arith.subf %150, %153 : vector<128x1xf32>
    %155 = math.exp %154 : vector<128x1xf32>
    %156 = vector.broadcast %153 : vector<128x1xf32> to vector<128x256xf32>
    %157 = arith.subf %148, %156 : vector<128x256xf32>
    %158 = math.exp %157 : vector<128x256xf32>
    %c3_84 = arith.constant 3 : index
    %c0_85 = arith.constant 0 : index
    %c0_86 = arith.constant 0 : index
    %159 = vector.load %arg9[%c3_84, %c0_85, %c0_86] : memref<4x128x1xf32, #tpu.memory_space<vmem>>, vector<1x128x1xf32>
    %160 = vector.shape_cast %159 : vector<1x128x1xf32> to vector<128x1xf32>
    %161 = arith.mulf %155, %160 : vector<128x1xf32>
    %cst_87 = arith.constant dense<0.000000e+00> : vector<128xf32>
    %162 = vector.multi_reduction <add>, %158, %cst_87 [1] : vector<128x256xf32> to vector<128xf32>
    %163 = vector.shape_cast %162 : vector<128xf32> to vector<128x1xf32>
    %164 = arith.addf %161, %163 : vector<128x1xf32>
    %c3_88 = arith.constant 3 : index
    %c0_89 = arith.constant 0 : index
    %c0_90 = arith.constant 0 : index
    %165 = vector.load %arg9[%c3_88, %c0_89, %c0_90] : memref<4x128x1xf32, #tpu.memory_space<vmem>>, vector<1x128x1xf32>
    %166 = vector.shape_cast %165 : vector<1x128x1xf32> to vector<128x1xf32>
    %167 = vector.shape_cast %164 : vector<128x1xf32> to vector<1x128x1xf32>
    tpu.vector_store %arg9[%c3_88, %c0_89, %c0_90], %167 {strides = array<i32>} : memref<4x128x1xf32, #tpu.memory_space<vmem>>, vector<1x128x1xf32>,
    %c3_91 = arith.constant 3 : index
    %c0_92 = arith.constant 0 : index
    %c0_93 = arith.constant 0 : index
    %168 = vector.load %arg10[%c3_91, %c0_92, %c0_93] : memref<4x128x8xf32, #tpu.memory_space<vmem>>, vector<1x128x8xf32>
    %169 = vector.shape_cast %168 : vector<1x128x8xf32> to vector<128x8xf32>
    %170 = vector.broadcast %155 : vector<128x1xf32> to vector<128x8xf32>
    %171 = arith.mulf %170, %169 : vector<128x8xf32>
    %172 = arith.truncf %158 : vector<128x256xf32> to vector<128x256xbf16>
    %c3_94 = arith.constant 3 : index
    %c0_95 = arith.constant 0 : index
    %c0_96 = arith.constant 0 : index
    %173 = vector.load %arg3[%c3_94, %c0_95, %c0_96] : memref<4x256x8xbf16, #tpu.memory_space<vmem>>, vector<1x256x8xbf16>
    %174 = vector.shape_cast %173 : vector<1x256x8xbf16> to vector<256x8xbf16>
    %cst_97 = arith.constant dense<0.000000e+00> : vector<128x8xf32>
    %175 = tpu.matmul %172, %174, %cst_97 {dimension_numbers = #tpu.dot_dimension_numbers<[1], [0], [0], [1], [0, 0, 1, 1], [], []>} : vector<128x256xbf16>, vector<256x8xbf16>, vector<128x8xf32> -> vector<128x8xf32>
    %176 = arith.addf %171, %175 : vector<128x8xf32>
    %c3_98 = arith.constant 3 : index
    %c0_99 = arith.constant 0 : index
    %c0_100 = arith.constant 0 : index
    %177 = vector.load %arg10[%c3_98, %c0_99, %c0_100] : memref<4x128x8xf32, #tpu.memory_space<vmem>>, vector<1x128x8xf32>
    %178 = vector.shape_cast %177 : vector<1x128x8xf32> to vector<128x8xf32>
    %179 = vector.shape_cast %176 : vector<128x8xf32> to vector<1x128x8xf32>
    tpu.vector_store %arg10[%c3_98, %c0_99, %c0_100], %179 {strides = array<i32>} : memref<4x128x8xf32, #tpu.memory_space<vmem>>, vector<1x128x8xf32>,
    %c3_101 = arith.constant 3 : index
    %c0_102 = arith.constant 0 : index
    %c0_103 = arith.constant 0 : index
    %180 = vector.load %arg8[%c3_101, %c0_102, %c0_103] : memref<4x128x1xf32, #tpu.memory_space<vmem>>, vector<1x128x1xf32>
    %181 = vector.shape_cast %180 : vector<1x128x1xf32> to vector<128x1xf32>
    %182 = vector.shape_cast %153 : vector<128x1xf32> to vector<1x128x1xf32>
    tpu.vector_store %arg8[%c3_101, %c0_102, %c0_103], %182 {strides = array<i32>} : memref<4x128x1xf32, #tpu.memory_space<vmem>>, vector<1x128x1xf32>,
    %c0_i32_104 = arith.constant 0 : i32
    %183 = arith.cmpi eq, %arg1, %c0_i32_104 : i32
    %184 = arith.extui %183 : i1 to i32
    %c0_i32_105 = arith.constant 0 : i32
    %185 = arith.cmpi ne, %184, %c0_i32_105 : i32
    scf.if %185 {
      %c0_106 = arith.constant 0 : index
      %c0_107 = arith.constant 0 : index
      %c0_108 = arith.constant 0 : index
      %186 = vector.load %arg9[%c0_106, %c0_107, %c0_108] : memref<4x128x1xf32, #tpu.memory_space<vmem>>, vector<1x128x1xf32>
      %187 = vector.shape_cast %186 : vector<1x128x1xf32> to vector<128x1xf32>
      %cst_109 = arith.constant 9.99999971E-10 : f32
      %188 = vector.broadcast %cst_109 : f32 to vector<128x1xf32>
      %189 = arith.maximumf %187, %188 : vector<128x1xf32>
      %cst_110 = arith.constant 1.000000e+00 : f32
      %190 = vector.broadcast %cst_110 : f32 to vector<128x1xf32>
      %191 = arith.divf %190, %189 : vector<128x1xf32>
      %c0_111 = arith.constant 0 : index
      %c0_112 = arith.constant 0 : index
      %c0_113 = arith.constant 0 : index
      %192 = vector.load %arg10[%c0_111, %c0_112, %c0_113] : memref<4x128x8xf32, #tpu.memory_space<vmem>>, vector<1x128x8xf32>
      %193 = vector.shape_cast %192 : vector<1x128x8xf32> to vector<128x8xf32>
      %194 = vector.broadcast %191 : vector<128x1xf32> to vector<128x8xf32>
      %195 = arith.mulf %193, %194 : vector<128x8xf32>
      %c1_114 = arith.constant 1 : index
      %c0_115 = arith.constant 0 : index
      %c0_116 = arith.constant 0 : index
      %196 = vector.load %arg9[%c1_114, %c0_115, %c0_116] : memref<4x128x1xf32, #tpu.memory_space<vmem>>, vector<1x128x1xf32>
      %197 = vector.shape_cast %196 : vector<1x128x1xf32> to vector<128x1xf32>
      %cst_117 = arith.constant 9.99999971E-10 : f32
      %198 = vector.broadcast %cst_117 : f32 to vector<128x1xf32>
      %199 = arith.maximumf %197, %198 : vector<128x1xf32>
      %cst_118 = arith.constant 1.000000e+00 : f32
      %200 = vector.broadcast %cst_118 : f32 to vector<128x1xf32>
      %201 = arith.divf %200, %199 : vector<128x1xf32>
      %c1_119 = arith.constant 1 : index
      %c0_120 = arith.constant 0 : index
      %c0_121 = arith.constant 0 : index
      %202 = vector.load %arg10[%c1_119, %c0_120, %c0_121] : memref<4x128x8xf32, #tpu.memory_space<vmem>>, vector<1x128x8xf32>
      %203 = vector.shape_cast %202 : vector<1x128x8xf32> to vector<128x8xf32>
      %204 = vector.broadcast %201 : vector<128x1xf32> to vector<128x8xf32>
      %205 = arith.mulf %203, %204 : vector<128x8xf32>
      %c2_122 = arith.constant 2 : index
      %c0_123 = arith.constant 0 : index
      %c0_124 = arith.constant 0 : index
      %206 = vector.load %arg9[%c2_122, %c0_123, %c0_124] : memref<4x128x1xf32, #tpu.memory_space<vmem>>, vector<1x128x1xf32>
      %207 = vector.shape_cast %206 : vector<1x128x1xf32> to vector<128x1xf32>
      %cst_125 = arith.constant 9.99999971E-10 : f32
      %208 = vector.broadcast %cst_125 : f32 to vector<128x1xf32>
      %209 = arith.maximumf %207, %208 : vector<128x1xf32>
      %cst_126 = arith.constant 1.000000e+00 : f32
      %210 = vector.broadcast %cst_126 : f32 to vector<128x1xf32>
      %211 = arith.divf %210, %209 : vector<128x1xf32>
      %c2_127 = arith.constant 2 : index
      %c0_128 = arith.constant 0 : index
      %c0_129 = arith.constant 0 : index
      %212 = vector.load %arg10[%c2_127, %c0_128, %c0_129] : memref<4x128x8xf32, #tpu.memory_space<vmem>>, vector<1x128x8xf32>
      %213 = vector.shape_cast %212 : vector<1x128x8xf32> to vector<128x8xf32>
      %214 = vector.broadcast %211 : vector<128x1xf32> to vector<128x8xf32>
      %215 = arith.mulf %213, %214 : vector<128x8xf32>
      %c3_130 = arith.constant 3 : index
      %c0_131 = arith.constant 0 : index
      %c0_132 = arith.constant 0 : index
      %216 = vector.load %arg9[%c3_130, %c0_131, %c0_132] : memref<4x128x1xf32, #tpu.memory_space<vmem>>, vector<1x128x1xf32>
      %217 = vector.shape_cast %216 : vector<1x128x1xf32> to vector<128x1xf32>
      %cst_133 = arith.constant 9.99999971E-10 : f32
      %218 = vector.broadcast %cst_133 : f32 to vector<128x1xf32>
      %219 = arith.maximumf %217, %218 : vector<128x1xf32>
      %cst_134 = arith.constant 1.000000e+00 : f32
      %220 = vector.broadcast %cst_134 : f32 to vector<128x1xf32>
      %221 = arith.divf %220, %219 : vector<128x1xf32>
      %c3_135 = arith.constant 3 : index
      %c0_136 = arith.constant 0 : index
      %c0_137 = arith.constant 0 : index
      %222 = vector.load %arg10[%c3_135, %c0_136, %c0_137] : memref<4x128x8xf32, #tpu.memory_space<vmem>>, vector<1x128x8xf32>
      %223 = vector.shape_cast %222 : vector<1x128x8xf32> to vector<128x8xf32>
      %224 = vector.broadcast %221 : vector<128x1xf32> to vector<128x8xf32>
      %225 = arith.mulf %223, %224 : vector<128x8xf32>
      %226 = tpu.concatenate %195, %205, %215, %225 in 1 : vector<128x8xf32>, vector<128x8xf32>, vector<128x8xf32>, vector<128x8xf32> -> vector<128x32xf32>
      %c0_138 = arith.constant 0 : index
      %c0_139 = arith.constant 0 : index
      %227 = vector.load %arg6[%c0_138, %c0_139] : memref<1x32xf32, #tpu.memory_space<vmem>>, vector<1x32xf32>
      %228 = vector.broadcast %227 : vector<1x32xf32> to vector<128x32xf32>
      %229 = arith.addf %226, %228 : vector<128x32xf32>
      %cst_140 = arith.constant 0.000000e+00 : f32
      %230 = vector.broadcast %cst_140 : f32 to vector<128x32xf32>
      %231 = arith.cmpf ogt, %229, %230 : vector<128x32xf32>
      %232 = math.exp %229 : vector<128x32xf32>
      %cst_141 = arith.constant 1.000000e+00 : f32
      %233 = vector.broadcast %cst_141 : f32 to vector<128x32xf32>
      %234 = arith.subf %232, %233 : vector<128x32xf32>
      %235 = arith.select %231, %229, %234 : vector<128x32xi1>, vector<128x32xf32>
      %cst_142 = arith.constant 0.000000e+00 : f32
      %236 = vector.broadcast %cst_142 : f32 to vector<128x96xf32>
      %237 = tpu.concatenate %235, %236 in 1 : vector<128x32xf32>, vector<128x96xf32> -> vector<128x128xf32>
      %c0_143 = arith.constant 0 : index
      %c0_144 = arith.constant 0 : index
      %238 = vector.load %arg7[%c0_143, %c0_144] : memref<128x128xf32, #tpu.memory_space<vmem>>, vector<128x128xf32>
      tpu.vector_store %arg7[%c0_143, %c0_144], %237 {strides = array<i32>} : memref<128x128xf32, #tpu.memory_space<vmem>>, vector<128x128xf32>,
    } else {
    }
    return
  }
  func.func @transform_0(%arg0: i32, %arg1: i32) -> (i32, i32) {
    %c0_i32 = arith.constant 0 : i32
    return %arg0, %arg1 : i32, i32
  }
  func.func @transform_1(%arg0: i32, %arg1: i32) -> (i32, i32, i32) {
    %c0_i32 = arith.constant 0 : i32
    %c0_i32_0 = arith.constant 0 : i32
    %c0_i32_1 = arith.constant 0 : i32
    return %c0_i32, %arg1, %c0_i32_0 : i32, i32, i32
  }
  func.func @transform_2(%arg0: i32, %arg1: i32) -> (i32, i32) {
    %c0_i32 = arith.constant 0 : i32
    %c0_i32_0 = arith.constant 0 : i32
    return %c0_i32, %arg1 : i32, i32
  }
  func.func @transform_3(%arg0: i32, %arg1: i32) -> (i32, i32) {
    %c0_i32 = arith.constant 0 : i32
    %c0_i32_0 = arith.constant 0 : i32
    return %arg0, %c0_i32 : i32, i32
  }
  func.func @transform_4(%arg0: i32, %arg1: i32) -> (i32, i32) {
    %c0_i32 = arith.constant 0 : i32
    %c0_i32_0 = arith.constant 0 : i32
    %c0_i32_1 = arith.constant 0 : i32
    return %c0_i32, %c0_i32_0 : i32, i32
  }
  func.func @transform_5(%arg0: i32, %arg1: i32) -> (i32, i32) {
    %c0_i32 = arith.constant 0 : i32
    %c0_i32_0 = arith.constant 0 : i32
    return %arg0, %c0_i32 : i32, i32
  }
}

module attributes {stable_mosaic.version = 11 : i64} {
  func.func @_proj_kernel(%arg0: i32, %arg1: memref<128x128xbf16, #tpu.memory_space<vmem>>, %arg2: memref<128x128xbf16, #tpu.memory_space<vmem>>, %arg3: memref<128x128xf32, #tpu.memory_space<vmem>>) attributes {dimension_semantics = [#tpu.dimension_semantics<parallel>], iteration_bounds = array<i64: 2>, scalar_prefetch = 0 : i64, scratch_operands = 0 : i64, tpu.core_type = #tpu.core_type<tc>, window_params = [{transform_indices = @transform_0, window_bounds = array<i64: 128, 128>}, {pipeline_mode = #tpu.pipeline_mode<synchronous>, transform_indices = @transform_1, window_bounds = array<i64: 128, 128>}, {transform_indices = @transform_2, window_bounds = array<i64: 128, 128>}]} {
    %c0 = arith.constant 0 : index
    %c0_0 = arith.constant 0 : index
    %0 = vector.load %arg1[%c0, %c0_0] : memref<128x128xbf16, #tpu.memory_space<vmem>>, vector<128x128xbf16>
    %c0_1 = arith.constant 0 : index
    %c0_2 = arith.constant 0 : index
    %1 = vector.load %arg2[%c0_1, %c0_2] : memref<128x128xbf16, #tpu.memory_space<vmem>>, vector<128x128xbf16>
    %cst = arith.constant dense<0.000000e+00> : vector<128x128xf32>
    %2 = tpu.matmul %0, %1, %cst {dimension_numbers = #tpu.dot_dimension_numbers<[1], [0], [0], [1], [0, 0, 1, 1], [], []>} : vector<128x128xbf16>, vector<128x128xbf16>, vector<128x128xf32> -> vector<128x128xf32>
    %c0_3 = arith.constant 0 : index
    %c0_4 = arith.constant 0 : index
    %3 = vector.load %arg3[%c0_3, %c0_4] : memref<128x128xf32, #tpu.memory_space<vmem>>, vector<128x128xf32>
    tpu.vector_store %arg3[%c0_3, %c0_4], %2 {strides = array<i32>} : memref<128x128xf32, #tpu.memory_space<vmem>>, vector<128x128xf32>,
    return
  }
  func.func @transform_0(%arg0: i32) -> (i32, i32) {
    %c0_i32 = arith.constant 0 : i32
    %c0_i32_0 = arith.constant 0 : i32
    return %arg0, %c0_i32 : i32, i32
  }
  func.func @transform_1(%arg0: i32) -> (i32, i32) {
    %c0_i32 = arith.constant 0 : i32
    %c0_i32_0 = arith.constant 0 : i32
    %c0_i32_1 = arith.constant 0 : i32
    return %c0_i32, %c0_i32_0 : i32, i32
  }
  func.func @transform_2(%arg0: i32) -> (i32, i32) {
    %c0_i32 = arith.constant 0 : i32
    %c0_i32_0 = arith.constant 0 : i32
    return %arg0, %c0_i32 : i32, i32
  }
}

module attributes {stable_mosaic.version = 11 : i64} {
  func.func @_attn_kernel(%arg0: i32, %arg1: i32, %arg2: memref<128x256xi8, #tpu.memory_space<vmem>>, %arg3: memref<1x256x7xbf16, #tpu.memory_space<vmem>>, %arg4: memref<1x256xf32, #tpu.memory_space<vmem>>, %arg5: memref<128x1xf32, #tpu.memory_space<vmem>>, %arg6: memref<1x7xf32, #tpu.memory_space<vmem>>, %arg7: memref<128x128xf32, #tpu.memory_space<vmem>>, %arg8: memref<1x128x1xf32, #tpu.memory_space<vmem>>, %arg9: memref<1x128x1xf32, #tpu.memory_space<vmem>>, %arg10: memref<1x128x7xf32, #tpu.memory_space<vmem>>) attributes {dimension_semantics = [#tpu.dimension_semantics<parallel>, #tpu.dimension_semantics<arbitrary>], iteration_bounds = array<i64: 2, 1>, scalar_prefetch = 0 : i64, scratch_operands = 3 : i64, tpu.core_type = #tpu.core_type<tc>, window_params = [{transform_indices = @transform_0, window_bounds = array<i64: 128, 256>}, {transform_indices = @transform_1, window_bounds = array<i64: 1, 256, 7>}, {transform_indices = @transform_2, window_bounds = array<i64: 1, 256>}, {transform_indices = @transform_3, window_bounds = array<i64: 128, 1>}, {pipeline_mode = #tpu.pipeline_mode<synchronous>, transform_indices = @transform_4, window_bounds = array<i64: 1, 7>}, {transform_indices = @transform_5, window_bounds = array<i64: 128, 128>}]} {
    %c0_i32 = arith.constant 0 : i32
    %0 = arith.cmpi eq, %arg1, %c0_i32 : i32
    %1 = arith.extui %0 : i1 to i32
    %c0_i32_0 = arith.constant 0 : i32
    %2 = arith.cmpi ne, %1, %c0_i32_0 : i32
    scf.if %2 {
      %cst_34 = arith.constant -1.000000e+30 : f32
      %55 = vector.broadcast %cst_34 : f32 to vector<1x128x1xf32>
      %c0_35 = arith.constant 0 : index
      %c0_36 = arith.constant 0 : index
      %c0_37 = arith.constant 0 : index
      %56 = vector.load %arg8[%c0_35, %c0_36, %c0_37] : memref<1x128x1xf32, #tpu.memory_space<vmem>>, vector<1x128x1xf32>
      tpu.vector_store %arg8[%c0_35, %c0_36, %c0_37], %55 {strides = array<i32>} : memref<1x128x1xf32, #tpu.memory_space<vmem>>, vector<1x128x1xf32>,
      %cst_38 = arith.constant 0.000000e+00 : f32
      %57 = vector.broadcast %cst_38 : f32 to vector<1x128x1xf32>
      %c0_39 = arith.constant 0 : index
      %c0_40 = arith.constant 0 : index
      %c0_41 = arith.constant 0 : index
      %58 = vector.load %arg9[%c0_39, %c0_40, %c0_41] : memref<1x128x1xf32, #tpu.memory_space<vmem>>, vector<1x128x1xf32>
      tpu.vector_store %arg9[%c0_39, %c0_40, %c0_41], %57 {strides = array<i32>} : memref<1x128x1xf32, #tpu.memory_space<vmem>>, vector<1x128x1xf32>,
      %cst_42 = arith.constant 0.000000e+00 : f32
      %59 = vector.broadcast %cst_42 : f32 to vector<1x128x7xf32>
      %c0_43 = arith.constant 0 : index
      %c0_44 = arith.constant 0 : index
      %c0_45 = arith.constant 0 : index
      %60 = vector.load %arg10[%c0_43, %c0_44, %c0_45] : memref<1x128x7xf32, #tpu.memory_space<vmem>>, vector<1x128x7xf32>
      tpu.vector_store %arg10[%c0_43, %c0_44, %c0_45], %59 {strides = array<i32>} : memref<1x128x7xf32, #tpu.memory_space<vmem>>, vector<1x128x7xf32>,
    } else {
    }
    %c0 = arith.constant 0 : index
    %c0_1 = arith.constant 0 : index
    %3 = vector.load %arg2[%c0, %c0_1] : memref<128x256xi8, #tpu.memory_space<vmem>>, vector<128x256xi8>
    %4 = arith.sitofp %3 : vector<128x256xi8> to vector<128x256xf32>
    %cst = arith.constant 1.000000e+00 : f32
    %5 = vector.broadcast %cst : f32 to vector<128x256xf32>
    %6 = arith.subf %4, %5 : vector<128x256xf32>
    %cst_2 = arith.constant 1.000000e+09 : f32
    %7 = vector.broadcast %cst_2 : f32 to vector<128x256xf32>
    %8 = arith.mulf %6, %7 : vector<128x256xf32>
    %c0_3 = arith.constant 0 : index
    %c0_4 = arith.constant 0 : index
    %9 = vector.load %arg4[%c0_3, %c0_4] : memref<1x256xf32, #tpu.memory_space<vmem>>, vector<1x256xf32>
    %c0_5 = arith.constant 0 : index
    %c0_6 = arith.constant 0 : index
    %10 = vector.load %arg5[%c0_5, %c0_6] : memref<128x1xf32, #tpu.memory_space<vmem>>, vector<128x1xf32>
    %11 = vector.broadcast %10 : vector<128x1xf32> to vector<128x256xf32>
    %12 = vector.broadcast %9 : vector<1x256xf32> to vector<128x256xf32>
    %13 = arith.addf %11, %12 : vector<128x256xf32>
    %cst_7 = arith.constant 2.000000e-01 : f32
    %14 = vector.broadcast %cst_7 : f32 to vector<128x256xf32>
    %15 = arith.mulf %14, %13 : vector<128x256xf32>
    %16 = arith.maximumf %13, %15 : vector<128x256xf32>
    %17 = arith.addf %16, %8 : vector<128x256xf32>
    %c0_8 = arith.constant 0 : index
    %c0_9 = arith.constant 0 : index
    %c0_10 = arith.constant 0 : index
    %18 = vector.load %arg8[%c0_8, %c0_9, %c0_10] : memref<1x128x1xf32, #tpu.memory_space<vmem>>, vector<1x128x1xf32>
    %19 = vector.shape_cast %18 : vector<1x128x1xf32> to vector<128x1xf32>
    %cst_11 = arith.constant dense<0xFF800000> : vector<128xf32>
    %20 = vector.multi_reduction <maximumf>, %17, %cst_11 [1] : vector<128x256xf32> to vector<128xf32>
    %21 = vector.shape_cast %20 : vector<128xf32> to vector<128x1xf32>
    %22 = arith.maximumf %19, %21 : vector<128x1xf32>
    %23 = arith.subf %19, %22 : vector<128x1xf32>
    %24 = math.exp %23 : vector<128x1xf32>
    %25 = vector.broadcast %22 : vector<128x1xf32> to vector<128x256xf32>
    %26 = arith.subf %17, %25 : vector<128x256xf32>
    %27 = math.exp %26 : vector<128x256xf32>
    %c0_12 = arith.constant 0 : index
    %c0_13 = arith.constant 0 : index
    %c0_14 = arith.constant 0 : index
    %28 = vector.load %arg9[%c0_12, %c0_13, %c0_14] : memref<1x128x1xf32, #tpu.memory_space<vmem>>, vector<1x128x1xf32>
    %29 = vector.shape_cast %28 : vector<1x128x1xf32> to vector<128x1xf32>
    %30 = arith.mulf %24, %29 : vector<128x1xf32>
    %cst_15 = arith.constant dense<0.000000e+00> : vector<128xf32>
    %31 = vector.multi_reduction <add>, %27, %cst_15 [1] : vector<128x256xf32> to vector<128xf32>
    %32 = vector.shape_cast %31 : vector<128xf32> to vector<128x1xf32>
    %33 = arith.addf %30, %32 : vector<128x1xf32>
    %c0_16 = arith.constant 0 : index
    %c0_17 = arith.constant 0 : index
    %c0_18 = arith.constant 0 : index
    %34 = vector.load %arg9[%c0_16, %c0_17, %c0_18] : memref<1x128x1xf32, #tpu.memory_space<vmem>>, vector<1x128x1xf32>
    %35 = vector.shape_cast %34 : vector<1x128x1xf32> to vector<128x1xf32>
    %36 = vector.shape_cast %33 : vector<128x1xf32> to vector<1x128x1xf32>
    tpu.vector_store %arg9[%c0_16, %c0_17, %c0_18], %36 {strides = array<i32>} : memref<1x128x1xf32, #tpu.memory_space<vmem>>, vector<1x128x1xf32>,
    %c0_19 = arith.constant 0 : index
    %c0_20 = arith.constant 0 : index
    %c0_21 = arith.constant 0 : index
    %37 = vector.load %arg10[%c0_19, %c0_20, %c0_21] : memref<1x128x7xf32, #tpu.memory_space<vmem>>, vector<1x128x7xf32>
    %38 = vector.shape_cast %37 : vector<1x128x7xf32> to vector<128x7xf32>
    %39 = vector.broadcast %24 : vector<128x1xf32> to vector<128x7xf32>
    %40 = arith.mulf %39, %38 : vector<128x7xf32>
    %41 = arith.truncf %27 : vector<128x256xf32> to vector<128x256xbf16>
    %c0_22 = arith.constant 0 : index
    %c0_23 = arith.constant 0 : index
    %c0_24 = arith.constant 0 : index
    %42 = vector.load %arg3[%c0_22, %c0_23, %c0_24] : memref<1x256x7xbf16, #tpu.memory_space<vmem>>, vector<1x256x7xbf16>
    %43 = vector.shape_cast %42 : vector<1x256x7xbf16> to vector<256x7xbf16>
    %cst_25 = arith.constant dense<0.000000e+00> : vector<128x7xf32>
    %44 = tpu.matmul %41, %43, %cst_25 {dimension_numbers = #tpu.dot_dimension_numbers<[1], [0], [0], [1], [0, 0, 1, 1], [], []>} : vector<128x256xbf16>, vector<256x7xbf16>, vector<128x7xf32> -> vector<128x7xf32>
    %45 = arith.addf %40, %44 : vector<128x7xf32>
    %c0_26 = arith.constant 0 : index
    %c0_27 = arith.constant 0 : index
    %c0_28 = arith.constant 0 : index
    %46 = vector.load %arg10[%c0_26, %c0_27, %c0_28] : memref<1x128x7xf32, #tpu.memory_space<vmem>>, vector<1x128x7xf32>
    %47 = vector.shape_cast %46 : vector<1x128x7xf32> to vector<128x7xf32>
    %48 = vector.shape_cast %45 : vector<128x7xf32> to vector<1x128x7xf32>
    tpu.vector_store %arg10[%c0_26, %c0_27, %c0_28], %48 {strides = array<i32>} : memref<1x128x7xf32, #tpu.memory_space<vmem>>, vector<1x128x7xf32>,
    %c0_29 = arith.constant 0 : index
    %c0_30 = arith.constant 0 : index
    %c0_31 = arith.constant 0 : index
    %49 = vector.load %arg8[%c0_29, %c0_30, %c0_31] : memref<1x128x1xf32, #tpu.memory_space<vmem>>, vector<1x128x1xf32>
    %50 = vector.shape_cast %49 : vector<1x128x1xf32> to vector<128x1xf32>
    %51 = vector.shape_cast %22 : vector<128x1xf32> to vector<1x128x1xf32>
    tpu.vector_store %arg8[%c0_29, %c0_30, %c0_31], %51 {strides = array<i32>} : memref<1x128x1xf32, #tpu.memory_space<vmem>>, vector<1x128x1xf32>,
    %c0_i32_32 = arith.constant 0 : i32
    %52 = arith.cmpi eq, %arg1, %c0_i32_32 : i32
    %53 = arith.extui %52 : i1 to i32
    %c0_i32_33 = arith.constant 0 : i32
    %54 = arith.cmpi ne, %53, %c0_i32_33 : i32
    scf.if %54 {
      %c0_34 = arith.constant 0 : index
      %c0_35 = arith.constant 0 : index
      %c0_36 = arith.constant 0 : index
      %55 = vector.load %arg9[%c0_34, %c0_35, %c0_36] : memref<1x128x1xf32, #tpu.memory_space<vmem>>, vector<1x128x1xf32>
      %56 = vector.shape_cast %55 : vector<1x128x1xf32> to vector<128x1xf32>
      %cst_37 = arith.constant 9.99999971E-10 : f32
      %57 = vector.broadcast %cst_37 : f32 to vector<128x1xf32>
      %58 = arith.maximumf %56, %57 : vector<128x1xf32>
      %cst_38 = arith.constant 1.000000e+00 : f32
      %59 = vector.broadcast %cst_38 : f32 to vector<128x1xf32>
      %60 = arith.divf %59, %58 : vector<128x1xf32>
      %c0_39 = arith.constant 0 : index
      %c0_40 = arith.constant 0 : index
      %c0_41 = arith.constant 0 : index
      %61 = vector.load %arg10[%c0_39, %c0_40, %c0_41] : memref<1x128x7xf32, #tpu.memory_space<vmem>>, vector<1x128x7xf32>
      %62 = vector.shape_cast %61 : vector<1x128x7xf32> to vector<128x7xf32>
      %63 = vector.broadcast %60 : vector<128x1xf32> to vector<128x7xf32>
      %64 = arith.mulf %62, %63 : vector<128x7xf32>
      %cst_42 = arith.constant 1.000000e+00 : f32
      %65 = vector.broadcast %cst_42 : f32 to vector<128x7xf32>
      %66 = arith.mulf %64, %65 : vector<128x7xf32>
      %c0_43 = arith.constant 0 : index
      %c0_44 = arith.constant 0 : index
      %67 = vector.load %arg6[%c0_43, %c0_44] : memref<1x7xf32, #tpu.memory_space<vmem>>, vector<1x7xf32>
      %68 = vector.broadcast %67 : vector<1x7xf32> to vector<128x7xf32>
      %69 = arith.addf %66, %68 : vector<128x7xf32>
      %cst_45 = arith.constant 0.000000e+00 : f32
      %70 = vector.broadcast %cst_45 : f32 to vector<128x121xf32>
      %71 = tpu.concatenate %69, %70 in 1 : vector<128x7xf32>, vector<128x121xf32> -> vector<128x128xf32>
      %c0_46 = arith.constant 0 : index
      %c0_47 = arith.constant 0 : index
      %72 = vector.load %arg7[%c0_46, %c0_47] : memref<128x128xf32, #tpu.memory_space<vmem>>, vector<128x128xf32>
      tpu.vector_store %arg7[%c0_46, %c0_47], %71 {strides = array<i32>} : memref<128x128xf32, #tpu.memory_space<vmem>>, vector<128x128xf32>,
    } else {
    }
    return
  }
  func.func @transform_0(%arg0: i32, %arg1: i32) -> (i32, i32) {
    %c0_i32 = arith.constant 0 : i32
    return %arg0, %arg1 : i32, i32
  }
  func.func @transform_1(%arg0: i32, %arg1: i32) -> (i32, i32, i32) {
    %c0_i32 = arith.constant 0 : i32
    %c0_i32_0 = arith.constant 0 : i32
    %c0_i32_1 = arith.constant 0 : i32
    return %c0_i32, %arg1, %c0_i32_0 : i32, i32, i32
  }
  func.func @transform_2(%arg0: i32, %arg1: i32) -> (i32, i32) {
    %c0_i32 = arith.constant 0 : i32
    %c0_i32_0 = arith.constant 0 : i32
    return %c0_i32, %arg1 : i32, i32
  }
  func.func @transform_3(%arg0: i32, %arg1: i32) -> (i32, i32) {
    %c0_i32 = arith.constant 0 : i32
    %c0_i32_0 = arith.constant 0 : i32
    return %arg0, %c0_i32 : i32, i32
  }
  func.func @transform_4(%arg0: i32, %arg1: i32) -> (i32, i32) {
    %c0_i32 = arith.constant 0 : i32
    %c0_i32_0 = arith.constant 0 : i32
    %c0_i32_1 = arith.constant 0 : i32
    return %c0_i32, %c0_i32_0 : i32, i32
  }
  func.func @transform_5(%arg0: i32, %arg1: i32) -> (i32, i32) {
    %c0_i32 = arith.constant 0 : i32
    %c0_i32_0 = arith.constant 0 : i32
    return %arg0, %c0_i32 : i32, i32
  }
}

</mosaic_0001>

<bundles_post_ra>
// kernel: gat_forward.4
= control target key start
LH: loop header
LB: loop body
LE: loop exit
PB: predicated region body
PF: predicated region fallthrough
CT: control target
= control target key end

     0   :  { %s503_s9 = smov 0   ;;  %s549_s0 = inlined_call_operand.vmem [shape: bf16[256,16], index: 0, kind: input, shape index: {}]   ;;  %s550_s1 = inlined_call_operand.vmem [shape: bf16[16,128], index: 1, kind: input, shape index: {}]   ;;  %s551_s2 = inlined_call_operand.vmem [shape: f32[256,128], index: 2, kind: output, shape index: {}]  }
   0x1 LB: > { %s406_s10 = sadd.s32 4294967295, %s486_s9   ;;  %p410_p0 = scmp.ge.s32.totalorder %s486_s9, 1  ;;  %s486_s9 = sphi %s503_s9, %s12_s9  }
   0x2   : > { %p113_p1 = scmp.lt.s32.totalorder %s486_s9, 3 }
   0x4   : > { %p114_p2 = pnand %p410_p0, %p113_p1 }
   0x5   : > { %v471_v0 = vld [vmem:[%s550_s1] sm:$0xff] (!%p114_p2)   ;;  %s411_s13 = sshll.u32 (!%p114_p2), %s406_s10, 4  ;;  %vm212_vm0 = vcmask (!%p114_p2), 130048  }
   0x6   : > { %117 = sbr.rel (%p114_p2) target bundleno = 243 (0xf3), region = 28  ;;  %p136_p3 = scmp.lt.s32.totalorder (!%p114_p2), %s411_s13, 31  ;;  %443 = vmatprep.subr.bf16.mxu0 (!%p114_p2), %v471_v0  ;;  %461 = vmatprep.subr.bf16.mxu1 (!%p114_p2), %v471_v0 }
   0x7   : > { %444 = vmatpush3.bf16.msra.mxu0 (!%p114_p2), %v471_v0  ;;  %462 = vmatpush3.bf16.msra.mxu1 (!%p114_p2), %v471_v0 }
   0xd   : > { %s553_s13 = smov (!%p136_p3, %s411_s13), 31 }
   0xe   : > { %s412_s14 = sshll.u32 %s553_s13, 2  ;;  %s414_s18 = sshll.u32 %s553_s13, 3 }
   0xf   : > { %s139_s17 = scalar_lea.vmem %s549_s0, %s412_s14  ;;  %s528_s21 = scalar_lea.vmem %s551_s2, %s414_s18 }
  0x10   : > { %v472_v1 = vld [vmem:[%s139_s17] sm:$0xff]   ;;  %v474_v3 = vld [vmem:[%s139_s17 + $0x8] sm:$0xff]   ;;  %v476_v5 = vld [vmem:[%s139_s17 + $0x10] sm:$0xff]  }
  0x11   : > { %v473_v2 = vld [vmem:[%s139_s17 + $0x20] sm:$0xff]   ;;  %445 = vmatprep.mubr.msk.bf16.mxu0 %vm212_vm0, %v472_v1  ;;  %v475_v4 = vld [vmem:[%s139_s17 + $0x28] sm:$0xff]   ;;  %v477_v6 = vld [vmem:[%s139_s17 + $0x30] sm:$0xff]  }
  0x12   : > { %453 = vmatprep.mubr.msk.bf16.mxu1 %vm212_vm0, %v473_v2  ;;  %446 = vmatmul.mubr.msk.bf16.vlgmr.msra.gmra.mrb[0].mxu0 %vm212_vm0, %v474_v3  ;;  %v478_v7 = vld [vmem:[%s139_s17 + $0x18] sm:$0xff]  }
  0x13   : > { %454 = vmatmul.mubr.msk.bf16.vlgmr.msra.gmra.mrb[0].mxu1 %vm212_vm0, %v475_v4  ;;  %449 = vmatprep.mubr.msk.bf16.mxu0 %vm212_vm0, %v476_v5  ;;  %v479_v8 = vld [vmem:[%s139_s17 + $0x38] sm:$0xff]  }
  0x14   : > { %457 = vmatprep.mubr.msk.bf16.mxu1 %vm212_vm0, %v477_v6 }
  0x1a   : > { %450 = vmatmul.mubr.msk.bf16.gmra.mrb[4].mxu0 %vm212_vm0, %v478_v7 }
  0x1b   : > { %458 = vmatmul.mubr.msk.bf16.gmra.mrb[4].mxu1 %vm212_vm0, %v479_v8 }
  0xe5   : > { %v447_v9 = vpop.f32.mrb[0].mxu0 }
  0xe6   : > { %336 = vst [vmem:[%s528_s21 + $0x10] sm:$0xff] %v447_v9  ;;  %v455_v10 = vpop.f32.mrb[0].mxu1  ;;  %v271_v11 = vpop.f32.mrb[1].mxu0 }
  0xe7   : > { %344 = vst [vmem:[%s528_s21 + $0x50] sm:$0xff] %v455_v10  ;;  %334 = vst [vmem:[%s528_s21] sm:$0xff] %v271_v11  ;;  %v303_v12 = vpop.f32.mrb[1].mxu1  ;;  %v448_v13 = vpop.f32.mrb[2].mxu0 }
  0xe8   : > { %342 = vst [vmem:[%s528_s21 + $0x40] sm:$0xff] %v303_v12  ;;  %337 = vst [vmem:[%s528_s21 + $0x18] sm:$0xff] %v448_v13  ;;  %v456_v14 = vpop.f32.mrb[2].mxu1  ;;  %v274_v15 = vpop.f32.mrb[3].mxu0 }
  0xe9   : > { %345 = vst [vmem:[%s528_s21 + $0x58] sm:$0xff] %v456_v14  ;;  %335 = vst [vmem:[%s528_s21 + $0x8] sm:$0xff] %v274_v15  ;;  %v306_v16 = vpop.f32.mrb[3].mxu1 }
  0xea   : > { %343 = vst [vmem:[%s528_s21 + $0x48] sm:$0xff] %v306_v16 }
  0xed   : > { %v451_v17 = vpop.f32.mrb[4].mxu0 }
  0xee   : > { %340 = vst [vmem:[%s528_s21 + $0x30] sm:$0xff] %v451_v17  ;;  %v459_v18 = vpop.f32.mrb[4].mxu1  ;;  %v287_v19 = vpop.f32.mrb[5].mxu0 }
  0xef   : > { %348 = vst [vmem:[%s528_s21 + $0x70] sm:$0xff] %v459_v18  ;;  %338 = vst [vmem:[%s528_s21 + $0x20] sm:$0xff] %v287_v19  ;;  %v319_v20 = vpop.f32.mrb[5].mxu1  ;;  %v452_v21 = vpop.f32.mrb[6].mxu0 }
  0xf0   : > { %346 = vst [vmem:[%s528_s21 + $0x60] sm:$0xff] %v319_v20  ;;  %341 = vst [vmem:[%s528_s21 + $0x38] sm:$0xff] %v452_v21  ;;  %v460_v22 = vpop.f32.mrb[6].mxu1  ;;  %v290_v23 = vpop.f32.mrb[7].mxu0 }
  0xf1   : > { %349 = vst [vmem:[%s528_s21 + $0x78] sm:$0xff] %v460_v22  ;;  %339 = vst [vmem:[%s528_s21 + $0x28] sm:$0xff] %v290_v23  ;;  %v322_v24 = vpop.f32.mrb[7].mxu1 }
  0xf2   : > { %347 = vst [vmem:[%s528_s21 + $0x68] sm:$0xff] %v322_v24 }
  0xf3 PF: > { %s12_s9 = sadd.s32 1, %s486_s9  }
  0xf4   : > { %p9_p4 = scmp.ge.s32.totalorder %s12_s9, 4  }
  0xf6   :  { %11 = sbr.rel (!%p9_p4) target bundleno = 1 (0x1), region = 58 }

// kernel: gat_forward.6
= control target key start
LH: loop header
LB: loop body
LE: loop exit
PB: predicated region body
PF: predicated region fallthrough
CT: control target
= control target key end

     0   :  { %s583_s9 = smov 0   ;;  %s656_s0 = inlined_call_operand.vmem [shape: bf16[256,128], index: 0, kind: input, shape index: {}]   ;;  %s657_s1 = inlined_call_operand.vmem [shape: bf16[128,128], index: 1, kind: input, shape index: {}]   ;;  %s658_s2 = inlined_call_operand.vmem [shape: f32[256,128], index: 2, kind: output, shape index: {}]  }
   0x1 LB: > { %s445_s10 = sadd.s32 4294967295, %s566_s9   ;;  %p449_p0 = scmp.ge.s32.totalorder %s566_s9, 1  ;;  %s566_s9 = sphi %s583_s9, %s12_s9  }
   0x2   : > { %p113_p1 = scmp.lt.s32.totalorder %s566_s9, 3 }
   0x4   : > { %p114_p2 = pnand %p449_p0, %p113_p1 }
   0x5   : > { %v544_v0 = vld [vmem:[%s657_s1] sm:$0xff] (!%p114_p2)   ;;  %s450_s13 = sshll.u32 (!%p114_p2), %s445_s10, 4  ;;  %v545_v1 = vld [vmem:[%s657_s1 + $0x8] sm:$0xff] (!%p114_p2)   ;;  %v546_v2 = vld [vmem:[%s657_s1 + $0x10] sm:$0xff] (!%p114_p2)  }
   0x6   : > { %117 = sbr.rel (%p114_p2) target bundleno = 262 (0x106), region = 28  ;;  %p136_p3 = scmp.lt.s32.totalorder (!%p114_p2), %s450_s13, 31  ;;  %488 = vmatprep.subr.bf16.mxu0 (!%p114_p2), %v544_v0  ;;  %520 = vmatprep.subr.bf16.mxu1 (!%p114_p2), %v544_v0  ;;  %v547_v3 = vld [vmem:[%s657_s1 + $0x18] sm:$0xff] (!%p114_p2)   ;;  %v548_v6 = vld [vmem:[%s657_s1 + $0x20] sm:$0xff] (!%p114_p2)   ;;  %v549_v7 = vld [vmem:[%s657_s1 + $0x28] sm:$0xff] (!%p114_p2)  }
   0x7   : > { %489 = vmatpush3.bf16.msra.mxu0 (!%p114_p2), %v544_v0  ;;  %528 = vmatpush3.bf16.msra.mxu1 (!%p114_p2), %v544_v0  ;;  %v550_v8 = vld [vmem:[%s657_s1 + $0x30] sm:$0xff] (!%p114_p2)   ;;  %v551_v9 = vld [vmem:[%s657_s1 + $0x38] sm:$0xff] (!%p114_p2)  }
   0x8   : > { %490 = vmatprep.subr.bf16.mxu0 (!%p114_p2), %v545_v1  ;;  %521 = vmatprep.subr.bf16.mxu1 (!%p114_p2), %v545_v1 }
   0xb   : > { %491 = vmatpush3.bf16.msra.mxu0 (!%p114_p2), %v545_v1  ;;  %529 = vmatpush3.bf16.msra.mxu1 (!%p114_p2), %v545_v1 }
   0xc   : > { %492 = vmatprep.subr.bf16.mxu0 (!%p114_p2), %v546_v2  ;;  %522 = vmatprep.subr.bf16.mxu1 (!%p114_p2), %v546_v2 }
   0xd   : > { %s660_s13 = smov (!%p136_p3, %s450_s13), 31 }
   0xe   : > { %s451_s18 = sshll.u32 %s660_s13, 2  ;;  %s453_s4 = sshll.u32 %s660_s13, 3 }
   0xf   : > { %s606_s21 = scalar_lea.vmem %s656_s0, %s451_s18  ;;  %493 = vmatpush3.bf16.msra.mxu0 %v546_v2  ;;  %530 = vmatpush3.bf16.msra.mxu1 %v546_v2  ;;  %s635_s7 = scalar_lea.vmem %s658_s2, %s453_s4 }
  0x10   : > { %v552_v4 = vld [vmem:[%s606_s21] sm:$0xff]   ;;  %494 = vmatprep.subr.bf16.mxu0 %v547_v3  ;;  %523 = vmatprep.subr.bf16.mxu1 %v547_v3  ;;  %v554_v10 = vld [vmem:[%s606_s21 + $0x8] sm:$0xff]   ;;  %v556_v12 = vld [vmem:[%s606_s21 + $0x10] sm:$0xff]  }
  0x11   : > { %v553_v5 = vld [vmem:[%s606_s21 + $0x20] sm:$0xff]   ;;  %504 = vmatprep.mubr.bf16.mxu0 %v552_v4  ;;  %v555_v11 = vld [vmem:[%s606_s21 + $0x28] sm:$0xff]   ;;  %v557_v13 = vld [vmem:[%s606_s21 + $0x30] sm:$0xff]  }
  0x12   : > { %512 = vmatprep.mubr.bf16.mxu1 %v553_v5  ;;  %v558_v14 = vld [vmem:[%s606_s21 + $0x18] sm:$0xff]  }
  0x13   : > { %495 = vmatpush3.bf16.msra.mxu0 %v547_v3  ;;  %531 = vmatpush3.bf16.msra.mxu1 %v547_v3  ;;  %v559_v15 = vld [vmem:[%s606_s21 + $0x38] sm:$0xff]  }
  0x14   : > { %496 = vmatprep.subr.bf16.mxu0 %v548_v6  ;;  %524 = vmatprep.subr.bf16.mxu1 %v548_v6 }
  0x17   : > { %497 = vmatpush3.bf16.msra.mxu0 %v548_v6  ;;  %532 = vmatpush3.bf16.msra.mxu1 %v548_v6 }
  0x18   : > { %498 = vmatprep.subr.bf16.mxu0 %v549_v7  ;;  %525 = vmatprep.subr.bf16.mxu1 %v549_v7 }
  0x1b   : > { %499 = vmatpush3.bf16.msra.mxu0 %v549_v7  ;;  %533 = vmatpush3.bf16.msra.mxu1 %v549_v7 }
  0x1c   : > { %500 = vmatprep.subr.bf16.mxu0 %v550_v8  ;;  %526 = vmatprep.subr.bf16.mxu1 %v550_v8 }
  0x1f   : > { %501 = vmatpush3.bf16.msra.mxu0 %v550_v8  ;;  %534 = vmatpush3.bf16.msra.mxu1 %v550_v8 }
  0x20   : > { %502 = vmatprep.subr.bf16.mxu0 %v551_v9  ;;  %527 = vmatprep.subr.bf16.mxu1 %v551_v9 }
  0x23   : > { %503 = vmatpush3.bf16.msra.mxu0 %v551_v9  ;;  %535 = vmatpush3.bf16.msra.mxu1 %v551_v9 }
  0x26   : > { %505 = vmatmul.mubr.bf16.vlgmr.msra.gmra.mrb[0].mxu0 %v554_v10  ;;  %513 = vmatmul.mubr.bf16.vlgmr.msra.gmra.mrb[0].mxu1 %v555_v11 }
  0x27   : > { %508 = vmatprep.mubr.bf16.mxu0 %v556_v12  ;;  %516 = vmatprep.mubr.bf16.mxu1 %v557_v13 }
  0x2e   : > { %509 = vmatmul.mubr.bf16.gmra.mrb[4].mxu0 %v558_v14  ;;  %517 = vmatmul.mubr.bf16.gmra.mrb[4].mxu1 %v559_v15 }
  0xf9   : > { %v506_v16 = vpop.f32.mrb[0].mxu0  ;;  %v514_v17 = vpop.f32.mrb[0].mxu1 }
  0xfa   : > { %375 = vst [vmem:[%s635_s7 + $0x10] sm:$0xff] %v506_v16  ;;  %383 = vst [vmem:[%s635_s7 + $0x50] sm:$0xff] %v514_v17  ;;  %v310_v18 = vpop.f32.mrb[1].mxu0  ;;  %v342_v19 = vpop.f32.mrb[1].mxu1 }
  0xfb   : > { %373 = vst [vmem:[%s635_s7] sm:$0xff] %v310_v18  ;;  %381 = vst [vmem:[%s635_s7 + $0x40] sm:$0xff] %v342_v19  ;;  %v507_v20 = vpop.f32.mrb[2].mxu0  ;;  %v515_v21 = vpop.f32.mrb[2].mxu1 }
  0xfc   : > { %376 = vst [vmem:[%s635_s7 + $0x18] sm:$0xff] %v507_v20  ;;  %384 = vst [vmem:[%s635_s7 + $0x58] sm:$0xff] %v515_v21  ;;  %v313_v22 = vpop.f32.mrb[3].mxu0  ;;  %v345_v23 = vpop.f32.mrb[3].mxu1 }
  0xfd   : > { %374 = vst [vmem:[%s635_s7 + $0x8] sm:$0xff] %v313_v22  ;;  %382 = vst [vmem:[%s635_s7 + $0x48] sm:$0xff] %v345_v23 }
 0x101   : > { %v510_v24 = vpop.f32.mrb[4].mxu0  ;;  %v518_v25 = vpop.f32.mrb[4].mxu1 }
 0x102   : > { %379 = vst [vmem:[%s635_s7 + $0x30] sm:$0xff] %v510_v24  ;;  %387 = vst [vmem:[%s635_s7 + $0x70] sm:$0xff] %v518_v25  ;;  %v326_v26 = vpop.f32.mrb[5].mxu0  ;;  %v358_v27 = vpop.f32.mrb[5].mxu1 }
 0x103   : > { %377 = vst [vmem:[%s635_s7 + $0x20] sm:$0xff] %v326_v26  ;;  %385 = vst [vmem:[%s635_s7 + $0x60] sm:$0xff] %v358_v27  ;;  %v511_v28 = vpop.f32.mrb[6].mxu0  ;;  %v519_v29 = vpop.f32.mrb[6].mxu1 }
 0x104   : > { %380 = vst [vmem:[%s635_s7 + $0x38] sm:$0xff] %v511_v28  ;;  %388 = vst [vmem:[%s635_s7 + $0x78] sm:$0xff] %v519_v29  ;;  %v329_v30 = vpop.f32.mrb[7].mxu0  ;;  %v361_v31 = vpop.f32.mrb[7].mxu1 }
 0x105   : > { %378 = vst [vmem:[%s635_s7 + $0x28] sm:$0xff] %v329_v30  ;;  %386 = vst [vmem:[%s635_s7 + $0x68] sm:$0xff] %v361_v31 }
 0x106 PF: > { %s12_s9 = sadd.s32 1, %s566_s9  }
 0x107   : > { %p9_p4 = scmp.ge.s32.totalorder %s12_s9, 4  }
 0x109   :  { %11 = sbr.rel (!%p9_p4) target bundleno = 1 (0x1), region = 58 }

// kernel: gat_forward.7
= control target key start
LH: loop header
LB: loop body
LE: loop exit
PB: predicated region body
PF: predicated region fallthrough
CT: control target
= control target key end

     0   :  { %s2288_s18 = smov 0   ;;  %s2290_s19 = smov 0   ;;  %s3218_s0 = inlined_call_operand.vmem [shape: s8[256,256], index: 0, kind: input, shape index: {}]   ;;  %s3219_s1 = inlined_call_operand.vmem [shape: bf16[1,256,7], index: 1, kind: input, shape index: {}]   ;;  %s3220_s2 = inlined_call_operand.vmem [shape: f32[1,256], index: 2, kind: input, shape index: {}]   ;;  %s3221_s3 = inlined_call_operand.vmem [shape: f32[256,1], index: 3, kind: input, shape index: {}]   ;;  %s3222_s4 = inlined_call_operand.vmem [shape: f32[1,7], index: 4, kind: input, shape index: {}]   ;;  %s3223_s5 = inlined_call_operand.vmem [shape: f32[256,128], index: 5, kind: output, shape index: {}]  }
   0x1   :  { %s2292_s20 = smov 0  }
   0x2 LB: > { %s27_s21 = sadd.s32 1, %s2249_s19  ;;  %p1918_p0 = scmp.ge.s32.totalorder %s2253_s20, 1  ;;  %s2253_s20 = sphi %s2292_s20, %s15_s20   ;;  %s2249_s19 = sphi %s2290_s19, %s3286_s19   ;;  %s2245_s18 = sphi %s2288_s18, %s3285_s18  }
   0x3   : > { %p29_p1 = scmp.ge.s32.totalorder %s27_s21, 2  ;;  %p240_p2 = scmp.lt.s32.totalorder %s2253_s20, 3 }
   0x5   : > { %s3288_s21 = smov (%p29_p1, %s27_s21), 0  ;;  %p241_p3 = pnand %p1918_p0, %p240_p2 }
   0x7   : > { %244 = sbr.rel (%p241_p3) target bundleno = 798 (0x31e), region = 40 }
   0xe   : > { %s1922_s22 = sshll.u32 %s2245_s18, 4  ;;  %v2255_v0 = vmov 0   ;;  %vm327_vm0 = vcmask 7168   ;;  %v2256_v17 = vmov -1e+30   ;;  %s1919_s27 = sshll.u32 %s2245_s18, 2  ;;  %v611_v19 = vlaneseq }
   0xf   : > { %2086 = vset.pattern.permute.xlu1 %v2255_v0  ;;  %2085 = vset.pattern.permute.xlu0 %v2255_v0  ;;  %p311_p4 = scmp.lt.s32.totalorder %s1922_s22, 31  ;;  %328 = vst.msk [vmem:[#allocation2] sm:$0xff] %vm327_vm0, %v2256_v17  ;;  %329 = vst.msk [vmem:[#allocation2 + $0x8] sm:$0xff] %vm327_vm0, %v2256_v17  ;;  %p289_p5 = scmp.lt.s32.totalorder %s1919_s27, 7  ;;  %v2356_v36 = vld [vmem:[%s3220_s2] sm:$0x3] }
  0x10   : > { %330 = vst.msk [vmem:[#allocation2 + $0x10] sm:$0xff] %vm327_vm0, %v2256_v17  ;;  %331 = vst.msk [vmem:[#allocation2 + $0x18] sm:$0xff] %vm327_vm0, %v2256_v17  ;;  %v2347_v25 = vshrl.u32 %v611_v19, 7  ;;  %vm360_vm1 = vcmask 56320  }
  0x11   : > { %s3290_s22 = smov (!%p311_p4, %s1922_s22), 31  ;;  %332 = vst.msk [vmem:[#allocation2 + $0x20] sm:$0xff] %vm327_vm0, %v2256_v17  ;;  %333 = vst.msk [vmem:[#allocation2 + $0x28] sm:$0xff] %vm327_vm0, %v2256_v17  ;;  %s3292_s27 = smov (!%p289_p5, %s1919_s27), 7 }
  0x12   : > { %s1923_s23 = sshll.u32 %s3290_s22, 3  ;;  %334 = vst.msk [vmem:[#allocation2 + $0x30] sm:$0xff] %vm327_vm0, %v2256_v17  ;;  %335 = vst.msk [vmem:[#allocation2 + $0x38] sm:$0xff] %vm327_vm0, %v2256_v17  ;;  %s1977_s28 = sshll.u32 %s3292_s27, 4  ;;  %v613_v34 = vsub.s32 0, %v2347_v25  ;;  %v617_v49 = vsub.s32 1, %v2347_v25 }
  0x13   : > { %s314_s26 = scalar_lea.vmem %s3221_s3, %s1923_s23  ;;  %336 = vst.msk [vmem:[#allocation2 + $0x40] sm:$0xff] %vm327_vm0, %v2256_v17  ;;  %337 = vst.msk [vmem:[#allocation2 + $0x48] sm:$0xff] %vm327_vm0, %v2256_v17  ;;  %s2337_s6 = scalar_lea.vmem %s3218_s0, %s1977_s28 }
  0x14   : > { %v522_v1 = vld [vmem:[%s314_s26 + $0x40] sm:$0xff]  ;;  %v523_v3 = vld [vmem:[%s314_s26 + $0x48] sm:$0xff]  ;;  %v517_v5 = vld [vmem:[%s314_s26 + $0x18] sm:$0xff]  ;;  %338 = vst.msk [vmem:[#allocation2 + $0x50] sm:$0xff] %vm327_vm0, %v2256_v17  ;;  %v2360_v48 = vrot.slane %v2356_v36, %v613_v34  ;;  %s3159_s30 = scalar_lea.vmem %s3223_s5, %s1923_s23 }
  0x15   : > { %v514_v2 = vld [vmem:[%s314_s26] sm:$0xff]  ;;  %572 = vperm.xlu1 %2086, %v522_v1   ;;  %v515_v4 = vld [vmem:[%s314_s26 + $0x8] sm:$0xff]  ;;  %v516_v6 = vld [vmem:[%s314_s26 + $0x10] sm:$0xff]  ;;  %339 = vst.msk [vmem:[#allocation2 + $0x58] sm:$0xff] %vm327_vm0, %v2256_v17 }
  0x16   : > { %532 = vperm.xlu0 %2085, %v514_v2   ;;  %v525_v7 = vld [vmem:[%s314_s26 + $0x58] sm:$0xff]  ;;  %v524_v8 = vld [vmem:[%s314_s26 + $0x50] sm:$0xff]  ;;  %v519_v9 = vld [vmem:[%s314_s26 + $0x28] sm:$0xff]  ;;  %340 = vst.msk [vmem:[#allocation2 + $0x60] sm:$0xff] %vm327_vm0, %v2256_v17 }
  0x17   : > { %v518_v10 = vld [vmem:[%s314_s26 + $0x20] sm:$0xff]  ;;  %v527_v11 = vld [vmem:[%s314_s26 + $0x68] sm:$0xff]  ;;  %v521_v13 = vld [vmem:[%s314_s26 + $0x38] sm:$0xff]  ;;  %341 = vst.msk [vmem:[#allocation2 + $0x68] sm:$0xff] %vm327_vm0, %v2256_v17 }
  0x18   : > { %v526_v12 = vld [vmem:[%s314_s26 + $0x60] sm:$0xff]  ;;  %v520_v14 = vld [vmem:[%s314_s26 + $0x30] sm:$0xff]  ;;  %v529_v15 = vld [vmem:[%s314_s26 + $0x78] sm:$0xff]  ;;  %342 = vst.msk [vmem:[#allocation2 + $0x70] sm:$0xff] %vm327_vm0, %v2256_v17 }
  0x19   : > { %577 = vperm.xlu1 %2086, %v523_v3   ;;  %v528_v16 = vld [vmem:[%s314_s26 + $0x70] sm:$0xff]  ;;  %343 = vst.msk [vmem:[#allocation2 + $0x78] sm:$0xff] %vm327_vm0, %v2256_v17  ;;  %v377_v18 = vld [vmem:[%s2337_s6] sm:$0xff]  ;;  %v378_v20 = vld [vmem:[%s2337_s6 + $0x8] sm:$0xff] }
  0x1a   : > { %537 = vperm.xlu0 %2085, %v515_v4   ;;  %v385_v21 = vunpack.c.0.s8 %v377_v18  ;;  %v2342_v22 = vld [vmem:[%s2337_s6 + $0x20] sm:$0xff]  ;;  %v2345_v23 = vld [vmem:[%s2337_s6 + $0x28] sm:$0xff]  ;;  %v386_v24 = vunpack.c.0.s8 %v378_v20  ;;  %v387_v26 = vunpack.c.1.s8 %v377_v18  ;;  %v388_v27 = vunpack.c.1.s8 %v378_v20  ;;  %v2367_v59 = vld [vmem:[%s2337_s6 + $0x10] sm:$0xff] }
  0x1b   : > { %v401_v28 = vunpack.c.0.s8 %v2342_v22  ;;  %v402_v29 = vunpack.c.0.s8 %v2345_v23  ;;  %v389_v32 = vunpack.c.2.s8 %v377_v18  ;;  %v390_v33 = vunpack.c.2.s8 %v378_v20  ;;  %v2373_v2 = vld [vmem:[%s2337_s6 + $0x18] sm:$0xff] }
  0x1c   : > { %v417_v30 = vcvt.s32.f32 %v385_v21  ;;  %v418_v31 = vcvt.s32.f32 %v386_v24  ;;  %v403_v35 = vunpack.c.1.s8 %v2342_v22  ;;  %v419_v37 = vcvt.s32.f32 %v387_v26 }
  0x1d   : > { %547 = vperm.xlu1 %2086, %v517_v5   ;;  %v420_v38 = vcvt.s32.f32 %v388_v27  ;;  %v433_v39 = vcvt.s32.f32 %v401_v28  ;;  %v434_v40 = vcvt.s32.f32 %v402_v29  ;;  %v404_v42 = vunpack.c.1.s8 %v2345_v23 }
  0x1e   : > { %542 = vperm.xlu0 %2085, %v516_v6   ;;  %v1926_v41 = vadd.f32 -1.0, %v417_v30  ;;  %v391_v43 = vunpack.c.3.s8 %v377_v18  ;;  %v1927_v44 = vadd.f32 -1.0, %v418_v31  ;;  %v421_v45 = vcvt.s32.f32 %v389_v32  ;;  %v2395_v18 = vld [vmem:[%s2337_s6 + $0x38] sm:$0xff] }
  0x1f   : > { %v422_v46 = vcvt.s32.f32 %v390_v33  ;;  %v392_v47 = vunpack.c.3.s8 %v378_v20  ;;  %v435_v50 = vcvt.s32.f32 %v403_v35  ;;  %v1928_v51 = vadd.f32 -1.0, %v419_v37 }
  0x20   : > { %v1929_v52 = vadd.f32 -1.0, %v420_v38  ;;  %v1942_v53 = vadd.f32 -1.0, %v433_v39  ;;  %v1943_v54 = vadd.f32 -1.0, %v434_v40  ;;  %v2363_v55 = vmul.f32 1e+09, %v1926_v41 }
  0x21   : > { %587 = vperm.xlu1 %2086, %v525_v7   ;;  %v436_v56 = vcvt.s32.f32 %v404_v42  ;;  %v405_v57 = vunpack.c.2.s8 %v2342_v22  ;;  %v423_v58 = vcvt.s32.f32 %v391_v43  ;;  %v2369_v60 = vmul.f32 1e+09, %v1927_v44 }
  0x22   : > { %582 = vperm.xlu0 %2085, %v524_v8   ;;  %v1930_v61 = vadd.f32 -1.0, %v421_v45  ;;  %v1931_v62 = vadd.f32 -1.0, %v422_v46  ;;  %v424_v63 = vcvt.s32.f32 %v392_v47  ;;  %v1944_v0 = vadd.f32 -1.0, %v435_v50 }
  0x23   : > { %v406_v1 = vunpack.c.2.s8 %v2345_v23  ;;  %v407_v3 = vunpack.c.3.s8 %v2342_v22  ;;  %v408_v4 = vunpack.c.3.s8 %v2345_v23  ;;  %v2377_v5 = vmul.f32 1e+09, %v1928_v51 }
  0x24   : > { %v2379_v6 = vmul.f32 1e+09, %v1929_v52  ;;  %v2381_v7 = vmul.f32 1e+09, %v1942_v53  ;;  %v393_v8 = vunpack.c.0.s8 %v2367_v59  ;;  %v394_v17 = vunpack.c.0.s8 %v2373_v2 }
  0x25   : > { %557 = vperm.xlu1 %2086, %v519_v9   ;;  %v2384_v9 = vmul.f32 1e+09, %v1943_v54  ;;  %v2397_v19 = vmul.f32 1e+09, %v1944_v0  ;;  %v438_v20 = vcvt.s32.f32 %v406_v1  ;;  %v439_v21 = vcvt.s32.f32 %v407_v3 }
  0x26   : > { %552 = vperm.xlu0 %2085, %v518_v10   ;;  %v1945_v10 = vadd.f32 -1.0, %v436_v56  ;;  %v440_v22 = vcvt.s32.f32 %v408_v4  ;;  %v425_v23 = vcvt.s32.f32 %v393_v8  ;;  %v395_v26 = vunpack.c.1.s8 %v2367_v59 }
  0x27   : > { %v396_v27 = vunpack.c.1.s8 %v2373_v2  ;;  %v410_v31 = vunpack.c.0.s8 %v2395_v18  ;;  %v426_v33 = vcvt.s32.f32 %v394_v17  ;;  %v412_v35 = vunpack.c.1.s8 %v2395_v18 }
  0x28   : > { %v2402_v28 = vmul.f32 1e+09, %v1945_v10  ;;  %v1947_v37 = vadd.f32 -1.0, %v438_v20  ;;  %v1948_v38 = vadd.f32 -1.0, %v439_v21  ;;  %v1949_v39 = vadd.f32 -1.0, %v440_v22 }
  0x29   : > { %597 = vperm.xlu1 %2086, %v527_v11   ;;  %v437_v11 = vcvt.s32.f32 %v405_v57  ;;  %v397_v40 = vunpack.c.2.s8 %v2367_v59  ;;  %v1934_v41 = vadd.f32 -1.0, %v425_v23  ;;  %v427_v43 = vcvt.s32.f32 %v395_v26 }
  0x2a   : > { %592 = vperm.xlu0 %2085, %v526_v12   ;;  %v1932_v12 = vadd.f32 -1.0, %v423_v58  ;;  %v428_v44 = vcvt.s32.f32 %v396_v27  ;;  %v442_v46 = vcvt.s32.f32 %v410_v31  ;;  %v398_v47 = vunpack.c.2.s8 %v2373_v2 }
  0x2b   : > { %v1946_v29 = vadd.f32 -1.0, %v437_v11  ;;  %v399_v50 = vunpack.c.3.s8 %v2367_v59  ;;  %v1935_v51 = vadd.f32 -1.0, %v426_v33  ;;  %v444_v53 = vcvt.s32.f32 %v412_v35 }
  0x2c   : > { %v2404_v30 = vmul.f32 1e+09, %v1932_v12  ;;  %v400_v54 = vunpack.c.3.s8 %v2373_v2  ;;  %v2417_v56 = vmul.f32 1e+09, %v1947_v37  ;;  %v2419_v57 = vmul.f32 1e+09, %v1948_v38 }
  0x2d   : > { %567 = vperm.xlu1 %2086, %v521_v13   ;;  %v2387_v13 = vld [vmem:[%s2337_s6 + $0x30] sm:$0xff]  ;;  %v2412_v45 = vmul.f32 1e+09, %v1946_v29  ;;  %v2421_v58 = vmul.f32 1e+09, %v1949_v39  ;;  %v1936_v0 = vadd.f32 -1.0, %v427_v43  ;;  %v430_v4 = vcvt.s32.f32 %v398_v47 }
  0x2e   : > { %562 = vperm.xlu0 %2085, %v520_v14   ;;  %v2389_v14 = vmul.f32 1e+09, %v1930_v61  ;;  %v409_v24 = vunpack.c.0.s8 %v2387_v13  ;;  %v411_v34 = vunpack.c.1.s8 %v2387_v13  ;;  %v429_v61 = vcvt.s32.f32 %v397_v40 }
  0x2f   : > { %v1937_v1 = vadd.f32 -1.0, %v428_v44  ;;  %v1951_v3 = vadd.f32 -1.0, %v442_v46  ;;  %v413_v59 = vunpack.c.2.s8 %v2387_v13  ;;  %v431_v8 = vcvt.s32.f32 %v399_v50 }
  0x30   : > { %v441_v42 = vcvt.s32.f32 %v409_v24  ;;  %v443_v52 = vcvt.s32.f32 %v411_v34  ;;  %v2426_v10 = vmul.f32 1e+09, %v1935_v51  ;;  %v1953_v11 = vadd.f32 -1.0, %v444_v53 }
  0x31   : > { %607 = vperm.xlu1 %2086, %v529_v15   ;;  %v2391_v15 = vmul.f32 1e+09, %v1931_v62  ;;  %v2423_v62 = vmul.f32 1e+09, %v1934_v41  ;;  %v432_v12 = vcvt.s32.f32 %v400_v54  ;;  %v414_v17 = vunpack.c.2.s8 %v2395_v18 }
  0x32   : > { %602 = vperm.xlu0 %2085, %v528_v16   ;;  %v1933_v16 = vadd.f32 -1.0, %v424_v63  ;;  %v1950_v63 = vadd.f32 -1.0, %v441_v42  ;;  %v1952_v2 = vadd.f32 -1.0, %v443_v52  ;;  %v415_v20 = vunpack.c.3.s8 %v2387_v13 }
  0x33   : > { %v416_v21 = vunpack.c.3.s8 %v2395_v18  ;;  %v2434_v22 = vrot.slane %v2356_v36, %v617_v49  ;;  %v2438_v24 = vmul.f32 1e+09, %v1936_v0  ;;  %v2440_v26 = vmul.f32 1e+09, %v1937_v1 }
  0x34   : > { %v2407_v32 = vmul.f32 1e+09, %v1933_v16  ;;  %v1938_v16 = vadd.f32 -1.0, %v429_v61  ;;  %v2436_v23 = vmul.f32 1e+09, %v1950_v63  ;;  %v1939_v29 = vadd.f32 -1.0, %v430_v4 }
  0x35   : > { %v2442_v27 = vmul.f32 1e+09, %v1951_v3  ;;  %v445_v31 = vcvt.s32.f32 %v413_v59  ;;  %v1940_v33 = vadd.f32 -1.0, %v431_v8  ;;  %v2444_v34 = vmul.f32 1e+09, %v1952_v2 }
  0x36   : > { %v2446_v13 = vmul.f32 1e+09, %v1953_v11  ;;  %v1941_v18 = vadd.f32 -1.0, %v432_v12  ;;  %v2448_v36 = vmul.f32 1e+09, %v1938_v16  ;;  %v446_v49 = vcvt.s32.f32 %v414_v17 }
  0x37   : > { %v447_v37 = vcvt.s32.f32 %v415_v20  ;;  %v448_v38 = vcvt.s32.f32 %v416_v21  ;;  %v2454_v43 = vmul.f32 1e+09, %v1939_v29  ;;  %v1954_v44 = vadd.f32 -1.0, %v445_v31 }
  0x38   : > { %v2456_v46 = vmul.f32 1e+09, %v1940_v33  ;;  %v1955_v61 = vadd.f32 -1.0, %v446_v49  ;;  %v2458_v63 = vmul.f32 1e+09, %v1941_v18 }
  0x39   : > { %v2460_v0 = vadd.f32 -1.0, %v447_v37  ;;  %v2465_v59 = vadd.f32 -1.0, %v448_v38  ;;  %v2476_v21 = vmul.f32 1e+09, %v1954_v44 }
  0x94   : > { %v573_v25 = vpop.permute.xlu1 %572 }
  0x95   : > { %v533_v35 = vpop.permute.xlu0 %532  ;;  %v637_v39 = vadd.f32 %v2360_v48, %v573_v25  ;;  %v638_v40 = vadd.f32 %v2434_v22, %v573_v25 }
  0x96   : > { %v621_v41 = vadd.f32 %v2360_v48, %v533_v35  ;;  %v622_v42 = vadd.f32 %v2434_v22, %v533_v35  ;;  %v2481_v35 = vmul.f32 1e+09, %v1955_v61 }
  0x97   : > { %v669_v47 = vmul.f32 0.2, %v637_v39  ;;  %v670_v50 = vmul.f32 0.2, %v638_v40 }
  0x98   : > { %v653_v51 = vmul.f32 0.2, %v621_v41  ;;  %v654_v52 = vmul.f32 0.2, %v622_v42  ;;  %v578_v53 = vpop.permute.xlu1 %577 }
  0x99   : > { %v538_v54 = vpop.permute.xlu0 %537  ;;  %v701_v1 = vmax.f32 %v637_v39, %v669_v47  ;;  %v2463_v4 = vadd.f32 %v2360_v48, %v578_v53  ;;  %v2468_v2 = vadd.f32 %v2434_v22, %v578_v53  ;;  %v702_v16 = vmax.f32 %v638_v40, %v670_v50 }
  0x9a   : > { %v685_v3 = vmax.f32 %v621_v41, %v653_v51  ;;  %v686_v8 = vmax.f32 %v622_v42, %v654_v52  ;;  %v623_v11 = vadd.f32 %v2360_v48, %v538_v54  ;;  %v624_v12 = vadd.f32 %v2434_v22, %v538_v54 }
  0x9b   : > { %v671_v17 = vmul.f32 0.2, %v2463_v4  ;;  %v672_v49 = vmul.f32 0.2, %v2468_v2  ;;  %v2493_v42 = vadd.f32 %v701_v1, %v2381_v7  ;;  %v2499_v50 = vadd.f32 %v702_v16, %v2384_v9 }
  0x9c   : > { %v2474_v20 = vadd.f32 %v685_v3, %v2363_v55  ;;  %v655_v29 = vmul.f32 0.2, %v623_v11  ;;  %v656_v31 = vmul.f32 0.2, %v624_v12  ;;  %v548_v33 = vpop.permute.xlu1 %547  ;;  %v2479_v25 = vadd.f32 %v686_v8, %v2369_v60 }
  0x9d   : > { %v543_v18 = vpop.permute.xlu0 %542  ;;  %v2485_v37 = vadd.f32 %v2360_v48, %v548_v33  ;;  %v2488_v38 = vadd.f32 %v2434_v22, %v548_v33  ;;  %v703_v60 = vmax.f32 %v2463_v4, %v671_v17  ;;  %v704_v1 = vmax.f32 %v2468_v2, %v672_v49 }
  0x9e   : > { %v625_v55 = vadd.f32 %v2360_v48, %v543_v18  ;;  %v687_v39 = vmax.f32 %v623_v11, %v655_v29  ;;  %v688_v40 = vmax.f32 %v624_v12, %v656_v31  ;;  %v626_v41 = vadd.f32 %v2434_v22, %v543_v18 }
  0x9f   : > { %v765_v47 = vmax.f32 %v2474_v20, %v2479_v25  ;;  %v659_v51 = vmul.f32 0.2, %v2485_v37  ;;  %v660_v3 = vmul.f32 0.2, %v2488_v38  ;;  %v789_v16 = vmax.f32 %v2493_v42, %v2499_v50 }
  0xa0   : > { %v657_v44 = vmul.f32 0.2, %v625_v55  ;;  %v658_v52 = vmul.f32 0.2, %v626_v41  ;;  %v588_v53 = vpop.permute.xlu1 %587  ;;  %v2503_v61 = vadd.f32 %v687_v39, %v2377_v5  ;;  %v2506_v7 = vadd.f32 %v688_v40, %v2379_v6 }
  0xa1   : > { %v583_v54 = vpop.permute.xlu0 %582  ;;  %766 = vmax.xlane.f32.xlu0 %v765_v47  ;;  %v2511_v9 = vadd.f32 %v2360_v48, %v588_v53  ;;  %v2514_v11 = vadd.f32 %v2434_v22, %v588_v53  ;;  %v691_v29 = vmax.f32 %v2485_v37, %v659_v51  ;;  %v692_v39 = vmax.f32 %v2488_v38, %v660_v3 }
  0xa2   : > { %v689_v4 = vmax.f32 %v625_v55, %v657_v44  ;;  %v690_v8 = vmax.f32 %v626_v41, %v658_v52  ;;  %v641_v12 = vadd.f32 %v2360_v48, %v583_v54  ;;  %v642_v5 = vadd.f32 %v2434_v22, %v583_v54 }
  0xa3   : > { %v2519_v6 = vmul.f32 0.2, %v2511_v9  ;;  %v768_v2 = vmax.f32 %v2503_v61, %v2506_v7  ;;  %v2534_v40 = vmul.f32 0.2, %v2514_v11  ;;  %v2555_v3 = vadd.f32 %v704_v1, %v2402_v28 }
  0xa4   : > { %v2526_v17 = vadd.f32 %v689_v4, %v2389_v14  ;;  %v673_v31 = vmul.f32 0.2, %v641_v12  ;;  %v674_v33 = vmul.f32 0.2, %v642_v5  ;;  %v558_v18 = vpop.permute.xlu1 %557  ;;  %v2530_v55 = vadd.f32 %v690_v8, %v2391_v15 }
  0xa5   : > { %v553_v49 = vpop.permute.xlu0 %552  ;;  %769 = vmax.xlane.f32.xlu1 %v768_v2  ;;  %790 = vmax.xlane.f32.xlu0 %v789_v16  ;;  %v2537_v41 = vadd.f32 %v2360_v48, %v558_v18  ;;  %v2540_v14 = vadd.f32 %v2434_v22, %v558_v18  ;;  %v2544_v15 = vadd.f32 %v703_v60, %v2397_v19 }
  0xa6   : > { %v705_v37 = vmax.f32 %v641_v12, %v673_v31  ;;  %v706_v44 = vmax.f32 %v642_v5, %v674_v33  ;;  %v629_v47 = vadd.f32 %v2360_v48, %v553_v49  ;;  %v707_v38 = vmax.f32 %v2511_v9, %v2519_v6 }
  0xa7   : > { %v2549_v51 = vmul.f32 0.2, %v2537_v41  ;;  %v630_v52 = vadd.f32 %v2434_v22, %v553_v49  ;;  %v771_v53 = vmax.f32 %v2526_v17, %v2530_v55  ;;  %v708_v9 = vmax.f32 %v2514_v11, %v2534_v40 }
  0xa8   : > { %v661_v54 = vmul.f32 0.2, %v629_v47  ;;  %v598_v4 = vpop.permute.xlu1 %597  ;;  %v2558_v19 = vadd.f32 %v705_v37, %v2412_v45  ;;  %v2561_v60 = vadd.f32 %v706_v44, %v2417_v56  ;;  %v664_v12 = vmul.f32 0.2, %v2540_v14 }
  0xa9   : > { %v593_v8 = vpop.permute.xlu0 %592  ;;  %v662_v5 = vmul.f32 0.2, %v630_v52  ;;  %772 = vmax.xlane.f32.xlu1 %v771_v53  ;;  %v2567_v6 = vadd.f32 %v2360_v48, %v598_v4  ;;  %v695_v28 = vmax.f32 %v2537_v41, %v2549_v51  ;;  %v792_v45 = vmax.f32 %v2544_v15, %v2555_v3 }
  0xaa   : > { %v2574_v1 = vadd.f32 %v2434_v22, %v598_v4  ;;  %v645_v56 = vadd.f32 %v2360_v48, %v593_v8  ;;  %v693_v2 = vmax.f32 %v629_v47, %v661_v54  ;;  %v646_v16 = vadd.f32 %v2434_v22, %v593_v8 }
  0xab   : > { %v694_v11 = vmax.f32 %v630_v52, %v662_v5  ;;  %v795_v31 = vmax.f32 %v2558_v19, %v2561_v60  ;;  %793 = vmax.xlane.f32.xlu0 %v792_v45  ;;  %v679_v33 = vmul.f32 0.2, %v2567_v6  ;;  %v2582_v49 = vadd.f32 %v691_v29, %v2404_v30 }
  0xac   : > { %v677_v18 = vmul.f32 0.2, %v645_v56  ;;  %v2585_v40 = vadd.f32 %v692_v39, %v2407_v32  ;;  %v568_v41 = vpop.permute.xlu1 %567  ;;  %v680_v44 = vmul.f32 0.2, %v2574_v1  ;;  %v678_v47 = vmul.f32 0.2, %v646_v16 }
  0xad   : > { %v563_v37 = vpop.permute.xlu0 %562  ;;  %796 = vmax.xlane.f32.xlu1 %v795_v31  ;;  %v635_v51 = vadd.f32 %v2360_v48, %v568_v41  ;;  %v636_v52 = vadd.f32 %v2434_v22, %v568_v41  ;;  %v696_v53 = vmax.f32 %v2540_v14, %v664_v12  ;;  %v2596_v45 = vadd.f32 %v693_v2, %v2423_v62 }
  0xae   : > { %v709_v54 = vmax.f32 %v645_v56, %v677_v18  ;;  %v774_v30 = vmax.f32 %v2582_v49, %v2585_v40  ;;  %v633_v29 = vadd.f32 %v2360_v48, %v563_v37  ;;  %v710_v32 = vmax.f32 %v646_v16, %v678_v47 }
  0xaf   : > { %v667_v39 = vmul.f32 0.2, %v635_v51  ;;  %v668_v4 = vmul.f32 0.2, %v636_v52  ;;  %v634_v8 = vadd.f32 %v2434_v22, %v563_v37  ;;  %v2599_v31 = vadd.f32 %v694_v11, %v2426_v10 }
  0xb0   : > { %775 = vmax.xlane.f32.xlu0 %v774_v30  ;;  %v665_v5 = vmul.f32 0.2, %v633_v29  ;;  %v2602_v14 = vadd.f32 %v707_v38, %v2419_v57  ;;  %v608_v12 = vpop.permute.xlu1 %607  ;;  %v711_v18 = vmax.f32 %v2567_v6, %v679_v33  ;;  %v712_v16 = vmax.f32 %v2574_v1, %v680_v44 }
  0xb1   : > { %v603_v56 = vpop.permute.xlu0 %602  ;;  %v666_v41 = vmul.f32 0.2, %v634_v8  ;;  %v2607_v37 = vadd.f32 %v708_v9, %v2421_v58  ;;  %v777_v62 = vmax.f32 %v2596_v45, %v2599_v31  ;;  %v651_v10 = vadd.f32 %v2360_v48, %v608_v12 }
  0xb2   : > { %v697_v47 = vmax.f32 %v633_v29, %v665_v5  ;;  %v652_v2 = vadd.f32 %v2434_v22, %v608_v12  ;;  %v649_v6 = vadd.f32 %v2360_v48, %v603_v56  ;;  %v650_v1 = vadd.f32 %v2434_v22, %v603_v56 }
  0xb3   : > { %v698_v57 = vmax.f32 %v634_v8, %v666_v41  ;;  %v798_v38 = vmax.f32 %v2602_v14, %v2607_v37  ;;  %v699_v11 = vmax.f32 %v635_v51, %v667_v39  ;;  %v700_v33 = vmax.f32 %v636_v52, %v668_v4  ;;  %778 = vmax.xlane.f32.xlu1 %v777_v62  ;;  %v2090_v41 = vld [vmem:[%s3219_s1 + $0x8] sm:$0xff]   ;;  %v2092_v62 = vld [vmem:[%s3219_s1 + $0x10] sm:$0xff]  }
  0xb4   : > { %v2618_v58 = vadd.f32 %v709_v54, %v2436_v23  ;;  %v2621_v9 = vadd.f32 %v710_v32, %v2442_v27  ;;  %v681_v44 = vmul.f32 0.2, %v649_v6  ;;  %v682_v30 = vmul.f32 0.2, %v650_v1 }
  0xb5   : > { %799 = vmax.xlane.f32.xlu0 %v798_v38  ;;  %v2624_v29 = vadd.f32 %v695_v28, %v2438_v24  ;;  %v2627_v8 = vadd.f32 %v696_v53, %v2440_v26  ;;  %v683_v48 = vmul.f32 0.2, %v651_v10  ;;  %v684_v22 = vmul.f32 0.2, %v652_v2  ;;  %v2728_v38 = vld [vmem:[#allocation2 + $0x8] sm:$0xff] }
  0xb6   : > { %v801_v51 = vmax.f32 %v2618_v58, %v2621_v9  ;;  %v2632_v23 = vadd.f32 %v697_v47, %v2448_v36  ;;  %v713_v52 = vmax.f32 %v649_v6, %v681_v44  ;;  %v714_v27 = vmax.f32 %v650_v1, %v682_v30  ;;  %v2091_v47 = vld [vmem:[%s3219_s1 + $0x50] sm:$0xff]   ;;  %v2730_v6 = vld [vmem:[#allocation2 + $0x40] sm:$0xff] }
  0xb7   : > { %v780_v54 = vmax.f32 %v2624_v29, %v2627_v8  ;;  %v2637_v32 = vadd.f32 %v698_v57, %v2454_v43  ;;  %v2640_v24 = vadd.f32 %v711_v18, %v2444_v34  ;;  %v2643_v26 = vadd.f32 %v712_v16, %v2446_v13  ;;  %v2088_v18 = vld [vmem:[%s3219_s1] sm:$0xff]   ;;  %v2089_v16 = vld [vmem:[%s3219_s1 + $0x48] sm:$0xff]   ;;  %v2873_v1 = vld [vmem:[#allocation2 + $0x70] sm:$0xff] }
  0xb8   : > { %802 = vmax.xlane.f32.xlu1 %v801_v51  ;;  %v2648_v28 = vadd.f32 %v713_v52, %v2476_v21  ;;  %v2651_v53 = vadd.f32 %v714_v27, %v2481_v35  ;;  %v715_v39 = vmax.f32 %v651_v10, %v683_v48  ;;  %v511_v43 = vmul.f32 1e+09, %v2460_v0  ;;  %v2723_v10 = vld [vmem:[#allocation2] sm:$0xff]  ;;  %v2743_v48 = vld [vmem:[#allocation2 + $0x10] sm:$0xff]  ;;  %v2093_v27 = vld [vmem:[%s3219_s1 + $0x58] sm:$0xff]   ;;  %3250 = vst [vmem:[#allocation15_spill] sm:$0xff] %v2873_v1 }
  0xb9   : > { %781 = vmax.xlane.f32.xlu0 %v780_v54  ;;  %v783_v36 = vmax.f32 %v2632_v23, %v2637_v32  ;;  %v512_v4 = vmul.f32 1e+09, %v2465_v59  ;;  %v716_v34 = vmax.f32 %v652_v2, %v684_v22  ;;  %v804_v13 = vmax.f32 %v2640_v24, %v2643_v26  ;;  %v2094_v54 = vld [vmem:[%s3219_s1 + $0x18] sm:$0xff]  }
  0xba   : > { %v2658_v5 = vadd.f32 %v699_v11, %v2456_v46  ;;  %v2661_v12 = vadd.f32 %v700_v33, %v2458_v63  ;;  %v807_v21 = vmax.f32 %v2648_v28, %v2651_v53  ;;  %v2667_v35 = vadd.f32 %v715_v39, %v511_v43  ;;  %v2087_v63 = vld [vmem:[%s3219_s1 + $0x40] sm:$0xff]   ;;  %v2764_v39 = vld [vmem:[#allocation2 + $0x48] sm:$0xff]  ;;  %v2766_v43 = vld [vmem:[#allocation2 + $0x50] sm:$0xff] }
  0xbb   : > { %v2669_v59 = vadd.f32 %v716_v34, %v512_v4  ;;  %v3224_v56 = vmov 0.0   ;;  %1978 = vmatprep.subr.bf16.mxu0 %v2087_v63  ;;  %2042 = vmatprep.subr.bf16.mxu1 %v2087_v63  ;;  %3240 = vst [vmem:[#allocation5_spill] sm:$0xff] %v2764_v39  ;;  %3241 = vst [vmem:[#allocation6_spill] sm:$0xff] %v2766_v43  ;;  %v2100_v63 = vld [vmem:[%s3219_s1 + $0x30] sm:$0xff]   ;;  %v2102_v4 = vld [vmem:[%s3219_s1 + $0x38] sm:$0xff]  }
  0xbc   : > { %784 = vmax.xlane.f32.xlu1 %v783_v36  ;;  %v786_v0 = vmax.f32 %v2658_v5, %v2661_v12  ;;  %344 = vst.msk [vmem:[#allocation3] sm:$0xff] %vm327_vm0, %v3224_v56  ;;  %345 = vst.msk [vmem:[#allocation3 + $0x8] sm:$0xff] %vm327_vm0, %v3224_v56  ;;  %1979 = vmatpush3.bf16.msra.mxu0 %v2088_v18 }
  0xbd   : > { %805 = vmax.xlane.f32.xlu0 %v804_v13  ;;  %346 = vst.msk [vmem:[#allocation3 + $0x10] sm:$0xff] %vm327_vm0, %v3224_v56  ;;  %347 = vst.msk [vmem:[#allocation3 + $0x18] sm:$0xff] %vm327_vm0, %v3224_v56  ;;  %v810_v46 = vmax.f32 %v2667_v35, %v2669_v59  ;;  %2050 = vmatpush3.bf16.msra.mxu1 %v2088_v18  ;;  %v2095_v18 = vld [vmem:[%s3219_s1 + $0x60] sm:$0xff]  }
  0xbe   : > { %348 = vst.msk [vmem:[#allocation3 + $0x20] sm:$0xff] %vm327_vm0, %v3224_v56  ;;  %349 = vst.msk [vmem:[#allocation3 + $0x28] sm:$0xff] %vm327_vm0, %v3224_v56  ;;  %1980 = vmatprep.subr.bf16.mxu0 %v2089_v16  ;;  %2043 = vmatprep.subr.bf16.mxu1 %v2089_v16  ;;  %v2096_v16 = vld [vmem:[%s3219_s1 + $0x20] sm:$0xff]  }
  0xbf   : > { %350 = vst.msk [vmem:[#allocation3 + $0x30] sm:$0xff] %vm327_vm0, %v3224_v56  ;;  %351 = vst.msk [vmem:[#allocation3 + $0x38] sm:$0xff] %vm327_vm0, %v3224_v56 }
  0xc0   : > { %808 = vmax.xlane.f32.xlu1 %v807_v21  ;;  %352 = vst.msk [vmem:[#allocation3 + $0x40] sm:$0xff] %vm327_vm0, %v3224_v56  ;;  %353 = vst.msk [vmem:[#allocation3 + $0x48] sm:$0xff] %vm327_vm0, %v3224_v56  ;;  %1981 = vmatpush3.bf16.msra.mxu0 %v2090_v41 }
  0xc1   : > { %354 = vst.msk [vmem:[#allocation3 + $0x50] sm:$0xff] %vm327_vm0, %v3224_v56  ;;  %355 = vst.msk [vmem:[#allocation3 + $0x58] sm:$0xff] %vm327_vm0, %v3224_v56  ;;  %787 = vmax.xlane.f32.xlu0 %v786_v0  ;;  %2051 = vmatpush3.bf16.msra.mxu1 %v2090_v41  ;;  %v2828_v41 = vld [vmem:[#allocation2 + $0x28] sm:$0xff] }
  0xc2   : > { %356 = vst.msk [vmem:[#allocation3 + $0x60] sm:$0xff] %vm327_vm0, %v3224_v56  ;;  %357 = vst.msk [vmem:[#allocation3 + $0x68] sm:$0xff] %vm327_vm0, %v3224_v56  ;;  %1982 = vmatprep.subr.bf16.mxu0 %v2091_v47  ;;  %2044 = vmatprep.subr.bf16.mxu1 %v2091_v47 }
  0xc3   : > { %358 = vst.msk [vmem:[#allocation3 + $0x70] sm:$0xff] %vm327_vm0, %v3224_v56  ;;  %359 = vst.msk [vmem:[#allocation3 + $0x78] sm:$0xff] %vm327_vm0, %v3224_v56  ;;  %v2847_v56 = vld [vmem:[#allocation2 + $0x30] sm:$0xff] }
  0xc4   : > { %1983 = vmatpush3.bf16.msra.mxu0 %v2092_v62 }
  0xc5   : > { %811 = vmax.xlane.f32.xlu0 %v810_v46  ;;  %2052 = vmatpush3.bf16.msra.mxu1 %v2092_v62  ;;  %v2779_v46 = vld [vmem:[#allocation2 + $0x18] sm:$0xff] }
  0xc6   : > { %1984 = vmatprep.subr.bf16.mxu0 %v2093_v27  ;;  %2045 = vmatprep.subr.bf16.mxu1 %v2093_v27  ;;  %v2097_v27 = vld [vmem:[%s3219_s1 + $0x68] sm:$0xff]  }
  0xc8   : > { %1985 = vmatpush3.bf16.msra.mxu0 %v2094_v54 }
  0xc9   : > { %2053 = vmatpush3.bf16.msra.mxu1 %v2094_v54  ;;  %1986 = vmatprep.subr.bf16.mxu0 %v2095_v18  ;;  %v2098_v54 = vld [vmem:[%s3219_s1 + $0x28] sm:$0xff]  }
  0xca   : > { %2046 = vmatprep.subr.bf16.mxu1 %v2095_v18 }
  0xcc   : > { %1987 = vmatpush3.bf16.msra.mxu0 %v2096_v16 }
  0xcd   : > { %2054 = vmatpush3.bf16.msra.mxu1 %v2096_v16  ;;  %v2821_v16 = vld [vmem:[#allocation2 + $0x60] sm:$0xff]  ;;  %1988 = vmatprep.subr.bf16.mxu0 %v2097_v27 }
  0xce   : > { %3246 = vst [vmem:[#allocation11_spill] sm:$0xff] %v2821_v16  ;;  %2047 = vmatprep.subr.bf16.mxu1 %v2097_v27 }
  0xd0   : > { %1989 = vmatpush3.bf16.msra.mxu0 %v2098_v54 }
  0xd1   : > { %2055 = vmatpush3.bf16.msra.mxu1 %v2098_v54  ;;  %v2854_v54 = vld [vmem:[#allocation2 + $0x68] sm:$0xff] }
  0xd2   : > { %3248 = vst [vmem:[#allocation13_spill] sm:$0xff] %v2854_v54 }
 0x12e   : > { %v767_v2 = vpop.xlane.xlu0 %766 }
 0x12f   : > { %v2726_v57 = vmax.f32 %v2723_v10, %v767_v2  ;;  %v2800_v2 = vld [vmem:[#allocation2 + $0x20] sm:$0xff] }
 0x131   : > { %1552 = vst.msk [vmem:[#allocation2] sm:$0xff] %vm327_vm0, %v2726_v57  ;;  %879 = vperm.xlu1 %2086, %v2726_v57  }
 0x132   : > { %v770_v11 = vpop.xlane.xlu1 %769  ;;  %v791_v33 = vpop.xlane.xlu0 %790 }
 0x133   : > { %v2738_v44 = vmax.f32 %v2728_v38, %v770_v11  ;;  %v2741_v30 = vmax.f32 %v2730_v6, %v791_v33  ;;  %v2807_v33 = vld [vmem:[#allocation2 + $0x58] sm:$0xff] }
 0x134   : > { %3244 = vst [vmem:[#allocation9_spill] sm:$0xff] %v2807_v33 }
 0x135   : > { %1553 = vst.msk [vmem:[#allocation2 + $0x8] sm:$0xff] %vm327_vm0, %v2738_v44  ;;  %1560 = vst.msk [vmem:[#allocation2 + $0x40] sm:$0xff] %vm327_vm0, %v2741_v30  ;;  %884 = vperm.xlu0 %2085, %v2738_v44   ;;  %919 = vperm.xlu1 %2086, %v2741_v30  }
 0x136   : > { %v773_v52 = vpop.xlane.xlu1 %772 }
 0x137   : > { %v2762_v36 = vmax.f32 %v2743_v48, %v773_v52 }
 0x138   : > { %v794_v34 = vpop.xlane.xlu0 %793 }
 0x139   : > { %1554 = vst.msk [vmem:[#allocation2 + $0x10] sm:$0xff] %vm327_vm0, %v2762_v36  ;;  %889 = vperm.xlu0 %2085, %v2762_v36   ;;  %v2774_v13 = vmax.f32 %v2764_v39, %v794_v34 }
 0x13a   : > { %v797_v21 = vpop.xlane.xlu1 %796 }
 0x13b   : > { %3242 = vst [vmem:[#allocation7_spill] sm:$0xff] %v2774_v13  ;;  %v2777_v0 = vmax.f32 %v2766_v43, %v797_v21  ;;  %1561 = vst.msk [vmem:[#allocation2 + $0x48] sm:$0xff] %vm327_vm0, %v2774_v13  ;;  %924 = vperm.xlu1 %2086, %v2774_v13  }
 0x13d   : > { %3243 = vst [vmem:[#allocation8_spill] sm:$0xff] %v2777_v0  ;;  %1562 = vst.msk [vmem:[#allocation2 + $0x50] sm:$0xff] %vm327_vm0, %v2777_v0  ;;  %v776_v47 = vpop.xlane.xlu0 %775  ;;  %929 = vperm.xlu0 %2085, %v2777_v0  }
 0x13e   : > { %v2798_v62 = vmax.f32 %v2779_v46, %v776_v47 }
 0x140   : > { %1555 = vst.msk [vmem:[#allocation2 + $0x18] sm:$0xff] %vm327_vm0, %v2798_v62  ;;  %894 = vperm.xlu1 %2086, %v2798_v62   ;;  %v779_v52 = vpop.xlane.xlu1 %778 }
 0x141   : > { %v2816_v34 = vmax.f32 %v2800_v2, %v779_v52 }
 0x142   : > { %v800_v21 = vpop.xlane.xlu0 %799 }
 0x143   : > { %v2819_v18 = vmax.f32 %v2807_v33, %v800_v21  ;;  %1556 = vst.msk [vmem:[#allocation2 + $0x20] sm:$0xff] %vm327_vm0, %v2816_v34  ;;  %899 = vperm.xlu0 %2085, %v2816_v34   ;;  %v2099_v21 = vld [vmem:[%s3219_s1 + $0x70] sm:$0xff]  }
 0x144   : > { %1990 = vmatprep.subr.bf16.mxu0 %v2099_v21  ;;  %2048 = vmatprep.subr.bf16.mxu1 %v2099_v21  ;;  %v2101_v21 = vld [vmem:[%s3219_s1 + $0x78] sm:$0xff]  }
 0x145   : > { %3245 = vst [vmem:[#allocation10_spill] sm:$0xff] %v2819_v18  ;;  %1563 = vst.msk [vmem:[#allocation2 + $0x58] sm:$0xff] %vm327_vm0, %v2819_v18  ;;  %934 = vperm.xlu1 %2086, %v2819_v18   ;;  %v803_v27 = vpop.xlane.xlu1 %802  ;;  %1991 = vmatpush3.bf16.msra.mxu0 %v2100_v63 }
 0x146   : > { %v2842_v51 = vmax.f32 %v2821_v16, %v803_v27  ;;  %v782_v47 = vpop.xlane.xlu0 %781  ;;  %2056 = vmatpush3.bf16.msra.mxu1 %v2100_v63  ;;  %1992 = vmatprep.subr.bf16.mxu0 %v2101_v21  ;;  %v2880_v63 = vld [vmem:[#allocation2 + $0x38] sm:$0xff] }
 0x147   : > { %v2845_v52 = vmax.f32 %v2828_v41, %v782_v47  ;;  %2049 = vmatprep.subr.bf16.mxu1 %v2101_v21 }
 0x148   : > { %3247 = vst [vmem:[#allocation12_spill] sm:$0xff] %v2842_v51  ;;  %1564 = vst.msk [vmem:[#allocation2 + $0x60] sm:$0xff] %vm327_vm0, %v2842_v51  ;;  %939 = vperm.xlu0 %2085, %v2842_v51  }
 0x149   : > { %1557 = vst.msk [vmem:[#allocation2 + $0x28] sm:$0xff] %vm327_vm0, %v2845_v52  ;;  %904 = vperm.xlu1 %2086, %v2845_v52   ;;  %v785_v47 = vpop.xlane.xlu1 %784  ;;  %1993 = vmatpush3.bf16.msra.mxu0 %v2102_v4 }
 0x14a   : > { %v2865_v11 = vmax.f32 %v2847_v56, %v785_v47  ;;  %v806_v22 = vpop.xlane.xlu0 %805  ;;  %2057 = vmatpush3.bf16.msra.mxu1 %v2102_v4  ;;  %v2898_v47 = vld [vmem:[#allocation2 + $0x78] sm:$0xff] }
 0x14b   : > { %v2871_v27 = vmax.f32 %v2854_v54, %v806_v22  ;;  %3252 = vst [vmem:[#allocation17_spill] sm:$0xff] %v2898_v47 }
 0x14c   : > { %1558 = vst.msk [vmem:[#allocation2 + $0x30] sm:$0xff] %vm327_vm0, %v2865_v11  ;;  %909 = vperm.xlu0 %2085, %v2865_v11  }
 0x14d   : > { %3249 = vst [vmem:[#allocation14_spill] sm:$0xff] %v2871_v27  ;;  %1565 = vst.msk [vmem:[#allocation2 + $0x68] sm:$0xff] %vm327_vm0, %v2871_v27  ;;  %944 = vperm.xlu1 %2086, %v2871_v27   ;;  %v809_v22 = vpop.xlane.xlu1 %808 }
 0x14e   : > { %v2888_v21 = vmax.f32 %v2873_v1, %v809_v22  ;;  %v788_v51 = vpop.xlane.xlu0 %787 }
 0x14f   : > { %v2891_v16 = vmax.f32 %v2880_v63, %v788_v51 }
 0x150   : > { %3251 = vst [vmem:[#allocation16_spill] sm:$0xff] %v2888_v21  ;;  %1566 = vst.msk [vmem:[#allocation2 + $0x70] sm:$0xff] %vm327_vm0, %v2888_v21  ;;  %949 = vperm.xlu0 %2085, %v2888_v21  }
 0x151   : > { %1559 = vst.msk [vmem:[#allocation2 + $0x38] sm:$0xff] %vm327_vm0, %v2891_v16  ;;  %914 = vperm.xlu1 %2086, %v2891_v16  }
 0x152   : > { %v812_v51 = vpop.xlane.xlu0 %811 }
 0x153   : > { %v2906_v22 = vmax.f32 %v2898_v47, %v812_v51 }
 0x155   : > { %3253 = vst [vmem:[#allocation18_spill] sm:$0xff] %v2906_v22  ;;  %1567 = vst.msk [vmem:[#allocation2 + $0x78] sm:$0xff] %vm327_vm0, %v2906_v22  ;;  %954 = vperm.xlu1 %2086, %v2906_v22  }
 0x1b0   : > { %v880_v21 = vpop.permute.xlu1 %879 }
 0x1b1   : > { %v957_v4 = vsub.f32 %v2474_v20, %v880_v21  ;;  %v958_v1 = vsub.f32 %v2479_v25, %v880_v21 }
 0x1b3   : > { %v989_v27 = vmul.f32 1.442695, %v957_v4  ;;  %v991_v54 = vmul.f32 1.442695, %v958_v1 }
 0x1b4   : > { %v920_v33 = vpop.permute.xlu1 %919  ;;  %v885_v0 = vpop.permute.xlu0 %884 }
 0x1b5   : > { %2103 = vpow2.f32 %v989_v27  ;;  %v973_v51 = vsub.f32 %v2493_v42, %v920_v33  ;;  %v959_v43 = vsub.f32 %v2503_v61, %v885_v0  ;;  %v960_v18 = vsub.f32 %v2506_v7, %v885_v0 }
 0x1b6   : > { %2105 = vpow2.f32 %v991_v54  ;;  %v974_v47 = vsub.f32 %v2499_v50, %v920_v33 }
 0x1b7   : > { %v1021_v22 = vmul.f32 1.442695, %v973_v51  ;;  %v993_v13 = vmul.f32 1.442695, %v959_v43  ;;  %v995_v39 = vmul.f32 1.442695, %v960_v18 }
 0x1b8   : > { %v890_v20 = vpop.permute.xlu0 %889  ;;  %v1023_v21 = vmul.f32 1.442695, %v974_v47 }
 0x1b9   : > { %v961_v25 = vsub.f32 %v2526_v17, %v890_v20  ;;  %v962_v1 = vsub.f32 %v2530_v55, %v890_v20  ;;  %2107 = vpow2.f32 %v1021_v22 }
 0x1ba   : > { %2109 = vpow2.f32 %v993_v13  ;;  %v925_v27 = vpop.permute.xlu1 %924 }
 0x1bb   : > { %v997_v42 = vmul.f32 1.442695, %v961_v25  ;;  %v999_v4 = vmul.f32 1.442695, %v962_v1  ;;  %2111 = vpow2.f32 %v995_v39  ;;  %v975_v61 = vsub.f32 %v2544_v15, %v925_v27 }
 0x1bc   : > { %v976_v7 = vsub.f32 %v2555_v3, %v925_v27  ;;  %v930_v50 = vpop.permute.xlu0 %929 }
 0x1bd   : > { %2113 = vpow2.f32 %v997_v42  ;;  %v977_v43 = vsub.f32 %v2558_v19, %v930_v50  ;;  %v1025_v0 = vmul.f32 1.442695, %v975_v61  ;;  %v978_v17 = vsub.f32 %v2561_v60, %v930_v50 }
 0x1be   : > { %v1027_v33 = vmul.f32 1.442695, %v976_v7  ;;  %2115 = vpow2.f32 %v999_v4 }
 0x1bf   : > { %v2104_v55 = vpop.eup %2103  ;;  %2117 = vpow2.f32 %v1023_v21  ;;  %v895_v13 = vpop.permute.xlu1 %894  ;;  %v1029_v18 = vmul.f32 1.442695, %v977_v43  ;;  %v1031_v19 = vmul.f32 1.442695, %v978_v17 }
 0x1c0   : > { %v2106_v54 = vpop.eup %2105  ;;  %2119 = vpow2.f32 %v1025_v0  ;;  %v963_v39 = vsub.f32 %v2582_v49, %v895_v13  ;;  %v964_v15 = vsub.f32 %v2585_v40, %v895_v13 }
 0x1c1   : > { %2121 = vpow2.f32 %v1027_v33  ;;  %v1085_v3 = vadd.f32 %v2106_v54, %v2104_v55 }
 0x1c2   : > { %v1001_v47 = vmul.f32 1.442695, %v963_v39  ;;  %v1003_v22 = vmul.f32 1.442695, %v964_v15  ;;  %2123 = vpow2.f32 %v1029_v18  ;;  %v900_v51 = vpop.permute.xlu0 %899 }
 0x1c3   : > { %1086 = vadd.xlane.f32.xlu0 %v1085_v3  ;;  %v2927_v20 = vpop.eup %2107  ;;  %v965_v25 = vsub.f32 %v2596_v45, %v900_v51  ;;  %v966_v1 = vsub.f32 %v2599_v31, %v900_v51 }
 0x1c4   : > { %2125 = vpow2.f32 %v1001_v47  ;;  %v935_v60 = vpop.permute.xlu1 %934  ;;  %v2110_v21 = vpop.eup %2109 }
 0x1c5   : > { %2127 = vpow2.f32 %v1003_v22  ;;  %v979_v49 = vsub.f32 %v2602_v14, %v935_v60  ;;  %v980_v40 = vsub.f32 %v2607_v37, %v935_v60  ;;  %v2112_v27 = vpop.eup %2111  ;;  %v1005_v42 = vmul.f32 1.442695, %v965_v25 }
 0x1c6   : > { %2129 = vpow2.f32 %v1031_v19  ;;  %v1007_v4 = vmul.f32 1.442695, %v966_v1  ;;  %v1278_v61 = vpack.c.bf16 %v2110_v21, %v2104_v55  ;;  %v1279_v33 = vpack.c.bf16 %v2112_v27, %v2106_v54 }
 0x1c7   : > { %v2933_v7 = vpop.eup %2113  ;;  %v1033_v50 = vmul.f32 1.442695, %v979_v49  ;;  %v1035_v43 = vmul.f32 1.442695, %v980_v40  ;;  %v940_v0 = vpop.permute.xlu0 %939  ;;  %v1088_v45 = vadd.f32 %v2112_v27, %v2110_v21  ;;  %2131 = vpow2.f32 %v1005_v42 }
 0x1c8   : > { %v2116_v17 = vpop.eup %2115  ;;  %v905_v31 = vpop.permute.xlu1 %904  ;;  %v981_v13 = vsub.f32 %v2618_v58, %v940_v0  ;;  %v982_v14 = vsub.f32 %v2621_v9, %v940_v0  ;;  %1454 = vmatprep.mubr.bf16.mxu0 %v1279_v33 }
 0x1c9   : > { %v2937_v37 = vpop.eup %2117  ;;  %2133 = vpow2.f32 %v1033_v50  ;;  %v967_v18 = vsub.f32 %v2624_v29, %v905_v31  ;;  %v968_v55 = vsub.f32 %v2627_v8, %v905_v31  ;;  %1089 = vadd.xlane.f32.xlu1 %v1088_v45  ;;  %v1091_v39 = vadd.f32 %v2116_v17, %v2933_v7  ;;  %1455 = vmatmul.mubr.bf16.vlgmr.msra.gmra.mrb[0].mxu0 %v1278_v61 }
 0x1ca   : > { %v2942_v54 = vpop.eup %2119  ;;  %2135 = vpow2.f32 %v1035_v43  ;;  %v1037_v15 = vmul.f32 1.442695, %v981_v13  ;;  %v1039_v3 = vmul.f32 1.442695, %v982_v14 }
 0x1cb   : > { %v2944_v58 = vpop.eup %2121  ;;  %2137 = vpow2.f32 %v1007_v4  ;;  %v1009_v9 = vmul.f32 1.442695, %v967_v18  ;;  %v1011_v47 = vmul.f32 1.442695, %v968_v55  ;;  %v910_v22 = vpop.permute.xlu0 %909  ;;  %1092 = vadd.xlane.f32.xlu0 %v1091_v39  ;;  %v1286_v29 = vpack.c.bf16 %v2942_v54, %v2927_v20 }
 0x1cc   : > { %2139 = vpow2.f32 %v1037_v15  ;;  %v945_v8 = vpop.permute.xlu1 %944  ;;  %v969_v19 = vsub.f32 %v2632_v23, %v910_v22  ;;  %v970_v51 = vsub.f32 %v2637_v32, %v910_v22  ;;  %v1287_v60 = vpack.c.bf16 %v2944_v58, %v2937_v37  ;;  %v2952_v25 = vpop.eup %2123 }
 0x1cd   : > { %2141 = vpow2.f32 %v1009_v9  ;;  %v983_v1 = vsub.f32 %v2640_v24, %v945_v8  ;;  %v984_v21 = vsub.f32 %v2643_v26, %v945_v8 }
 0x1ce   : > { %v2126_v49 = vpop.eup %2125  ;;  %2143 = vpow2.f32 %v1011_v47  ;;  %v1013_v40 = vmul.f32 1.442695, %v969_v19  ;;  %v1015_v27 = vmul.f32 1.442695, %v970_v51  ;;  %1486 = vmatprep.mubr.bf16.mxu1 %v1287_v60 }
 0x1cf   : > { %v2128_v42 = vpop.eup %2127  ;;  %2145 = vpow2.f32 %v1039_v3  ;;  %v1041_v23 = vmul.f32 1.442695, %v983_v1  ;;  %v1043_v4 = vmul.f32 1.442695, %v984_v21  ;;  %1487 = vmatmul.mubr.bf16.vlgmr.msra.gmra.mrb[0].mxu1 %v1286_v29  ;;  %v950_v32 = vpop.permute.xlu0 %949  ;;  %v1280_v61 = vpack.c.bf16 %v2126_v49, %v2933_v7 }
 0x1d0   : > { %v2957_v50 = vpop.eup %2129  ;;  %2147 = vpow2.f32 %v1013_v40  ;;  %v915_v43 = vpop.permute.xlu1 %914  ;;  %v985_v24 = vsub.f32 %v2648_v28, %v950_v32  ;;  %v986_v26 = vsub.f32 %v2651_v53, %v950_v32  ;;  %v1281_v0 = vpack.c.bf16 %v2128_v42, %v2116_v17 }
 0x1d1   : > { %2149 = vpow2.f32 %v1041_v23  ;;  %v971_v33 = vsub.f32 %v2658_v5, %v915_v43  ;;  %v972_v45 = vsub.f32 %v2661_v12, %v915_v43  ;;  %v1094_v31 = vadd.f32 %v2128_v42, %v2126_v49  ;;  %v2132_v13 = vpop.eup %2131 }
 0x1d2   : > { %2151 = vpow2.f32 %v1043_v4  ;;  %1462 = vmatprep.mubr.bf16.mxu0 %v1281_v0  ;;  %v1045_v55 = vmul.f32 1.442695, %v985_v24  ;;  %v1047_v53 = vmul.f32 1.442695, %v986_v26 }
 0x1d3   : > { %v2963_v14 = vpop.eup %2133  ;;  %2153 = vpow2.f32 %v1015_v27  ;;  %v1017_v7 = vmul.f32 1.442695, %v971_v33  ;;  %v1019_v18 = vmul.f32 1.442695, %v972_v45  ;;  %1095 = vadd.xlane.f32.xlu0 %v1094_v31  ;;  %1463 = vmatmul.mubr.bf16.gmra.mrb[4].mxu0 %v1280_v61  ;;  %v1109_v33 = vadd.f32 %v2937_v37, %v2927_v20 }
 0x1d4   : > { %v2136_v28 = vpop.eup %2135  ;;  %v955_v17 = vpop.permute.xlu1 %954  ;;  %v1288_v5 = vpack.c.bf16 %v2963_v14, %v2952_v25 }
 0x1d5   : > { %v2138_v39 = vpop.eup %2137  ;;  %2155 = vpow2.f32 %v1017_v7  ;;  %v987_v12 = vsub.f32 %v2667_v35, %v955_v17  ;;  %v988_v15 = vsub.f32 %v2669_v59, %v955_v17  ;;  %v1289_v3 = vpack.c.bf16 %v2136_v28, %v2957_v50 }
 0x1d6   : > { %v2140_v9 = vpop.eup %2139  ;;  %2157 = vpow2.f32 %v1019_v18  ;;  %v1097_v47 = vadd.f32 %v2138_v39, %v2132_v13  ;;  %v1112_v7 = vadd.f32 %v2944_v58, %v2942_v54  ;;  %v1118_v20 = vadd.f32 %v2136_v28, %v2963_v14 }
 0x1d7   : > { %v2142_v22 = vpop.eup %2141  ;;  %2159 = vpow2.f32 %v1045_v55  ;;  %v1049_v29 = vmul.f32 1.442695, %v987_v12  ;;  %v1051_v8 = vmul.f32 1.442695, %v988_v15  ;;  %1494 = vmatprep.mubr.bf16.mxu1 %v1289_v3  ;;  %v1115_v55 = vadd.f32 %v2957_v50, %v2952_v25 }
 0x1d8   : > { %v2144_v19 = vpop.eup %2143  ;;  %2161 = vpow2.f32 %v1047_v53  ;;  %1098 = vadd.xlane.f32.xlu1 %v1097_v47  ;;  %1495 = vmatmul.mubr.bf16.gmra.mrb[4].mxu1 %v1288_v5  ;;  %v1282_v51 = vpack.c.bf16 %v2142_v22, %v2132_v13  ;;  %v3254_v54 = vsub.f32 %v2723_v10, %v2726_v57  ;;  %v3255_v25 = vsub.f32 %v2743_v48, %v2762_v36 }
 0x1d9   : > { %v2146_v60 = vpop.eup %2145  ;;  %2163 = vpow2.f32 %v1049_v29  ;;  %v1100_v35 = vadd.f32 %v2144_v19, %v2142_v22  ;;  %v1283_v1 = vpack.c.bf16 %v2144_v19, %v2138_v39  ;;  %v3256_v14 = vsub.f32 %v2728_v38, %v2738_v44  ;;  %v3267_v29 = vld [vmem:[#allocation6_spill] sm:$0xff] }
 0x1da   : > { %v2148_v59 = vpop.eup %2147  ;;  %2165 = vpow2.f32 %v1051_v8  ;;  %v1121_v37 = vadd.f32 %v2146_v60, %v2140_v9  ;;  %v845_v58 = vmul.f32 1.442695, %v3254_v54  ;;  %v849_v50 = vmul.f32 1.442695, %v3255_v25  ;;  %v3268_v8 = vld [vmem:[#allocation8_spill] sm:$0xff] }
 0x1db   : > { %v2150_v21 = vpop.eup %2149  ;;  %1101 = vadd.xlane.f32.xlu0 %v1100_v35  ;;  %1470 = vmatprep.mubr.bf16.mxu0 %v1283_v1  ;;  %v847_v28 = vmul.f32 1.442695, %v3256_v14  ;;  %v3257_v39 = vsub.f32 %v2779_v46, %v2798_v62  ;;  %v3258_v15 = vmov 0.0   ;;  %v3259_v10 = vsub.f32 %v2800_v2, %v2816_v34  ;;  %v3273_v1 = vld [vmem:[#allocation11_spill] sm:$0xff] }
 0x1dc   : > { %v2152_v49 = vpop.eup %2151  ;;  %1471 = vmatmul.mubr.bf16.gmra.mrb[8].mxu0 %v1282_v51  ;;  %v1290_v40 = vpack.c.bf16 %v2150_v21, %v2140_v9  ;;  %2167 = vpow2.f32 %v845_v58  ;;  %361 = vst.msk [vmem:[#allocation4] sm:$0xff] %vm360_vm1, %v3258_v15  ;;  %362 = vst.msk [vmem:[#allocation4 + $0x8] sm:$0xff] %vm360_vm1, %v3258_v15  ;;  %v3260_v38 = vsub.f32 %v2828_v41, %v2845_v52  ;;  %v3264_v41 = vld [vmem:[#allocation5_spill] sm:$0xff]  ;;  %v3265_v52 = vld [vmem:[#allocation7_spill] sm:$0xff] }
 0x1dd   : > { %v2154_v27 = vpop.eup %2153  ;;  %v1291_v42 = vpack.c.bf16 %v2152_v49, %v2146_v60  ;;  %v1124_v53 = vadd.f32 %v2152_v49, %v2150_v21  ;;  %2169 = vpow2.f32 %v849_v50  ;;  %v851_v12 = vmul.f32 1.442695, %v3257_v39  ;;  %363 = vst.msk [vmem:[#allocation4 + $0x10] sm:$0xff] %vm360_vm1, %v3258_v15  ;;  %364 = vst.msk [vmem:[#allocation4 + $0x18] sm:$0xff] %vm360_vm1, %v3258_v15  ;;  %v1054_v50 = vld [vmem:[#allocation3 + $0x8] sm:$0xff]  ;;  %v1055_v14 = vld [vmem:[#allocation3 + $0x10] sm:$0xff] }
 0x1de   : > { %v1103_v23 = vadd.f32 %v2154_v27, %v2148_v59  ;;  %365 = vst.msk [vmem:[#allocation4 + $0x20] sm:$0xff] %vm360_vm1, %v3258_v15  ;;  %366 = vst.msk [vmem:[#allocation4 + $0x28] sm:$0xff] %vm360_vm1, %v3258_v15  ;;  %2171 = vpow2.f32 %v847_v28  ;;  %v853_v57 = vmul.f32 1.442695, %v3259_v10  ;;  %v855_v44 = vmul.f32 1.442695, %v3260_v38 }
 0x1df   : > { %v2156_v4 = vpop.eup %2155  ;;  %1502 = vmatprep.mubr.bf16.mxu1 %v1291_v42  ;;  %367 = vst.msk [vmem:[#allocation4 + $0x30] sm:$0xff] %vm360_vm1, %v3258_v15  ;;  %368 = vst.msk [vmem:[#allocation4 + $0x38] sm:$0xff] %vm360_vm1, %v3258_v15  ;;  %2173 = vpow2.f32 %v851_v12  ;;  %v3261_v36 = vsub.f32 %v2847_v56, %v2865_v11  ;;  %v3262_v62 = vsub.f32 %v2880_v63, %v2891_v16  ;;  %v3270_v63 = vld [vmem:[#allocation9_spill] sm:$0xff] }
 0x1e0   : > { %v2158_v32 = vpop.eup %2157  ;;  %1104 = vadd.xlane.f32.xlu1 %v1103_v23  ;;  %1503 = vmatmul.mubr.bf16.gmra.mrb[8].mxu1 %v1290_v40  ;;  %v1284_v61 = vpack.c.bf16 %v2156_v4, %v2148_v59  ;;  %369 = vst.msk [vmem:[#allocation4 + $0x40] sm:$0xff] %vm360_vm1, %v3258_v15  ;;  %370 = vst.msk [vmem:[#allocation4 + $0x48] sm:$0xff] %vm360_vm1, %v3258_v15  ;;  %2175 = vpow2.f32 %v853_v57  ;;  %v3263_v2 = vsub.f32 %v2730_v6, %v2741_v30  ;;  %v3271_v6 = vld [vmem:[#allocation10_spill] sm:$0xff]  ;;  %v3274_v59 = vld [vmem:[#allocation12_spill] sm:$0xff] }
 0x1e1   : > { %v2160_v43 = vpop.eup %2159  ;;  %v1106_v24 = vadd.f32 %v2158_v32, %v2156_v4  ;;  %v1285_v26 = vpack.c.bf16 %v2158_v32, %v2154_v27  ;;  %371 = vst.msk [vmem:[#allocation4 + $0x50] sm:$0xff] %vm360_vm1, %v3258_v15  ;;  %372 = vst.msk [vmem:[#allocation4 + $0x58] sm:$0xff] %vm360_vm1, %v3258_v15  ;;  %v857_v46 = vmul.f32 1.442695, %v3261_v36  ;;  %2177 = vpow2.f32 %v855_v44  ;;  %v3276_v40 = vld [vmem:[#allocation13_spill] sm:$0xff]  ;;  %v3277_v27 = vld [vmem:[#allocation14_spill] sm:$0xff] }
 0x1e2   : > { %v2162_v0 = vpop.eup %2161  ;;  %373 = vst.msk [vmem:[#allocation4 + $0x60] sm:$0xff] %vm360_vm1, %v3258_v15  ;;  %374 = vst.msk [vmem:[#allocation4 + $0x68] sm:$0xff] %vm360_vm1, %v3258_v15  ;;  %v859_v3 = vmul.f32 1.442695, %v3262_v62  ;;  %v861_v34 = vmul.f32 1.442695, %v3263_v2  ;;  %v3266_v47 = vsub.f32 %v3264_v41, %v3265_v52  ;;  %v3269_v19 = vsub.f32 %v3267_v29, %v3268_v8 }
 0x1e3   : > { %v2164_v45 = vpop.eup %2163  ;;  %1107 = vadd.xlane.f32.xlu0 %v1106_v24  ;;  %1478 = vmatprep.mubr.bf16.mxu0 %v1285_v26  ;;  %v1127_v17 = vadd.f32 %v2162_v0, %v2160_v43  ;;  %375 = vst.msk [vmem:[#allocation4 + $0x70] sm:$0xff] %vm360_vm1, %v3258_v15  ;;  %376 = vst.msk [vmem:[#allocation4 + $0x78] sm:$0xff] %vm360_vm1, %v3258_v15  ;;  %2179 = vpow2.f32 %v857_v46  ;;  %v3272_v30 = vsub.f32 %v3270_v63, %v3271_v6  ;;  %v1056_v36 = vld [vmem:[#allocation3 + $0x18] sm:$0xff]  ;;  %v1057_v2 = vld [vmem:[#allocation3 + $0x20] sm:$0xff] }
 0x1e4   : > { %v2166_v31 = vpop.eup %2165  ;;  %1110 = vadd.xlane.f32.xlu1 %v1109_v33  ;;  %1479 = vmatmul.mubr.bf16.gmra.mrb[12].mxu0 %v1284_v61  ;;  %v1292_v13 = vpack.c.bf16 %v2164_v45, %v2160_v43  ;;  %v863_v22 = vmul.f32 1.442695, %v3266_v47  ;;  %2181 = vpow2.f32 %v859_v3  ;;  %v865_v16 = vmul.f32 1.442695, %v3269_v19  ;;  %v3279_v61 = vld [vmem:[#allocation15_spill] sm:$0xff]  ;;  %v3280_v43 = vld [vmem:[#allocation16_spill] sm:$0xff] }
 0x1e5   : > { %v1293_v18 = vpack.c.bf16 %v2166_v31, %v2162_v0  ;;  %v1130_v5 = vadd.f32 %v2166_v31, %v2164_v45  ;;  %2183 = vpow2.f32 %v861_v34  ;;  %v867_v51 = vmul.f32 1.442695, %v3272_v30  ;;  %v3282_v0 = vld [vmem:[#allocation17_spill] sm:$0xff]  ;;  %v3283_v33 = vld [vmem:[#allocation18_spill] sm:$0xff] }
 0x1e6   : > { %v2168_v48 = vpop.eup %2167  ;;  %2185 = vpow2.f32 %v863_v22  ;;  %v3275_v21 = vsub.f32 %v3273_v1, %v3274_v59  ;;  %v3278_v42 = vsub.f32 %v3276_v40, %v3277_v27  ;;  %v3281_v24 = vsub.f32 %v3279_v61, %v3280_v43  ;;  %v1058_v47 = vld [vmem:[#allocation3 + $0x28] sm:$0xff]  ;;  %v1061_v59 = vld [vmem:[#allocation3 + $0x40] sm:$0xff] }
 0x1e7   : > { %1113 = vadd.xlane.f32.xlu0 %v1112_v7  ;;  %1510 = vmatprep.mubr.bf16.mxu1 %v1293_v18  ;;  %v2170_v9 = vpop.eup %2169  ;;  %2187 = vpow2.f32 %v865_v16  ;;  %v3284_v45 = vsub.f32 %v3282_v0, %v3283_v33  ;;  %v1059_v16 = vld [vmem:[#allocation3 + $0x30] sm:$0xff] }
 0x1e8   : > { %1116 = vadd.xlane.f32.xlu1 %v1115_v55  ;;  %1511 = vmatmul.mubr.bf16.gmra.mrb[12].mxu1 %v1292_v13  ;;  %v2172_v56 = vpop.eup %2171  ;;  %v869_v49 = vmul.f32 1.442695, %v3275_v21  ;;  %2189 = vpow2.f32 %v867_v51  ;;  %v871_v23 = vmul.f32 1.442695, %v3278_v42  ;;  %v873_v26 = vmul.f32 1.442695, %v3281_v24 }
 0x1e9   : > { %v2174_v11 = vpop.eup %2173  ;;  %v875_v31 = vmul.f32 1.442695, %v3284_v45  ;;  %v1070_v28 = vmul.f32 %v2172_v56, %v1054_v50  ;;  %v1071_v15 = vmul.f32 %v2170_v9, %v1055_v14  ;;  %v1060_v51 = vld [vmem:[#allocation3 + $0x38] sm:$0xff]  ;;  %v1063_v24 = vld [vmem:[#allocation3 + $0x50] sm:$0xff] }
 0x1ea   : > { %v3045_v60 = vpop.eup %2175  ;;  %2191 = vpow2.f32 %v869_v49 }
 0x1eb   : > { %1119 = vadd.xlane.f32.xlu0 %v1118_v20  ;;  %v3047_v35 = vpop.eup %2177  ;;  %2193 = vpow2.f32 %v871_v23  ;;  %v1073_v52 = vmul.f32 %v3045_v60, %v1057_v2  ;;  %v1062_v23 = vld [vmem:[#allocation3 + $0x48] sm:$0xff] }
 0x1ec   : > { %1122 = vadd.xlane.f32.xlu1 %v1121_v37  ;;  %2195 = vpow2.f32 %v873_v26  ;;  %v1074_v8 = vmul.f32 %v3047_v35, %v1058_v47 }
 0x1ed   : > { %v3057_v4 = vpop.eup %2179  ;;  %2197 = vpow2.f32 %v875_v31 }
 0x1ee   : > { %v3059_v32 = vpop.eup %2181  ;;  %v1075_v30 = vmul.f32 %v3057_v4, %v1059_v16 }
 0x1ef   : > { %1125 = vadd.xlane.f32.xlu0 %v1124_v53  ;;  %v3069_v13 = vpop.eup %2183  ;;  %v1076_v49 = vmul.f32 %v3059_v32, %v1060_v51 }
 0x1f0   : > { %1128 = vadd.xlane.f32.xlu1 %v1127_v17  ;;  %v3071_v7 = vpop.eup %2185  ;;  %v1077_v27 = vmul.f32 %v3069_v13, %v1061_v59 }
 0x1f1   : > { %v3075_v18 = vpop.eup %2187  ;;  %v1078_v33 = vmul.f32 %v3071_v7, %v1062_v23 }
 0x1f2   : > { %v3077_v55 = vpop.eup %2189  ;;  %v1079_v45 = vmul.f32 %v3075_v18, %v1063_v24 }
 0x1f3   : > { %1131 = vadd.xlane.f32.xlu0 %v1130_v5  ;;  %v1053_v5 = vld [vmem:[#allocation3] sm:$0xff] }
 0x1f4   : > { %v3081_v20 = vpop.eup %2191  ;;  %v1069_v54 = vmul.f32 %v2168_v48, %v1053_v5 }
 0x1f5   : > { %v3083_v37 = vpop.eup %2193 }
 0x1f6   : > { %v3087_v53 = vpop.eup %2195 }
 0x1f7   : > { %v3089_v17 = vpop.eup %2197 }
 0x201   : > { %1184 = vperm.xlu1 %2086, %v2168_v48   ;;  %v1072_v48 = vmul.f32 %v2174_v11, %v1056_v36 }
 0x205   : > { %1194 = vperm.xlu1 %2086, %v2170_v9  }
 0x209   : > { %1199 = vperm.xlu1 %2086, %v2174_v11   ;;  %1189 = vperm.xlu0 %2085, %v2172_v56  }
 0x20d   : > { %1209 = vperm.xlu1 %2086, %v3047_v35   ;;  %1204 = vperm.xlu0 %2085, %v3045_v60  }
 0x211   : > { %1219 = vperm.xlu1 %2086, %v3059_v32   ;;  %1214 = vperm.xlu0 %2085, %v3057_v4  }
 0x215   : > { %1229 = vperm.xlu1 %2086, %v3071_v7   ;;  %1224 = vperm.xlu0 %2085, %v3069_v13   ;;  %v1064_v13 = vld [vmem:[#allocation3 + $0x58] sm:$0xff] }
 0x216   : > { %v1080_v14 = vmul.f32 %v3077_v55, %v1064_v13 }
 0x219   : > { %1239 = vperm.xlu1 %2086, %v3077_v55   ;;  %1234 = vperm.xlu0 %2085, %v3075_v18   ;;  %v1066_v18 = vld [vmem:[#allocation3 + $0x68] sm:$0xff] }
 0x21a   : > { %v1082_v36 = vmul.f32 %v3083_v37, %v1066_v18 }
 0x21d   : > { %1249 = vperm.xlu1 %2086, %v3083_v37   ;;  %1244 = vperm.xlu0 %2085, %v3081_v20  }
 0x221   : > { %1259 = vperm.xlu1 %2086, %v3089_v17   ;;  %1254 = vperm.xlu0 %2085, %v3087_v53  }
 0x250   : > { %v1087_v58 = vpop.xlane.xlu0 %1086 }
 0x251   : > { %v1133_v25 = vadd.f32 %v1087_v58, %v1069_v54  ;;  %v1065_v58 = vld [vmem:[#allocation3 + $0x60] sm:$0xff] }
 0x252   : > { %v1081_v7 = vmul.f32 %v3081_v20, %v1065_v58 }
 0x253   : > { %1150 = vst.msk [vmem:[#allocation3] sm:$0xff] %vm327_vm0, %v1133_v25 }
 0x256   : > { %v1090_v39 = vpop.xlane.xlu1 %1089 }
 0x257   : > { %v1134_v12 = vadd.f32 %v1090_v39, %v1070_v28 }
 0x258   : > { %v1093_v10 = vpop.xlane.xlu0 %1092 }
 0x259   : > { %1151 = vst.msk [vmem:[#allocation3 + $0x8] sm:$0xff] %vm327_vm0, %v1134_v12  ;;  %v1135_v57 = vadd.f32 %v1093_v10, %v1071_v15 }
 0x25a   : > { %v1571_v38 = vld [vmem:[#allocation3] sm:$0xff] }
 0x25b   : > { %1152 = vst.msk [vmem:[#allocation3 + $0x10] sm:$0xff] %vm327_vm0, %v1135_v57  ;;  %v1587_v44 = vmax.f32 %v1571_v38, 1e-09  ;;  %v1067_v57 = vld [vmem:[#allocation3 + $0x70] sm:$0xff] }
 0x25c   : > { %v1083_v20 = vmul.f32 %v3087_v53, %v1067_v57  ;;  %v1175_v57 = vld [vmem:[#allocation4 + $0x48] sm:$0xff] }
 0x25d   : > { %2199 = vrcp.f32 %v1587_v44 }
 0x260   : > { %v1096_v46 = vpop.xlane.xlu0 %1095  ;;  %v1572_v62 = vld [vmem:[#allocation3 + $0x8] sm:$0xff] }
 0x261   : > { %v1136_v3 = vadd.f32 %v1096_v46, %v1072_v48  ;;  %v1588_v34 = vmax.f32 %v1572_v62, 1e-09 }
 0x262   : > { %v1573_v41 = vld [vmem:[#allocation3 + $0x10] sm:$0xff] }
 0x263   : > { %1153 = vst.msk [vmem:[#allocation3 + $0x18] sm:$0xff] %vm327_vm0, %v1136_v3  ;;  %2201 = vrcp.f32 %v1588_v34  ;;  %v1589_v9 = vmax.f32 %v1573_v41, 1e-09  ;;  %v1068_v3 = vld [vmem:[#allocation3 + $0x78] sm:$0xff] }
 0x264   : > { %v1084_v37 = vmul.f32 %v3089_v17, %v1068_v3 }
 0x265   : > { %v1099_v22 = vpop.xlane.xlu1 %1098  ;;  %2203 = vrcp.f32 %v1589_v9 }
 0x266   : > { %v1137_v56 = vadd.f32 %v1099_v22, %v1073_v52 }
 0x267   : > { %v2200_v29 = vpop.eup %2199 }
 0x268   : > { %1154 = vst.msk [vmem:[#allocation3 + $0x20] sm:$0xff] %vm327_vm0, %v1137_v56  ;;  %v1102_v11 = vpop.xlane.xlu0 %1101  ;;  %1653 = vperm.xlu0 %2085, %v2200_v29  }
 0x269   : > { %v1138_v19 = vadd.f32 %v1102_v11, %v1074_v8 }
 0x26a   : > { %v1574_v63 = vld [vmem:[#allocation3 + $0x18] sm:$0xff] }
 0x26b   : > { %1155 = vst.msk [vmem:[#allocation3 + $0x28] sm:$0xff] %vm327_vm0, %v1138_v19  ;;  %v1590_v6 = vmax.f32 %v1574_v63, 1e-09 }
 0x26d   : > { %v2202_v60 = vpop.eup %2201  ;;  %v1105_v1 = vpop.xlane.xlu1 %1104  ;;  %2205 = vrcp.f32 %v1590_v6 }
 0x26e   : > { %v1139_v21 = vadd.f32 %v1105_v1, %v1075_v30  ;;  %1658 = vperm.xlu1 %2086, %v2202_v60  }
 0x26f   : > { %v2204_v35 = vpop.eup %2203  ;;  %v1575_v40 = vld [vmem:[#allocation3 + $0x20] sm:$0xff] }
 0x270   : > { %1156 = vst.msk [vmem:[#allocation3 + $0x30] sm:$0xff] %vm327_vm0, %v1139_v21  ;;  %v1108_v42 = vpop.xlane.xlu0 %1107  ;;  %1663 = vperm.xlu0 %2085, %v2204_v35   ;;  %v1591_v61 = vmax.f32 %v1575_v40, 1e-09 }
 0x271   : > { %v1111_v4 = vpop.xlane.xlu1 %1110  ;;  %v1140_v43 = vadd.f32 %v1108_v42, %v1076_v49 }
 0x272   : > { %v1141_v26 = vadd.f32 %v1111_v4, %v1077_v27  ;;  %2207 = vrcp.f32 %v1591_v61  ;;  %v1576_v0 = vld [vmem:[#allocation3 + $0x28] sm:$0xff] }
 0x273   : > { %1157 = vst.msk [vmem:[#allocation3 + $0x38] sm:$0xff] %vm327_vm0, %v1140_v43  ;;  %v1592_v32 = vmax.f32 %v1576_v0, 1e-09 }
 0x274   : > { %1158 = vst.msk [vmem:[#allocation3 + $0x40] sm:$0xff] %vm327_vm0, %v1141_v26  ;;  %v1114_v31 = vpop.xlane.xlu0 %1113 }
 0x275   : > { %v1117_v5 = vpop.xlane.xlu1 %1116  ;;  %v1142_v54 = vadd.f32 %v1114_v31, %v1078_v33  ;;  %2209 = vrcp.f32 %v1592_v32  ;;  %v1166_v31 = vld [vmem:[#allocation4] sm:$0xff] }
 0x276   : > { %v1143_v25 = vadd.f32 %v1117_v5, %v1079_v45 }
 0x277   : > { %v2206_v50 = vpop.eup %2205  ;;  %1159 = vst.msk [vmem:[#allocation3 + $0x48] sm:$0xff] %vm327_vm0, %v1142_v54  ;;  %v1577_v28 = vld [vmem:[#allocation3 + $0x30] sm:$0xff]  ;;  %v1167_v54 = vld [vmem:[#allocation4 + $0x8] sm:$0xff] }
 0x278   : > { %1160 = vst.msk [vmem:[#allocation3 + $0x50] sm:$0xff] %vm327_vm0, %v1143_v25  ;;  %1668 = vperm.xlu1 %2086, %v2206_v50   ;;  %v1120_v39 = vpop.xlane.xlu0 %1119  ;;  %v1593_v12 = vmax.f32 %v1577_v28, 1e-09 }
 0x279   : > { %v1123_v15 = vpop.xlane.xlu1 %1122  ;;  %v1144_v10 = vadd.f32 %v1120_v39, %v1080_v14  ;;  %v1174_v39 = vld [vmem:[#allocation4 + $0x40] sm:$0xff] }
 0x27a   : > { %v1145_v38 = vadd.f32 %v1123_v15, %v1081_v7  ;;  %2211 = vrcp.f32 %v1593_v12  ;;  %v1578_v44 = vld [vmem:[#allocation3 + $0x38] sm:$0xff] }
 0x27b   : > { %1161 = vst.msk [vmem:[#allocation3 + $0x58] sm:$0xff] %vm327_vm0, %v1144_v10  ;;  %v1579_v55 = vld [vmem:[#allocation3 + $0x40] sm:$0xff]  ;;  %v1594_v48 = vmax.f32 %v1578_v44, 1e-09 }
 0x27c   : > { %v2208_v46 = vpop.eup %2207  ;;  %1162 = vst.msk [vmem:[#allocation3 + $0x60] sm:$0xff] %vm327_vm0, %v1145_v38  ;;  %v1126_v62 = vpop.xlane.xlu0 %1125  ;;  %v1595_v2 = vmax.f32 %v1579_v55, 1e-09 }
 0x27d   : > { %v1129_v34 = vpop.xlane.xlu1 %1128  ;;  %1673 = vperm.xlu0 %2085, %v2208_v46   ;;  %v1146_v41 = vadd.f32 %v1126_v62, %v1082_v36  ;;  %2213 = vrcp.f32 %v1594_v48 }
 0x27e   : > { %v1147_v9 = vadd.f32 %v1129_v34, %v1083_v20  ;;  %2215 = vrcp.f32 %v1595_v2  ;;  %v1580_v52 = vld [vmem:[#allocation3 + $0x48] sm:$0xff]  ;;  %v1168_v20 = vld [vmem:[#allocation4 + $0x10] sm:$0xff] }
 0x27f   : > { %v2210_v47 = vpop.eup %2209  ;;  %1163 = vst.msk [vmem:[#allocation3 + $0x68] sm:$0xff] %vm327_vm0, %v1146_v41  ;;  %v1581_v22 = vld [vmem:[#allocation3 + $0x50] sm:$0xff]  ;;  %v1596_v56 = vmax.f32 %v1580_v52, 1e-09 }
 0x280   : > { %1164 = vst.msk [vmem:[#allocation3 + $0x70] sm:$0xff] %vm327_vm0, %v1147_v9  ;;  %1678 = vperm.xlu1 %2086, %v2210_v47   ;;  %v1132_v53 = vpop.xlane.xlu0 %1131  ;;  %v1597_v29 = vmax.f32 %v1581_v22, 1e-09  ;;  %v1169_v9 = vld [vmem:[#allocation4 + $0x18] sm:$0xff] }
 0x281   : > { %v1148_v8 = vadd.f32 %v1132_v53, %v1084_v37  ;;  %2217 = vrcp.f32 %v1596_v56  ;;  %v1185_v30 = vpop.permute.xlu1 %1184 }
 0x282   : > { %2219 = vrcp.f32 %v1597_v29  ;;  %v1582_v11 = vld [vmem:[#allocation3 + $0x58] sm:$0xff]  ;;  %v1262_v25 = vmul.f32 %v1185_v30, %v1166_v31 }
 0x283   : > { %1165 = vst.msk [vmem:[#allocation3 + $0x78] sm:$0xff] %vm327_vm0, %v1148_v8  ;;  %v1583_v19 = vld [vmem:[#allocation3 + $0x60] sm:$0xff]  ;;  %v1598_v16 = vmax.f32 %v1582_v11, 1e-09  ;;  %v1176_v8 = vld [vmem:[#allocation4 + $0x50] sm:$0xff] }
 0x284   : > { %v2212_v63 = vpop.eup %2211  ;;  %v1599_v6 = vmax.f32 %v1583_v19, 1e-09 }
 0x285   : > { %1683 = vperm.xlu0 %2085, %v2212_v63   ;;  %2221 = vrcp.f32 %v1598_v16  ;;  %v1195_v40 = vpop.permute.xlu1 %1194 }
 0x286   : > { %2223 = vrcp.f32 %v1599_v6  ;;  %v1584_v17 = vld [vmem:[#allocation3 + $0x68] sm:$0xff]  ;;  %v1264_v47 = vmul.f32 %v1195_v40, %v1168_v20  ;;  %v1177_v6 = vld [vmem:[#allocation4 + $0x58] sm:$0xff] }
 0x287   : > { %v2214_v51 = vpop.eup %2213  ;;  %v1585_v60 = vld [vmem:[#allocation3 + $0x70] sm:$0xff]  ;;  %v1600_v1 = vmax.f32 %v1584_v17, 1e-09 }
 0x288   : > { %v2216_v59 = vpop.eup %2215  ;;  %1688 = vperm.xlu1 %2086, %v2214_v51   ;;  %v1601_v21 = vmax.f32 %v1585_v60, 1e-09  ;;  %v1190_v61 = vpop.permute.xlu0 %1189 }
 0x289   : > { %1693 = vperm.xlu0 %2085, %v2216_v59   ;;  %2225 = vrcp.f32 %v1600_v1  ;;  %v1200_v43 = vpop.permute.xlu1 %1199  ;;  %v1263_v7 = vmul.f32 %v1190_v61, %v1167_v54 }
 0x28a   : > { %2227 = vrcp.f32 %v1601_v21  ;;  %v1586_v35 = vld [vmem:[#allocation3 + $0x78] sm:$0xff]  ;;  %v1265_v29 = vmul.f32 %v1200_v43, %v1169_v9  ;;  %v1170_v21 = vld [vmem:[#allocation4 + $0x20] sm:$0xff] }
 0x28b   : > { %v2218_v49 = vpop.eup %2217  ;;  %v1602_v27 = vmax.f32 %v1586_v35, 1e-09 }
 0x28c   : > { %v2220_v42 = vpop.eup %2219  ;;  %1698 = vperm.xlu1 %2086, %v2218_v49   ;;  %v3121_v0 = vpop.permute.xlu0 %1204 }
 0x28d   : > { %1703 = vperm.xlu0 %2085, %v2220_v42   ;;  %2229 = vrcp.f32 %v1602_v27  ;;  %v3123_v32 = vpop.permute.xlu1 %1209 }
 0x28f   : > { %v2222_v23 = vpop.eup %2221 }
 0x290   : > { %v2224_v4 = vpop.eup %2223  ;;  %1708 = vperm.xlu1 %2086, %v2222_v23   ;;  %v3125_v45 = vpop.permute.xlu0 %1214  ;;  %v1171_v23 = vld [vmem:[#allocation4 + $0x28] sm:$0xff] }
 0x291   : > { %1713 = vperm.xlu0 %2085, %v2224_v4   ;;  %v3127_v13 = vpop.permute.xlu1 %1219  ;;  %v1266_v4 = vmul.f32 %v3121_v0, %v1170_v21  ;;  %v1267_v54 = vmul.f32 %v3123_v32, %v1171_v23 }
 0x293   : > { %v2226_v24 = vpop.eup %2225 }
 0x294   : > { %v2228_v26 = vpop.eup %2227  ;;  %1718 = vperm.xlu1 %2086, %v2226_v24   ;;  %v1225_v18 = vpop.permute.xlu0 %1224 }
 0x295   : > { %1723 = vperm.xlu0 %2085, %v2228_v26   ;;  %v1230_v38 = vpop.permute.xlu1 %1229  ;;  %v1270_v55 = vmul.f32 %v1225_v18, %v1174_v39 }
 0x296   : > { %v1271_v3 = vmul.f32 %v1230_v38, %v1175_v57 }
 0x297   : > { %v2230_v33 = vpop.eup %2229 }
 0x298   : > { %1728 = vperm.xlu1 %2086, %v2230_v33   ;;  %v1235_v11 = vpop.permute.xlu0 %1234  ;;  %v1178_v33 = vld [vmem:[#allocation4 + $0x60] sm:$0xff] }
 0x299   : > { %v1240_v30 = vpop.permute.xlu1 %1239  ;;  %v1272_v60 = vmul.f32 %v1235_v11, %v1176_v8 }
 0x29a   : > { %v1273_v49 = vmul.f32 %v1240_v30, %v1177_v6  ;;  %v3152_v30 = vld [vmem:[%s3222_s4] ss:$0 sm:$0xff] }
 0x29c   : > { %v1994_v5 = vpop.f32.mrb[0].mxu0  ;;  %v1245_v31 = vpop.permute.xlu0 %1244 }
 0x29d   : > { %v1995_v58 = vpop.f32.mrb[1].mxu0  ;;  %v1274_v39 = vmul.f32 %v1245_v31, %v1178_v33 }
 0x29e   : > { %v1996_v50 = vadd.f32 %v1995_v58, %v1994_v5  ;;  %v1997_v14 = vpop.f32.mrb[2].mxu0 }
 0x29f   : > { %v1998_v28 = vpop.f32.mrb[3].mxu0 }
 0x2a0   : > { %v1519_v12 = vadd.f32 %v1996_v50, %v1262_v25  ;;  %v1999_v15 = vadd.f32 %v1998_v28, %v1997_v14  ;;  %v1179_v14 = vld [vmem:[#allocation4 + $0x68] sm:$0xff]  ;;  %v1250_v28 = vpop.permute.xlu1 %1249 }
 0x2a1   : > { %v1275_v57 = vmul.f32 %v1250_v28, %v1179_v14 }
 0x2a2   : > { %v2018_v10 = vpop.f32.mrb[0].mxu1  ;;  %1536 = vst.msk [vmem:[#allocation4] sm:$0xff] %vm360_vm1, %v1519_v12  ;;  %v1520_v44 = vadd.f32 %v1999_v15, %v1263_v7  ;;  %v1172_v15 = vld [vmem:[#allocation4 + $0x30] sm:$0xff] }
 0x2a3   : > { %v2019_v36 = vpop.f32.mrb[1].mxu1 }
 0x2a4   : > { %v2020_v48 = vadd.f32 %v2019_v36, %v2018_v10  ;;  %v2021_v46 = vpop.f32.mrb[2].mxu1  ;;  %1537 = vst.msk [vmem:[#allocation4 + $0x8] sm:$0xff] %vm360_vm1, %v1520_v44  ;;  %v1173_v36 = vld [vmem:[#allocation4 + $0x38] sm:$0xff] }
 0x2a5   : > { %v2022_v62 = vpop.f32.mrb[3].mxu1 }
 0x2a6   : > { %v1527_v2 = vadd.f32 %v2020_v48, %v1270_v55  ;;  %v2023_v34 = vadd.f32 %v2022_v62, %v2021_v46  ;;  %v2000_v41 = vpop.f32.mrb[4].mxu0  ;;  %v1268_v48 = vmul.f32 %v3125_v45, %v1172_v15 }
 0x2a7   : > { %v2001_v52 = vpop.f32.mrb[5].mxu0 }
 0x2a8   : > { %1544 = vst.msk [vmem:[#allocation4 + $0x40] sm:$0xff] %vm360_vm1, %v1527_v2  ;;  %v1528_v37 = vadd.f32 %v2023_v34, %v1271_v3  ;;  %v2002_v22 = vadd.f32 %v2001_v52, %v2000_v41  ;;  %v2003_v56 = vpop.f32.mrb[6].mxu0  ;;  %v1180_v3 = vld [vmem:[#allocation4 + $0x70] sm:$0xff]  ;;  %v1255_v2 = vpop.permute.xlu0 %1254  ;;  %v1269_v41 = vmul.f32 %v3127_v13, %v1173_v36 }
 0x2a9   : > { %v2004_v53 = vpop.f32.mrb[7].mxu0  ;;  %v1635_v6 = vld [vmem:[#allocation4] sm:$0xff] }
 0x2aa   : > { %1545 = vst.msk [vmem:[#allocation4 + $0x48] sm:$0xff] %vm360_vm1, %v1528_v37  ;;  %v1521_v19 = vadd.f32 %v2002_v22, %v1264_v47  ;;  %v2005_v16 = vadd.f32 %v2004_v53, %v2003_v56  ;;  %v1181_v37 = vld [vmem:[#allocation4 + $0x78] sm:$0xff]  ;;  %v1260_v22 = vpop.permute.xlu1 %1259  ;;  %v1276_v53 = vmul.f32 %v1255_v2, %v1180_v3 }
 0x2ab   : > { %v2024_v63 = vpop.f32.mrb[4].mxu1  ;;  %v1636_v21 = vld [vmem:[#allocation4 + $0x8] sm:$0xff] }
 0x2ac   : > { %1538 = vst.msk [vmem:[#allocation4 + $0x10] sm:$0xff] %vm360_vm1, %v1521_v19  ;;  %v1522_v17 = vadd.f32 %v2005_v16, %v1265_v29  ;;  %v2025_v51 = vpop.f32.mrb[5].mxu1  ;;  %v1277_v19 = vmul.f32 %v1260_v22, %v1181_v37 }
 0x2ad   : > { %v2026_v1 = vadd.f32 %v2025_v51, %v2024_v63  ;;  %v2027_v59 = vpop.f32.mrb[6].mxu1 }
 0x2ae   : > { %1539 = vst.msk [vmem:[#allocation4 + $0x18] sm:$0xff] %vm360_vm1, %v1522_v17  ;;  %v2028_v35 = vpop.f32.mrb[7].mxu1 }
 0x2af   : > { %v1529_v40 = vadd.f32 %v2026_v1, %v1272_v60  ;;  %v2029_v27 = vadd.f32 %v2028_v35, %v2027_v59  ;;  %v2006_v42 = vpop.f32.mrb[8].mxu0 }
 0x2b0   : > { %v2007_v61 = vpop.f32.mrb[9].mxu0 }
 0x2b1   : > { %1546 = vst.msk [vmem:[#allocation4 + $0x50] sm:$0xff] %vm360_vm1, %v1529_v40  ;;  %v1530_v43 = vadd.f32 %v2029_v27, %v1273_v49  ;;  %v2008_v24 = vadd.f32 %v2007_v61, %v2006_v42  ;;  %v2009_v26 = vpop.f32.mrb[10].mxu0 }
 0x2b2   : > { %v2010_v5 = vpop.f32.mrb[11].mxu0 }
 0x2b3   : > { %1547 = vst.msk [vmem:[#allocation4 + $0x58] sm:$0xff] %vm360_vm1, %v1530_v43  ;;  %v1523_v58 = vadd.f32 %v2008_v24, %v1266_v4  ;;  %v2011_v25 = vadd.f32 %v2010_v5, %v2009_v26  ;;  %v2030_v50 = vpop.f32.mrb[8].mxu1  ;;  %v1637_v49 = vld [vmem:[#allocation4 + $0x10] sm:$0xff] }
 0x2b4   : > { %v2031_v7 = vpop.f32.mrb[9].mxu1 }
 0x2b5   : > { %1540 = vst.msk [vmem:[#allocation4 + $0x20] sm:$0xff] %vm360_vm1, %v1523_v58  ;;  %v1524_v0 = vadd.f32 %v2011_v25, %v1267_v54  ;;  %v2032_v18 = vadd.f32 %v2031_v7, %v2030_v50  ;;  %v2033_v12 = vpop.f32.mrb[10].mxu1  ;;  %v1638_v43 = vld [vmem:[#allocation4 + $0x18] sm:$0xff] }
 0x2b6   : > { %v2034_v10 = vpop.f32.mrb[11].mxu1 }
 0x2b7   : > { %1541 = vst.msk [vmem:[#allocation4 + $0x28] sm:$0xff] %vm360_vm1, %v1524_v0  ;;  %v1531_v32 = vadd.f32 %v2032_v18, %v1274_v39  ;;  %v2035_v38 = vadd.f32 %v2034_v10, %v2033_v12  ;;  %v2012_v44 = vpop.f32.mrb[12].mxu0 }
 0x2b8   : > { %v2013_v55 = vpop.f32.mrb[13].mxu0 }
 0x2b9   : > { %1548 = vst.msk [vmem:[#allocation4 + $0x60] sm:$0xff] %vm360_vm1, %v1531_v32  ;;  %v1532_v46 = vadd.f32 %v2035_v38, %v1275_v57  ;;  %v2014_v20 = vadd.f32 %v2013_v55, %v2012_v44  ;;  %v2015_v62 = vpop.f32.mrb[14].mxu0  ;;  %v1643_v44 = vld [vmem:[#allocation4 + $0x40] sm:$0xff] }
 0x2ba   : > { %v2016_v34 = vpop.f32.mrb[15].mxu0 }
 0x2bb   : > { %1549 = vst.msk [vmem:[#allocation4 + $0x68] sm:$0xff] %vm360_vm1, %v1532_v46  ;;  %v1525_v9 = vadd.f32 %v2014_v20, %v1268_v48  ;;  %v2017_v52 = vadd.f32 %v2016_v34, %v2015_v62  ;;  %v2036_v47 = vpop.f32.mrb[12].mxu1  ;;  %v1644_v62 = vld [vmem:[#allocation4 + $0x48] sm:$0xff] }
 0x2bc   : > { %v2037_v56 = vpop.f32.mrb[13].mxu1  ;;  %v1639_v5 = vld [vmem:[#allocation4 + $0x20] sm:$0xff] }
 0x2bd   : > { %1542 = vst.msk [vmem:[#allocation4 + $0x30] sm:$0xff] %vm360_vm1, %v1525_v9  ;;  %v1526_v45 = vadd.f32 %v2017_v52, %v1269_v41  ;;  %v2038_v29 = vadd.f32 %v2037_v56, %v2036_v47  ;;  %v2039_v8 = vpop.f32.mrb[14].mxu1  ;;  %v1645_v41 = vld [vmem:[#allocation4 + $0x50] sm:$0xff]  ;;  %v1646_v56 = vld [vmem:[#allocation4 + $0x58] sm:$0xff] }
 0x2be   : > { %v2040_v11 = vpop.f32.mrb[15].mxu1  ;;  %v1640_v50 = vld [vmem:[#allocation4 + $0x28] sm:$0xff] }
 0x2bf   : > { %1543 = vst.msk [vmem:[#allocation4 + $0x38] sm:$0xff] %vm360_vm1, %v1526_v45  ;;  %v1533_v13 = vadd.f32 %v2038_v29, %v1276_v53  ;;  %v2041_v16 = vadd.f32 %v2040_v11, %v2039_v8 }
 0x2c0   : > { %v1647_v8 = vld [vmem:[#allocation4 + $0x60] sm:$0xff] }
 0x2c1   : > { %1550 = vst.msk [vmem:[#allocation4 + $0x70] sm:$0xff] %vm360_vm1, %v1533_v13  ;;  %v1534_v63 = vadd.f32 %v2041_v16, %v1277_v19 }
 0x2c3   : > { %1551 = vst.msk [vmem:[#allocation4 + $0x78] sm:$0xff] %vm360_vm1, %v1534_v63 }
 0x2c4   : > { %v1641_v18 = vld [vmem:[#allocation4 + $0x30] sm:$0xff] }
 0x2c6   : > { %v1642_v57 = vld [vmem:[#allocation4 + $0x38] sm:$0xff] }
 0x2e7   : > { %v1654_v17 = vpop.permute.xlu0 %1653 }
 0x2e8   : > { %v1731_v51 = vmul.f32 %v1654_v17, %v1635_v6  ;;  %v1648_v6 = vld [vmem:[#allocation4 + $0x68] sm:$0xff] }
 0x2ea   : > { %v1754_v60 = vadd.f32 %v3152_v30, %v1731_v51 }
 0x2ec   : > { %v1770_v1 = vsel %vm360_vm1, %v1754_v60, 0.0 }
 0x2ed   : > { %1786 = vst [vmem:[%s3159_s30] sm:$0xff] %v1770_v1  ;;  %v1659_v59 = vpop.permute.xlu1 %1658  ;;  %v1649_v1 = vld [vmem:[#allocation4 + $0x70] sm:$0xff] }
 0x2ee   : > { %v1732_v35 = vmul.f32 %v1659_v59, %v1636_v21 }
 0x2ef   : > { %v1664_v40 = vpop.permute.xlu0 %1663 }
 0x2f0   : > { %v1755_v27 = vadd.f32 %v3152_v30, %v1732_v35  ;;  %v1733_v42 = vmul.f32 %v1664_v40, %v1637_v49 }
 0x2f2   : > { %v1771_v23 = vsel %vm360_vm1, %v1755_v27, 0.0  ;;  %v1756_v61 = vadd.f32 %v3152_v30, %v1733_v42  ;;  %v1650_v27 = vld [vmem:[#allocation4 + $0x78] sm:$0xff] }
 0x2f3   : > { %1787 = vst [vmem:[%s3159_s30 + $0x8] sm:$0xff] %v1771_v23 }
 0x2f4   : > { %v1772_v4 = vsel %vm360_vm1, %v1756_v61, 0.0 }
 0x2f5   : > { %1788 = vst [vmem:[%s3159_s30 + $0x10] sm:$0xff] %v1772_v4 }
 0x2f7   : > { %v1669_v24 = vpop.permute.xlu1 %1668 }
 0x2f8   : > { %v1734_v26 = vmul.f32 %v1669_v24, %v1638_v43 }
 0x2fa   : > { %v1757_v33 = vadd.f32 %v3152_v30, %v1734_v26 }
 0x2fc   : > { %v1773_v31 = vsel %vm360_vm1, %v1757_v33, 0.0  ;;  %v1674_v54 = vpop.permute.xlu0 %1673 }
 0x2fd   : > { %1789 = vst [vmem:[%s3159_s30 + $0x18] sm:$0xff] %v1773_v31  ;;  %v1735_v58 = vmul.f32 %v1674_v54, %v1639_v5 }
 0x2ff   : > { %v1758_v25 = vadd.f32 %v3152_v30, %v1735_v58  ;;  %v1679_v14 = vpop.permute.xlu1 %1678 }
 0x300   : > { %v1736_v28 = vmul.f32 %v1679_v14, %v1640_v50 }
 0x301   : > { %v1774_v7 = vsel %vm360_vm1, %v1758_v25, 0.0 }
 0x302   : > { %1790 = vst [vmem:[%s3159_s30 + $0x20] sm:$0xff] %v1774_v7  ;;  %v1759_v39 = vadd.f32 %v3152_v30, %v1736_v28 }
 0x304   : > { %v1775_v0 = vsel %vm360_vm1, %v1759_v39, 0.0  ;;  %v1684_v12 = vpop.permute.xlu0 %1683 }
 0x305   : > { %1791 = vst [vmem:[%s3159_s30 + $0x28] sm:$0xff] %v1775_v0  ;;  %v1737_v15 = vmul.f32 %v1684_v12, %v1641_v18 }
 0x307   : > { %v1760_v10 = vadd.f32 %v3152_v30, %v1737_v15  ;;  %v1689_v32 = vpop.permute.xlu1 %1688 }
 0x308   : > { %v1738_v38 = vmul.f32 %v1689_v32, %v1642_v57  ;;  %v1694_v36 = vpop.permute.xlu0 %1693 }
 0x309   : > { %v1776_v55 = vsel %vm360_vm1, %v1760_v10, 0.0  ;;  %v1739_v48 = vmul.f32 %v1694_v36, %v1643_v44 }
 0x30a   : > { %1792 = vst [vmem:[%s3159_s30 + $0x30] sm:$0xff] %v1776_v55  ;;  %v1761_v46 = vadd.f32 %v3152_v30, %v1738_v38 }
 0x30b   : > { %v1762_v20 = vadd.f32 %v3152_v30, %v1739_v48  ;;  %v1699_v3 = vpop.permute.xlu1 %1698 }
 0x30c   : > { %v1777_v2 = vsel %vm360_vm1, %v1761_v46, 0.0  ;;  %v1740_v34 = vmul.f32 %v1699_v3, %v1644_v62  ;;  %v1704_v9 = vpop.permute.xlu0 %1703 }
 0x30d   : > { %1793 = vst [vmem:[%s3159_s30 + $0x38] sm:$0xff] %v1777_v2  ;;  %v1778_v52 = vsel %vm360_vm1, %v1762_v20, 0.0  ;;  %v1741_v47 = vmul.f32 %v1704_v9, %v1645_v41 }
 0x30e   : > { %1794 = vst [vmem:[%s3159_s30 + $0x40] sm:$0xff] %v1778_v52  ;;  %v1763_v37 = vadd.f32 %v3152_v30, %v1740_v34 }
 0x30f   : > { %v1764_v22 = vadd.f32 %v3152_v30, %v1741_v47  ;;  %v1709_v53 = vpop.permute.xlu1 %1708 }
 0x310   : > { %v1779_v45 = vsel %vm360_vm1, %v1763_v37, 0.0  ;;  %v1742_v29 = vmul.f32 %v1709_v53, %v1646_v56  ;;  %v1714_v11 = vpop.permute.xlu0 %1713 }
 0x311   : > { %1795 = vst [vmem:[%s3159_s30 + $0x48] sm:$0xff] %v1779_v45  ;;  %v1780_v19 = vsel %vm360_vm1, %v1764_v22, 0.0  ;;  %v1743_v13 = vmul.f32 %v1714_v11, %v1647_v8 }
 0x312   : > { %1796 = vst [vmem:[%s3159_s30 + $0x50] sm:$0xff] %v1780_v19  ;;  %v1765_v16 = vadd.f32 %v3152_v30, %v1742_v29 }
 0x313   : > { %v1766_v63 = vadd.f32 %v3152_v30, %v1743_v13  ;;  %v1719_v17 = vpop.permute.xlu1 %1718 }
 0x314   : > { %v1781_v51 = vsel %vm360_vm1, %v1765_v16, 0.0  ;;  %v1744_v60 = vmul.f32 %v1719_v17, %v1648_v6  ;;  %v1724_v59 = vpop.permute.xlu0 %1723 }
 0x315   : > { %1797 = vst [vmem:[%s3159_s30 + $0x58] sm:$0xff] %v1781_v51  ;;  %v1782_v21 = vsel %vm360_vm1, %v1766_v63, 0.0  ;;  %v1745_v35 = vmul.f32 %v1724_v59, %v1649_v1 }
 0x316   : > { %1798 = vst [vmem:[%s3159_s30 + $0x60] sm:$0xff] %v1782_v21  ;;  %v1767_v49 = vadd.f32 %v3152_v30, %v1744_v60 }
 0x317   : > { %v1768_v40 = vadd.f32 %v3152_v30, %v1745_v35  ;;  %v1729_v42 = vpop.permute.xlu1 %1728 }
 0x318   : > { %v1783_v23 = vsel %vm360_vm1, %v1767_v49, 0.0  ;;  %v1746_v61 = vmul.f32 %v1729_v42, %v1650_v27 }
 0x319   : > { %1799 = vst [vmem:[%s3159_s30 + $0x68] sm:$0xff] %v1783_v23  ;;  %v1784_v4 = vsel %vm360_vm1, %v1768_v40, 0.0 }
 0x31a   : > { %1800 = vst [vmem:[%s3159_s30 + $0x70] sm:$0xff] %v1784_v4  ;;  %v1769_v43 = vadd.f32 %v3152_v30, %v1746_v61 }
 0x31c   : > { %v1785_v24 = vsel %vm360_vm1, %v1769_v43, 0.0 }
 0x31d   : > { %1801 = vst [vmem:[%s3159_s30 + $0x78] sm:$0xff] %v1785_v24 }
 0x31e PF: > { %s15_s20 = sadd.s32 1, %s2253_s20   ;;  %s3285_s18 = smov %s2249_s19 }
 0x31f   : > { %p12_p6 = scmp.ge.s32.totalorder %s15_s20, 4   ;;  %s3286_s19 = smov %s3288_s21 }
 0x321   :  { %14 = sbr.rel (!%p12_p6) target bundleno = 2 (0x2), region = 87 }

// kernel: gat_forward.5
= control target key start
LH: loop header
LB: loop body
LE: loop exit
PB: predicated region body
PF: predicated region fallthrough
CT: control target
= control target key end

     0   :  { %s7247_s18 = smov 0   ;;  %s7249_s19 = smov 0   ;;  %s10867_s0 = inlined_call_operand.vmem [shape: s8[256,256], index: 0, kind: input, shape index: {}]   ;;  %s10868_s1 = inlined_call_operand.vmem [shape: bf16[4,256,8], index: 1, kind: input, shape index: {}]   ;;  %s10869_s2 = inlined_call_operand.vmem [shape: f32[4,256], index: 2, kind: input, shape index: {}]   ;;  %s10870_s3 = inlined_call_operand.vmem [shape: f32[256,4], index: 3, kind: input, shape index: {}]   ;;  %s10871_s4 = inlined_call_operand.vmem [shape: f32[1,32], index: 4, kind: input, shape index: {}]   ;;  %s10872_s5 = inlined_call_operand.vmem [shape: f32[256,128], index: 5, kind: output, shape index: {}]  }
   0x1   :  { %s7251_s20 = smov 0  }
   0x2 LB: > { %s27_s21 = sadd.s32 1, %s7202_s19  ;;  %p6020_p0 = scmp.ge.s32.totalorder %s7206_s20, 1  ;;  %s7206_s20 = sphi %s7251_s20, %s15_s20   ;;  %s7202_s19 = sphi %s7249_s19, %s11576_s19   ;;  %s7198_s18 = sphi %s7247_s18, %s11575_s18  }
   0x3   : > { %p29_p1 = scmp.ge.s32.totalorder %s27_s21, 2  ;;  %p241_p2 = scmp.lt.s32.totalorder %s7206_s20, 3 }
   0x5   : > { %s11578_s21 = smov (%p29_p1, %s27_s21), 0  ;;  %p242_p3 = pnand %p6020_p0, %p241_p2 }
   0x7   : > { %245 = sbr.rel (%p242_p3) target bundleno = 2044 (0x7fc), region = 40 }
   0xe   : > { %s6024_s22 = sshll.u32 %s7198_s18, 4  ;;  %v7208_v0 = vmov 1   ;;  %v10873_v1 = vmov 0   ;;  %s6021_s27 = sshll.u32 %s7198_s18, 2  ;;  %v758_v18 = vlaneseq  ;;  %vm330_vm0 = vcmask 7168   ;;  %v660_v32 = vld [vmem:[%s10869_s2] sm:$0xff] }
   0xf   : > { %6530 = vset.pattern.permute.xlu0 %v7208_v0  ;;  %p314_p4 = scmp.lt.s32.totalorder %s6024_s22, 31  ;;  %6529 = vset.pattern.permute.xlu1 %v10873_v1  ;;  %p291_p5 = scmp.lt.s32.totalorder %s6021_s27, 7  ;;  %v7210_v19 = vmov -1e+30   ;;  %vm459_vm1 = vcmask 64512   ;;  %vm5731_vm2 = vcmask 130048  }
  0x10   : > { %331 = vst.msk [vmem:[#allocation2] sm:$0xff] %vm330_vm0, %v7210_v19  ;;  %332 = vst.msk [vmem:[#allocation2 + $0x8] sm:$0xff] %vm330_vm0, %v7210_v19  ;;  %v7435_v21 = vshrl.u32 %v758_v18, 7  ;;  %s7215_s7 = smov 16   ;;  %s7216_s8 = smov 24   ;;  %vm5748_vm3 = vcmask 195584  }
  0x11   : > { %s11580_s22 = smov (!%p314_p4, %s6024_s22), 31  ;;  %s11582_s27 = smov (!%p291_p5, %s6021_s27), 7  ;;  %333 = vst.msk [vmem:[#allocation2 + $0x10] sm:$0xff] %vm330_vm0, %v7210_v19  ;;  %334 = vst.msk [vmem:[#allocation2 + $0x18] sm:$0xff] %vm330_vm0, %v7210_v19  ;;  %vm5868_vm4 = vcmask 261120  }
  0x12   : > { %s6025_s23 = sshll.u32 %s11580_s22, 3  ;;  %s6239_s28 = sshll.u32 %s11582_s27, 4  ;;  %335 = vst.msk [vmem:[#allocation2 + $0x20] sm:$0xff] %vm330_vm0, %v7210_v19  ;;  %336 = vst.msk [vmem:[#allocation2 + $0x28] sm:$0xff] %vm330_vm0, %v7210_v19  ;;  %v1789_v29 = vsub.s32 1, %v7435_v21  ;;  %v1793_v33 = vsub.s32 5, %v7435_v21 }
  0x13   : > { %s7277_s26 = scalar_lea.vmem %s10870_s3, %s6025_s23  ;;  %s7301_s6 = scalar_lea.vmem %s10867_s0, %s6239_s28  ;;  %337 = vst.msk [vmem:[#allocation2 + $0x30] sm:$0xff] %vm330_vm0, %v7210_v19  ;;  %338 = vst.msk [vmem:[#allocation2 + $0x38] sm:$0xff] %vm330_vm0, %v7210_v19  ;;  %v7458_v34 = vsub.s32 0, %v7435_v21  ;;  %v764_v43 = vsub.s32 4, %v7435_v21 }
  0x14   : > { %v661_v2 = vld [vmem:[%s7277_s26] sm:$0xff]  ;;  %v663_v3 = vld [vmem:[%s7277_s26 + $0x10] sm:$0xff]  ;;  %v664_v4 = vld [vmem:[%s7277_s26 + $0x18] sm:$0xff]  ;;  %339 = vst.msk [vmem:[#allocation2 + $0x40] sm:$0xff] %vm330_vm0, %v7210_v19  ;;  %v1790_v39 = vrot.slane %v660_v32, %v1789_v29  ;;  %v1794_v42 = vrot.slane %v660_v32, %v1793_v33  ;;  %s10757_s12 = scalar_lea.vmem %s10872_s5, %s6025_s23 }
  0x15   : > { %1724 = vperm.xlu0 %6530, %v661_v2   ;;  %689 = vperm.xlu1 %6529, %v663_v3   ;;  %v666_v5 = vld [vmem:[%s7277_s26 + $0x28] sm:$0xff]  ;;  %v668_v6 = vld [vmem:[%s7277_s26 + $0x38] sm:$0xff]  ;;  %v665_v12 = vld [vmem:[%s7277_s26 + $0x20] sm:$0xff]  ;;  %340 = vst.msk [vmem:[#allocation2 + $0x48] sm:$0xff] %vm330_vm0, %v7210_v19  ;;  %v761_v44 = vrot.slane %v660_v32, %v7458_v34  ;;  %v7474_v57 = vrot.slane %v660_v32, %v764_v43 }
  0x16   : > { %v670_v7 = vld [vmem:[%s7277_s26 + $0x48] sm:$0xff]  ;;  %v672_v8 = vld [vmem:[%s7277_s26 + $0x58] sm:$0xff]  ;;  %v667_v13 = vld [vmem:[%s7277_s26 + $0x30] sm:$0xff]  ;;  %341 = vst.msk [vmem:[#allocation2 + $0x50] sm:$0xff] %vm330_vm0, %v7210_v19  ;;  %v7469_v52 = vrot.slane %v1790_v39, %v1789_v29  ;;  %v7472_v56 = vrot.slane %v1794_v42, %v1789_v29 }
  0x17   : > { %v674_v9 = vld [vmem:[%s7277_s26 + $0x68] sm:$0xff]  ;;  %v676_v10 = vld [vmem:[%s7277_s26 + $0x78] sm:$0xff]  ;;  %v669_v14 = vld [vmem:[%s7277_s26 + $0x40] sm:$0xff]  ;;  %342 = vst.msk [vmem:[#allocation2 + $0x58] sm:$0xff] %vm330_vm0, %v7210_v19  ;;  %v7482_v61 = vrot.slane %v761_v44, %v7458_v34 }
  0x18   : > { %v662_v11 = vld [vmem:[%s7277_s26 + $0x8] sm:$0xff]  ;;  %v671_v15 = vld [vmem:[%s7277_s26 + $0x50] sm:$0xff]  ;;  %v673_v16 = vld [vmem:[%s7277_s26 + $0x60] sm:$0xff]  ;;  %343 = vst.msk [vmem:[#allocation2 + $0x60] sm:$0xff] %vm330_vm0, %v7210_v19 }
  0x19   : > { %1736 = vperm.xlu0 %6530, %v664_v4   ;;  %694 = vperm.xlu1 %6529, %v664_v4   ;;  %v675_v17 = vld [vmem:[%s7277_s26 + $0x70] sm:$0xff]  ;;  %344 = vst.msk [vmem:[#allocation2 + $0x68] sm:$0xff] %vm330_vm0, %v7210_v19  ;;  %345 = vst.msk [vmem:[#allocation2 + $0x70] sm:$0xff] %vm330_vm0, %v7210_v19  ;;  %v7432_v20 = vld [vmem:[%s7301_s6] sm:$0xff] }
  0x1a   : > { %346 = vst.msk [vmem:[#allocation2 + $0x78] sm:$0xff] %vm330_vm0, %v7210_v19  ;;  %347 = vst.msk [vmem:[#allocation2 + $0x80] sm:$0xff] %vm330_vm0, %v7210_v19  ;;  %v7438_v22 = vld [vmem:[%s7301_s6 + $0x8] sm:$0xff]  ;;  %v7441_v23 = vld [vmem:[%s7301_s6 + $0x10] sm:$0xff]  ;;  %v532_v25 = vunpack.c.0.s8 %v7432_v20  ;;  %v538_v27 = vunpack.c.3.s8 %v7432_v20 }
  0x1b   : > { %348 = vst.msk [vmem:[#allocation2 + $0x88] sm:$0xff] %vm330_vm0, %v7210_v19  ;;  %349 = vst.msk [vmem:[#allocation2 + $0x90] sm:$0xff] %vm330_vm0, %v7210_v19  ;;  %v7444_v24 = vld [vmem:[%s7301_s6 + $0x18] sm:$0xff]  ;;  %v533_v26 = vunpack.c.0.s8 %v7438_v22  ;;  %v539_v28 = vunpack.c.3.s8 %v7438_v22  ;;  %v542_v30 = vunpack.c.1.s8 %v7441_v23  ;;  %v7463_v46 = vld [vmem:[%s7301_s6 + $0x20] sm:$0xff]  ;;  %v546_v48 = vunpack.c.3.s8 %v7441_v23 }
  0x1c   : > { %350 = vst.msk [vmem:[#allocation2 + $0x98] sm:$0xff] %vm330_vm0, %v7210_v19  ;;  %351 = vst.msk [vmem:[#allocation2 + $0xa0] sm:$0xff] %vm330_vm0, %v7210_v19  ;;  %v543_v31 = vunpack.c.1.s8 %v7444_v24  ;;  %v564_v35 = vcvt.s32.f32 %v532_v25  ;;  %v570_v37 = vcvt.s32.f32 %v538_v27  ;;  %v7466_v47 = vld [vmem:[%s7301_s6 + $0x28] sm:$0xff]  ;;  %v547_v55 = vunpack.c.3.s8 %v7444_v24  ;;  %v7479_v60 = vld [vmem:[%s7301_s6 + $0x30] sm:$0xff] }
  0x1d   : > { %1744 = vperm.xlu0 %6530, %v666_v5   ;;  %704 = vperm.xlu1 %6529, %v666_v5   ;;  %352 = vst.msk [vmem:[#allocation2 + $0xa8] sm:$0xff] %vm330_vm0, %v7210_v19  ;;  %353 = vst.msk [vmem:[#allocation2 + $0xb0] sm:$0xff] %vm330_vm0, %v7210_v19  ;;  %v565_v36 = vcvt.s32.f32 %v533_v26  ;;  %v571_v38 = vcvt.s32.f32 %v539_v28  ;;  %v574_v40 = vcvt.s32.f32 %v542_v30  ;;  %v550_v58 = vunpack.c.1.s8 %v7463_v46 }
  0x1e   : > { %354 = vst.msk [vmem:[#allocation2 + $0xb8] sm:$0xff] %vm330_vm0, %v7210_v19  ;;  %355 = vst.msk [vmem:[#allocation2 + $0xc0] sm:$0xff] %vm330_vm0, %v7210_v19  ;;  %v575_v41 = vcvt.s32.f32 %v543_v31  ;;  %v6028_v45 = vadd.f32 -1.0, %v564_v35  ;;  %v6034_v50 = vadd.f32 -1.0, %v570_v37  ;;  %v551_v59 = vunpack.c.1.s8 %v7466_v47 }
  0x1f   : > { %356 = vst.msk [vmem:[#allocation2 + $0xc8] sm:$0xff] %vm330_vm0, %v7210_v19  ;;  %357 = vst.msk [vmem:[#allocation2 + $0xd0] sm:$0xff] %vm330_vm0, %v7210_v19  ;;  %v6029_v49 = vadd.f32 -1.0, %v565_v36  ;;  %v6035_v51 = vadd.f32 -1.0, %v571_v38  ;;  %v6038_v53 = vadd.f32 -1.0, %v574_v40  ;;  %v578_v63 = vcvt.s32.f32 %v546_v48 }
  0x20   : > { %358 = vst.msk [vmem:[#allocation2 + $0xd8] sm:$0xff] %vm330_vm0, %v7210_v19  ;;  %359 = vst.msk [vmem:[#allocation2 + $0xe0] sm:$0xff] %vm330_vm0, %v7210_v19  ;;  %v6039_v54 = vadd.f32 -1.0, %v575_v41  ;;  %v7484_v62 = vmul.f32 1e+09, %v6028_v45  ;;  %v534_v26 = vunpack.c.1.s8 %v7432_v20  ;;  %v535_v27 = vunpack.c.1.s8 %v7438_v22 }
  0x21   : > { %1752 = vperm.xlu0 %6530, %v668_v6   ;;  %714 = vperm.xlu1 %6529, %v668_v6   ;;  %360 = vst.msk [vmem:[#allocation2 + $0xe8] sm:$0xff] %vm330_vm0, %v7210_v19  ;;  %361 = vst.msk [vmem:[#allocation2 + $0xf0] sm:$0xff] %vm330_vm0, %v7210_v19  ;;  %v7492_v4 = vmul.f32 1e+09, %v6034_v50  ;;  %v7494_v5 = vmul.f32 1e+09, %v6035_v51  ;;  %v555_v6 = vunpack.c.3.s8 %v7466_v47  ;;  %v537_v28 = vunpack.c.2.s8 %v7438_v22 }
  0x22   : > { %362 = vst.msk [vmem:[#allocation2 + $0xf8] sm:$0xff] %vm330_vm0, %v7210_v19  ;;  %363 = vst.msk [vmem:[#allocation2 + $0x100] sm:$0xff] %vm330_vm0, %v7210_v19  ;;  %v6042_v18 = vadd.f32 -1.0, %v578_v63  ;;  %v540_v32 = vunpack.c.0.s8 %v7441_v23  ;;  %v541_v33 = vunpack.c.0.s8 %v7444_v24  ;;  %v566_v43 = vcvt.s32.f32 %v534_v26 }
  0x23   : > { %364 = vst.msk [vmem:[#allocation2 + $0x108] sm:$0xff] %vm330_vm0, %v7210_v19  ;;  %365 = vst.msk [vmem:[#allocation2 + $0x110] sm:$0xff] %vm330_vm0, %v7210_v19  ;;  %v587_v29 = vcvt.s32.f32 %v555_v6  ;;  %v567_v44 = vcvt.s32.f32 %v535_v27  ;;  %v569_v45 = vcvt.s32.f32 %v537_v28  ;;  %v545_v26 = vunpack.c.2.s8 %v7444_v24 }
  0x24   : > { %366 = vst.msk [vmem:[#allocation2 + $0x118] sm:$0xff] %vm330_vm0, %v7210_v19  ;;  %367 = vst.msk [vmem:[#allocation2 + $0x120] sm:$0xff] %vm330_vm0, %v7210_v19  ;;  %v7519_v41 = vmul.f32 1e+09, %v6042_v18  ;;  %v572_v51 = vcvt.s32.f32 %v540_v32  ;;  %v548_v28 = vunpack.c.0.s8 %v7463_v46  ;;  %v7556_v24 = vrot.slane %v7474_v57, %v7458_v34 }
  0x25   : > { %1760 = vperm.xlu0 %6530, %v670_v7   ;;  %724 = vperm.xlu1 %6529, %v670_v7   ;;  %368 = vst.msk [vmem:[#allocation2 + $0x128] sm:$0xff] %vm330_vm0, %v7210_v19  ;;  %369 = vst.msk [vmem:[#allocation2 + $0x130] sm:$0xff] %vm330_vm0, %v7210_v19  ;;  %v6051_v48 = vadd.f32 -1.0, %v587_v29 }
  0x26   : > { %370 = vst.msk [vmem:[#allocation2 + $0x138] sm:$0xff] %vm330_vm0, %v7210_v19  ;;  %371 = vst.msk [vmem:[#allocation2 + $0x140] sm:$0xff] %vm330_vm0, %v7210_v19  ;;  %v580_v57 = vcvt.s32.f32 %v548_v28 }
  0x27   : > { %372 = vst.msk [vmem:[#allocation2 + $0x148] sm:$0xff] %vm330_vm0, %v7210_v19  ;;  %373 = vst.msk [vmem:[#allocation2 + $0x150] sm:$0xff] %vm330_vm0, %v7210_v19 }
  0x28   : > { %374 = vst.msk [vmem:[#allocation2 + $0x158] sm:$0xff] %vm330_vm0, %v7210_v19  ;;  %375 = vst.msk [vmem:[#allocation2 + $0x160] sm:$0xff] %vm330_vm0, %v7210_v19 }
  0x29   : > { %1768 = vperm.xlu0 %6530, %v672_v8   ;;  %734 = vperm.xlu1 %6529, %v672_v8   ;;  %376 = vst.msk [vmem:[#allocation2 + $0x168] sm:$0xff] %vm330_vm0, %v7210_v19  ;;  %377 = vst.msk [vmem:[#allocation2 + $0x170] sm:$0xff] %vm330_vm0, %v7210_v19 }
  0x2a   : > { %378 = vst.msk [vmem:[#allocation2 + $0x178] sm:$0xff] %vm330_vm0, %v7210_v19  ;;  %379 = vst.msk [vmem:[#allocation2 + $0x180] sm:$0xff] %vm330_vm0, %v7210_v19 }
  0x2b   : > { %380 = vst.msk [vmem:[#allocation2 + $0x188] sm:$0xff] %vm330_vm0, %v7210_v19  ;;  %381 = vst.msk [vmem:[#allocation2 + $0x190] sm:$0xff] %vm330_vm0, %v7210_v19 }
  0x2c   : > { %382 = vst.msk [vmem:[#allocation2 + $0x198] sm:$0xff] %vm330_vm0, %v7210_v19  ;;  %383 = vst.msk [vmem:[#allocation2 + $0x1a0] sm:$0xff] %vm330_vm0, %v7210_v19 }
  0x2d   : > { %1776 = vperm.xlu0 %6530, %v674_v9   ;;  %744 = vperm.xlu1 %6529, %v674_v9   ;;  %384 = vst.msk [vmem:[#allocation2 + $0x1a8] sm:$0xff] %vm330_vm0, %v7210_v19  ;;  %385 = vst.msk [vmem:[#allocation2 + $0x1b0] sm:$0xff] %vm330_vm0, %v7210_v19  ;;  %v7501_v9 = vmul.f32 1e+09, %v6038_v53  ;;  %v573_v53 = vcvt.s32.f32 %v541_v33 }
  0x2e   : > { %386 = vst.msk [vmem:[#allocation2 + $0x1b8] sm:$0xff] %vm330_vm0, %v7210_v19  ;;  %387 = vst.msk [vmem:[#allocation2 + $0x1c0] sm:$0xff] %vm330_vm0, %v7210_v19 }
  0x2f   : > { %388 = vst.msk [vmem:[#allocation2 + $0x1c8] sm:$0xff] %vm330_vm0, %v7210_v19  ;;  %389 = vst.msk [vmem:[#allocation2 + $0x1d0] sm:$0xff] %vm330_vm0, %v7210_v19 }
  0x30   : > { %390 = vst.msk [vmem:[#allocation2 + $0x1d8] sm:$0xff] %vm330_vm0, %v7210_v19  ;;  %391 = vst.msk [vmem:[#allocation2 + $0x1e0] sm:$0xff] %vm330_vm0, %v7210_v19 }
  0x31   : > { %1784 = vperm.xlu0 %6530, %v676_v10   ;;  %754 = vperm.xlu1 %6529, %v676_v10   ;;  %392 = vst.msk [vmem:[#allocation2 + $0x1e8] sm:$0xff] %vm330_vm0, %v7210_v19  ;;  %393 = vst.msk [vmem:[#allocation2 + $0x1f0] sm:$0xff] %vm330_vm0, %v7210_v19  ;;  %v7503_v10 = vmul.f32 1e+09, %v6039_v54 }
  0x32   : > { %394 = vst.msk [vmem:[#allocation2 + $0x1f8] sm:$0xff] %vm330_vm0, %v7210_v19  ;;  %11093 = vst [vmem:[#allocation5_spill] sm:$0xff] %v7435_v21 }
  0x33   : > { %11094 = vst [vmem:[#allocation6_spill] sm:$0xff] %v7484_v62  ;;  %11096 = vst [vmem:[#allocation8_spill] sm:$0xff] %v7492_v4 }
  0x34   : > { %11097 = vst [vmem:[#allocation9_spill] sm:$0xff] %v7494_v5  ;;  %11098 = vst [vmem:[#allocation10_spill] sm:$0xff] %v7501_v9 }
  0x35   : > { %6532 = vset.pattern.permute.xlu0 %v10873_v1  ;;  %6531 = vset.pattern.permute.xlu1 %v7208_v0  ;;  %v7487_v0 = vld [vmem:[%s7301_s6 + $0x38] sm:$0xff]  ;;  %11099 = vst [vmem:[#allocation11_spill] sm:$0xff] %v7503_v10  ;;  %11100 = vst [vmem:[#allocation12_spill] sm:$0xff] %v7519_v41  ;;  %s7214_s6 = smov 8  }
  0x36   : > { %679 = vperm.xlu0 %6532, %v661_v2   ;;  %1728 = vperm.xlu1 %6531, %v662_v11   ;;  %v554_v2 = vunpack.c.3.s8 %v7463_v46  ;;  %v563_v25 = vunpack.c.3.s8 %v7487_v0 }
  0x38   : > { %v586_v19 = vcvt.s32.f32 %v554_v2  ;;  %v595_v22 = vcvt.s32.f32 %v563_v25  ;;  %v6037_v25 = vadd.f32 -1.0, %v573_v53 }
  0x3a   : > { %684 = vperm.xlu0 %6532, %v662_v11   ;;  %1732 = vperm.xlu1 %6531, %v663_v3   ;;  %v7490_v3 = vmul.f32 1e+09, %v6029_v49  ;;  %v579_v11 = vcvt.s32.f32 %v547_v55  ;;  %v6050_v42 = vadd.f32 -1.0, %v586_v19  ;;  %v6036_v19 = vadd.f32 -1.0, %v572_v51 }
  0x3c   : > { %11095 = vst [vmem:[#allocation7_spill] sm:$0xff] %v7490_v3  ;;  %v6043_v35 = vadd.f32 -1.0, %v579_v11  ;;  %v544_v11 = vunpack.c.2.s8 %v7441_v23  ;;  %v549_v23 = vunpack.c.0.s8 %v7466_v47 }
  0x3e   : > { %699 = vperm.xlu0 %6532, %v665_v12   ;;  %1740 = vperm.xlu1 %6531, %v665_v12   ;;  %v558_v12 = vunpack.c.1.s8 %v7479_v60  ;;  %v7525_v54 = vmul.f32 1e+09, %v6043_v35 }
  0x40   : > { %v590_v36 = vcvt.s32.f32 %v558_v12  ;;  %11101 = vst [vmem:[#allocation13_spill] sm:$0xff] %v7525_v54  ;;  %v7532_v12 = vmul.f32 1e+09, %v6050_v42 }
  0x42   : > { %709 = vperm.xlu0 %6532, %v667_v13   ;;  %1748 = vperm.xlu1 %6531, %v667_v13   ;;  %v582_v13 = vcvt.s32.f32 %v550_v58  ;;  %v6054_v55 = vadd.f32 -1.0, %v590_v36  ;;  %11104 = vst [vmem:[#allocation16_spill] sm:$0xff] %v7532_v12  ;;  %v576_v36 = vcvt.s32.f32 %v544_v11  ;;  %v560_v11 = vunpack.c.2.s8 %v7479_v60 }
  0x44   : > { %v6046_v37 = vadd.f32 -1.0, %v582_v13  ;;  %v6059_v13 = vadd.f32 -1.0, %v595_v22  ;;  %v7539_v27 = vmul.f32 1e+09, %v6054_v55  ;;  %v6040_v51 = vadd.f32 -1.0, %v576_v36 }
  0x45   : > { %v556_v55 = vunpack.c.0.s8 %v7479_v60  ;;  %v592_v21 = vcvt.s32.f32 %v560_v11 }
  0x46   : > { %719 = vperm.xlu0 %6532, %v669_v14   ;;  %1756 = vperm.xlu1 %6531, %v669_v14   ;;  %v583_v14 = vcvt.s32.f32 %v551_v59  ;;  %v7527_v58 = vmul.f32 1e+09, %v6046_v37  ;;  %11106 = vst [vmem:[#allocation18_spill] sm:$0xff] %v7539_v27  ;;  %v552_v37 = vunpack.c.2.s8 %v7463_v46  ;;  %v7570_v46 = vmul.f32 1e+09, %v6037_v25 }
  0x48   : > { %v6047_v38 = vadd.f32 -1.0, %v583_v14  ;;  %11102 = vst [vmem:[#allocation14_spill] sm:$0xff] %v7527_v58  ;;  %v6030_v14 = vadd.f32 -1.0, %v566_v43  ;;  %v7568_v43 = vmul.f32 1e+09, %v6036_v19  ;;  %11116 = vst [vmem:[#allocation28_spill] sm:$0xff] %v7570_v46  ;;  %v584_v53 = vcvt.s32.f32 %v552_v37 }
  0x4a   : > { %729 = vperm.xlu0 %6532, %v671_v15   ;;  %1764 = vperm.xlu1 %6531, %v671_v15   ;;  %v559_v15 = vunpack.c.1.s8 %v7487_v0  ;;  %v7529_v59 = vmul.f32 1e+09, %v6047_v38  ;;  %v7552_v38 = vmul.f32 1e+09, %v6059_v13  ;;  %11115 = vst [vmem:[#allocation27_spill] sm:$0xff] %v7568_v43 }
  0x4c   : > { %v591_v39 = vcvt.s32.f32 %v559_v15  ;;  %11103 = vst [vmem:[#allocation15_spill] sm:$0xff] %v7529_v59  ;;  %v6031_v15 = vadd.f32 -1.0, %v567_v44  ;;  %11110 = vst [vmem:[#allocation22_spill] sm:$0xff] %v7552_v38  ;;  %v577_v44 = vcvt.s32.f32 %v545_v26  ;;  %v6044_v26 = vadd.f32 -1.0, %v580_v57 }
  0x4e   : > { %739 = vperm.xlu0 %6532, %v673_v16   ;;  %1772 = vperm.xlu1 %6531, %v673_v16   ;;  %v562_v16 = vunpack.c.3.s8 %v7479_v60  ;;  %v6055_v63 = vadd.f32 -1.0, %v591_v39  ;;  %v7558_v39 = vmul.f32 1e+09, %v6030_v14  ;;  %v6041_v19 = vadd.f32 -1.0, %v577_v44 }
  0x4f   : > { %v6048_v60 = vadd.f32 -1.0, %v584_v53  ;;  %v7597_v57 = vmul.f32 1e+09, %v6044_v26 }
  0x50   : > { %v594_v40 = vcvt.s32.f32 %v562_v16  ;;  %v6033_v16 = vadd.f32 -1.0, %v569_v45  ;;  %v7543_v29 = vmul.f32 1e+09, %v6055_v63  ;;  %11111 = vst [vmem:[#allocation23_spill] sm:$0xff] %v7558_v39  ;;  %v581_v45 = vcvt.s32.f32 %v549_v23 }
  0x51   : > { %v557_v63 = vunpack.c.0.s8 %v7487_v0  ;;  %v7591_v23 = vmul.f32 1e+09, %v6040_v51  ;;  %11121 = vst [vmem:[#allocation33_spill] sm:$0xff] %v7597_v57 }
  0x52   : > { %749 = vperm.xlu0 %6532, %v675_v17   ;;  %1780 = vperm.xlu1 %6531, %v675_v17   ;;  %v536_v17 = vunpack.c.2.s8 %v7432_v20  ;;  %v6058_v2 = vadd.f32 -1.0, %v594_v40  ;;  %11107 = vst [vmem:[#allocation19_spill] sm:$0xff] %v7543_v29  ;;  %v7560_v40 = vmul.f32 1e+09, %v6031_v15  ;;  %v6045_v28 = vadd.f32 -1.0, %v581_v45 }
  0x53   : > { %11118 = vst [vmem:[#allocation30_spill] sm:$0xff] %v7591_v23  ;;  %v589_v36 = vcvt.s32.f32 %v557_v63  ;;  %v7595_v29 = vmul.f32 1e+09, %v6041_v19 }
  0x54   : > { %v568_v20 = vcvt.s32.f32 %v536_v17  ;;  %v7534_v17 = vmul.f32 1e+09, %v6051_v48  ;;  %v7545_v32 = vmul.f32 1e+09, %v6058_v2  ;;  %11112 = vst [vmem:[#allocation24_spill] sm:$0xff] %v7560_v40  ;;  %v553_v48 = vunpack.c.2.s8 %v7466_v47 }
  0x55   : > { %11120 = vst [vmem:[#allocation32_spill] sm:$0xff] %v7595_v29  ;;  %v7599_v45 = vmul.f32 1e+09, %v6045_v28  ;;  %v6053_v11 = vadd.f32 -1.0, %v589_v36 }
  0x56   : > { %6533 = vset.pattern.permute.xlu1 %v10873_v1  ;;  %v6032_v6 = vadd.f32 -1.0, %v568_v20  ;;  %11105 = vst [vmem:[#allocation17_spill] sm:$0xff] %v7534_v17  ;;  %11108 = vst [vmem:[#allocation20_spill] sm:$0xff] %v7545_v32  ;;  %v7562_v20 = vmul.f32 1e+09, %v6033_v16 }
  0x57   : > { %11122 = vst [vmem:[#allocation34_spill] sm:$0xff] %v7599_v45 }
  0x58   : > { %v7549_v35 = vmul.f32 1e+09, %v6032_v6  ;;  %11113 = vst [vmem:[#allocation25_spill] sm:$0xff] %v7562_v20 }
  0x5a   : > { %11109 = vst [vmem:[#allocation21_spill] sm:$0xff] %v7549_v35 }
  0x94   : > { %v7497_v7 = vpop.permute.xlu0 %1724  ;;  %v7499_v8 = vpop.permute.xlu1 %689 }
  0x95   : > { %v780_v42 = vadd.f32 %v7482_v61, %v7499_v8  ;;  %v781_v34 = vadd.f32 %v7556_v24, %v7499_v8  ;;  %v1805_v2 = vadd.f32 %v7469_v52, %v7497_v7  ;;  %v1806_v6 = vadd.f32 %v7472_v56, %v7497_v7 }
  0x96   : > { %v561_v8 = vunpack.c.2.s8 %v7487_v0  ;;  %v585_v7 = vcvt.s32.f32 %v553_v48  ;;  %v588_v0 = vcvt.s32.f32 %v556_v55  ;;  %v7607_v55 = vmul.f32 1e+09, %v6048_v60 }
  0x97   : > { %v812_v13 = vmul.f32 0.2, %v780_v42  ;;  %v813_v25 = vmul.f32 0.2, %v781_v34  ;;  %v1837_v37 = vmul.f32 0.2, %v1805_v2 }
  0x98   : > { %v7513_v30 = vpop.permute.xlu0 %1736  ;;  %v7515_v31 = vpop.permute.xlu1 %694  ;;  %v1838_v1 = vmul.f32 0.2, %v1806_v6  ;;  %v593_v38 = vcvt.s32.f32 %v561_v8  ;;  %v6049_v48 = vadd.f32 -1.0, %v585_v7  ;;  %11123 = vst [vmem:[#allocation35_spill] sm:$0xff] %v7607_v55  ;;  %v6052_v63 = vadd.f32 -1.0, %v588_v0 }
  0x99   : > { %v782_v47 = vadd.f32 %v7482_v61, %v7515_v31  ;;  %v783_v14 = vadd.f32 %v7556_v24, %v7515_v31  ;;  %v845_v44 = vmax.f32 %v781_v34, %v813_v25  ;;  %v7603_v51 = vadd.f32 %v7469_v52, %v7513_v30 }
  0x9a   : > { %v6056_v8 = vadd.f32 -1.0, %v592_v21  ;;  %v1870_v19 = vmax.f32 %v1806_v6, %v1838_v1  ;;  %v7611_v34 = vadd.f32 %v7472_v56, %v7513_v30  ;;  %v7640_v6 = vmul.f32 1e+09, %v6052_v63 }
  0x9b   : > { %v814_v32 = vmul.f32 0.2, %v782_v47  ;;  %v815_v31 = vmul.f32 0.2, %v783_v14  ;;  %v7631_v30 = vadd.f32 %v845_v44, %v7562_v20 }
  0x9c   : > { %v7521_v49 = vpop.permute.xlu0 %1744  ;;  %v7523_v50 = vpop.permute.xlu1 %704  ;;  %11130 = vst [vmem:[#allocation42_spill] sm:$0xff] %v7640_v6  ;;  %v7653_v0 = vmul.f32 0.2, %v7611_v34 }
  0x9d   : > { %v846_v28 = vmax.f32 %v782_v47, %v814_v32  ;;  %v847_v7 = vmax.f32 %v783_v14, %v815_v31  ;;  %v7620_v60 = vadd.f32 %v7469_v52, %v7521_v49  ;;  %v7624_v21 = vadd.f32 %v7482_v61, %v7523_v50  ;;  %11127 = vst [vmem:[#allocation39_spill] sm:$0xff] %v7631_v30 }
  0x9e   : > { %v7628_v1 = vadd.f32 %v7556_v24, %v7523_v50  ;;  %v7636_v32 = vadd.f32 %v7472_v56, %v7521_v49  ;;  %v7642_v47 = vmul.f32 1e+09, %v6053_v11  ;;  %v7644_v14 = vmul.f32 1e+09, %v6056_v8 }
  0x9f   : > { %11126 = vst [vmem:[#allocation38_spill] sm:$0xff] %v7620_v60  ;;  %v7658_v49 = vadd.f32 %v846_v28, %v7492_v4  ;;  %v7666_v44 = vmul.f32 0.2, %v7620_v60 }
  0xa0   : > { %v7536_v18 = vpop.permute.xlu0 %1752  ;;  %v7547_v33 = vpop.permute.xlu1 %714  ;;  %11128 = vst [vmem:[#allocation40_spill] sm:$0xff] %v7636_v32  ;;  %11131 = vst [vmem:[#allocation43_spill] sm:$0xff] %v7642_v47  ;;  %v819_v63 = vmul.f32 0.2, %v7628_v1 }
  0xa1   : > { %11132 = vst [vmem:[#allocation44_spill] sm:$0xff] %v7644_v14  ;;  %11135 = vst [vmem:[#allocation47_spill] sm:$0xff] %v7658_v49  ;;  %v7692_v20 = vadd.f32 %v7472_v56, %v7536_v18 }
  0xa2   : > { %11138 = vst [vmem:[#allocation50_spill] sm:$0xff] %v7666_v44  ;;  %v851_v8 = vmax.f32 %v7628_v1, %v819_v63 }
  0xa3   : > { %11141 = vst [vmem:[#allocation53_spill] sm:$0xff] %v7692_v20 }
  0xa4   : > { %v7566_v22 = vpop.permute.xlu0 %1760  ;;  %v7589_v16 = vpop.permute.xlu1 %724 }
  0xa5   : > { %11114 = vst [vmem:[#allocation26_spill] sm:$0xff] %v7566_v22 }
  0xa8   : > { %v7587_v15 = vpop.permute.xlu0 %1768  ;;  %v7605_v53 = vpop.permute.xlu1 %734 }
  0xa9   : > { %11117 = vst [vmem:[#allocation29_spill] sm:$0xff] %v7587_v15  ;;  %v844_v15 = vmax.f32 %v780_v42, %v812_v13  ;;  %v6057_v42 = vadd.f32 -1.0, %v593_v38  ;;  %v1869_v13 = vmax.f32 %v1805_v2, %v1837_v37  ;;  %v1843_v38 = vmul.f32 0.2, %v7603_v51 }
  0xaa   : > { %v7638_v2 = vmul.f32 1e+09, %v6049_v48  ;;  %v7661_v37 = vadd.f32 %v847_v7, %v7494_v5  ;;  %v818_v48 = vmul.f32 0.2, %v7624_v21  ;;  %v7680_v7 = vadd.f32 %v7469_v52, %v7536_v18 }
  0xab   : > { %v7616_v26 = vadd.f32 %v844_v15, %v7549_v35  ;;  %v7647_v50 = vadd.f32 %v1869_v13, %v7484_v62  ;;  %v7650_v15 = vadd.f32 %v1870_v19, %v7490_v3  ;;  %v7663_v31 = vmul.f32 1e+09, %v6057_v42 }
  0xac   : > { %v7593_v22 = vpop.permute.xlu0 %1776  ;;  %11129 = vst [vmem:[#allocation41_spill] sm:$0xff] %v7638_v2  ;;  %v7655_v36 = vpop.permute.xlu1 %744  ;;  %11136 = vst [vmem:[#allocation48_spill] sm:$0xff] %v7661_v37  ;;  %v7673_v13 = vmul.f32 0.2, %v7636_v32  ;;  %v1875_v42 = vmax.f32 %v7603_v51, %v1843_v38  ;;  %v794_v35 = vadd.f32 %v7482_v61, %v7589_v16  ;;  %v795_v32 = vadd.f32 %v7556_v24, %v7589_v16 }
  0xad   : > { %11119 = vst [vmem:[#allocation31_spill] sm:$0xff] %v7593_v22  ;;  %11125 = vst [vmem:[#allocation37_spill] sm:$0xff] %v7616_v26  ;;  %v7686_v22 = vadd.f32 %v7556_v24, %v7547_v33  ;;  %v7707_v38 = vmul.f32 0.2, %v7680_v7  ;;  %v1876_v16 = vmax.f32 %v7611_v34, %v7653_v0 }
  0xae   : > { %11133 = vst [vmem:[#allocation45_spill] sm:$0xff] %v7647_v50  ;;  %11134 = vst [vmem:[#allocation46_spill] sm:$0xff] %v7650_v15 }
  0xaf   : > { %11137 = vst [vmem:[#allocation49_spill] sm:$0xff] %v7663_v31  ;;  %11139 = vst [vmem:[#allocation51_spill] sm:$0xff] %v7673_v13  ;;  %v850_v13 = vmax.f32 %v7624_v21, %v818_v48  ;;  %v823_v14 = vmul.f32 0.2, %v7686_v22 }
  0xb0   : > { %v7613_v25 = vpop.permute.xlu0 %1784  ;;  %11140 = vst [vmem:[#allocation52_spill] sm:$0xff] %v7680_v7  ;;  %v7702_v15 = vpop.permute.xlu1 %754  ;;  %11142 = vst [vmem:[#allocation54_spill] sm:$0xff] %v7707_v38 }
  0xb1   : > { %11124 = vst [vmem:[#allocation36_spill] sm:$0xff] %v7613_v25  ;;  %v790_v25 = vadd.f32 %v7482_v61, %v7547_v33 }
  0xb3   : > { %v822_v31 = vmul.f32 0.2, %v790_v25 }
  0xb5   : > { %v680_v11 = vpop.permute.xlu0 %679 }
  0xb6   : > { %v776_v19 = vadd.f32 %v7482_v61, %v680_v11  ;;  %v777_v28 = vadd.f32 %v7556_v24, %v680_v11 }
  0xb8   : > { %v808_v11 = vmul.f32 0.2, %v776_v19  ;;  %v809_v51 = vmul.f32 0.2, %v777_v28 }
  0xb9   : > { %v685_v33 = vpop.permute.xlu0 %684 }
  0xba   : > { %v778_v18 = vadd.f32 %v7482_v61, %v685_v33  ;;  %v779_v50 = vadd.f32 %v7556_v24, %v685_v33  ;;  %v840_v60 = vmax.f32 %v776_v19, %v808_v11  ;;  %v841_v44 = vmax.f32 %v777_v28, %v809_v51 }
  0xbb   : > { %v7719_v19 = vmul.f32 0.2, %v7692_v20  ;;  %v826_v28 = vmul.f32 0.2, %v794_v35  ;;  %v827_v11 = vmul.f32 0.2, %v795_v32  ;;  %v7722_v33 = vadd.f32 %v1875_v42, %v7492_v4 }
  0xbc   : > { %v810_v21 = vmul.f32 0.2, %v778_v18  ;;  %v811_v48 = vmul.f32 0.2, %v779_v50  ;;  %v7713_v1 = vadd.f32 %v840_v60, %v7484_v62  ;;  %v7716_v63 = vadd.f32 %v841_v44, %v7490_v3  ;;  %v7728_v62 = vpop.permute.xlu1 %1728 }
  0xbd   : > { %11144 = vst [vmem:[#allocation56_spill] sm:$0xff] %v7719_v19  ;;  %v700_v51 = vpop.permute.xlu0 %699  ;;  %11145 = vst [vmem:[#allocation57_spill] sm:$0xff] %v7722_v33  ;;  %v7731_v3 = vadd.f32 %v850_v13, %v7501_v9  ;;  %v7734_v20 = vadd.f32 %v851_v8, %v7503_v10  ;;  %v854_v19 = vmax.f32 %v790_v25, %v822_v31 }
  0xbe   : > { %11143 = vst [vmem:[#allocation55_spill] sm:$0xff] %v7716_v63  ;;  %v784_v7 = vadd.f32 %v7482_v61, %v700_v51  ;;  %v785_v34 = vadd.f32 %v7556_v24, %v700_v51  ;;  %v920_v60 = vmax.f32 %v7713_v1, %v7716_v63  ;;  %v842_v0 = vmax.f32 %v778_v18, %v810_v21  ;;  %v11191_v63 = vld [vmem:[#allocation46_spill] sm:$0xff] }
  0xbf   : > { %v843_v44 = vmax.f32 %v779_v50, %v811_v48  ;;  %11146 = vst [vmem:[#allocation58_spill] sm:$0xff] %v7731_v3  ;;  %11147 = vst [vmem:[#allocation59_spill] sm:$0xff] %v7734_v20  ;;  %v855_v51 = vmax.f32 %v7686_v22, %v823_v14  ;;  %v7742_v18 = vadd.f32 %v7482_v61, %v7605_v53 }
  0xc0   : > { %v816_v42 = vmul.f32 0.2, %v784_v7  ;;  %v817_v4 = vmul.f32 0.2, %v785_v34  ;;  %921 = vmax.xlane.f32.xlu0 %v920_v60  ;;  %v7737_v38 = vadd.f32 %v842_v0, %v7558_v39  ;;  %v858_v21 = vmax.f32 %v794_v35, %v826_v28 }
  0xc1   : > { %v710_v50 = vpop.permute.xlu0 %709  ;;  %v7745_v13 = vadd.f32 %v843_v44, %v7560_v40  ;;  %v859_v8 = vmax.f32 %v795_v32, %v827_v11  ;;  %v799_v0 = vadd.f32 %v7556_v24, %v7605_v53  ;;  %v7754_v14 = vadd.f32 %v854_v19, %v7519_v41 }
  0xc2   : > { %11148 = vst [vmem:[#allocation60_spill] sm:$0xff] %v7737_v38  ;;  %v788_v25 = vadd.f32 %v7482_v61, %v710_v50  ;;  %v789_v31 = vadd.f32 %v7556_v24, %v710_v50  ;;  %v848_v48 = vmax.f32 %v784_v7, %v816_v42  ;;  %v849_v60 = vmax.f32 %v785_v34, %v817_v4  ;;  %v7768_v7 = vpop.permute.xlu1 %1732 }
  0xc3   : > { %11149 = vst [vmem:[#allocation61_spill] sm:$0xff] %v7745_v13  ;;  %v923_v22 = vmax.f32 %v7737_v38, %v7745_v13  ;;  %11150 = vst [vmem:[#allocation62_spill] sm:$0xff] %v7754_v14  ;;  %v7757_v44 = vadd.f32 %v1876_v16, %v7494_v5  ;;  %v11152_v28 = vmax.f32 %v7616_v26, %v7631_v30  ;;  %v830_v19 = vmul.f32 0.2, %v7742_v18  ;;  %v11185_v30 = vld [vmem:[#allocation29_spill] sm:$0xff] }
  0xc4   : > { %v820_v35 = vmul.f32 0.2, %v788_v25  ;;  %v821_v32 = vmul.f32 0.2, %v789_v31  ;;  %v7763_v4 = vadd.f32 %v848_v48, %v7568_v43  ;;  %v7766_v53 = vadd.f32 %v849_v60, %v7570_v46  ;;  %v11190_v26 = vld [vmem:[#allocation45_spill] sm:$0xff] }
  0xc5   : > { %11151 = vst [vmem:[#allocation63_spill] sm:$0xff] %v7757_v44  ;;  %927 = vmax.xlane.f32.xlu0 %v11152_v28  ;;  %924 = vmax.xlane.f32.xlu1 %v923_v22  ;;  %v720_v11 = vpop.permute.xlu0 %719  ;;  %v7772_v16 = vadd.f32 %v855_v51, %v7525_v54  ;;  %v7775_v34 = vadd.f32 %v858_v21, %v7527_v58  ;;  %v831_v5 = vmul.f32 0.2, %v799_v0 }
  0xc6   : > { %11153 = vst [vmem:[#allocation64_spill] sm:$0xff] %v7763_v4  ;;  %11154 = vst [vmem:[#allocation65_spill] sm:$0xff] %v7766_v53  ;;  %v7778_v42 = vadd.f32 %v859_v8, %v7529_v59  ;;  %v792_v50 = vadd.f32 %v7482_v61, %v720_v11  ;;  %v793_v48 = vadd.f32 %v7556_v24, %v720_v11 }
  0xc7   : > { %11155 = vst [vmem:[#allocation66_spill] sm:$0xff] %v7772_v16  ;;  %11156 = vst [vmem:[#allocation67_spill] sm:$0xff] %v7775_v34  ;;  %v932_v60 = vmax.f32 %v7763_v4, %v7766_v53  ;;  %v852_v28 = vmax.f32 %v788_v25, %v820_v35  ;;  %v7786_v22 = vadd.f32 %v7482_v61, %v7655_v36 }
  0xc8   : > { %11157 = vst [vmem:[#allocation68_spill] sm:$0xff] %v7778_v42  ;;  %v7790_v51 = vadd.f32 %v7556_v24, %v7655_v36  ;;  %v853_v21 = vmax.f32 %v789_v31, %v821_v32  ;;  %v824_v8 = vmul.f32 0.2, %v792_v50  ;;  %v825_v13 = vmul.f32 0.2, %v793_v48 }
  0xc9   : > { %v11158_v38 = vmax.f32 %v7658_v49, %v7661_v37  ;;  %v7796_v11 = vadd.f32 %v852_v28, %v7591_v23  ;;  %v935_v25 = vmax.f32 %v7731_v3, %v7734_v20  ;;  %933 = vmax.xlane.f32.xlu1 %v932_v60  ;;  %v730_v35 = vpop.permute.xlu0 %729  ;;  %v941_v36 = vmax.f32 %v7754_v14, %v7772_v16  ;;  %v1741_v20 = vpop.permute.xlu1 %1740 }
  0xca   : > { %v7801_v53 = vadd.f32 %v853_v21, %v7595_v29  ;;  %v947_v31 = vmax.f32 %v7775_v34, %v7778_v42  ;;  %v862_v32 = vmax.f32 %v7742_v18, %v830_v19  ;;  %v797_v28 = vadd.f32 %v7556_v24, %v730_v35 }
  0xcb   : > { %930 = vmax.xlane.f32.xlu0 %v11158_v38  ;;  %11159 = vst [vmem:[#allocation69_spill] sm:$0xff] %v7796_v11  ;;  %v796_v38 = vadd.f32 %v7482_v61, %v730_v35  ;;  %v856_v4 = vmax.f32 %v792_v50, %v824_v8  ;;  %v857_v37 = vmax.f32 %v793_v48, %v825_v13  ;;  %v834_v60 = vmul.f32 0.2, %v7786_v22 }
  0xcc   : > { %11160 = vst [vmem:[#allocation70_spill] sm:$0xff] %v7801_v53  ;;  %v835_v21 = vmul.f32 0.2, %v7790_v51  ;;  %v938_v3 = vmax.f32 %v7796_v11, %v7801_v53  ;;  %v863_v16 = vmax.f32 %v799_v0, %v831_v5  ;;  %v829_v49 = vmul.f32 0.2, %v797_v28 }
  0xcd   : > { %v828_v14 = vmul.f32 0.2, %v796_v38  ;;  %v7815_v18 = vadd.f32 %v856_v4, %v7597_v57  ;;  %v7818_v19 = vadd.f32 %v857_v37, %v7599_v45  ;;  %v7822_v13 = vadd.f32 %v7482_v61, %v7702_v15  ;;  %v740_v48 = vpop.permute.xlu0 %739  ;;  %v1749_v11 = vpop.permute.xlu1 %1748 }
  0xce   : > { %v7826_v50 = vadd.f32 %v7556_v24, %v7702_v15  ;;  %939 = vmax.xlane.f32.xlu1 %v938_v3  ;;  %v7829_v5 = vadd.f32 %v862_v32, %v7532_v12  ;;  %v7833_v0 = vadd.f32 %v7469_v52, %v7728_v62  ;;  %v800_v37 = vadd.f32 %v7482_v61, %v740_v48 }
  0xcf   : > { %936 = vmax.xlane.f32.xlu0 %v935_v25  ;;  %11161 = vst [vmem:[#allocation71_spill] sm:$0xff] %v7815_v18  ;;  %11162 = vst [vmem:[#allocation72_spill] sm:$0xff] %v7818_v19  ;;  %v801_v4 = vadd.f32 %v7556_v24, %v740_v48  ;;  %v944_v8 = vmax.f32 %v7815_v18, %v7818_v19  ;;  %v860_v25 = vmax.f32 %v796_v38, %v828_v14 }
  0xd0   : > { %11163 = vst [vmem:[#allocation73_spill] sm:$0xff] %v7829_v5  ;;  %v861_v35 = vmax.f32 %v797_v28, %v829_v49  ;;  %v7840_v15 = vadd.f32 %v863_v16, %v7534_v17  ;;  %v1808_v3 = vadd.f32 %v7472_v56, %v7728_v62  ;;  %v866_v32 = vmax.f32 %v7786_v22, %v834_v60 }
  0xd1   : > { %v832_v42 = vmul.f32 0.2, %v800_v37  ;;  %v833_v34 = vmul.f32 0.2, %v801_v4  ;;  %v7846_v53 = vadd.f32 %v860_v25, %v7607_v55  ;;  %v867_v48 = vmax.f32 %v7790_v51, %v835_v21  ;;  %v750_v16 = vpop.permute.xlu0 %749 }
  0xd2   : > { %11164 = vst [vmem:[#allocation74_spill] sm:$0xff] %v7840_v15  ;;  %v838_v14 = vmul.f32 0.2, %v7822_v13  ;;  %v839_v49 = vmul.f32 0.2, %v7826_v50  ;;  %945 = vmax.xlane.f32.xlu1 %v944_v8  ;;  %v7852_v38 = vadd.f32 %v861_v35, %v7638_v2  ;;  %v804_v22 = vadd.f32 %v7482_v61, %v750_v16 }
  0xd3   : > { %942 = vmax.xlane.f32.xlu0 %v941_v36  ;;  %11165 = vst [vmem:[#allocation75_spill] sm:$0xff] %v7846_v53  ;;  %v1839_v62 = vmul.f32 0.2, %v7833_v0  ;;  %v805_v36 = vadd.f32 %v7556_v24, %v750_v16  ;;  %v864_v28 = vmax.f32 %v800_v37, %v832_v42  ;;  %v865_v60 = vmax.f32 %v801_v4, %v833_v34  ;;  %v11170_v42 = vld [vmem:[#allocation19_spill] sm:$0xff] }
  0xd4   : > { %11166 = vst [vmem:[#allocation76_spill] sm:$0xff] %v7852_v38  ;;  %v950_v51 = vmax.f32 %v7846_v53, %v7852_v38  ;;  %v1840_v21 = vmul.f32 0.2, %v1808_v3  ;;  %v1809_v25 = vadd.f32 %v7469_v52, %v7768_v7  ;;  %v1810_v8 = vadd.f32 %v7472_v56, %v7768_v7 }
  0xd5   : > { %v836_v35 = vmul.f32 0.2, %v804_v22  ;;  %v837_v19 = vmul.f32 0.2, %v805_v36  ;;  %v7864_v18 = vadd.f32 %v864_v28, %v7640_v6  ;;  %v7867_v61 = vadd.f32 %v865_v60, %v7642_v47  ;;  %v1757_v60 = vpop.permute.xlu1 %1756 }
  0xd6   : > { %951 = vmax.xlane.f32.xlu1 %v950_v51  ;;  %v953_v24 = vmax.f32 %v7829_v5, %v7840_v15  ;;  %v7872_v34 = vadd.f32 %v866_v32, %v7539_v27  ;;  %v7875_v37 = vadd.f32 %v867_v48, %v11170_v42  ;;  %v870_v7 = vmax.f32 %v7822_v13, %v838_v14  ;;  %v11172_v48 = vld [vmem:[#allocation44_spill] sm:$0xff]  ;;  %v11174_v13 = vld [vmem:[#allocation49_spill] sm:$0xff] }
  0xd7   : > { %948 = vmax.xlane.f32.xlu0 %v947_v31  ;;  %11167 = vst [vmem:[#allocation77_spill] sm:$0xff] %v7864_v18  ;;  %11168 = vst [vmem:[#allocation78_spill] sm:$0xff] %v7867_v61  ;;  %v956_v31 = vmax.f32 %v7864_v18, %v7867_v61  ;;  %v868_v4 = vmax.f32 %v804_v22, %v836_v35  ;;  %v869_v16 = vmax.f32 %v805_v36, %v837_v19  ;;  %v11176_v19 = vld [vmem:[#allocation26_spill] sm:$0xff] }
  0xd8   : > { %11169 = vst [vmem:[#allocation79_spill] sm:$0xff] %v7872_v34  ;;  %11171 = vst [vmem:[#allocation80_spill] sm:$0xff] %v7875_v37  ;;  %v871_v28 = vmax.f32 %v7826_v50, %v839_v49  ;;  %v1841_v51 = vmul.f32 0.2, %v1809_v25  ;;  %v1813_v38 = vadd.f32 %v7469_v52, %v1741_v20  ;;  %v1814_v15 = vadd.f32 %v7472_v56, %v1741_v20  ;;  %v11179_v35 = vld [vmem:[#allocation22_spill] sm:$0xff] }
  0xd9   : > { %v1871_v32 = vmax.f32 %v7833_v0, %v1839_v62  ;;  %v7885_v5 = vadd.f32 %v868_v4, %v11172_v48  ;;  %v7888_v14 = vadd.f32 %v869_v16, %v11174_v13  ;;  %v1842_v61 = vmul.f32 0.2, %v1810_v8  ;;  %v11177_v0 = vld [vmem:[#allocation20_spill] sm:$0xff]  ;;  %v1765_v18 = vpop.permute.xlu1 %1764 }
  0xda   : > { %v1872_v22 = vmax.f32 %v1808_v3, %v1840_v21  ;;  %v7892_v50 = vadd.f32 %v7469_v52, %v11176_v19  ;;  %v7896_v49 = vadd.f32 %v7472_v56, %v11176_v19  ;;  %957 = vmax.xlane.f32.xlu1 %v956_v31  ;;  %v959_v20 = vmax.f32 %v7872_v34, %v7875_v37  ;;  %v11181_v19 = vld [vmem:[#allocation50_spill] sm:$0xff] }
  0xdb   : > { %954 = vmax.xlane.f32.xlu0 %v953_v24  ;;  %11173 = vst [vmem:[#allocation81_spill] sm:$0xff] %v7885_v5  ;;  %11175 = vst [vmem:[#allocation82_spill] sm:$0xff] %v7888_v14  ;;  %v7901_v62 = vadd.f32 %v870_v7, %v11177_v0  ;;  %v962_v36 = vmax.f32 %v7885_v5, %v7888_v14  ;;  %v7906_v3 = vadd.f32 %v871_v28, %v11179_v35  ;;  %v11182_v37 = vld [vmem:[#allocation38_spill] sm:$0xff] }
  0xdc   : > { %v1817_v21 = vadd.f32 %v7469_v52, %v1749_v11  ;;  %v1818_v24 = vadd.f32 %v7472_v56, %v1749_v11  ;;  %v1845_v4 = vmul.f32 0.2, %v1813_v38  ;;  %v1846_v16 = vmul.f32 0.2, %v1814_v15 }
  0xdd   : > { %11178 = vst [vmem:[#allocation26_spill] sm:$0xff] %v7901_v62  ;;  %11180 = vst [vmem:[#allocation83_spill] sm:$0xff] %v7906_v3  ;;  %v1959_v31 = vmax.f32 %v7722_v33, %v7757_v44  ;;  %v1879_v34 = vmax.f32 %v11182_v37, %v11181_v19  ;;  %v7915_v7 = vadd.f32 %v1871_v32, %v7558_v39  ;;  %v1855_v11 = vmul.f32 0.2, %v7892_v50  ;;  %v11186_v37 = vld [vmem:[#allocation51_spill] sm:$0xff]  ;;  %v11189_v33 = vld [vmem:[#allocation25_spill] sm:$0xff] }
  0xde   : > { %v7918_v14 = vadd.f32 %v1872_v22, %v7560_v40  ;;  %v1873_v28 = vmax.f32 %v1809_v25, %v1841_v51  ;;  %v1874_v5 = vmax.f32 %v1810_v8, %v1842_v61  ;;  %v1856_v53 = vmul.f32 0.2, %v7896_v49  ;;  %963 = vmax.xlane.f32.xlu1 %v962_v36 }
  0xdf   : > { %960 = vmax.xlane.f32.xlu0 %v959_v20  ;;  %11183 = vst [vmem:[#allocation50_spill] sm:$0xff] %v7915_v7  ;;  %v7924_v44 = vadd.f32 %v7469_v52, %v11185_v30  ;;  %v11187_v20 = vld [vmem:[#allocation40_spill] sm:$0xff]  ;;  %v7930_v32 = vadd.f32 %v7472_v56, %v11185_v30  ;;  %v965_v25 = vmax.f32 %v7901_v62, %v7906_v3  ;;  %v1849_v8 = vmul.f32 0.2, %v1817_v21  ;;  %v11188_v30 = vld [vmem:[#allocation21_spill] sm:$0xff] }
  0xe0   : > { %11184 = vst [vmem:[#allocation38_spill] sm:$0xff] %v7918_v14  ;;  %v1880_v19 = vmax.f32 %v11187_v20, %v11186_v37  ;;  %v1850_v61 = vmul.f32 0.2, %v1818_v24  ;;  %v1821_v51 = vadd.f32 %v7469_v52, %v1757_v60  ;;  %v1822_v22 = vadd.f32 %v7472_v56, %v1757_v60 }
  0xe1   : > { %v1877_v40 = vmax.f32 %v1813_v38, %v1845_v4  ;;  %v1878_v39 = vmax.f32 %v1814_v15, %v1846_v16  ;;  %v1953_v36 = vmax.f32 %v7915_v7, %v7918_v14  ;;  %v7939_v37 = vadd.f32 %v1879_v34, %v7501_v9  ;;  %v11193_v38 = vld [vmem:[#allocation54_spill] sm:$0xff]  ;;  %v11194_v4 = vld [vmem:[#allocation52_spill] sm:$0xff] }
  0xe2   : > { %v7942_v20 = vadd.f32 %v1873_v28, %v11188_v30  ;;  %v7945_v3 = vadd.f32 %v1874_v5, %v11189_v33  ;;  %v1859_v62 = vmul.f32 0.2, %v7924_v44  ;;  %v11192_v60 = vmax.f32 %v11190_v26, %v11191_v63  ;;  %v11195_v34 = vld [vmem:[#allocation56_spill] sm:$0xff]  ;;  %v11197_v28 = vld [vmem:[#allocation31_spill] sm:$0xff] }
  0xe3   : > { %966 = vmax.xlane.f32.xlu0 %v965_v25  ;;  %v7952_v15 = vadd.f32 %v1880_v19, %v7503_v10  ;;  %v1883_v16 = vmax.f32 %v11194_v4, %v11193_v38  ;;  %v11196_v25 = vld [vmem:[#allocation53_spill] sm:$0xff]  ;;  %v7960_v30 = vadd.f32 %v7469_v52, %v11197_v28  ;;  %v7964_v5 = vadd.f32 %v7472_v56, %v11197_v28 }
  0xe4   : > { %1951 = vmax.xlane.f32.xlu1 %v11192_v60  ;;  %v1884_v9 = vmax.f32 %v11196_v25, %v11195_v34  ;;  %v1881_v33 = vmax.f32 %v1817_v21, %v1849_v8  ;;  %v1882_v14 = vmax.f32 %v1818_v24, %v1850_v61  ;;  %v1773_v60 = vpop.permute.xlu1 %1772  ;;  %v1853_v7 = vmul.f32 0.2, %v1821_v51 }
  0xe5   : > { %v1854_v19 = vmul.f32 0.2, %v1822_v22  ;;  %v7967_v10 = vadd.f32 %v1877_v40, %v7568_v43  ;;  %v7970_v38 = vadd.f32 %v1878_v39, %v7570_v46  ;;  %v1860_v4 = vmul.f32 0.2, %v7930_v32 }
  0xe6   : > { %v1956_v34 = vmax.f32 %v7942_v20, %v7945_v3  ;;  %v1825_v25 = vadd.f32 %v7469_v52, %v1765_v18  ;;  %v1826_v21 = vadd.f32 %v7472_v56, %v1765_v18  ;;  %v1965_v24 = vmax.f32 %v7939_v37, %v7952_v15 }
  0xe7   : > { %1954 = vmax.xlane.f32.xlu0 %v1953_v36  ;;  %v7980_v40 = vadd.f32 %v1883_v16, %v7519_v41  ;;  %v7983_v39 = vadd.f32 %v1884_v9, %v7525_v54  ;;  %v1887_v8 = vmax.f32 %v7892_v50, %v1855_v11  ;;  %v1863_v61 = vmul.f32 0.2, %v7960_v30 }
  0xe8   : > { %1960 = vmax.xlane.f32.xlu1 %v1959_v31  ;;  %v1888_v36 = vmax.f32 %v7896_v49, %v1856_v53  ;;  %v7989_v28 = vadd.f32 %v1881_v33, %v7591_v23  ;;  %v7992_v18 = vadd.f32 %v1882_v14, %v7595_v29  ;;  %v1864_v31 = vmul.f32 0.2, %v7964_v5  ;;  %v1781_v49 = vpop.permute.xlu1 %1780  ;;  %v11199_v33 = vld [vmem:[#allocation36_spill] sm:$0xff] }
  0xe9   : > { %11198 = vst [vmem:[#allocation29_spill] sm:$0xff] %v7983_v39  ;;  %v1962_v16 = vmax.f32 %v7967_v10, %v7970_v38  ;;  %v1885_v41 = vmax.f32 %v1821_v51, %v1853_v7  ;;  %v1886_v9 = vmax.f32 %v1822_v22, %v1854_v19  ;;  %v1857_v54 = vmul.f32 0.2, %v1825_v25 }
  0xea   : > { %v1858_v50 = vmul.f32 0.2, %v1826_v21  ;;  %v1829_v11 = vadd.f32 %v7469_v52, %v1773_v60  ;;  %v1830_v53 = vadd.f32 %v7472_v56, %v1773_v60  ;;  %v1835_v23 = vadd.f32 %v7469_v52, %v11199_v33 }
  0xeb   : > { %1957 = vmax.xlane.f32.xlu0 %v1956_v34  ;;  %v1836_v14 = vadd.f32 %v7472_v56, %v11199_v33  ;;  %v1971_v29 = vmax.f32 %v7980_v40, %v7983_v39  ;;  %v8006_v7 = vadd.f32 %v1887_v8, %v7527_v58  ;;  %v8009_v51 = vadd.f32 %v1888_v36, %v7529_v59 }
  0xec   : > { %1966 = vmax.xlane.f32.xlu1 %v1965_v24  ;;  %v1968_v22 = vmax.f32 %v7989_v28, %v7992_v18  ;;  %v1891_v60 = vmax.f32 %v7924_v44, %v1859_v62  ;;  %v1892_v19 = vmax.f32 %v7930_v32, %v1860_v4  ;;  %v8016_v34 = vadd.f32 %v1885_v41, %v7597_v57 }
  0xed   : > { %v8019_v24 = vadd.f32 %v1886_v9, %v7599_v45  ;;  %v1833_v33 = vadd.f32 %v7469_v52, %v1781_v49  ;;  %v1834_v8 = vadd.f32 %v7472_v56, %v1781_v49  ;;  %v1861_v36 = vmul.f32 0.2, %v1829_v11 }
  0xee   : > { %v1862_v59 = vmul.f32 0.2, %v1830_v53  ;;  %v1889_v58 = vmax.f32 %v1825_v25, %v1857_v54  ;;  %v1890_v46 = vmax.f32 %v1826_v21, %v1858_v50  ;;  %v1867_v43 = vmul.f32 0.2, %v1835_v23 }
  0xef   : > { %1963 = vmax.xlane.f32.xlu0 %v1962_v16  ;;  %v1868_v39 = vmul.f32 0.2, %v1836_v14  ;;  %v1977_v44 = vmax.f32 %v8006_v7, %v8009_v51  ;;  %v8026_v41 = vadd.f32 %v1891_v60, %v7532_v12  ;;  %v8029_v62 = vadd.f32 %v1892_v19, %v7534_v17  ;;  %v8588_v12 = vld [vmem:[#allocation2 + $0xb8] sm:$0xff] }
  0xf0   : > { %1972 = vmax.xlane.f32.xlu1 %v1971_v29  ;;  %v1895_v52 = vmax.f32 %v7960_v30, %v1863_v61  ;;  %v1974_v56 = vmax.f32 %v8016_v34, %v8019_v24  ;;  %v1865_v32 = vmul.f32 0.2, %v1833_v33  ;;  %v1866_v54 = vmul.f32 0.2, %v1834_v8  ;;  %11212 = vst [vmem:[#allocation85_spill] sm:$0xff] %v8588_v12 }
  0xf1   : > { %v1896_v4 = vmax.f32 %v7964_v5, %v1864_v31  ;;  %v8036_v29 = vadd.f32 %v1889_v58, %v7607_v55  ;;  %v8039_v25 = vadd.f32 %v1890_v46, %v7638_v2  ;;  %v1893_v21 = vmax.f32 %v1829_v11, %v1861_v36  ;;  %v6544_v36 = vld [vmem:[%s10868_s1 + $0x48] sm:$0xff]  }
  0xf2   : > { %v1894_v16 = vmax.f32 %v1830_v53, %v1862_v59  ;;  %v1983_v30 = vmax.f32 %v8026_v41, %v8029_v62  ;;  %v8044_v61 = vadd.f32 %v1895_v52, %v7539_v27  ;;  %v1899_v5 = vmax.f32 %v1835_v23, %v1867_v43  ;;  %v6546_v52 = vld [vmem:[%s10868_s1 + $0x50] sm:$0xff]  }
  0xf3   : > { %1969 = vmax.xlane.f32.xlu0 %v1968_v22  ;;  %v8047_v9 = vadd.f32 %v1896_v4, %v11170_v42  ;;  %v1900_v31 = vmax.f32 %v1836_v14, %v1868_v39  ;;  %v1897_v50 = vmax.f32 %v1833_v33, %v1865_v32  ;;  %v1980_v58 = vmax.f32 %v8036_v29, %v8039_v25  ;;  %v6542_v33 = vld [vmem:[%s10868_s1 + $0x40] sm:$0xff]  }
  0xf4   : > { %1978 = vmax.xlane.f32.xlu1 %v1977_v44  ;;  %v8052_v46 = vadd.f32 %v1893_v21, %v7640_v6  ;;  %v8055_v59 = vadd.f32 %v1894_v16, %v7642_v47  ;;  %v1898_v11 = vmax.f32 %v1834_v8, %v1866_v54  ;;  %v8060_v49 = vadd.f32 %v1899_v5, %v11177_v0  ;;  %v6543_v8 = vld [vmem:[%s10868_s1] sm:$0xff]   ;;  %v6545_v44 = vld [vmem:[%s10868_s1 + $0x8] sm:$0xff]   ;;  %v8231_v21 = vld [vmem:[#allocation2 + $0x10] sm:$0xff] }
  0xf5   : > { %v1989_v53 = vmax.f32 %v8044_v61, %v8047_v9  ;;  %v8063_v43 = vadd.f32 %v1900_v31, %v11179_v35  ;;  %v8068_v39 = vadd.f32 %v1897_v50, %v11172_v48  ;;  %v10966_v19 = vmov 0.0   ;;  %6240 = vmatprep.subr.bf16.mxu0 %v6542_v33  ;;  %v8226_v32 = vld [vmem:[#allocation2] sm:$0xff]  ;;  %v905_v16 = vld [vmem:[#allocation2 + $0x8] sm:$0xff]  ;;  %v8318_v47 = vld [vmem:[#allocation2 + $0x58] sm:$0xff] }
  0xf6   : > { %v1986_v23 = vmax.f32 %v8052_v46, %v8055_v59  ;;  %v8071_v14 = vadd.f32 %v1898_v11, %v11174_v13  ;;  %395 = vst.msk [vmem:[#allocation3] sm:$0xff] %vm330_vm0, %v10966_v19  ;;  %396 = vst.msk [vmem:[#allocation3 + $0x8] sm:$0xff] %vm330_vm0, %v10966_v19  ;;  %6241 = vmatpush3.bf16.msra.mxu0 %v6543_v8  ;;  %v8244_v11 = vld [vmem:[#allocation2 + $0x20] sm:$0xff]  ;;  %v8293_v0 = vld [vmem:[#allocation2 + $0x48] sm:$0xff] }
  0xf7   : > { %1975 = vmax.xlane.f32.xlu0 %v1974_v56  ;;  %v1995_v22 = vmax.f32 %v8060_v49, %v8063_v43  ;;  %397 = vst.msk [vmem:[#allocation3 + $0x10] sm:$0xff] %vm330_vm0, %v10966_v19  ;;  %398 = vst.msk [vmem:[#allocation3 + $0x18] sm:$0xff] %vm330_vm0, %v10966_v19  ;;  %6242 = vmatprep.subr.bf16.mxu0 %v6544_v36  ;;  %v6547_v56 = vld [vmem:[%s10868_s1 + $0x10] sm:$0xff]   ;;  %v8257_v36 = vld [vmem:[#allocation2 + $0x28] sm:$0xff] }
  0xf8   : > { %1984 = vmax.xlane.f32.xlu1 %v1983_v30  ;;  %v1992_v60 = vmax.f32 %v8068_v39, %v8071_v14  ;;  %399 = vst.msk [vmem:[#allocation3 + $0x20] sm:$0xff] %vm330_vm0, %v10966_v19  ;;  %400 = vst.msk [vmem:[#allocation3 + $0x28] sm:$0xff] %vm330_vm0, %v10966_v19  ;;  %v6552_v13 = vld [vmem:[%s10868_s1 + $0x68] sm:$0xff]  }
  0xf9   : > { %401 = vst.msk [vmem:[#allocation3 + $0x30] sm:$0xff] %vm330_vm0, %v10966_v19  ;;  %402 = vst.msk [vmem:[#allocation3 + $0x38] sm:$0xff] %vm330_vm0, %v10966_v19  ;;  %v6553_v48 = vld [vmem:[%s10868_s1 + $0x28] sm:$0xff]  }
  0xfa   : > { %403 = vst.msk [vmem:[#allocation3 + $0x40] sm:$0xff] %vm330_vm0, %v10966_v19  ;;  %404 = vst.msk [vmem:[#allocation3 + $0x48] sm:$0xff] %vm330_vm0, %v10966_v19  ;;  %6243 = vmatpush3.bf16.msra.mxu0 %v6545_v44  ;;  %v8262_v44 = vld [vmem:[#allocation2 + $0x30] sm:$0xff] }
  0xfb   : > { %1981 = vmax.xlane.f32.xlu0 %v1980_v58  ;;  %405 = vst.msk [vmem:[#allocation3 + $0x50] sm:$0xff] %vm330_vm0, %v10966_v19  ;;  %406 = vst.msk [vmem:[#allocation3 + $0x58] sm:$0xff] %vm330_vm0, %v10966_v19  ;;  %6244 = vmatprep.subr.bf16.mxu0 %v6546_v52  ;;  %v8239_v58 = vld [vmem:[#allocation2 + $0x18] sm:$0xff] }
  0xfc   : > { %1990 = vmax.xlane.f32.xlu1 %v1989_v53  ;;  %407 = vst.msk [vmem:[#allocation3 + $0x60] sm:$0xff] %vm330_vm0, %v10966_v19  ;;  %408 = vst.msk [vmem:[#allocation3 + $0x68] sm:$0xff] %vm330_vm0, %v10966_v19 }
  0xfd   : > { %409 = vst.msk [vmem:[#allocation3 + $0x70] sm:$0xff] %vm330_vm0, %v10966_v19  ;;  %410 = vst.msk [vmem:[#allocation3 + $0x78] sm:$0xff] %vm330_vm0, %v10966_v19 }
  0xfe   : > { %411 = vst.msk [vmem:[#allocation3 + $0x80] sm:$0xff] %vm330_vm0, %v10966_v19  ;;  %412 = vst.msk [vmem:[#allocation3 + $0x88] sm:$0xff] %vm330_vm0, %v10966_v19  ;;  %6245 = vmatpush3.bf16.msra.mxu0 %v6547_v56 }
  0xff   : > { %1987 = vmax.xlane.f32.xlu0 %v1986_v23  ;;  %413 = vst.msk [vmem:[#allocation3 + $0x90] sm:$0xff] %vm330_vm0, %v10966_v19  ;;  %414 = vst.msk [vmem:[#allocation3 + $0x98] sm:$0xff] %vm330_vm0, %v10966_v19  ;;  %v6548_v23 = vld [vmem:[%s10868_s1 + $0x58] sm:$0xff]  }
 0x100   : > { %1996 = vmax.xlane.f32.xlu1 %v1995_v22  ;;  %415 = vst.msk [vmem:[#allocation3 + $0xa0] sm:$0xff] %vm330_vm0, %v10966_v19  ;;  %416 = vst.msk [vmem:[#allocation3 + $0xa8] sm:$0xff] %vm330_vm0, %v10966_v19  ;;  %v6549_v22 = vld [vmem:[%s10868_s1 + $0x18] sm:$0xff]   ;;  %6246 = vmatprep.subr.bf16.mxu0 %v6548_v23  ;;  %v6551_v23 = vld [vmem:[%s10868_s1 + $0x20] sm:$0xff]  }
 0x101   : > { %417 = vst.msk [vmem:[#allocation3 + $0xb0] sm:$0xff] %vm330_vm0, %v10966_v19  ;;  %418 = vst.msk [vmem:[#allocation3 + $0xb8] sm:$0xff] %vm330_vm0, %v10966_v19 }
 0x102   : > { %419 = vst.msk [vmem:[#allocation3 + $0xc0] sm:$0xff] %vm330_vm0, %v10966_v19  ;;  %420 = vst.msk [vmem:[#allocation3 + $0xc8] sm:$0xff] %vm330_vm0, %v10966_v19  ;;  %6247 = vmatpush3.bf16.msra.mxu0 %v6549_v22  ;;  %v8282_v22 = vld [vmem:[#allocation2 + $0x40] sm:$0xff] }
 0x103   : > { %421 = vst.msk [vmem:[#allocation3 + $0xd0] sm:$0xff] %vm330_vm0, %v10966_v19  ;;  %422 = vst.msk [vmem:[#allocation3 + $0xd8] sm:$0xff] %vm330_vm0, %v10966_v19  ;;  %1993 = vmax.xlane.f32.xlu0 %v1992_v60 }
 0x104   : > { %423 = vst.msk [vmem:[#allocation3 + $0xe0] sm:$0xff] %vm330_vm0, %v10966_v19  ;;  %424 = vst.msk [vmem:[#allocation3 + $0xe8] sm:$0xff] %vm330_vm0, %v10966_v19 }
 0x105   : > { %425 = vst.msk [vmem:[#allocation3 + $0xf0] sm:$0xff] %vm330_vm0, %v10966_v19  ;;  %426 = vst.msk [vmem:[#allocation3 + $0xf8] sm:$0xff] %vm330_vm0, %v10966_v19 }
 0x106   : > { %427 = vst.msk [vmem:[#allocation3 + $0x100] sm:$0xff] %vm330_vm0, %v10966_v19  ;;  %428 = vst.msk [vmem:[#allocation3 + $0x108] sm:$0xff] %vm330_vm0, %v10966_v19 }
 0x107   : > { %429 = vst.msk [vmem:[#allocation3 + $0x110] sm:$0xff] %vm330_vm0, %v10966_v19  ;;  %430 = vst.msk [vmem:[#allocation3 + $0x118] sm:$0xff] %vm330_vm0, %v10966_v19 }
 0x108   : > { %431 = vst.msk [vmem:[#allocation3 + $0x120] sm:$0xff] %vm330_vm0, %v10966_v19  ;;  %432 = vst.msk [vmem:[#allocation3 + $0x128] sm:$0xff] %vm330_vm0, %v10966_v19 }
 0x109   : > { %433 = vst.msk [vmem:[#allocation3 + $0x130] sm:$0xff] %vm330_vm0, %v10966_v19  ;;  %434 = vst.msk [vmem:[#allocation3 + $0x138] sm:$0xff] %vm330_vm0, %v10966_v19 }
 0x10a   : > { %435 = vst.msk [vmem:[#allocation3 + $0x140] sm:$0xff] %vm330_vm0, %v10966_v19  ;;  %436 = vst.msk [vmem:[#allocation3 + $0x148] sm:$0xff] %vm330_vm0, %v10966_v19 }
 0x10b   : > { %437 = vst.msk [vmem:[#allocation3 + $0x150] sm:$0xff] %vm330_vm0, %v10966_v19  ;;  %438 = vst.msk [vmem:[#allocation3 + $0x158] sm:$0xff] %vm330_vm0, %v10966_v19 }
 0x10c   : > { %439 = vst.msk [vmem:[#allocation3 + $0x160] sm:$0xff] %vm330_vm0, %v10966_v19  ;;  %440 = vst.msk [vmem:[#allocation3 + $0x168] sm:$0xff] %vm330_vm0, %v10966_v19 }
 0x10d   : > { %441 = vst.msk [vmem:[#allocation3 + $0x170] sm:$0xff] %vm330_vm0, %v10966_v19  ;;  %442 = vst.msk [vmem:[#allocation3 + $0x178] sm:$0xff] %vm330_vm0, %v10966_v19 }
 0x10e   : > { %443 = vst.msk [vmem:[#allocation3 + $0x180] sm:$0xff] %vm330_vm0, %v10966_v19  ;;  %444 = vst.msk [vmem:[#allocation3 + $0x188] sm:$0xff] %vm330_vm0, %v10966_v19 }
 0x10f   : > { %445 = vst.msk [vmem:[#allocation3 + $0x190] sm:$0xff] %vm330_vm0, %v10966_v19  ;;  %446 = vst.msk [vmem:[#allocation3 + $0x198] sm:$0xff] %vm330_vm0, %v10966_v19 }
 0x110   : > { %447 = vst.msk [vmem:[#allocation3 + $0x1a0] sm:$0xff] %vm330_vm0, %v10966_v19  ;;  %448 = vst.msk [vmem:[#allocation3 + $0x1a8] sm:$0xff] %vm330_vm0, %v10966_v19 }
 0x111   : > { %449 = vst.msk [vmem:[#allocation3 + $0x1b0] sm:$0xff] %vm330_vm0, %v10966_v19  ;;  %450 = vst.msk [vmem:[#allocation3 + $0x1b8] sm:$0xff] %vm330_vm0, %v10966_v19 }
 0x112   : > { %451 = vst.msk [vmem:[#allocation3 + $0x1c0] sm:$0xff] %vm330_vm0, %v10966_v19  ;;  %452 = vst.msk [vmem:[#allocation3 + $0x1c8] sm:$0xff] %vm330_vm0, %v10966_v19 }
 0x113   : > { %453 = vst.msk [vmem:[#allocation3 + $0x1d0] sm:$0xff] %vm330_vm0, %v10966_v19  ;;  %454 = vst.msk [vmem:[#allocation3 + $0x1d8] sm:$0xff] %vm330_vm0, %v10966_v19 }
 0x114   : > { %455 = vst.msk [vmem:[#allocation3 + $0x1e0] sm:$0xff] %vm330_vm0, %v10966_v19  ;;  %456 = vst.msk [vmem:[#allocation3 + $0x1e8] sm:$0xff] %vm330_vm0, %v10966_v19 }
 0x115   : > { %457 = vst.msk [vmem:[#allocation3 + $0x1f0] sm:$0xff] %vm330_vm0, %v10966_v19  ;;  %458 = vst.msk [vmem:[#allocation3 + $0x1f8] sm:$0xff] %vm330_vm0, %v10966_v19 }
 0x14d   : > { %v922_v54 = vpop.xlane.xlu0 %921 }
 0x14e   : > { %v8229_v4 = vmax.f32 %v8226_v32, %v922_v54 }
 0x150   : > { %1707 = vst.msk [vmem:[#allocation2] sm:$0xff] %vm330_vm0, %v8229_v4  ;;  %1034 = vperm.xlu1 %6533, %v8229_v4  }
 0x152   : > { %v928_v30 = vpop.xlane.xlu0 %927  ;;  %v925_v5 = vpop.xlane.xlu1 %924 }
 0x153   : > { %v8237_v31 = vmax.f32 %v8231_v21, %v928_v30  ;;  %v969_v50 = vmax.f32 %v905_v16, %v925_v5  ;;  %v8271_v5 = vld [vmem:[#allocation2 + $0x38] sm:$0xff] }
 0x155   : > { %1709 = vst.msk [vmem:[#allocation2 + $0x10] sm:$0xff] %vm330_vm0, %v8237_v31  ;;  %1044 = vperm.xlu1 %6533, %v8237_v31   ;;  %1708 = vst.msk [vmem:[#allocation2 + $0x8] sm:$0xff] %vm330_vm0, %v969_v50  ;;  %1039 = vperm.xlu0 %6532, %v969_v50  }
 0x156   : > { %v934_v60 = vpop.xlane.xlu1 %933 }
 0x157   : > { %v972_v8 = vmax.f32 %v8244_v11, %v934_v60 }
 0x158   : > { %v931_v53 = vpop.xlane.xlu0 %930 }
 0x159   : > { %v8254_v33 = vmax.f32 %v8239_v58, %v931_v53  ;;  %1711 = vst.msk [vmem:[#allocation2 + $0x20] sm:$0xff] %vm330_vm0, %v972_v8  ;;  %1054 = vperm.xlu0 %6532, %v972_v8   ;;  %v6550_v53 = vld [vmem:[%s10868_s1 + $0x60] sm:$0xff]  }
 0x15a   : > { %6248 = vmatprep.subr.bf16.mxu0 %v6550_v53 }
 0x15b   : > { %1710 = vst.msk [vmem:[#allocation2 + $0x18] sm:$0xff] %vm330_vm0, %v8254_v33  ;;  %1049 = vperm.xlu1 %6533, %v8254_v33   ;;  %v940_v56 = vpop.xlane.xlu1 %939  ;;  %6249 = vmatpush3.bf16.msra.mxu0 %v6551_v23 }
 0x15c   : > { %v937_v52 = vpop.xlane.xlu0 %936  ;;  %v8269_v30 = vmax.f32 %v8262_v44, %v940_v56  ;;  %6250 = vmatprep.subr.bf16.mxu0 %v6552_v13  ;;  %v6555_v13 = vld [vmem:[%s10868_s1 + $0x30] sm:$0xff]  }
 0x15d   : > { %v8266_v54 = vmax.f32 %v8257_v36, %v937_v52  ;;  %v985_v52 = vsub.f32 %v905_v16, %v969_v50  ;;  %v8304_v16 = vld [vmem:[#allocation2 + $0x50] sm:$0xff]  ;;  %v984_v50 = vsub.f32 %v8226_v32, %v8229_v4  ;;  %v8329_v4 = vld [vmem:[#allocation2 + $0x60] sm:$0xff] }
 0x15e   : > { %1713 = vst.msk [vmem:[#allocation2 + $0x30] sm:$0xff] %vm330_vm0, %v8269_v30  ;;  %1064 = vperm.xlu0 %6532, %v8269_v30   ;;  %v6554_v32 = vld [vmem:[%s10868_s1 + $0x70] sm:$0xff]  }
 0x15f   : > { %1712 = vst.msk [vmem:[#allocation2 + $0x28] sm:$0xff] %vm330_vm0, %v8266_v54  ;;  %1059 = vperm.xlu1 %6533, %v8266_v54   ;;  %v946_v56 = vpop.xlane.xlu1 %945  ;;  %v1002_v23 = vmul.f32 1.442695, %v985_v52  ;;  %6251 = vmatpush3.bf16.msra.mxu0 %v6553_v48  ;;  %v1000_v48 = vmul.f32 1.442695, %v984_v50 }
 0x160   : > { %v943_v60 = vpop.xlane.xlu0 %942  ;;  %v8291_v35 = vmax.f32 %v8282_v22, %v946_v56  ;;  %6252 = vmatprep.subr.bf16.mxu0 %v6554_v32 }
 0x161   : > { %v8288_v19 = vmax.f32 %v8271_v5, %v943_v60  ;;  %v988_v60 = vsub.f32 %v8244_v11, %v972_v8  ;;  %v986_v11 = vsub.f32 %v8231_v21, %v8237_v31  ;;  %6606 = vpow2.f32 %v1002_v23  ;;  %v8344_v21 = vld [vmem:[#allocation2 + $0x68] sm:$0xff]  ;;  %v6556_v31 = vld [vmem:[%s10868_s1 + $0x78] sm:$0xff]  }
 0x162   : > { %1715 = vst.msk [vmem:[#allocation2 + $0x40] sm:$0xff] %vm330_vm0, %v8291_v35  ;;  %1074 = vperm.xlu0 %6532, %v8291_v35   ;;  %v6557_v23 = vld [vmem:[%s10868_s1 + $0x38] sm:$0xff]   ;;  %6608 = vpow2.f32 %v1000_v48 }
 0x163   : > { %1714 = vst.msk [vmem:[#allocation2 + $0x38] sm:$0xff] %vm330_vm0, %v8288_v19  ;;  %1069 = vperm.xlu1 %6533, %v8288_v19   ;;  %v952_v56 = vpop.xlane.xlu1 %951  ;;  %v1008_v52 = vmul.f32 1.442695, %v988_v60  ;;  %6253 = vmatpush3.bf16.msra.mxu0 %v6555_v13  ;;  %v987_v60 = vsub.f32 %v8239_v58, %v8254_v33  ;;  %v8370_v58 = vld [vmem:[#allocation2 + $0x78] sm:$0xff]  ;;  %v989_v33 = vsub.f32 %v8257_v36, %v8266_v54 }
 0x164   : > { %v949_v53 = vpop.xlane.xlu0 %948  ;;  %v8316_v27 = vmax.f32 %v8304_v16, %v952_v56  ;;  %6254 = vmatprep.subr.bf16.mxu0 %v6556_v31 }
 0x165   : > { %v8313_v42 = vmax.f32 %v8293_v0, %v949_v53  ;;  %v990_v53 = vsub.f32 %v8262_v44, %v8269_v30  ;;  %v8355_v44 = vld [vmem:[#allocation2 + $0x70] sm:$0xff]  ;;  %v1004_v30 = vmul.f32 1.442695, %v986_v11  ;;  %6610 = vpow2.f32 %v1008_v52  ;;  %v8377_v11 = vld [vmem:[#allocation2 + $0x80] sm:$0xff] }
 0x166   : > { %1717 = vst.msk [vmem:[#allocation2 + $0x50] sm:$0xff] %vm330_vm0, %v8316_v27  ;;  %1084 = vperm.xlu0 %6532, %v8316_v27   ;;  %11200 = vst [vmem:[#allocation51_spill] sm:$0xff] %v8377_v11  ;;  %v994_v36 = vsub.f32 %v8304_v16, %v8316_v27  ;;  %v991_v27 = vsub.f32 %v8271_v5, %v8288_v19  ;;  %v8416_v5 = vld [vmem:[#allocation2 + $0x90] sm:$0xff] }
 0x167   : > { %1716 = vst.msk [vmem:[#allocation2 + $0x48] sm:$0xff] %vm330_vm0, %v8313_v42  ;;  %1079 = vperm.xlu1 %6533, %v8313_v42   ;;  %v958_v56 = vpop.xlane.xlu1 %957  ;;  %v1012_v13 = vmul.f32 1.442695, %v990_v53  ;;  %6255 = vmatpush3.bf16.msra.mxu0 %v6557_v23  ;;  %6612 = vpow2.f32 %v1004_v30  ;;  %v8390_v23 = vld [vmem:[#allocation2 + $0x88] sm:$0xff]  ;;  %11206 = vst [vmem:[#allocation56_spill] sm:$0xff] %v8416_v5 }
 0x168   : > { %v955_v8 = vpop.xlane.xlu0 %954  ;;  %v8342_v50 = vmax.f32 %v8329_v4, %v958_v56  ;;  %11202 = vst [vmem:[#allocation45_spill] sm:$0xff] %v8390_v23 }
 0x169   : > { %v8339_v6 = vmax.f32 %v8318_v47, %v955_v8  ;;  %v992_v8 = vsub.f32 %v8282_v22, %v8291_v35  ;;  %v1006_v35 = vmul.f32 1.442695, %v987_v60  ;;  %6614 = vpow2.f32 %v1012_v13 }
 0x16a   : > { %1719 = vst.msk [vmem:[#allocation2 + $0x60] sm:$0xff] %vm330_vm0, %v8342_v50  ;;  %1094 = vperm.xlu0 %6532, %v8342_v50   ;;  %v1010_v60 = vmul.f32 1.442695, %v989_v33 }
 0x16b   : > { %1718 = vst.msk [vmem:[#allocation2 + $0x58] sm:$0xff] %vm330_vm0, %v8339_v6  ;;  %1089 = vperm.xlu1 %6533, %v8339_v6   ;;  %v964_v56 = vpop.xlane.xlu1 %963  ;;  %v1016_v52 = vmul.f32 1.442695, %v992_v8  ;;  %v8392_v30 = vpop.eup %6606  ;;  %6616 = vpow2.f32 %v1006_v35  ;;  %v1020_v8 = vmul.f32 1.442695, %v994_v36  ;;  %v11209_v36 = vmov 0.0  }
 0x16c   : > { %v961_v32 = vpop.xlane.xlu0 %960  ;;  %v8368_v48 = vmax.f32 %v8355_v44, %v964_v56  ;;  %v996_v56 = vsub.f32 %v8329_v4, %v8342_v50  ;;  %v8425_v4 = vld [vmem:[#allocation2 + $0xa8] sm:$0xff]  ;;  %v8427_v50 = vmul.f32 1.442695, %v991_v27  ;;  %461 = vst.msk [vmem:[#allocation4 + $0x8] sm:$0xff] %vm459_vm1, %v11209_v36  ;;  %460 = vst.msk [vmem:[#allocation4] sm:$0xff] %vm459_vm1, %v11209_v36  ;;  %v995_v2 = vsub.f32 %v8318_v47, %v8339_v6 }
 0x16d   : > { %v8365_v17 = vmax.f32 %v8344_v21, %v961_v32  ;;  %v8397_v32 = vld [vmem:[#allocation2 + $0x98] sm:$0xff]  ;;  %6618 = vpow2.f32 %v1016_v52  ;;  %11207 = vst [vmem:[#allocation53_spill] sm:$0xff] %v8425_v4  ;;  %462 = vst.msk [vmem:[#allocation4 + $0x10] sm:$0xff] %vm459_vm1, %v11209_v36 }
 0x16e   : > { %1721 = vst.msk [vmem:[#allocation2 + $0x70] sm:$0xff] %vm330_vm0, %v8368_v48  ;;  %1104 = vperm.xlu0 %6532, %v8368_v48   ;;  %11203 = vst [vmem:[#allocation46_spill] sm:$0xff] %v8397_v32  ;;  %6620 = vpow2.f32 %v1010_v60 }
 0x16f   : > { %1720 = vst.msk [vmem:[#allocation2 + $0x68] sm:$0xff] %vm330_vm0, %v8365_v17  ;;  %1099 = vperm.xlu1 %6533, %v8365_v17   ;;  %6622 = vpow2.f32 %v1020_v8 }
 0x170   : > { %v967_v22 = vpop.xlane.xlu0 %966  ;;  %463 = vst.msk [vmem:[#allocation4 + $0x18] sm:$0xff] %vm459_vm1, %v11209_v36  ;;  %464 = vst.msk [vmem:[#allocation4 + $0x20] sm:$0xff] %vm459_vm1, %v11209_v36  ;;  %6624 = vpow2.f32 %v8427_v50  ;;  %v11214_v50 = vsub.f32 %v8355_v44, %v8368_v48  ;;  %v8622_v44 = vld [vmem:[#allocation2 + $0xc8] sm:$0xff]  ;;  %v1022_v48 = vmul.f32 1.442695, %v995_v2 }
 0x171   : > { %v1952_v54 = vpop.xlane.xlu1 %1951  ;;  %v8385_v53 = vmax.f32 %v8370_v58, %v967_v22  ;;  %v8411_v22 = vpop.eup %6608  ;;  %465 = vst.msk [vmem:[#allocation4 + $0x28] sm:$0xff] %vm459_vm1, %v11209_v36  ;;  %466 = vst.msk [vmem:[#allocation4 + $0x30] sm:$0xff] %vm459_vm1, %v11209_v36 }
 0x172   : > { %v8388_v31 = vmax.f32 %v8377_v11, %v1952_v54  ;;  %1344 = vperm.xlu0 %6532, %v8392_v30   ;;  %v8418_v54 = vpop.eup %6610  ;;  %467 = vst.msk [vmem:[#allocation4 + $0x38] sm:$0xff] %vm459_vm1, %v11209_v36  ;;  %468 = vst.msk [vmem:[#allocation4 + $0x40] sm:$0xff] %vm459_vm1, %v11209_v36  ;;  %v1028_v45 = vmul.f32 1.442695, %v11214_v50 }
 0x173   : > { %1722 = vst.msk [vmem:[#allocation2 + $0x78] sm:$0xff] %vm330_vm0, %v8385_v53  ;;  %1109 = vperm.xlu1 %6533, %v8385_v53   ;;  %v8573_v8 = vpop.eup %6612  ;;  %11219 = vst [vmem:[#allocation90_spill] sm:$0xff] %v8622_v44 }
 0x174   : > { %11201 = vst [vmem:[#allocation40_spill] sm:$0xff] %v8388_v31  ;;  %2738 = vst.msk [vmem:[#allocation2 + $0x80] sm:$0xff] %vm330_vm0, %v8388_v31  ;;  %v1955_v13 = vpop.xlane.xlu0 %1954 }
 0x175   : > { %v1961_v33 = vpop.xlane.xlu1 %1960  ;;  %v8409_v35 = vmax.f32 %v8390_v23, %v1955_v13  ;;  %469 = vst.msk [vmem:[#allocation4 + $0x48] sm:$0xff] %vm459_vm1, %v11209_v36  ;;  %470 = vst.msk [vmem:[#allocation4 + $0x50] sm:$0xff] %vm459_vm1, %v11209_v36  ;;  %v8581_v13 = vpop.eup %6614  ;;  %v8687_v23 = vld [vmem:[#allocation2 + $0xe0] sm:$0xff] }
 0x176   : > { %v8414_v19 = vmax.f32 %v8397_v32, %v1961_v33  ;;  %1359 = vperm.xlu0 %6532, %v8418_v54   ;;  %v8436_v33 = vmul.f32 1.442695, %v996_v56  ;;  %471 = vst.msk [vmem:[#allocation4 + $0x58] sm:$0xff] %vm459_vm1, %v11209_v36  ;;  %472 = vst.msk [vmem:[#allocation4 + $0x60] sm:$0xff] %vm459_vm1, %v11209_v36  ;;  %v8608_v6 = vpop.eup %6616 }
 0x177   : > { %11204 = vst [vmem:[#allocation54_spill] sm:$0xff] %v8409_v35  ;;  %2739 = vst.msk [vmem:[#allocation2 + $0x88] sm:$0xff] %vm330_vm0, %v8409_v35  ;;  %1339 = vperm.xlu1 %6533, %v8411_v22   ;;  %v8615_v55 = vpop.eup %6618 }
 0x178   : > { %11205 = vst [vmem:[#allocation52_spill] sm:$0xff] %v8414_v19  ;;  %2741 = vst.msk [vmem:[#allocation2 + $0x98] sm:$0xff] %vm330_vm0, %v8414_v19  ;;  %v1958_v60 = vpop.xlane.xlu0 %1957  ;;  %6626 = vpow2.f32 %v8436_v33  ;;  %v8631_v33 = vpop.eup %6620 }
 0x179   : > { %v8440_v52 = vpop.xlane.xlu1 %1966  ;;  %v8443_v16 = vmax.f32 %v8416_v5, %v1958_v60  ;;  %473 = vst.msk [vmem:[#allocation4 + $0x68] sm:$0xff] %vm459_vm1, %v11209_v36  ;;  %474 = vst.msk [vmem:[#allocation4 + $0x70] sm:$0xff] %vm459_vm1, %v11209_v36  ;;  %v8579_v60 = vld [vmem:[#allocation2 + $0xa0] sm:$0xff] }
 0x17a   : > { %475 = vst.msk [vmem:[#allocation4 + $0x78] sm:$0xff] %vm459_vm1, %v11209_v36  ;;  %476 = vst.msk [vmem:[#allocation4 + $0x80] sm:$0xff] %vm459_vm1, %v11209_v36  ;;  %v8577_v56 = vmax.f32 %v8425_v4, %v8440_v52  ;;  %v11213_v52 = vsub.f32 %v8293_v0, %v8313_v42  ;;  %1369 = vperm.xlu0 %6532, %v8581_v13  }
 0x17b   : > { %11208 = vst [vmem:[#allocation31_spill] sm:$0xff] %v8443_v16  ;;  %477 = vst.msk [vmem:[#allocation4 + $0x88] sm:$0xff] %vm459_vm1, %v11209_v36  ;;  %1349 = vperm.xlu1 %6533, %v8573_v8  }
 0x17c   : > { %478 = vst.msk [vmem:[#allocation4 + $0x90] sm:$0xff] %vm459_vm1, %v11209_v36  ;;  %479 = vst.msk [vmem:[#allocation4 + $0x98] sm:$0xff] %vm459_vm1, %v11209_v36  ;;  %v1964_v27 = vpop.xlane.xlu0 %1963 }
 0x17d   : > { %480 = vst.msk [vmem:[#allocation4 + $0xa0] sm:$0xff] %vm459_vm1, %v11209_v36  ;;  %481 = vst.msk [vmem:[#allocation4 + $0xa8] sm:$0xff] %vm459_vm1, %v11209_v36  ;;  %v1973_v42 = vpop.xlane.xlu1 %1972  ;;  %v8606_v0 = vmax.f32 %v8579_v60, %v1964_v27  ;;  %v997_v27 = vsub.f32 %v8344_v21, %v8365_v17  ;;  %v8639_v17 = vld [vmem:[#allocation2 + $0xc0] sm:$0xff]  ;;  %v8641_v21 = vpop.eup %6622 }
 0x17e   : > { %482 = vst.msk [vmem:[#allocation4 + $0xb0] sm:$0xff] %vm459_vm1, %v11209_v36  ;;  %483 = vst.msk [vmem:[#allocation4 + $0xb8] sm:$0xff] %vm459_vm1, %v11209_v36  ;;  %v8611_v47 = vmax.f32 %v8588_v12, %v1973_v42  ;;  %1379 = vperm.xlu0 %6532, %v8615_v55  }
 0x17f   : > { %484 = vst.msk [vmem:[#allocation4 + $0xc0] sm:$0xff] %vm459_vm1, %v11209_v36  ;;  %485 = vst.msk [vmem:[#allocation4 + $0xc8] sm:$0xff] %vm459_vm1, %v11209_v36  ;;  %1354 = vperm.xlu1 %6533, %v8608_v6  }
 0x180   : > { %486 = vst.msk [vmem:[#allocation4 + $0xd0] sm:$0xff] %vm459_vm1, %v11209_v36  ;;  %487 = vst.msk [vmem:[#allocation4 + $0xd8] sm:$0xff] %vm459_vm1, %v11209_v36  ;;  %v1970_v42 = vpop.xlane.xlu0 %1969 }
 0x181   : > { %488 = vst.msk [vmem:[#allocation4 + $0xe0] sm:$0xff] %vm459_vm1, %v11209_v36  ;;  %489 = vst.msk [vmem:[#allocation4 + $0xe8] sm:$0xff] %vm459_vm1, %v11209_v36  ;;  %v1979_v57 = vpop.xlane.xlu1 %1978 }
 0x182   : > { %490 = vst.msk [vmem:[#allocation4 + $0xf0] sm:$0xff] %vm459_vm1, %v11209_v36  ;;  %491 = vst.msk [vmem:[#allocation4 + $0xf8] sm:$0xff] %vm459_vm1, %v11209_v36  ;;  %v8637_v2 = vmax.f32 %v8622_v44, %v1979_v57  ;;  %1389 = vperm.xlu0 %6532, %v8641_v21   ;;  %v8672_v44 = vld [vmem:[#allocation2 + $0xe8] sm:$0xff] }
 0x183   : > { %492 = vst.msk [vmem:[#allocation4 + $0x100] sm:$0xff] %vm459_vm1, %v11209_v36  ;;  %493 = vst.msk [vmem:[#allocation4 + $0x108] sm:$0xff] %vm459_vm1, %v11209_v36  ;;  %1364 = vperm.xlu1 %6533, %v8631_v33  }
 0x184   : > { %494 = vst.msk [vmem:[#allocation4 + $0x110] sm:$0xff] %vm459_vm1, %v11209_v36  ;;  %495 = vst.msk [vmem:[#allocation4 + $0x118] sm:$0xff] %vm459_vm1, %v11209_v36  ;;  %v1976_v50 = vpop.xlane.xlu0 %1975 }
 0x185   : > { %496 = vst.msk [vmem:[#allocation4 + $0x120] sm:$0xff] %vm459_vm1, %v11209_v36  ;;  %497 = vst.msk [vmem:[#allocation4 + $0x128] sm:$0xff] %vm459_vm1, %v11209_v36  ;;  %v1985_v12 = vpop.xlane.xlu1 %1984 }
 0x186   : > { %498 = vst.msk [vmem:[#allocation4 + $0x130] sm:$0xff] %vm459_vm1, %v11209_v36  ;;  %499 = vst.msk [vmem:[#allocation4 + $0x138] sm:$0xff] %vm459_vm1, %v11209_v36 }
 0x187   : > { %500 = vst.msk [vmem:[#allocation4 + $0x140] sm:$0xff] %vm459_vm1, %v11209_v36  ;;  %501 = vst.msk [vmem:[#allocation4 + $0x148] sm:$0xff] %vm459_vm1, %v11209_v36 }
 0x188   : > { %502 = vst.msk [vmem:[#allocation4 + $0x150] sm:$0xff] %vm459_vm1, %v11209_v36  ;;  %503 = vst.msk [vmem:[#allocation4 + $0x158] sm:$0xff] %vm459_vm1, %v11209_v36 }
 0x189   : > { %504 = vst.msk [vmem:[#allocation4 + $0x160] sm:$0xff] %vm459_vm1, %v11209_v36  ;;  %505 = vst.msk [vmem:[#allocation4 + $0x168] sm:$0xff] %vm459_vm1, %v11209_v36  ;;  %v1991_v32 = vpop.xlane.xlu1 %1990 }
 0x18a   : > { %506 = vst.msk [vmem:[#allocation4 + $0x170] sm:$0xff] %vm459_vm1, %v11209_v36  ;;  %507 = vst.msk [vmem:[#allocation4 + $0x178] sm:$0xff] %vm459_vm1, %v11209_v36  ;;  %v8685_v5 = vmax.f32 %v8672_v44, %v1991_v32 }
 0x18b   : > { %508 = vst.msk [vmem:[#allocation4 + $0x180] sm:$0xff] %vm459_vm1, %v11209_v36  ;;  %509 = vst.msk [vmem:[#allocation4 + $0x188] sm:$0xff] %vm459_vm1, %v11209_v36 }
 0x18c   : > { %510 = vst.msk [vmem:[#allocation4 + $0x190] sm:$0xff] %vm459_vm1, %v11209_v36  ;;  %511 = vst.msk [vmem:[#allocation4 + $0x198] sm:$0xff] %vm459_vm1, %v11209_v36 }
 0x18d   : > { %512 = vst.msk [vmem:[#allocation4 + $0x1a0] sm:$0xff] %vm459_vm1, %v11209_v36  ;;  %513 = vst.msk [vmem:[#allocation4 + $0x1a8] sm:$0xff] %vm459_vm1, %v11209_v36 }
 0x18e   : > { %514 = vst.msk [vmem:[#allocation4 + $0x1b0] sm:$0xff] %vm459_vm1, %v11209_v36  ;;  %515 = vst.msk [vmem:[#allocation4 + $0x1b8] sm:$0xff] %vm459_vm1, %v11209_v36 }
 0x18f   : > { %516 = vst.msk [vmem:[#allocation4 + $0x1c0] sm:$0xff] %vm459_vm1, %v11209_v36  ;;  %517 = vst.msk [vmem:[#allocation4 + $0x1c8] sm:$0xff] %vm459_vm1, %v11209_v36 }
 0x190   : > { %518 = vst.msk [vmem:[#allocation4 + $0x1d0] sm:$0xff] %vm459_vm1, %v11209_v36  ;;  %519 = vst.msk [vmem:[#allocation4 + $0x1d8] sm:$0xff] %vm459_vm1, %v11209_v36 }
 0x191   : > { %520 = vst.msk [vmem:[#allocation4 + $0x1e0] sm:$0xff] %vm459_vm1, %v11209_v36  ;;  %521 = vst.msk [vmem:[#allocation4 + $0x1e8] sm:$0xff] %vm459_vm1, %v11209_v36 }
 0x192   : > { %522 = vst.msk [vmem:[#allocation4 + $0x1f0] sm:$0xff] %vm459_vm1, %v11209_v36  ;;  %523 = vst.msk [vmem:[#allocation4 + $0x1f8] sm:$0xff] %vm459_vm1, %v11209_v36  ;;  %v1018_v36 = vmul.f32 1.442695, %v11213_v52  ;;  %v8613_v52 = vld [vmem:[#allocation2 + $0xb0] sm:$0xff] }
 0x193   : > { %11210 = vst [vmem:[#allocation36_spill] sm:$0xff] %v8577_v56  ;;  %11211 = vst [vmem:[#allocation84_spill] sm:$0xff] %v8579_v60  ;;  %v8634_v4 = vmax.f32 %v8613_v52, %v1970_v42  ;;  %v1026_v42 = vmul.f32 1.442695, %v997_v27 }
 0x194   : > { %2740 = vst.msk [vmem:[#allocation2 + $0x90] sm:$0xff] %vm330_vm0, %v8443_v16  ;;  %2743 = vst.msk [vmem:[#allocation2 + $0xa8] sm:$0xff] %vm330_vm0, %v8577_v56  ;;  %6628 = vpow2.f32 %v1018_v36  ;;  %v8656_v36 = vmax.f32 %v8639_v17, %v1976_v50  ;;  %v6558_v50 = vld [vmem:[%s10868_s1 + $0xc0] sm:$0xff]  }
 0x195   : > { %11215 = vst [vmem:[#allocation86_spill] sm:$0xff] %v8606_v0  ;;  %11216 = vst [vmem:[#allocation87_spill] sm:$0xff] %v8611_v47  ;;  %6630 = vpow2.f32 %v1028_v45  ;;  %v8648_v45 = vld [vmem:[#allocation2 + $0xd8] sm:$0xff]  ;;  %6304 = vmatprep.subr.bf16.mxu1 %v6558_v50 }
 0x196   : > { %11217 = vst [vmem:[#allocation88_spill] sm:$0xff] %v8613_v52  ;;  %11218 = vst [vmem:[#allocation89_spill] sm:$0xff] %v8615_v55  ;;  %6632 = vpow2.f32 %v1022_v48  ;;  %v8658_v52 = vpop.eup %6624  ;;  %v8661_v60 = vmax.f32 %v8648_v45, %v1985_v12  ;;  %v8663_v48 = vld [vmem:[#allocation2 + $0xd0] sm:$0xff]  ;;  %v1982_v12 = vpop.xlane.xlu0 %1981 }
 0x197   : > { %2742 = vst.msk [vmem:[#allocation2 + $0xa0] sm:$0xff] %vm330_vm0, %v8606_v0  ;;  %2745 = vst.msk [vmem:[#allocation2 + $0xb8] sm:$0xff] %vm330_vm0, %v8611_v47  ;;  %v8665_v27 = vpop.eup %6626  ;;  %1374 = vperm.xlu1 %6533, %v8658_v52   ;;  %6634 = vpow2.f32 %v1026_v42  ;;  %v8680_v57 = vmax.f32 %v8663_v48, %v1982_v12  ;;  %v999_v12 = vsub.f32 %v8370_v58, %v8385_v53  ;;  %v6560_v53 = vld [vmem:[%s10868_s1 + $0xc8] sm:$0xff]  }
 0x198   : > { %11220 = vst [vmem:[#allocation91_spill] sm:$0xff] %v8634_v4  ;;  %11221 = vst [vmem:[#allocation92_spill] sm:$0xff] %v8637_v2  ;;  %1399 = vperm.xlu0 %6532, %v8665_v27  }
 0x199   : > { %11222 = vst [vmem:[#allocation93_spill] sm:$0xff] %v8639_v17  ;;  %11223 = vst [vmem:[#allocation94_spill] sm:$0xff] %v8641_v21 }
 0x19a   : > { %2744 = vst.msk [vmem:[#allocation2 + $0xb0] sm:$0xff] %vm330_vm0, %v8634_v4  ;;  %11224 = vst [vmem:[#allocation95_spill] sm:$0xff] %v8648_v45  ;;  %v8696_v45 = vld [vmem:[#allocation2 + $0xf8] sm:$0xff]  ;;  %v1988_v11 = vpop.xlane.xlu0 %1987 }
 0x19b   : > { %2747 = vst.msk [vmem:[#allocation2 + $0xc8] sm:$0xff] %vm330_vm0, %v8637_v2  ;;  %11225 = vst [vmem:[#allocation96_spill] sm:$0xff] %v8656_v36  ;;  %v8712_v58 = vmax.f32 %v8687_v23, %v1988_v11  ;;  %v6561_v11 = vld [vmem:[%s10868_s1 + $0x88] sm:$0xff]  }
 0x19c   : > { %11226 = vst [vmem:[#allocation97_spill] sm:$0xff] %v8661_v60  ;;  %11227 = vst [vmem:[#allocation98_spill] sm:$0xff] %v8663_v48  ;;  %v6559_v48 = vld [vmem:[%s10868_s1 + $0x80] sm:$0xff]  }
 0x19d   : > { %11228 = vst [vmem:[#allocation99_spill] sm:$0xff] %v8665_v27  ;;  %2746 = vst.msk [vmem:[#allocation2 + $0xc0] sm:$0xff] %vm330_vm0, %v8656_v36  ;;  %v1997_v27 = vpop.xlane.xlu1 %1996  ;;  %6305 = vmatpush3.bf16.msra.mxu1 %v6559_v48 }
 0x19e   : > { %11229 = vst [vmem:[#allocation100_spill] sm:$0xff] %v8672_v44  ;;  %2749 = vst.msk [vmem:[#allocation2 + $0xd8] sm:$0xff] %vm330_vm0, %v8661_v60  ;;  %v8682_v17 = vpop.eup %6628  ;;  %v8720_v44 = vmax.f32 %v8696_v45, %v1997_v27  ;;  %v1994_v50 = vpop.xlane.xlu0 %1993  ;;  %6306 = vmatprep.subr.bf16.mxu1 %v6560_v53  ;;  %v6563_v53 = vld [vmem:[%s10868_s1 + $0x90] sm:$0xff]  }
 0x19f   : > { %11230 = vst [vmem:[#allocation101_spill] sm:$0xff] %v8680_v57  ;;  %11231 = vst [vmem:[#allocation102_spill] sm:$0xff] %v8682_v17  ;;  %v8689_v42 = vpop.eup %6630  ;;  %1384 = vperm.xlu1 %6533, %v8682_v17   ;;  %v1030_v17 = vmul.f32 1.442695, %v999_v12  ;;  %v6562_v12 = vld [vmem:[%s10868_s1 + $0xd0] sm:$0xff]  }
 0x1a0   : > { %11232 = vst [vmem:[#allocation103_spill] sm:$0xff] %v8685_v5  ;;  %11233 = vst [vmem:[#allocation104_spill] sm:$0xff] %v8687_v23  ;;  %1409 = vperm.xlu0 %6532, %v8689_v42   ;;  %v8717_v32 = vpop.eup %6632  ;;  %v6570_v27 = vld [vmem:[%s10868_s1 + $0xf0] sm:$0xff]  }
 0x1a1   : > { %11234 = vst [vmem:[#allocation105_spill] sm:$0xff] %v8689_v42  ;;  %2748 = vst.msk [vmem:[#allocation2 + $0xd0] sm:$0xff] %vm330_vm0, %v8680_v57  ;;  %v8722_v42 = vld [vmem:[#allocation2 + $0xf0] sm:$0xff]  ;;  %v8740_v23 = vpop.eup %6634  ;;  %6307 = vmatpush3.bf16.msra.mxu1 %v6561_v11  ;;  %6636 = vpow2.f32 %v1030_v17  ;;  %v6564_v17 = vld [vmem:[%s10868_s1 + $0xd8] sm:$0xff]  }
 0x1a2   : > { %11235 = vst [vmem:[#allocation106_spill] sm:$0xff] %v8696_v45  ;;  %2751 = vst.msk [vmem:[#allocation2 + $0xe8] sm:$0xff] %vm330_vm0, %v8685_v5  ;;  %v8738_v21 = vmax.f32 %v8722_v42, %v1994_v50  ;;  %6308 = vmatprep.subr.bf16.mxu1 %v6562_v12  ;;  %v6565_v11 = vld [vmem:[%s10868_s1 + $0x98] sm:$0xff]   ;;  %v6566_v12 = vld [vmem:[%s10868_s1 + $0xe0] sm:$0xff]  }
 0x1a3   : > { %11236 = vst [vmem:[#allocation107_spill] sm:$0xff] %v8712_v58  ;;  %11237 = vst [vmem:[#allocation108_spill] sm:$0xff] %v8717_v32  ;;  %1394 = vperm.xlu1 %6533, %v8717_v32   ;;  %v11244_v45 = vld [vmem:[#allocation37_spill] sm:$0xff] }
 0x1a4   : > { %11238 = vst [vmem:[#allocation109_spill] sm:$0xff] %v8720_v44  ;;  %11239 = vst [vmem:[#allocation110_spill] sm:$0xff] %v8722_v42  ;;  %2064 = vperm.xlu0 %6532, %v8388_v31  }
 0x1a5   : > { %2750 = vst.msk [vmem:[#allocation2 + $0xe0] sm:$0xff] %vm330_vm0, %v8712_v58  ;;  %2753 = vst.msk [vmem:[#allocation2 + $0xf8] sm:$0xff] %vm330_vm0, %v8720_v44  ;;  %6309 = vmatpush3.bf16.msra.mxu1 %v6563_v53  ;;  %v6567_v53 = vld [vmem:[%s10868_s1 + $0xa0] sm:$0xff]  }
 0x1a6   : > { %11240 = vst [vmem:[#allocation111_spill] sm:$0xff] %v8738_v21  ;;  %11241 = vst [vmem:[#allocation112_spill] sm:$0xff] %v8740_v23  ;;  %6310 = vmatprep.subr.bf16.mxu1 %v6564_v17  ;;  %v6568_v17 = vld [vmem:[%s10868_s1 + $0xe8] sm:$0xff]  }
 0x1a7   : > { %2752 = vst.msk [vmem:[#allocation2 + $0xf0] sm:$0xff] %vm330_vm0, %v8738_v21  ;;  %1404 = vperm.xlu1 %6533, %v8740_v23  }
 0x1a8   : > { %2109 = vperm.xlu0 %6532, %v8637_v2  }
 0x1a9   : > { %6311 = vmatpush3.bf16.msra.mxu1 %v6565_v11  ;;  %v6569_v11 = vld [vmem:[%s10868_s1 + $0xa8] sm:$0xff]  }
 0x1aa   : > { %6312 = vmatprep.subr.bf16.mxu1 %v6566_v12  ;;  %v6571_v12 = vld [vmem:[%s10868_s1 + $0xb0] sm:$0xff]  }
 0x1ab   : > { %2069 = vperm.xlu1 %6533, %v8409_v35   ;;  %v8764_v50 = vpop.eup %6636 }
 0x1ac   : > { %2119 = vperm.xlu0 %6532, %v8661_v60   ;;  %11242 = vst [vmem:[#allocation113_spill] sm:$0xff] %v8764_v50 }
 0x1ad   : > { %6313 = vmatpush3.bf16.msra.mxu1 %v6567_v53  ;;  %v6572_v53 = vld [vmem:[%s10868_s1 + $0xf8] sm:$0xff]  }
 0x1ae   : > { %6314 = vmatprep.subr.bf16.mxu1 %v6568_v17  ;;  %v6573_v17 = vld [vmem:[%s10868_s1 + $0xb8] sm:$0xff]  }
 0x1af   : > { %2074 = vperm.xlu1 %6533, %v8443_v16   ;;  %v7212_v16 = vmov 2  }
 0x1b0   : > { %2129 = vperm.xlu0 %6532, %v8685_v5   ;;  %v11245_v5 = vld [vmem:[#allocation39_spill] sm:$0xff] }
 0x1b1   : > { %6315 = vmatpush3.bf16.msra.mxu1 %v6569_v11 }
 0x1b2   : > { %6316 = vmatprep.subr.bf16.mxu1 %v6570_v27 }
 0x1b3   : > { %1414 = vperm.xlu1 %6533, %v8764_v50  }
 0x1b4   : > { %2139 = vperm.xlu0 %6532, %v8720_v44  }
 0x1b5   : > { %6317 = vmatpush3.bf16.msra.mxu1 %v6571_v12  ;;  %v11243_v12 = vld [vmem:[#allocation55_spill] sm:$0xff] }
 0x1b6   : > { %6318 = vmatprep.subr.bf16.mxu1 %v6572_v53 }
 0x1b7   : > { %2079 = vperm.xlu1 %6533, %v8414_v19  }
 0x1b8   : > { %6535 = vset.pattern.permute.xlu0 %v7212_v16 }
 0x1b9   : > { %6319 = vmatpush3.bf16.msra.mxu1 %v6573_v17 }
 0x1bb   : > { %2084 = vperm.xlu1 %6533, %v8606_v0  }
 0x1bf   : > { %2089 = vperm.xlu1 %6533, %v8577_v56  }
 0x1c3   : > { %2094 = vperm.xlu1 %6533, %v8634_v4  }
 0x1c7   : > { %2099 = vperm.xlu1 %6533, %v8611_v47  }
 0x1cb   : > { %2104 = vperm.xlu1 %6533, %v8656_v36  }
 0x1cf   : > { %2114 = vperm.xlu1 %6533, %v8680_v57   ;;  %v1035_v27 = vpop.permute.xlu1 %1034  ;;  %v11246_v57 = vld [vmem:[#allocation60_spill] sm:$0xff] }
 0x1d0   : > { %v1112_v11 = vsub.f32 %v7713_v1, %v1035_v27  ;;  %v1113_v53 = vsub.f32 %v11243_v12, %v1035_v27  ;;  %v11248_v27 = vld [vmem:[#allocation47_spill] sm:$0xff]  ;;  %v11249_v12 = vld [vmem:[#allocation48_spill] sm:$0xff] }
 0x1d2   : > { %v1144_v48 = vmul.f32 1.442695, %v1112_v11  ;;  %v1146_v44 = vmul.f32 1.442695, %v1113_v53 }
 0x1d3   : > { %2124 = vperm.xlu1 %6533, %v8712_v58   ;;  %v11247_v58 = vld [vmem:[#allocation61_spill] sm:$0xff] }
 0x1d4   : > { %v1045_v17 = vpop.permute.xlu1 %1044  ;;  %6638 = vpow2.f32 %v1144_v48  ;;  %v1040_v2 = vpop.permute.xlu0 %1039 }
 0x1d5   : > { %v1116_v42 = vsub.f32 %v11244_v45, %v1045_v17  ;;  %v1117_v60 = vsub.f32 %v11245_v5, %v1045_v17  ;;  %6640 = vpow2.f32 %v1146_v44  ;;  %v1114_v36 = vsub.f32 %v11246_v57, %v1040_v2  ;;  %v11250_v45 = vld [vmem:[#allocation64_spill] sm:$0xff]  ;;  %v11251_v17 = vld [vmem:[#allocation65_spill] sm:$0xff] }
 0x1d6   : > { %v1115_v47 = vsub.f32 %v11247_v58, %v1040_v2 }
 0x1d7   : > { %2134 = vperm.xlu1 %6533, %v8738_v21   ;;  %v1152_v21 = vmul.f32 1.442695, %v1116_v42  ;;  %v1154_v4 = vmul.f32 1.442695, %v1117_v60  ;;  %v1148_v56 = vmul.f32 1.442695, %v1114_v36 }
 0x1d8   : > { %v1150_v1 = vmul.f32 1.442695, %v1115_v47  ;;  %v1055_v53 = vpop.permute.xlu0 %1054  ;;  %v11252_v47 = vld [vmem:[#allocation58_spill] sm:$0xff]  ;;  %v11253_v42 = vld [vmem:[#allocation59_spill] sm:$0xff] }
 0x1d9   : > { %6642 = vpow2.f32 %v1152_v21  ;;  %v1120_v5 = vsub.f32 %v11250_v45, %v1055_v53  ;;  %v1121_v44 = vsub.f32 %v11251_v17, %v1055_v53 }
 0x1da   : > { %v1050_v0 = vpop.permute.xlu1 %1049  ;;  %6644 = vpow2.f32 %v1154_v4 }
 0x1db   : > { %v1118_v11 = vsub.f32 %v11248_v27, %v1050_v0  ;;  %v1119_v48 = vsub.f32 %v11249_v12, %v1050_v0  ;;  %6646 = vpow2.f32 %v1148_v56  ;;  %v1160_v2 = vmul.f32 1.442695, %v1120_v5  ;;  %v11254_v0 = vld [vmem:[#allocation69_spill] sm:$0xff]  ;;  %v11255_v12 = vld [vmem:[#allocation70_spill] sm:$0xff]  ;;  %6534 = vset.pattern.permute.xlu1 %v7212_v16  ;;  %v11259_v16 = vld [vmem:[#allocation72_spill] sm:$0xff] }
 0x1dc   : > { %6648 = vpow2.f32 %v1150_v1  ;;  %v1162_v60 = vmul.f32 1.442695, %v1121_v44  ;;  %v11256_v44 = vld [vmem:[#allocation62_spill] sm:$0xff] }
 0x1dd   : > { %v1156_v57 = vmul.f32 1.442695, %v1118_v11  ;;  %v1158_v19 = vmul.f32 1.442695, %v1119_v48  ;;  %v1065_v27 = vpop.permute.xlu0 %1064 }
 0x1de   : > { %v1060_v36 = vpop.permute.xlu1 %1059  ;;  %v1124_v4 = vsub.f32 %v11254_v0, %v1065_v27  ;;  %v1125_v45 = vsub.f32 %v11255_v12, %v1065_v27  ;;  %v6639_v56 = vpop.eup %6638  ;;  %v11258_v27 = vld [vmem:[#allocation71_spill] sm:$0xff] }
 0x1df   : > { %6650 = vpow2.f32 %v1156_v57  ;;  %v1122_v21 = vsub.f32 %v11252_v47, %v1060_v36  ;;  %v1123_v58 = vsub.f32 %v11253_v42, %v1060_v36  ;;  %v6641_v48 = vpop.eup %6640 }
 0x1e0   : > { %6652 = vpow2.f32 %v1158_v19  ;;  %v1168_v53 = vmul.f32 1.442695, %v1124_v4  ;;  %v1170_v5 = vmul.f32 1.442695, %v1125_v45  ;;  %v11257_v19 = vld [vmem:[#allocation66_spill] sm:$0xff]  ;;  %v1240_v42 = vadd.f32 %v6641_v48, %v6639_v56 }
 0x1e1   : > { %6654 = vpow2.f32 %v1160_v2  ;;  %v1164_v1 = vmul.f32 1.442695, %v1122_v21  ;;  %v1166_v11 = vmul.f32 1.442695, %v1123_v58  ;;  %v1075_v47 = vpop.permute.xlu0 %1074 }
 0x1e2   : > { %6656 = vpow2.f32 %v1162_v60  ;;  %v1070_v17 = vpop.permute.xlu1 %1069  ;;  %v1128_v0 = vsub.f32 %v11258_v27, %v1075_v47  ;;  %v1129_v12 = vsub.f32 %v11259_v16, %v1075_v47  ;;  %1241 = vadd.xlane.f32.xlu0 %v1240_v42 }
 0x1e3   : > { %6658 = vpow2.f32 %v1164_v1  ;;  %v1126_v57 = vsub.f32 %v11256_v44, %v1070_v17  ;;  %v1127_v36 = vsub.f32 %v11257_v19, %v1070_v17  ;;  %v8819_v2 = vpop.eup %6642  ;;  %v11260_v17 = vld [vmem:[#allocation67_spill] sm:$0xff] }
 0x1e4   : > { %6660 = vpow2.f32 %v1166_v11  ;;  %v6645_v58 = vpop.eup %6644  ;;  %v1176_v4 = vmul.f32 1.442695, %v1128_v0  ;;  %v1178_v45 = vmul.f32 1.442695, %v1129_v12  ;;  %v11261_v11 = vld [vmem:[#allocation68_spill] sm:$0xff] }
 0x1e5   : > { %6662 = vpow2.f32 %v1168_v53  ;;  %v1172_v21 = vmul.f32 1.442695, %v1126_v57  ;;  %v1174_v60 = vmul.f32 1.442695, %v1127_v36  ;;  %v6647_v44 = vpop.eup %6646  ;;  %v1085_v27 = vpop.permute.xlu0 %1084  ;;  %v1246_v47 = vadd.f32 %v6645_v58, %v8819_v2  ;;  %v11262_v53 = vld [vmem:[#allocation75_spill] sm:$0xff]  ;;  %v11263_v36 = vld [vmem:[#allocation76_spill] sm:$0xff] }
 0x1e6   : > { %6664 = vpow2.f32 %v1170_v5  ;;  %v1080_v1 = vpop.permute.xlu1 %1079  ;;  %v6649_v16 = vpop.eup %6648  ;;  %v1132_v57 = vsub.f32 %v11262_v53, %v1085_v27  ;;  %v1133_v42 = vsub.f32 %v11263_v36, %v1085_v27  ;;  %v1433_v31 = vpack.c.bf16 %v6647_v44, %v6639_v56  ;;  %v11265_v56 = vld [vmem:[#allocation74_spill] sm:$0xff] }
 0x1e7   : > { %6666 = vpow2.f32 %v1172_v21  ;;  %v1130_v19 = vsub.f32 %v11260_v17, %v1080_v1  ;;  %v1131_v35 = vsub.f32 %v11261_v11, %v1080_v1  ;;  %1247 = vadd.xlane.f32.xlu0 %v1246_v47  ;;  %v1434_v21 = vpack.c.bf16 %v6649_v16, %v6641_v48  ;;  %v11266_v48 = vld [vmem:[#allocation77_spill] sm:$0xff] }
 0x1e8   : > { %6668 = vpow2.f32 %v1174_v60  ;;  %v1184_v1 = vmul.f32 1.442695, %v1132_v57  ;;  %v1186_v11 = vmul.f32 1.442695, %v1133_v42  ;;  %v1243_v50 = vadd.f32 %v6649_v16, %v6647_v44  ;;  %v11264_v60 = vld [vmem:[#allocation73_spill] sm:$0xff] }
 0x1e9   : > { %v8826_v5 = vpop.eup %6650  ;;  %6670 = vpow2.f32 %v1176_v4  ;;  %v1180_v0 = vmul.f32 1.442695, %v1130_v19  ;;  %v1182_v12 = vmul.f32 1.442695, %v1131_v35  ;;  %1609 = vmatprep.mubr.bf16.mxu0 %v1434_v21  ;;  %v1095_v36 = vpop.permute.xlu0 %1094  ;;  %v11267_v19 = vld [vmem:[#allocation78_spill] sm:$0xff] }
 0x1ea   : > { %v6653_v17 = vpop.eup %6652  ;;  %6672 = vpow2.f32 %v1178_v45  ;;  %v1090_v23 = vpop.permute.xlu1 %1089  ;;  %1610 = vmatmul.mubr.bf16.vlgmr.msra.gmra.mrb[0].mxu0 %v1433_v31  ;;  %v1136_v45 = vsub.f32 %v11266_v48, %v1095_v36  ;;  %v1137_v44 = vsub.f32 %v11267_v19, %v1095_v36 }
 0x1eb   : > { %v8828_v32 = vpop.eup %6654  ;;  %6674 = vpow2.f32 %v1180_v0  ;;  %v1134_v27 = vsub.f32 %v11264_v60, %v1090_v23  ;;  %v1135_v53 = vsub.f32 %v11265_v56, %v1090_v23  ;;  %v1249_v4 = vadd.f32 %v6653_v17, %v8826_v5 }
 0x1ec   : > { %v6657_v35 = vpop.eup %6656  ;;  %6676 = vpow2.f32 %v1182_v12  ;;  %v1436_v47 = vpack.c.bf16 %v6653_v17, %v6645_v58  ;;  %v1192_v21 = vmul.f32 1.442695, %v1136_v45  ;;  %v1194_v60 = vmul.f32 1.442695, %v1137_v44  ;;  %v11268_v12 = vld [vmem:[#allocation79_spill] sm:$0xff]  ;;  %v11269_v58 = vld [vmem:[#allocation80_spill] sm:$0xff] }
 0x1ed   : > { %v8835_v16 = vpop.eup %6658  ;;  %6678 = vpow2.f32 %v1184_v1  ;;  %v1188_v57 = vmul.f32 1.442695, %v1134_v27  ;;  %v1190_v42 = vmul.f32 1.442695, %v1135_v53  ;;  %1250 = vadd.xlane.f32.xlu0 %v1249_v4  ;;  %v1252_v23 = vadd.f32 %v6657_v35, %v8828_v32  ;;  %v1105_v36 = vpop.permute.xlu0 %1104  ;;  %v11270_v53 = vld [vmem:[#allocation81_spill] sm:$0xff] }
 0x1ee   : > { %v6661_v0 = vpop.eup %6660  ;;  %6680 = vpow2.f32 %v1186_v11  ;;  %1617 = vmatprep.mubr.bf16.mxu0 %v1436_v47  ;;  %v1140_v4 = vsub.f32 %v11270_v53, %v1105_v36  ;;  %v11271_v11 = vld [vmem:[#allocation82_spill] sm:$0xff]  ;;  %v1435_v45 = vpack.c.bf16 %v8826_v5, %v8819_v2  ;;  %v11273_v2 = vld [vmem:[#allocation83_spill] sm:$0xff] }
 0x1ef   : > { %v8838_v31 = vpop.eup %6662  ;;  %6682 = vpow2.f32 %v1188_v57  ;;  %v1255_v1 = vadd.f32 %v6661_v0, %v8835_v16  ;;  %v1141_v48 = vsub.f32 %v11271_v11, %v1105_v36  ;;  %v11272_v36 = vld [vmem:[#allocation26_spill] sm:$0xff] }
 0x1f0   : > { %v6665_v27 = vpop.eup %6664  ;;  %6684 = vpow2.f32 %v1190_v42 }
 0x1f1   : > { %v8847_v19 = vpop.eup %6666  ;;  %6686 = vpow2.f32 %v1192_v21  ;;  %1256 = vadd.xlane.f32.xlu0 %v1255_v1  ;;  %v1258_v57 = vadd.f32 %v6665_v27, %v8838_v31  ;;  %v1202_v42 = vmul.f32 1.442695, %v1141_v48  ;;  %v8854_v55 = vpop.permute.xlu0 %1344 }
 0x1f2   : > { %6688 = vpow2.f32 %v1194_v60  ;;  %11274 = vst [vmem:[#allocation55_spill] sm:$0xff] %v8854_v55  ;;  %1618 = vmatmul.mubr.bf16.gmra.mrb[4].mxu0 %v1435_v45 }
 0x1fb   : > { %1244 = vadd.xlane.f32.xlu1 %v1243_v50  ;;  %v1100_v50 = vpop.permute.xlu1 %1099 }
 0x1fc   : > { %v1138_v56 = vsub.f32 %v11268_v12, %v1100_v50  ;;  %v1139_v17 = vsub.f32 %v11269_v58, %v1100_v50  ;;  %v6669_v50 = vpop.eup %6668  ;;  %v1200_v12 = vmul.f32 1.442695, %v1140_v4  ;;  %v1438_v58 = vpack.c.bf16 %v6661_v0, %v6657_v35 }
 0x1fd   : > { %v8850_v53 = vpop.eup %6670  ;;  %v1261_v21 = vadd.f32 %v6669_v50, %v8847_v19 }
 0x1fe   : > { %v1196_v44 = vmul.f32 1.442695, %v1138_v56  ;;  %v1198_v47 = vmul.f32 1.442695, %v1139_v17  ;;  %v6673_v56 = vpop.eup %6672  ;;  %1625 = vmatprep.mubr.bf16.mxu0 %v1438_v58  ;;  %v1437_v58 = vpack.c.bf16 %v8835_v16, %v8828_v32 }
 0x1ff   : > { %1253 = vadd.xlane.f32.xlu1 %v1252_v23  ;;  %v1110_v23 = vpop.permute.xlu1 %1109  ;;  %v6675_v60 = vpop.eup %6674  ;;  %1262 = vadd.xlane.f32.xlu0 %v1261_v21  ;;  %v1264_v35 = vadd.f32 %v6673_v56, %v8850_v53 }
 0x200   : > { %6690 = vpow2.f32 %v1196_v44  ;;  %v1142_v11 = vsub.f32 %v11272_v36, %v1110_v23  ;;  %v1143_v5 = vsub.f32 %v11273_v2, %v1110_v23  ;;  %v6677_v0 = vpop.eup %6676  ;;  %v8860_v44 = vpop.permute.xlu0 %1359  ;;  %1626 = vmatmul.mubr.bf16.gmra.mrb[8].mxu0 %v1437_v58 }
 0x201   : > { %6692 = vpow2.f32 %v1198_v47  ;;  %v6679_v48 = vpop.eup %6678  ;;  %11276 = vst [vmem:[#allocation39_spill] sm:$0xff] %v8860_v44  ;;  %v1267_v23 = vadd.f32 %v6677_v0, %v6675_v60 }
 0x202   : > { %6694 = vpow2.f32 %v1200_v12  ;;  %v1204_v17 = vmul.f32 1.442695, %v1142_v11  ;;  %v1206_v1 = vmul.f32 1.442695, %v1143_v5  ;;  %v6681_v47 = vpop.eup %6680  ;;  %v1440_v11 = vpack.c.bf16 %v6669_v50, %v6665_v27 }
 0x203   : > { %1259 = vadd.xlane.f32.xlu1 %v1258_v57  ;;  %6696 = vpow2.f32 %v1202_v42  ;;  %v8858_v4 = vpop.permute.xlu1 %1339  ;;  %v6683_v45 = vpop.eup %6682  ;;  %1268 = vadd.xlane.f32.xlu0 %v1267_v23  ;;  %v1270_v57 = vadd.f32 %v6681_v47, %v6679_v48 }
 0x204   : > { %11275 = vst [vmem:[#allocation37_spill] sm:$0xff] %v8858_v4  ;;  %6698 = vpow2.f32 %v1204_v17  ;;  %v6685_v12 = vpop.eup %6684  ;;  %v8868_v2 = vpop.permute.xlu0 %1369  ;;  %1633 = vmatprep.mubr.bf16.mxu0 %v1440_v11  ;;  %v1439_v11 = vpack.c.bf16 %v8847_v19, %v8838_v31 }
 0x205   : > { %6700 = vpow2.f32 %v1206_v1  ;;  %v8866_v42 = vpop.eup %6686  ;;  %11278 = vst [vmem:[#allocation61_spill] sm:$0xff] %v8868_v2  ;;  %v1273_v5 = vadd.f32 %v6685_v12, %v6683_v45  ;;  %v1442_v2 = vpack.c.bf16 %v6677_v0, %v6673_v56  ;;  %v1444_v4 = vpack.c.bf16 %v6685_v12, %v6681_v47  ;;  %v11284_v47 = vld [vmem:[#allocation50_spill] sm:$0xff] }
 0x206   : > { %v6689_v21 = vpop.eup %6688  ;;  %v11285_v12 = vld [vmem:[#allocation38_spill] sm:$0xff] }
 0x207   : > { %1265 = vadd.xlane.f32.xlu1 %v1264_v35  ;;  %v8864_v36 = vpop.permute.xlu1 %1349  ;;  %1274 = vadd.xlane.f32.xlu0 %v1273_v5  ;;  %v1276_v1 = vadd.f32 %v6689_v21, %v8866_v42 }
 0x208   : > { %11277 = vst [vmem:[#allocation60_spill] sm:$0xff] %v8864_v36  ;;  %v8875_v16 = vpop.permute.xlu0 %1379  ;;  %1634 = vmatmul.mubr.bf16.gmra.mrb[12].mxu0 %v1439_v11  ;;  %v1443_v11 = vpack.c.bf16 %v6683_v45, %v6679_v48 }
 0x209   : > { %11280 = vst [vmem:[#allocation48_spill] sm:$0xff] %v8875_v16  ;;  %1641 = vmatprep.mubr.bf16.mxu0 %v1442_v2 }
 0x20a   : > { %v6691_v17 = vpop.eup %6690 }
 0x20b   : > { %1271 = vadd.xlane.f32.xlu1 %v1270_v57  ;;  %v6693_v35 = vpop.eup %6692  ;;  %v8871_v23 = vpop.permute.xlu1 %1354 }
 0x20c   : > { %11279 = vst [vmem:[#allocation47_spill] sm:$0xff] %v8871_v23  ;;  %v8873_v32 = vpop.eup %6694  ;;  %v1279_v44 = vadd.f32 %v6693_v35, %v6691_v17  ;;  %v8882_v36 = vpop.permute.xlu0 %1389 }
 0x20d   : > { %v6697_v27 = vpop.eup %6696 }
 0x20e   : > { %v6699_v50 = vpop.eup %6698  ;;  %1280 = vadd.xlane.f32.xlu0 %v1279_v44  ;;  %v1282_v57 = vadd.f32 %v6697_v27, %v8873_v32  ;;  %v1441_v44 = vpack.c.bf16 %v6675_v60, %v8850_v53  ;;  %v1446_v53 = vpack.c.bf16 %v6693_v35, %v6689_v21 }
 0x20f   : > { %1277 = vadd.xlane.f32.xlu1 %v1276_v1  ;;  %v6701_v58 = vpop.eup %6700  ;;  %v8880_v5 = vpop.permute.xlu1 %1364 }
 0x210   : > { %v1285_v23 = vadd.f32 %v6701_v58, %v6699_v50  ;;  %1642 = vmatmul.mubr.bf16.gmra.mrb[16].mxu0 %v1441_v44  ;;  %v1448_v21 = vpack.c.bf16 %v6701_v58, %v6697_v27 }
 0x211   : > { %1649 = vmatprep.mubr.bf16.mxu0 %v1444_v4 }
 0x212   : > { %1286 = vadd.xlane.f32.xlu0 %v1285_v23 }
 0x213   : > { %1283 = vadd.xlane.f32.xlu1 %v1282_v57 }
 0x216   : > { %v8884_v16 = vpop.permute.xlu1 %1374 }
 0x217   : > { %v8886_v1 = vpop.permute.xlu0 %1399 }
 0x218   : > { %11281 = vst [vmem:[#allocation64_spill] sm:$0xff] %v8886_v1  ;;  %1650 = vmatmul.mubr.bf16.gmra.mrb[20].mxu0 %v1443_v11 }
 0x219   : > { %1657 = vmatprep.mubr.bf16.mxu0 %v1446_v53 }
 0x21e   : > { %v8889_v55 = vpop.permute.xlu1 %1384 }
 0x21f   : > { %v8891_v31 = vpop.permute.xlu0 %1409 }
 0x220   : > { %11282 = vst [vmem:[#allocation65_spill] sm:$0xff] %v8891_v31 }
 0x222   : > { %v8893_v19 = vpop.permute.xlu1 %1394 }
 0x223   : > { %11283 = vst [vmem:[#allocation58_spill] sm:$0xff] %v8893_v19  ;;  %v2065_v56 = vpop.permute.xlu0 %2064 }
 0x224   : > { %v2142_v0 = vsub.f32 %v11190_v26, %v2065_v56  ;;  %v2143_v2 = vsub.f32 %v11191_v63, %v2065_v56  ;;  %v1445_v26 = vpack.c.bf16 %v6691_v17, %v8866_v42  ;;  %v1447_v42 = vpack.c.bf16 %v6699_v50, %v8873_v32 }
 0x226   : > { %v2174_v23 = vmul.f32 1.442695, %v2142_v0  ;;  %v2176_v57 = vmul.f32 1.442695, %v2143_v2  ;;  %v8897_v1 = vpop.permute.xlu1 %1404  ;;  %1658 = vmatmul.mubr.bf16.gmra.mrb[24].mxu0 %v1445_v26 }
 0x227   : > { %1665 = vmatprep.mubr.bf16.mxu0 %v1448_v21  ;;  %v2110_v26 = vpop.permute.xlu0 %2109 }
 0x228   : > { %6702 = vpow2.f32 %v2174_v23 }
 0x229   : > { %6704 = vpow2.f32 %v2176_v57 }
 0x22a   : > { %v2070_v60 = vpop.permute.xlu1 %2069 }
 0x22b   : > { %v2144_v4 = vsub.f32 %v11284_v47, %v2070_v60  ;;  %v2145_v44 = vsub.f32 %v11285_v12, %v2070_v60 }
 0x22d   : > { %v2178_v31 = vmul.f32 1.442695, %v2144_v4  ;;  %v2180_v19 = vmul.f32 1.442695, %v2145_v44 }
 0x22e   : > { %v2075_v63 = vpop.permute.xlu1 %2074  ;;  %1666 = vmatmul.mubr.bf16.gmra.mrb[28].mxu0 %v1447_v42 }
 0x22f   : > { %6706 = vpow2.f32 %v2178_v31  ;;  %v2146_v48 = vsub.f32 %v7942_v20, %v2075_v63  ;;  %v2147_v45 = vsub.f32 %v7945_v3, %v2075_v63  ;;  %v11286_v20 = vld [vmem:[#allocation57_spill] sm:$0xff]  ;;  %v11287_v3 = vld [vmem:[#allocation63_spill] sm:$0xff] }
 0x230   : > { %6708 = vpow2.f32 %v2180_v19 }
 0x231   : > { %v2182_v35 = vmul.f32 1.442695, %v2146_v48  ;;  %v2184_v56 = vmul.f32 1.442695, %v2147_v45 }
 0x232   : > { %v6703_v0 = vpop.eup %6702  ;;  %v8904_v2 = vpop.permute.xlu1 %1414 }
 0x233   : > { %v6705_v23 = vpop.eup %6704  ;;  %6710 = vpow2.f32 %v2182_v35 }
 0x234   : > { %6712 = vpow2.f32 %v2184_v56  ;;  %v2271_v57 = vadd.f32 %v6705_v23, %v6703_v0 }
 0x236   : > { %2272 = vadd.xlane.f32.xlu1 %v2271_v57  ;;  %v2080_v17 = vpop.permute.xlu1 %2079  ;;  %v2120_v57 = vpop.permute.xlu0 %2119 }
 0x237   : > { %v2148_v31 = vsub.f32 %v11286_v20, %v2080_v17  ;;  %v2149_v27 = vsub.f32 %v11287_v3, %v2080_v17 }
 0x239   : > { %v6707_v58 = vpop.eup %6706  ;;  %v2186_v19 = vmul.f32 1.442695, %v2148_v31  ;;  %v2188_v11 = vmul.f32 1.442695, %v2149_v27 }
 0x23a   : > { %v6709_v53 = vpop.eup %6708  ;;  %v2085_v60 = vpop.permute.xlu1 %2084  ;;  %v2464_v47 = vpack.c.bf16 %v6707_v58, %v6703_v0 }
 0x23b   : > { %6714 = vpow2.f32 %v2186_v19  ;;  %v2150_v4 = vsub.f32 %v7967_v10, %v2085_v60  ;;  %v2151_v12 = vsub.f32 %v7970_v38, %v2085_v60  ;;  %v2274_v44 = vadd.f32 %v6709_v53, %v6707_v58  ;;  %v11288_v60 = vld [vmem:[#allocation29_spill] sm:$0xff] }
 0x23c   : > { %6716 = vpow2.f32 %v2188_v11  ;;  %v2465_v32 = vpack.c.bf16 %v6709_v53, %v6705_v23  ;;  %v2160_v23 = vsub.f32 %v8006_v7, %v2110_v26  ;;  %v2164_v19 = vsub.f32 %v8026_v41, %v2120_v57 }
 0x23d   : > { %v6711_v50 = vpop.eup %6710  ;;  %v2190_v63 = vmul.f32 1.442695, %v2150_v4  ;;  %v2192_v48 = vmul.f32 1.442695, %v2151_v12  ;;  %2275 = vadd.xlane.f32.xlu0 %v2274_v44  ;;  %v2130_v4 = vpop.permute.xlu0 %2129  ;;  %v2165_v41 = vsub.f32 %v8029_v62, %v2120_v57 }
 0x23e   : > { %v6713_v45 = vpop.eup %6712  ;;  %2641 = vmatprep.mubr.bf16.mxu1 %v2465_v32  ;;  %v2090_v21 = vpop.permute.xlu1 %2089  ;;  %v2210_v58 = vmul.f32 1.442695, %v2160_v23 }
 0x23f   : > { %6718 = vpow2.f32 %v2190_v63  ;;  %2642 = vmatmul.mubr.bf16.vlgmr.msra.gmra.mrb[0].mxu1 %v2464_v47  ;;  %v2152_v35 = vsub.f32 %v7939_v37, %v2090_v21  ;;  %v2153_v56 = vsub.f32 %v7952_v15, %v2090_v21  ;;  %v2277_v10 = vadd.f32 %v6713_v45, %v6711_v50 }
 0x240   : > { %6720 = vpow2.f32 %v2192_v48  ;;  %v2161_v37 = vsub.f32 %v8009_v51, %v2110_v26  ;;  %v2218_v63 = vmul.f32 1.442695, %v2164_v19  ;;  %v2220_v62 = vmul.f32 1.442695, %v2165_v41 }
 0x241   : > { %v2194_v38 = vmul.f32 1.442695, %v2152_v35  ;;  %v2196_v0 = vmul.f32 1.442695, %v2153_v56  ;;  %2278 = vadd.xlane.f32.xlu0 %v2277_v10  ;;  %v2168_v35 = vsub.f32 %v8044_v61, %v2130_v4  ;;  %v2140_v23 = vpop.permute.xlu0 %2139 }
 0x242   : > { %v2095_v42 = vpop.permute.xlu1 %2094  ;;  %v2212_v44 = vmul.f32 1.442695, %v2161_v37  ;;  %v2172_v37 = vsub.f32 %v8060_v49, %v2140_v23 }
 0x243   : > { %6722 = vpow2.f32 %v2194_v38  ;;  %v2154_v17 = vsub.f32 %v7989_v28, %v2095_v42  ;;  %v2155_v20 = vsub.f32 %v7992_v18, %v2095_v42 }
 0x244   : > { %6724 = vpow2.f32 %v2196_v0  ;;  %v2169_v0 = vsub.f32 %v8047_v9, %v2130_v4 }
 0x245   : > { %v6715_v31 = vpop.eup %6714  ;;  %v2198_v3 = vmul.f32 1.442695, %v2154_v17  ;;  %v2200_v15 = vmul.f32 1.442695, %v2155_v20 }
 0x246   : > { %v6717_v27 = vpop.eup %6716  ;;  %v2100_v11 = vpop.permute.xlu1 %2099  ;;  %v2466_v53 = vpack.c.bf16 %v6715_v31, %v6711_v50  ;;  %v2228_v9 = vmul.f32 1.442695, %v2169_v0 }
 0x247   : > { %6726 = vpow2.f32 %v2198_v3  ;;  %v2156_v7 = vsub.f32 %v7980_v40, %v2100_v11  ;;  %v2157_v47 = vsub.f32 %v11288_v60, %v2100_v11  ;;  %v2467_v28 = vpack.c.bf16 %v6717_v27, %v6713_v45 }
 0x248   : > { %6728 = vpow2.f32 %v2200_v15  ;;  %v2280_v18 = vadd.f32 %v6717_v27, %v6715_v31  ;;  %v2226_v31 = vmul.f32 1.442695, %v2168_v35 }
 0x249   : > { %v6719_v12 = vpop.eup %6718  ;;  %v2202_v51 = vmul.f32 1.442695, %v2156_v7  ;;  %v2204_v26 = vmul.f32 1.442695, %v2157_v47  ;;  %2649 = vmatprep.mubr.bf16.mxu1 %v2467_v28  ;;  %6730 = vpow2.f32 %v2210_v58  ;;  %v2173_v58 = vsub.f32 %v8063_v43, %v2140_v23 }
 0x24a   : > { %v6721_v32 = vpop.eup %6720  ;;  %2281 = vadd.xlane.f32.xlu1 %v2280_v18  ;;  %2650 = vmatmul.mubr.bf16.gmra.mrb[4].mxu1 %v2466_v53  ;;  %v2105_v50 = vpop.permute.xlu1 %2104  ;;  %v2234_v7 = vmul.f32 1.442695, %v2172_v37 }
 0x24b   : > { %6732 = vpow2.f32 %v2202_v51  ;;  %v2158_v40 = vsub.f32 %v8016_v34, %v2105_v50  ;;  %v2159_v48 = vsub.f32 %v8019_v24, %v2105_v50  ;;  %v2283_v45 = vadd.f32 %v6721_v32, %v6719_v12 }
 0x24c   : > { %6734 = vpow2.f32 %v2204_v26  ;;  %v2236_v43 = vmul.f32 1.442695, %v2173_v58 }
 0x24d   : > { %v6723_v21 = vpop.eup %6722  ;;  %6736 = vpow2.f32 %v2212_v44  ;;  %v2206_v56 = vmul.f32 1.442695, %v2158_v40  ;;  %v2208_v10 = vmul.f32 1.442695, %v2159_v48  ;;  %2284 = vadd.xlane.f32.xlu0 %v2283_v45 }
 0x24e   : > { %v6725_v38 = vpop.eup %6724  ;;  %6738 = vpow2.f32 %v2218_v63  ;;  %v2115_v57 = vpop.permute.xlu1 %2114  ;;  %v2468_v42 = vpack.c.bf16 %v6723_v21, %v6719_v12 }
 0x24f   : > { %6740 = vpow2.f32 %v2206_v56  ;;  %v2162_v34 = vsub.f32 %v8036_v29, %v2115_v57  ;;  %v2163_v24 = vsub.f32 %v8039_v25, %v2115_v57  ;;  %v2469_v17 = vpack.c.bf16 %v6725_v38, %v6721_v32 }
 0x250   : > { %6742 = vpow2.f32 %v2208_v10  ;;  %v2286_v20 = vadd.f32 %v6725_v38, %v6723_v21 }
 0x251   : > { %v6727_v61 = vpop.eup %6726  ;;  %v2214_v3 = vmul.f32 1.442695, %v2162_v34  ;;  %v2216_v15 = vmul.f32 1.442695, %v2163_v24  ;;  %2657 = vmatprep.mubr.bf16.mxu1 %v2469_v17  ;;  %6744 = vpow2.f32 %v2220_v62 }
 0x252   : > { %v6729_v27 = vpop.eup %6728  ;;  %2287 = vadd.xlane.f32.xlu1 %v2286_v20  ;;  %2658 = vmatmul.mubr.bf16.gmra.mrb[8].mxu1 %v2468_v42  ;;  %v2125_v29 = vpop.permute.xlu1 %2124 }
 0x253   : > { %6746 = vpow2.f32 %v2214_v3  ;;  %v2166_v25 = vsub.f32 %v8052_v46, %v2125_v29  ;;  %v2167_v19 = vsub.f32 %v8055_v59, %v2125_v29  ;;  %v2289_v11 = vadd.f32 %v6729_v27, %v6727_v61  ;;  %v6731_v53 = vpop.eup %6730  ;;  %v7150_v29 = vld [vmem:[%s7277_s26] sm:$0xff] }
 0x254   : > { %6748 = vpow2.f32 %v2216_v15 }
 0x255   : > { %v6733_v49 = vpop.eup %6732  ;;  %6750 = vpow2.f32 %v2226_v31  ;;  %v2222_v60 = vmul.f32 1.442695, %v2166_v25  ;;  %v2224_v47 = vmul.f32 1.442695, %v2167_v19  ;;  %2290 = vadd.xlane.f32.xlu0 %v2289_v11  ;;  %v7151_v25 = vld [vmem:[%s7277_s26 + $0x10] sm:$0xff]  ;;  %v7152_v19 = vld [vmem:[%s7277_s26 + $0x8] sm:$0xff] }
 0x256   : > { %v6735_v28 = vpop.eup %6734  ;;  %6752 = vpow2.f32 %v2228_v9  ;;  %v2135_v4 = vpop.permute.xlu1 %2134  ;;  %v2470_v18 = vpack.c.bf16 %v6733_v49, %v6727_v61  ;;  %v1208_v11 = vld [vmem:[#allocation3] sm:$0xff] }
 0x257   : > { %v6737_v12 = vpop.eup %6736  ;;  %6754 = vpow2.f32 %v2222_v60  ;;  %v2170_v46 = vsub.f32 %v8068_v39, %v2135_v4  ;;  %v2171_v59 = vsub.f32 %v8071_v14, %v2135_v4  ;;  %v2471_v44 = vpack.c.bf16 %v6735_v28, %v6729_v27  ;;  %v7156_v4 = vld [vmem:[%s7277_s26 + $0x30] sm:$0xff] }
 0x258   : > { %v6739_v51 = vpop.eup %6738  ;;  %6756 = vpow2.f32 %v2224_v47  ;;  %v2292_v26 = vadd.f32 %v6735_v28, %v6733_v49  ;;  %v2298_v39 = vadd.f32 %v6737_v12, %v6731_v53  ;;  %v7154_v49 = vld [vmem:[%s7277_s26 + $0x20] sm:$0xff]  ;;  %v1210_v47 = vld [vmem:[#allocation3 + $0x10] sm:$0xff]  ;;  %v7155_v28 = vld [vmem:[%s7277_s26 + $0x28] sm:$0xff] }
 0x259   : > { %v6741_v32 = vpop.eup %6740  ;;  %6758 = vpow2.f32 %v2234_v7  ;;  %v2230_v41 = vmul.f32 1.442695, %v2170_v46  ;;  %v2232_v63 = vmul.f32 1.442695, %v2171_v59  ;;  %2665 = vmatprep.mubr.bf16.mxu1 %v2471_v44  ;;  %v1224_v7 = vmul.f32 %v8411_v22, %v1208_v11  ;;  %v1211_v59 = vld [vmem:[#allocation3 + $0x18] sm:$0xff]  ;;  %v11292_v11 = vld [vmem:[#allocation94_spill] sm:$0xff] }
 0x25a   : > { %v6743_v50 = vpop.eup %6742  ;;  %6760 = vpow2.f32 %v2236_v43  ;;  %2293 = vadd.xlane.f32.xlu1 %v2292_v26  ;;  %2666 = vmatmul.mubr.bf16.gmra.mrb[12].mxu1 %v2470_v18  ;;  %v2472_v62 = vpack.c.bf16 %v6731_v53, %v6741_v32  ;;  %v7153_v53 = vld [vmem:[%s7277_s26 + $0x18] sm:$0xff]  ;;  %v1209_v18 = vld [vmem:[#allocation3 + $0x8] sm:$0xff] }
 0x25b   : > { %6762 = vpow2.f32 %v2230_v41  ;;  %v2295_v40 = vadd.f32 %v6743_v50, %v6741_v32  ;;  %v2473_v48 = vpack.c.bf16 %v6737_v12, %v6743_v50  ;;  %v6745_v45 = vpop.eup %6744  ;;  %v1226_v12 = vmul.f32 %v8573_v8, %v1210_v47  ;;  %v7157_v44 = vld [vmem:[%s7277_s26 + $0x38] sm:$0xff]  ;;  %v1212_v41 = vld [vmem:[#allocation3 + $0x20] sm:$0xff]  ;;  %v1213_v8 = vld [vmem:[#allocation3 + $0x28] sm:$0xff] }
 0x25c   : > { %6764 = vpow2.f32 %v2232_v63  ;;  %v2304_v38 = vadd.f32 %v6745_v45, %v6739_v51  ;;  %v1225_v26 = vmul.f32 %v8392_v30, %v1209_v18  ;;  %v1227_v63 = vmul.f32 %v8608_v6, %v1211_v59 }
 0x25d   : > { %v6747_v14 = vpop.eup %6746  ;;  %2296 = vadd.xlane.f32.xlu0 %v2295_v40  ;;  %2673 = vmatprep.mubr.bf16.mxu1 %v2473_v48  ;;  %v7159_v48 = vld [vmem:[%s7277_s26 + $0x48] sm:$0xff]  ;;  %v1228_v30 = vmul.f32 %v8418_v54, %v1212_v41  ;;  %v1229_v6 = vmul.f32 %v8631_v33, %v1213_v8  ;;  %v1223_v41 = vld [vmem:[#allocation3 + $0x78] sm:$0xff] }
 0x25e   : > { %v6749_v21 = vpop.eup %6748  ;;  %2299 = vadd.xlane.f32.xlu1 %v2298_v39  ;;  %v2474_v3 = vpack.c.bf16 %v6739_v51, %v6747_v14  ;;  %v7158_v51 = vld [vmem:[%s7277_s26 + $0x40] sm:$0xff]  ;;  %v7160_v39 = vld [vmem:[%s7277_s26 + $0x50] sm:$0xff] }
 0x25f   : > { %v6751_v35 = vpop.eup %6750  ;;  %v2301_v56 = vadd.f32 %v6749_v21, %v6747_v14  ;;  %v2475_v23 = vpack.c.bf16 %v6745_v45, %v6749_v21  ;;  %v1214_v21 = vld [vmem:[#allocation3 + $0x30] sm:$0xff] }
 0x260   : > { %v6753_v10 = vpop.eup %6752  ;;  %v1230_v54 = vmul.f32 %v8581_v13, %v1214_v21  ;;  %v11298_v21 = vld [vmem:[#allocation51_spill] sm:$0xff] }
 0x261   : > { %v6755_v0 = vpop.eup %6754  ;;  %2302 = vadd.xlane.f32.xlu0 %v2301_v56  ;;  %v2310_v17 = vadd.f32 %v6753_v10, %v6751_v35 }
 0x262   : > { %v6757_v57 = vpop.eup %6756  ;;  %2305 = vadd.xlane.f32.xlu1 %v2304_v38  ;;  %2674 = vmatmul.mubr.bf16.gmra.mrb[16].mxu1 %v2472_v62  ;;  %v2476_v27 = vpack.c.bf16 %v6751_v35, %v6755_v0  ;;  %v7161_v38 = vld [vmem:[%s7277_s26 + $0x58] sm:$0xff] }
 0x263   : > { %v6759_v42 = vpop.eup %6758  ;;  %2681 = vmatprep.mubr.bf16.mxu1 %v2475_v23  ;;  %v2307_v34 = vadd.f32 %v6757_v57, %v6755_v0  ;;  %v2477_v15 = vpack.c.bf16 %v6753_v10, %v6757_v57  ;;  %v1215_v10 = vld [vmem:[#allocation3 + $0x38] sm:$0xff]  ;;  %v7162_v0 = vld [vmem:[%s7277_s26 + $0x60] sm:$0xff] }
 0x264   : > { %v6761_v24 = vpop.eup %6760  ;;  %v1216_v57 = vld [vmem:[#allocation3 + $0x40] sm:$0xff]  ;;  %v1231_v33 = vmul.f32 %v8658_v52, %v1215_v10 }
 0x265   : > { %v6763_v20 = vpop.eup %6762  ;;  %2308 = vadd.xlane.f32.xlu0 %v2307_v34  ;;  %v2316_v37 = vadd.f32 %v6761_v24, %v6759_v42  ;;  %v11301_v10 = vld [vmem:[#allocation45_spill] sm:$0xff] }
 0x266   : > { %v6765_v61 = vpop.eup %6764  ;;  %2311 = vadd.xlane.f32.xlu1 %v2310_v17  ;;  %v2478_v58 = vpack.c.bf16 %v6759_v42, %v6763_v20  ;;  %v7163_v17 = vld [vmem:[%s7277_s26 + $0x68] sm:$0xff] }
 0x267   : > { %v2313_v31 = vadd.f32 %v6765_v61, %v6763_v20  ;;  %v2479_v9 = vpack.c.bf16 %v6761_v24, %v6765_v61  ;;  %v1217_v24 = vld [vmem:[#allocation3 + $0x48] sm:$0xff]  ;;  %v7164_v61 = vld [vmem:[%s7277_s26 + $0x70] sm:$0xff] }
 0x269   : > { %2314 = vadd.xlane.f32.xlu0 %v2313_v31  ;;  %v11289_v31 = vld [vmem:[#allocation89_spill] sm:$0xff] }
 0x26a   : > { %2317 = vadd.xlane.f32.xlu1 %v2316_v37  ;;  %2682 = vmatmul.mubr.bf16.gmra.mrb[20].mxu1 %v2474_v3  ;;  %v1232_v37 = vmul.f32 %v11289_v31, %v1216_v57  ;;  %v1218_v3 = vld [vmem:[#allocation3 + $0x50] sm:$0xff]  ;;  %v11308_v31 = vld [vmem:[#allocation52_spill] sm:$0xff] }
 0x26b   : > { %2689 = vmatprep.mubr.bf16.mxu1 %v2477_v15  ;;  %v11290_v15 = vld [vmem:[#allocation102_spill] sm:$0xff] }
 0x26f   : > { %v1242_v60 = vpop.xlane.xlu0 %1241 }
 0x270   : > { %v1288_v43 = vadd.f32 %v1242_v60, %v1224_v7  ;;  %v1220_v7 = vld [vmem:[#allocation3 + $0x60] sm:$0xff]  ;;  %v11293_v60 = vld [vmem:[#allocation108_spill] sm:$0xff] }
 0x272   : > { %2690 = vmatmul.mubr.bf16.gmra.mrb[24].mxu1 %v2476_v27  ;;  %1305 = vst.msk [vmem:[#allocation3] sm:$0xff] %vm330_vm0, %v1288_v43  ;;  %v1233_v27 = vmul.f32 %v11290_v15, %v1217_v24  ;;  %v2240_v15 = vld [vmem:[#allocation3 + $0x88] sm:$0xff] }
 0x273   : > { %2697 = vmatprep.mubr.bf16.mxu1 %v2479_v9 }
 0x274   : > { %v1248_v46 = vpop.xlane.xlu0 %1247 }
 0x275   : > { %v1290_v22 = vadd.f32 %v1248_v46, %v1226_v12  ;;  %v11294_v12 = vld [vmem:[#allocation99_spill] sm:$0xff] }
 0x276   : > { %v1236_v46 = vmul.f32 %v11294_v12, %v1220_v7  ;;  %v11313_v7 = vld [vmem:[#allocation53_spill] sm:$0xff]  ;;  %v11316_v12 = vld [vmem:[#allocation88_spill] sm:$0xff] }
 0x277   : > { %1307 = vst.msk [vmem:[#allocation3 + $0x10] sm:$0xff] %vm330_vm0, %v1290_v22  ;;  %v11295_v22 = vld [vmem:[#allocation112_spill] sm:$0xff] }
 0x27a   : > { %2698 = vmatmul.mubr.bf16.gmra.mrb[28].mxu1 %v2478_v58  ;;  %v1251_v40 = vpop.xlane.xlu0 %1250  ;;  %v1219_v58 = vld [vmem:[#allocation3 + $0x58] sm:$0xff] }
 0x27b   : > { %2755 = vperm.xlu1 %6534, %v7150_v29   ;;  %v1291_v45 = vadd.f32 %v1251_v40, %v1227_v63  ;;  %v7165_v29 = vld [vmem:[%s7277_s26 + $0x78] sm:$0xff]  ;;  %v1235_v47 = vmul.f32 %v11293_v60, %v1219_v58 }
 0x27c   : > { %v11314_v60 = vld [vmem:[#allocation36_spill] sm:$0xff] }
 0x27d   : > { %1308 = vst.msk [vmem:[#allocation3 + $0x18] sm:$0xff] %vm330_vm0, %v1291_v45 }
 0x27e   : > { %v1257_v56 = vpop.xlane.xlu0 %1256 }
 0x27f   : > { %2763 = vperm.xlu1 %6534, %v7151_v25   ;;  %2759 = vperm.xlu0 %6535, %v7152_v19   ;;  %v1293_v62 = vadd.f32 %v1257_v56, %v1229_v6  ;;  %v11291_v19 = vmov 0   ;;  %v11299_v6 = vld [vmem:[#allocation40_spill] sm:$0xff] }
 0x281   : > { %1310 = vst.msk [vmem:[#allocation3 + $0x28] sm:$0xff] %vm330_vm0, %v1293_v62 }
 0x283   : > { %2767 = vperm.xlu1 %6534, %v7153_v53   ;;  %2771 = vperm.xlu0 %6535, %v7154_v49   ;;  %v1234_v53 = vmul.f32 %v11292_v11, %v1218_v3 }
 0x287   : > { %2775 = vperm.xlu1 %6534, %v7155_v28   ;;  %2779 = vperm.xlu0 %6535, %v7156_v4   ;;  %v1221_v4 = vld [vmem:[#allocation3 + $0x68] sm:$0xff] }
 0x288   : > { %v1245_v32 = vpop.xlane.xlu1 %1244 }
 0x289   : > { %v1289_v50 = vadd.f32 %v1245_v32, %v1225_v26 }
 0x28b   : > { %2783 = vperm.xlu1 %6534, %v7157_v44   ;;  %2787 = vperm.xlu0 %6535, %v7158_v51   ;;  %1306 = vst.msk [vmem:[#allocation3 + $0x8] sm:$0xff] %vm330_vm0, %v1289_v50  ;;  %v1222_v44 = vld [vmem:[#allocation3 + $0x70] sm:$0xff]  ;;  %v1237_v51 = vmul.f32 %v11295_v22, %v1221_v4  ;;  %v11296_v50 = vld [vmem:[#allocation105_spill] sm:$0xff] }
 0x28c   : > { %v1254_v14 = vpop.xlane.xlu1 %1253  ;;  %v1263_v34 = vpop.xlane.xlu0 %1262  ;;  %v1238_v40 = vmul.f32 %v11296_v50, %v1222_v44  ;;  %v1321_v22 = vld [vmem:[#allocation4] sm:$0xff] }
 0x28d   : > { %v1292_v35 = vadd.f32 %v1254_v14, %v1228_v30  ;;  %v1295_v20 = vadd.f32 %v1263_v34, %v1231_v33  ;;  %v2239_v34 = vld [vmem:[#allocation3 + $0x80] sm:$0xff] }
 0x28e   : > { %v11319_v50 = vld [vmem:[#allocation85_spill] sm:$0xff] }
 0x28f   : > { %2791 = vperm.xlu1 %6534, %v7159_v48   ;;  %2795 = vperm.xlu0 %6535, %v7160_v39   ;;  %1309 = vst.msk [vmem:[#allocation3 + $0x20] sm:$0xff] %vm330_vm0, %v1292_v35  ;;  %1312 = vst.msk [vmem:[#allocation3 + $0x38] sm:$0xff] %vm330_vm0, %v1295_v20  ;;  %v11297_v48 = vld [vmem:[#allocation113_spill] sm:$0xff]  ;;  %v11300_v35 = vsub.f32 %v11298_v21, %v11299_v6 }
 0x290   : > { %v1260_v23 = vpop.xlane.xlu1 %1259  ;;  %v1269_v9 = vpop.xlane.xlu0 %1268  ;;  %v1239_v45 = vmul.f32 %v11297_v48, %v1223_v41  ;;  %v1322_v41 = vld [vmem:[#allocation4 + $0x8] sm:$0xff] }
 0x291   : > { %v1294_v42 = vadd.f32 %v1260_v23, %v1230_v54  ;;  %v1297_v25 = vadd.f32 %v1269_v9, %v1233_v27  ;;  %v2030_v56 = vmul.f32 1.442695, %v11300_v35  ;;  %v11304_v54 = vld [vmem:[#allocation56_spill] sm:$0xff]  ;;  %v11305_v23 = vld [vmem:[#allocation31_spill] sm:$0xff] }
 0x292   : > { %v11306_v57 = vsub.f32 %v11304_v54, %v11305_v23  ;;  %v11310_v27 = vld [vmem:[#allocation84_spill] sm:$0xff]  ;;  %v11324_v23 = vld [vmem:[#allocation93_spill] sm:$0xff] }
 0x293   : > { %2799 = vperm.xlu1 %6534, %v7161_v38   ;;  %2803 = vperm.xlu0 %6535, %v7162_v0   ;;  %1311 = vst.msk [vmem:[#allocation3 + $0x30] sm:$0xff] %vm330_vm0, %v1294_v42  ;;  %1314 = vst.msk [vmem:[#allocation3 + $0x48] sm:$0xff] %vm330_vm0, %v1297_v25  ;;  %6766 = vpow2.f32 %v2030_v56  ;;  %v11302_v38 = vld [vmem:[#allocation54_spill] sm:$0xff]  ;;  %v2243_v56 = vld [vmem:[#allocation3 + $0xa0] sm:$0xff] }
 0x294   : > { %v1266_v13 = vpop.xlane.xlu1 %1265  ;;  %v1275_v43 = vpop.xlane.xlu0 %1274  ;;  %v11303_v62 = vsub.f32 %v11301_v10, %v11302_v38  ;;  %v2034_v33 = vmul.f32 1.442695, %v11306_v57  ;;  %v11323_v10 = vld [vmem:[#allocation55_spill] sm:$0xff]  ;;  %v11325_v57 = vld [vmem:[#allocation96_spill] sm:$0xff] }
 0x295   : > { %v1296_v52 = vadd.f32 %v1266_v13, %v1232_v37  ;;  %v1299_v18 = vadd.f32 %v1275_v43, %v1235_v47  ;;  %v11315_v47 = vsub.f32 %v11313_v7, %v11314_v60  ;;  %v1418_v38 = vmul.f32 %v11323_v10, %v1322_v41  ;;  %v1324_v60 = vld [vmem:[#allocation4 + $0x18] sm:$0xff]  ;;  %v2245_v41 = vld [vmem:[#allocation3 + $0xb0] sm:$0xff] }
 0x296   : > { %v2032_v0 = vmul.f32 1.442695, %v11303_v62 }
 0x297   : > { %2807 = vperm.xlu1 %6534, %v7163_v17   ;;  %2811 = vperm.xlu0 %6535, %v7164_v61   ;;  %1313 = vst.msk [vmem:[#allocation3 + $0x40] sm:$0xff] %vm330_vm0, %v1296_v52  ;;  %1316 = vst.msk [vmem:[#allocation3 + $0x58] sm:$0xff] %vm330_vm0, %v1299_v18  ;;  %v11307_v61 = vld [vmem:[#allocation46_spill] sm:$0xff] }
 0x298   : > { %v1272_v49 = vpop.xlane.xlu1 %1271  ;;  %6768 = vpow2.f32 %v2032_v0  ;;  %v11309_v37 = vsub.f32 %v11307_v61, %v11308_v31  ;;  %v11311_v52 = vld [vmem:[#allocation86_spill] sm:$0xff] }
 0x299   : > { %v1298_v28 = vadd.f32 %v1272_v49, %v1234_v53  ;;  %6770 = vpow2.f32 %v2034_v33  ;;  %v11312_v9 = vsub.f32 %v11310_v27, %v11311_v52  ;;  %v2241_v53 = vld [vmem:[#allocation3 + $0x90] sm:$0xff]  ;;  %v11326_v33 = vsub.f32 %v11324_v23, %v11325_v57 }
 0x29a   : > { %v2036_v13 = vmul.f32 1.442695, %v11309_v37 }
 0x29b   : > { %2815 = vperm.xlu1 %6534, %v7165_v29   ;;  %6537 = vset.pattern.permute.xlu0 %v11291_v19  ;;  %1315 = vst.msk [vmem:[#allocation3 + $0x50] sm:$0xff] %vm330_vm0, %v1298_v28  ;;  %v1281_v32 = vpop.xlane.xlu0 %1280  ;;  %v2038_v58 = vmul.f32 1.442695, %v11312_v9  ;;  %v2040_v28 = vmul.f32 1.442695, %v11315_v47 }
 0x29c   : > { %v1278_v59 = vpop.xlane.xlu1 %1277  ;;  %v1301_v63 = vadd.f32 %v1281_v32, %v1237_v51  ;;  %6772 = vpow2.f32 %v2036_v13  ;;  %v2242_v32 = vld [vmem:[#allocation3 + $0x98] sm:$0xff] }
 0x29d   : > { %v1300_v26 = vadd.f32 %v1278_v59, %v1236_v46  ;;  %v8992_v42 = vpop.eup %6766  ;;  %6774 = vpow2.f32 %v2038_v58  ;;  %v11317_v46 = vld [vmem:[#allocation91_spill] sm:$0xff] }
 0x29e   : > { %1318 = vst.msk [vmem:[#allocation3 + $0x68] sm:$0xff] %vm330_vm0, %v1301_v63  ;;  %v2255_v24 = vmul.f32 %v8992_v42, %v2239_v34  ;;  %v11318_v59 = vsub.f32 %v11316_v12, %v11317_v46  ;;  %6776 = vpow2.f32 %v2040_v28  ;;  %v2046_v34 = vmul.f32 1.442695, %v11326_v33  ;;  %v11333_v28 = vld [vmem:[#allocation95_spill] sm:$0xff]  ;;  %v11336_v12 = vld [vmem:[#allocation60_spill] sm:$0xff] }
 0x29f   : > { %6536 = vset.pattern.permute.xlu1 %v11291_v19  ;;  %1317 = vst.msk [vmem:[#allocation3 + $0x60] sm:$0xff] %vm330_vm0, %v1300_v26  ;;  %v1287_v30 = vpop.xlane.xlu0 %1286  ;;  %v11379_v19 = vld [vmem:[#allocation34_spill] sm:$0xff] }
 0x2a0   : > { %v1284_v8 = vpop.xlane.xlu1 %1283  ;;  %v1303_v14 = vadd.f32 %v1287_v30, %v1239_v45  ;;  %v2042_v44 = vmul.f32 1.442695, %v11318_v59  ;;  %v11322_v45 = vld [vmem:[#allocation37_spill] sm:$0xff] }
 0x2a1   : > { %v1302_v39 = vadd.f32 %v1284_v8, %v1238_v40  ;;  %v11320_v40 = vld [vmem:[#allocation87_spill] sm:$0xff] }
 0x2a2   : > { %1320 = vst.msk [vmem:[#allocation3 + $0x78] sm:$0xff] %vm330_vm0, %v1303_v14  ;;  %v8998_v3 = vpop.eup %6768  ;;  %6778 = vpow2.f32 %v2042_v44  ;;  %v11321_v8 = vsub.f32 %v11319_v50, %v11320_v40 }
 0x2a3   : > { %1319 = vst.msk [vmem:[#allocation3 + $0x70] sm:$0xff] %vm330_vm0, %v1302_v39  ;;  %v2256_v29 = vmul.f32 %v8998_v3, %v2240_v15  ;;  %v9005_v25 = vpop.eup %6770  ;;  %v1417_v39 = vmul.f32 %v11322_v45, %v1321_v22  ;;  %v1323_v15 = vld [vmem:[#allocation4 + $0x10] sm:$0xff]  ;;  %v11338_v45 = vld [vmem:[#allocation104_spill] sm:$0xff] }
 0x2a4   : > { %v2257_v43 = vmul.f32 %v9005_v25, %v2241_v53  ;;  %v2044_v48 = vmul.f32 1.442695, %v11321_v8  ;;  %v11331_v53 = vld [vmem:[#allocation101_spill] sm:$0xff]  ;;  %v1419_v46 = vmul.f32 %v11336_v12, %v1323_v15  ;;  %v11347_v15 = vld [vmem:[#allocation106_spill] sm:$0xff] }
 0x2a6   : > { %v9016_v51 = vpop.eup %6772  ;;  %6780 = vpow2.f32 %v2044_v48 }
 0x2a7   : > { %v9022_v21 = vpop.eup %6774  ;;  %v2258_v35 = vmul.f32 %v9016_v51, %v2242_v32  ;;  %6782 = vpow2.f32 %v2046_v34 }
 0x2a8   : > { %v2259_v13 = vmul.f32 %v9022_v21, %v2243_v56  ;;  %v9035_v52 = vpop.eup %6776  ;;  %v11342_v56 = vld [vmem:[#allocation103_spill] sm:$0xff] }
 0x2ac   : > { %v9046_v22 = vpop.eup %6778 }
 0x2b0   : > { %v9059_v57 = vpop.eup %6780 }
 0x2bd   : > { %v6256_v26 = vpop.f32.mrb[0].mxu0 }
 0x2be   : > { %v6257_v63 = vpop.f32.mrb[1].mxu0 }
 0x2bf   : > { %v6258_v30 = vadd.f32 %v6257_v63, %v6256_v26  ;;  %v6259_v14 = vpop.f32.mrb[2].mxu0  ;;  %v11337_v63 = vld [vmem:[#allocation47_spill] sm:$0xff] }
 0x2c0   : > { %v6260_v6 = vpop.f32.mrb[3].mxu0  ;;  %v1420_v50 = vmul.f32 %v11337_v63, %v1324_v60  ;;  %v1327_v63 = vld [vmem:[#allocation4 + $0x30] sm:$0xff] }
 0x2c1   : > { %v1674_v62 = vadd.f32 %v6258_v30, %v1417_v39  ;;  %v6261_v0 = vadd.f32 %v6260_v6, %v6259_v14  ;;  %v11339_v39 = vld [vmem:[#allocation107_spill] sm:$0xff] }
 0x2c2   : > { %v11340_v30 = vsub.f32 %v11338_v45, %v11339_v39 }
 0x2c3   : > { %v2273_v17 = vpop.xlane.xlu1 %2272  ;;  %1691 = vst.msk [vmem:[#allocation4] sm:$0xff] %vm459_vm1, %v1674_v62  ;;  %v1675_v37 = vadd.f32 %v6261_v0, %v1418_v38  ;;  %v2261_v0 = vmul.f32 %v9046_v22, %v2245_v41 }
 0x2c4   : > { %v2319_v20 = vadd.f32 %v2273_v17, %v2255_v24  ;;  %v11327_v17 = vld [vmem:[#allocation90_spill] sm:$0xff]  ;;  %v2054_v14 = vmul.f32 1.442695, %v11340_v30  ;;  %v2250_v30 = vld [vmem:[#allocation3 + $0xd8] sm:$0xff] }
 0x2c5   : > { %1692 = vst.msk [vmem:[#allocation4 + $0x8] sm:$0xff] %vm459_vm1, %v1675_v37  ;;  %v6262_v9 = vpop.f32.mrb[4].mxu0  ;;  %v1326_v37 = vld [vmem:[#allocation4 + $0x28] sm:$0xff] }
 0x2c6   : > { %2335 = vst.msk [vmem:[#allocation3 + $0x80] sm:$0xff] %vm330_vm0, %v2319_v20  ;;  %v11328_v20 = vld [vmem:[#allocation92_spill] sm:$0xff]  ;;  %v6263_v47 = vpop.f32.mrb[5].mxu0 }
 0x2c7   : > { %v11329_v61 = vsub.f32 %v11327_v17, %v11328_v20  ;;  %v6264_v59 = vadd.f32 %v6263_v47, %v6262_v9  ;;  %v6265_v44 = vpop.f32.mrb[6].mxu0  ;;  %v11344_v17 = vld [vmem:[#allocation110_spill] sm:$0xff]  ;;  %v11345_v20 = vld [vmem:[#allocation111_spill] sm:$0xff] }
 0x2c8   : > { %v6266_v26 = vpop.f32.mrb[7].mxu0 }
 0x2c9   : > { %v2048_v31 = vmul.f32 1.442695, %v11329_v61  ;;  %v1676_v40 = vadd.f32 %v6264_v59, %v1419_v46  ;;  %v6267_v8 = vadd.f32 %v6266_v26, %v6265_v44  ;;  %v11346_v61 = vsub.f32 %v11344_v17, %v11345_v20  ;;  %v2248_v59 = vld [vmem:[#allocation3 + $0xc8] sm:$0xff] }
 0x2ca   : > { %v2276_v11 = vpop.xlane.xlu0 %2275 }
 0x2cb   : > { %v2320_v49 = vadd.f32 %v2276_v11, %v2256_v29  ;;  %v2244_v29 = vld [vmem:[#allocation3 + $0xa8] sm:$0xff]  ;;  %6784 = vpow2.f32 %v2048_v31  ;;  %1693 = vst.msk [vmem:[#allocation4 + $0x10] sm:$0xff] %vm459_vm1, %v1676_v40  ;;  %v1677_v62 = vadd.f32 %v6267_v8, %v1420_v50  ;;  %v2058_v31 = vmul.f32 1.442695, %v11346_v61  ;;  %v2249_v40 = vld [vmem:[#allocation3 + $0xd0] sm:$0xff] }
 0x2cc   : > { %v11330_v11 = vld [vmem:[#allocation98_spill] sm:$0xff]  ;;  %v2260_v32 = vmul.f32 %v9035_v52, %v2244_v29  ;;  %v11350_v29 = vld [vmem:[#allocation39_spill] sm:$0xff] }
 0x2cd   : > { %2336 = vst.msk [vmem:[#allocation3 + $0x88] sm:$0xff] %vm330_vm0, %v2320_v49  ;;  %v11332_v49 = vsub.f32 %v11330_v11, %v11331_v53 }
 0x2ce   : > { %v2279_v4 = vpop.xlane.xlu0 %2278  ;;  %1694 = vst.msk [vmem:[#allocation4 + $0x18] sm:$0xff] %vm459_vm1, %v1677_v62 }
 0x2cf   : > { %v2321_v18 = vadd.f32 %v2279_v4, %v2257_v43  ;;  %v2050_v7 = vmul.f32 1.442695, %v11332_v49  ;;  %v11334_v43 = vld [vmem:[#allocation97_spill] sm:$0xff] }
 0x2d0   : > { %v11335_v4 = vsub.f32 %v11333_v28, %v11334_v43  ;;  %v2247_v28 = vld [vmem:[#allocation3 + $0xc0] sm:$0xff] }
 0x2d1   : > { %2337 = vst.msk [vmem:[#allocation3 + $0x90] sm:$0xff] %vm330_vm0, %v2321_v18  ;;  %6786 = vpow2.f32 %v2050_v7  ;;  %v9070_v7 = vpop.eup %6782 }
 0x2d2   : > { %v2052_v18 = vmul.f32 1.442695, %v11335_v4  ;;  %v1422_v4 = vmul.f32 %v8880_v5, %v1326_v37 }
 0x2d3   : > { %v6268_v33 = vpop.f32.mrb[8].mxu0 }
 0x2d4   : > { %6788 = vpow2.f32 %v2052_v18 }
 0x2d5   : > { %6790 = vpow2.f32 %v2054_v14  ;;  %v9073_v43 = vpop.eup %6784  ;;  %v1328_v14 = vld [vmem:[#allocation4 + $0x38] sm:$0xff] }
 0x2d6   : > { %v2264_v50 = vmul.f32 %v9073_v43, %v2248_v59  ;;  %v1424_v20 = vmul.f32 %v8884_v16, %v1328_v14  ;;  %v1329_v16 = vld [vmem:[#allocation4 + $0x40] sm:$0xff]  ;;  %v2254_v59 = vld [vmem:[#allocation3 + $0xf8] sm:$0xff] }
 0x2d7   : > { %v2282_v54 = vpop.xlane.xlu1 %2281 }
 0x2d8   : > { %v2322_v24 = vadd.f32 %v2282_v54, %v2258_v35  ;;  %v11341_v35 = vld [vmem:[#allocation100_spill] sm:$0xff]  ;;  %v1325_v54 = vld [vmem:[#allocation4 + $0x20] sm:$0xff] }
 0x2d9   : > { %v11343_v10 = vsub.f32 %v11341_v35, %v11342_v56  ;;  %v1421_v11 = vmul.f32 %v11350_v29, %v1325_v54  ;;  %v11351_v56 = vld [vmem:[#allocation61_spill] sm:$0xff] }
 0x2da   : > { %2338 = vst.msk [vmem:[#allocation3 + $0x98] sm:$0xff] %vm330_vm0, %v2322_v24  ;;  %v2285_v27 = vpop.xlane.xlu0 %2284  ;;  %v2246_v24 = vld [vmem:[#allocation3 + $0xb8] sm:$0xff] }
 0x2db   : > { %v2323_v58 = vadd.f32 %v2285_v27, %v2259_v13  ;;  %v2056_v38 = vmul.f32 1.442695, %v11343_v10  ;;  %v6269_v13 = vpop.f32.mrb[9].mxu0  ;;  %v11348_v27 = vld [vmem:[#allocation109_spill] sm:$0xff]  ;;  %v2262_v47 = vmul.f32 %v9059_v57, %v2246_v24  ;;  %v9078_v41 = vpop.eup %6786  ;;  %v1423_v10 = vmul.f32 %v11351_v56, %v1327_v63 }
 0x2dc   : > { %v11349_v9 = vsub.f32 %v11347_v15, %v11348_v27  ;;  %v6270_v53 = vadd.f32 %v6269_v13, %v6268_v33  ;;  %v6271_v49 = vpop.f32.mrb[10].mxu0  ;;  %v2251_v24 = vld [vmem:[#allocation3 + $0xe0] sm:$0xff]  ;;  %v2252_v15 = vld [vmem:[#allocation3 + $0xe8] sm:$0xff] }
 0x2dd   : > { %2339 = vst.msk [vmem:[#allocation3 + $0xa0] sm:$0xff] %vm330_vm0, %v2323_v58  ;;  %6792 = vpow2.f32 %v2056_v38  ;;  %v6272_v60 = vpop.f32.mrb[11].mxu0  ;;  %v7166_v63 = vld [vmem:[%s10869_s2] sm:$0xff] }
 0x2de   : > { %v2060_v58 = vmul.f32 1.442695, %v11349_v9  ;;  %v1678_v18 = vadd.f32 %v6270_v53, %v1421_v11  ;;  %v6273_v12 = vadd.f32 %v6272_v60, %v6271_v49  ;;  %6794 = vpow2.f32 %v2058_v31  ;;  %v9082_v8 = vpop.eup %6788  ;;  %v11352_v9 = vld [vmem:[#allocation5_spill] sm:$0xff] }
 0x2df   : > { %v2288_v48 = vpop.xlane.xlu1 %2287  ;;  %v9088_v54 = vpop.eup %6790  ;;  %v2266_v33 = vmul.f32 %v9082_v8, %v2250_v30  ;;  %v2824_v29 = vsub.s32 6, %v11352_v9 }
 0x2e0   : > { %v2324_v6 = vadd.f32 %v2288_v48, %v2260_v32  ;;  %6796 = vpow2.f32 %v2060_v58  ;;  %1695 = vst.msk [vmem:[#allocation4 + $0x20] sm:$0xff] %vm459_vm1, %v1678_v18  ;;  %v1679_v26 = vadd.f32 %v6273_v12, %v1422_v4  ;;  %v2263_v32 = vmul.f32 %v9070_v7, %v2247_v28  ;;  %v6274_v48 = vpop.f32.mrb[12].mxu0  ;;  %v2253_v28 = vld [vmem:[#allocation3 + $0xf0] sm:$0xff] }
 0x2e1   : > { %v2820_v58 = vsub.s32 2, %v11352_v9  ;;  %v2267_v53 = vmul.f32 %v9088_v54, %v2251_v24 }
 0x2e2   : > { %2340 = vst.msk [vmem:[#allocation3 + $0xa8] sm:$0xff] %vm330_vm0, %v2324_v6  ;;  %v2291_v23 = vpop.xlane.xlu0 %2290  ;;  %v6275_v6 = vpop.f32.mrb[13].mxu0 }
 0x2e3   : > { %v2325_v34 = vadd.f32 %v2291_v23, %v2261_v0  ;;  %1696 = vst.msk [vmem:[#allocation4 + $0x28] sm:$0xff] %vm459_vm1, %v1679_v26  ;;  %v6276_v38 = vadd.f32 %v6275_v6, %v6274_v48  ;;  %v6277_v62 = vpop.f32.mrb[14].mxu0  ;;  %v2265_v0 = vmul.f32 %v9078_v41, %v2249_v40  ;;  %v11353_v40 = vld [vmem:[#allocation48_spill] sm:$0xff] }
 0x2e4   : > { %v6278_v23 = vpop.f32.mrb[15].mxu0  ;;  %v1425_v48 = vmul.f32 %v11353_v40, %v1329_v16 }
 0x2e5   : > { %2341 = vst.msk [vmem:[#allocation3 + $0xb0] sm:$0xff] %vm330_vm0, %v2325_v34  ;;  %v1680_v61 = vadd.f32 %v6276_v38, %v1423_v10  ;;  %v6279_v31 = vadd.f32 %v6278_v23, %v6277_v62  ;;  %v6280_v18 = vpop.f32.mrb[16].mxu0 }
 0x2e6   : > { %v6281_v26 = vpop.f32.mrb[17].mxu0 }
 0x2e7   : > { %v2294_v46 = vpop.xlane.xlu1 %2293  ;;  %v9092_v17 = vpop.eup %6792  ;;  %1697 = vst.msk [vmem:[#allocation4 + $0x30] sm:$0xff] %vm459_vm1, %v1680_v61  ;;  %v1681_v11 = vadd.f32 %v6279_v31, %v1424_v20  ;;  %v1331_v20 = vld [vmem:[#allocation4 + $0x50] sm:$0xff] }
 0x2e8   : > { %v2326_v44 = vadd.f32 %v2294_v46, %v2262_v47  ;;  %v9100_v49 = vpop.eup %6794  ;;  %v2268_v60 = vmul.f32 %v9092_v17, %v2252_v15  ;;  %v1427_v15 = vmul.f32 %v8882_v36, %v1331_v20 }
 0x2e9   : > { %1698 = vst.msk [vmem:[#allocation4 + $0x38] sm:$0xff] %vm459_vm1, %v1681_v11  ;;  %v2269_v30 = vmul.f32 %v9100_v49, %v2253_v28  ;;  %v1334_v28 = vld [vmem:[#allocation4 + $0x68] sm:$0xff] }
 0x2ea   : > { %2342 = vst.msk [vmem:[#allocation3 + $0xb8] sm:$0xff] %vm330_vm0, %v2326_v44  ;;  %v2297_v5 = vpop.xlane.xlu0 %2296  ;;  %v9104_v4 = vpop.eup %6796  ;;  %v1330_v44 = vld [vmem:[#allocation4 + $0x48] sm:$0xff] }
 0x2eb   : > { %v2300_v45 = vpop.xlane.xlu1 %2299  ;;  %v2327_v39 = vadd.f32 %v2297_v5, %v2263_v32  ;;  %v2825_v5 = vrot.slane %v7166_v63, %v2824_v29  ;;  %v2270_v6 = vmul.f32 %v9104_v4, %v2254_v59  ;;  %v1426_v56 = vmul.f32 %v8889_v55, %v1330_v44 }
 0x2ec   : > { %v2328_v35 = vadd.f32 %v2300_v45, %v2264_v50  ;;  %v2821_v50 = vrot.slane %v7166_v63, %v2820_v58  ;;  %v6282_v45 = vadd.f32 %v6281_v26, %v6280_v18  ;;  %v11354_v26 = vld [vmem:[#allocation64_spill] sm:$0xff] }
 0x2ed   : > { %2343 = vst.msk [vmem:[#allocation3 + $0xc0] sm:$0xff] %vm330_vm0, %v2327_v39  ;;  %v6283_v39 = vpop.f32.mrb[18].mxu0 }
 0x2ee   : > { %2344 = vst.msk [vmem:[#allocation3 + $0xc8] sm:$0xff] %vm330_vm0, %v2328_v35  ;;  %v2303_v34 = vpop.xlane.xlu0 %2302  ;;  %v6284_v14 = vpop.f32.mrb[19].mxu0  ;;  %v1682_v10 = vadd.f32 %v6282_v45, %v1425_v48  ;;  %v11356_v48 = vld [vmem:[#allocation65_spill] sm:$0xff] }
 0x2ef   : > { %v2306_v37 = vpop.xlane.xlu1 %2305  ;;  %v2329_v13 = vadd.f32 %v2303_v34, %v2265_v0  ;;  %v6285_v38 = vadd.f32 %v6284_v14, %v6283_v39  ;;  %v9118_v34 = vrot.slane %v2825_v5, %v2820_v58  ;;  %v6286_v55 = vpop.f32.mrb[20].mxu0 }
 0x2f0   : > { %v2330_v27 = vadd.f32 %v2306_v37, %v2266_v33  ;;  %v9116_v33 = vrot.slane %v2821_v50, %v2820_v58  ;;  %1699 = vst.msk [vmem:[#allocation4 + $0x40] sm:$0xff] %vm459_vm1, %v1682_v10  ;;  %v6287_v31 = vpop.f32.mrb[21].mxu0  ;;  %v1332_v58 = vld [vmem:[#allocation4 + $0x58] sm:$0xff] }
 0x2f1   : > { %2345 = vst.msk [vmem:[#allocation3 + $0xd0] sm:$0xff] %vm330_vm0, %v2329_v13  ;;  %v1683_v24 = vadd.f32 %v6285_v38, %v1426_v56  ;;  %v6288_v29 = vadd.f32 %v6287_v31, %v6286_v55  ;;  %v6289_v11 = vpop.f32.mrb[22].mxu0  ;;  %v1336_v50 = vld [vmem:[#allocation4 + $0x78] sm:$0xff]  ;;  %v11357_v55 = vld [vmem:[#allocation6_spill] sm:$0xff] }
 0x2f2   : > { %2346 = vst.msk [vmem:[#allocation3 + $0xd8] sm:$0xff] %vm330_vm0, %v2330_v27  ;;  %v2309_v47 = vpop.xlane.xlu0 %2308  ;;  %v1333_v27 = vld [vmem:[#allocation4 + $0x60] sm:$0xff] }
 0x2f3   : > { %v2312_v12 = vpop.xlane.xlu1 %2311  ;;  %v2331_v46 = vadd.f32 %v2309_v47, %v2267_v53  ;;  %1700 = vst.msk [vmem:[#allocation4 + $0x48] sm:$0xff] %vm459_vm1, %v1683_v24  ;;  %v1335_v53 = vld [vmem:[#allocation4 + $0x70] sm:$0xff]  ;;  %v1684_v18 = vadd.f32 %v6288_v29, %v1427_v15  ;;  %v1429_v36 = vmul.f32 %v11354_v26, %v1333_v27 }
 0x2f4   : > { %v2332_v32 = vadd.f32 %v2312_v12, %v2268_v60  ;;  %v6290_v12 = vpop.f32.mrb[23].mxu0  ;;  %v9136_v45 = vmul.f32 %v11356_v48, %v1335_v53 }
 0x2f5   : > { %2347 = vst.msk [vmem:[#allocation3 + $0xe0] sm:$0xff] %vm330_vm0, %v2331_v46  ;;  %v6291_v40 = vadd.f32 %v6290_v12, %v6289_v11 }
 0x2f6   : > { %2348 = vst.msk [vmem:[#allocation3 + $0xe8] sm:$0xff] %vm330_vm0, %v2332_v32  ;;  %v2315_v35 = vpop.xlane.xlu0 %2314  ;;  %v11355_v32 = vld [vmem:[#allocation58_spill] sm:$0xff] }
 0x2f7   : > { %v2318_v62 = vpop.xlane.xlu1 %2317  ;;  %v2333_v0 = vadd.f32 %v2315_v35, %v2269_v30  ;;  %v1428_v63 = vmul.f32 %v11355_v32, %v1332_v58  ;;  %1701 = vst.msk [vmem:[#allocation4 + $0x50] sm:$0xff] %vm459_vm1, %v1684_v18 }
 0x2f8   : > { %v2334_v23 = vadd.f32 %v2318_v62, %v2270_v6  ;;  %v1430_v6 = vmul.f32 %v8897_v1, %v1334_v28  ;;  %v9145_v62 = vmul.f32 %v8904_v2, %v1336_v50  ;;  %v11358_v28 = vld [vmem:[#allocation7_spill] sm:$0xff] }
 0x2f9   : > { %2349 = vst.msk [vmem:[#allocation3 + $0xf0] sm:$0xff] %vm330_vm0, %v2333_v0  ;;  %v1685_v56 = vadd.f32 %v6291_v40, %v1428_v63  ;;  %v6292_v24 = vpop.f32.mrb[24].mxu0 }
 0x2fa   : > { %2350 = vst.msk [vmem:[#allocation3 + $0xf8] sm:$0xff] %vm330_vm0, %v2334_v23 }
 0x2fb   : > { %v2756_v61 = vpop.permute.xlu1 %2755  ;;  %1702 = vst.msk [vmem:[#allocation4 + $0x58] sm:$0xff] %vm459_vm1, %v1685_v56 }
 0x2fc   : > { %v2836_v37 = vadd.f32 %v9116_v33, %v2756_v61  ;;  %v2837_v13 = vadd.f32 %v9118_v34, %v2756_v61 }
 0x2fe   : > { %v2868_v16 = vmul.f32 0.2, %v2836_v37  ;;  %v2869_v60 = vmul.f32 0.2, %v2837_v13  ;;  %v2760_v47 = vpop.permute.xlu0 %2759 }
 0x2ff   : > { %v2764_v46 = vpop.permute.xlu1 %2763  ;;  %v9128_v59 = vadd.f32 %v9116_v33, %v2760_v47  ;;  %v9131_v44 = vadd.f32 %v9118_v34, %v2760_v47 }
 0x300   : > { %v2900_v5 = vmax.f32 %v2836_v37, %v2868_v16  ;;  %v2840_v39 = vadd.f32 %v9116_v33, %v2764_v46  ;;  %v2841_v30 = vadd.f32 %v9118_v34, %v2764_v46  ;;  %v2901_v35 = vmax.f32 %v2837_v13, %v2869_v60  ;;  %v6293_v37 = vpop.f32.mrb[25].mxu0 }
 0x301   : > { %v2870_v14 = vmul.f32 0.2, %v9128_v59  ;;  %v2871_v10 = vmul.f32 0.2, %v9131_v44  ;;  %v6294_v58 = vadd.f32 %v6293_v37, %v6292_v24  ;;  %v6295_v11 = vpop.f32.mrb[26].mxu0 }
 0x302   : > { %v2772_v38 = vpop.permute.xlu0 %2771  ;;  %v2872_v0 = vmul.f32 0.2, %v2840_v39  ;;  %v2873_v23 = vmul.f32 0.2, %v2841_v30  ;;  %v9148_v61 = vadd.f32 %v2900_v5, %v11357_v55  ;;  %v6296_v47 = vpop.f32.mrb[27].mxu0  ;;  %v9168_v18 = vadd.f32 %v2901_v35, %v11358_v28 }
 0x303   : > { %v2768_v20 = vpop.permute.xlu1 %2767  ;;  %v2902_v31 = vmax.f32 %v9128_v59, %v2870_v14  ;;  %v2903_v1 = vmax.f32 %v9131_v44, %v2871_v10  ;;  %v9160_v29 = vadd.f32 %v9116_v33, %v2772_v38  ;;  %v9165_v60 = vadd.f32 %v9118_v34, %v2772_v38  ;;  %v11359_v10 = vld [vmem:[#allocation21_spill] sm:$0xff]  ;;  %v6298_v24 = vpop.f32.mrb[28].mxu0 }
 0x304   : > { %v9154_v13 = vadd.f32 %v9116_v33, %v2768_v20  ;;  %v9157_v2 = vadd.f32 %v9118_v34, %v2768_v20  ;;  %v2904_v15 = vmax.f32 %v2840_v39, %v2872_v0  ;;  %v2905_v27 = vmax.f32 %v2841_v30, %v2873_v23  ;;  %v11360_v20 = vld [vmem:[#allocation25_spill] sm:$0xff] }
 0x305   : > { %v1686_v46 = vadd.f32 %v6294_v58, %v1429_v36  ;;  %v2876_v59 = vmul.f32 0.2, %v9160_v29  ;;  %v6297_v44 = vadd.f32 %v6296_v47, %v6295_v11  ;;  %v2877_v5 = vmul.f32 0.2, %v9165_v60  ;;  %v11362_v11 = vld [vmem:[#allocation24_spill] sm:$0xff] }
 0x306   : > { %v2874_v53 = vmul.f32 0.2, %v9154_v13  ;;  %v2875_v16 = vmul.f32 0.2, %v9157_v2  ;;  %v2780_v12 = vpop.permute.xlu0 %2779  ;;  %v2981_v40 = vmax.f32 %v9148_v61, %v9168_v18  ;;  %v9195_v38 = vadd.f32 %v2904_v15, %v11359_v10 }
 0x307   : > { %v2776_v26 = vpop.permute.xlu1 %2775  ;;  %v9172_v32 = vadd.f32 %v9116_v33, %v2780_v12  ;;  %1703 = vst.msk [vmem:[#allocation4 + $0x60] sm:$0xff] %vm459_vm1, %v1686_v46  ;;  %v2908_v36 = vmax.f32 %v9160_v29, %v2876_v59  ;;  %v1687_v48 = vadd.f32 %v6297_v44, %v1430_v6  ;;  %v2909_v14 = vmax.f32 %v9165_v60, %v2877_v5 }
 0x308   : > { %v2906_v63 = vmax.f32 %v9154_v13, %v2874_v53  ;;  %v2907_v50 = vmax.f32 %v9157_v2, %v2875_v16  ;;  %v9182_v39 = vadd.f32 %v9116_v33, %v2776_v26  ;;  %v9185_v30 = vadd.f32 %v9118_v34, %v2776_v26  ;;  %2982 = vmax.xlane.f32.xlu0 %v2981_v40  ;;  %v11361_v13 = vld [vmem:[#allocation23_spill] sm:$0xff]  ;;  %v6299_v16 = vpop.f32.mrb[29].mxu0 }
 0x309   : > { %v9189_v35 = vadd.f32 %v9118_v34, %v2780_v12  ;;  %v9192_v56 = vmul.f32 0.2, %v9172_v32  ;;  %1704 = vst.msk [vmem:[#allocation4 + $0x68] sm:$0xff] %vm459_vm1, %v1687_v48  ;;  %v9201_v37 = vadd.f32 %v2905_v27, %v11360_v20  ;;  %v9204_v2 = vadd.f32 %v2902_v31, %v11361_v13  ;;  %v6301_v46 = vpop.f32.mrb[30].mxu0 }
 0x30a   : > { %v2788_v0 = vpop.permute.xlu0 %2787  ;;  %v2878_v6 = vmul.f32 0.2, %v9182_v39  ;;  %v2879_v23 = vmul.f32 0.2, %v9185_v30  ;;  %v9210_v53 = vadd.f32 %v2903_v1, %v11362_v11  ;;  %v6300_v12 = vadd.f32 %v6299_v16, %v6298_v24 }
 0x30b   : > { %v2784_v58 = vpop.permute.xlu1 %2783  ;;  %v2881_v29 = vmul.f32 0.2, %v9189_v35  ;;  %v2912_v15 = vmax.f32 %v9172_v32, %v9192_v56  ;;  %v2987_v31 = vmax.f32 %v9195_v38, %v9201_v37  ;;  %v6302_v32 = vpop.f32.mrb[31].mxu0  ;;  %v2852_v48 = vadd.f32 %v9116_v33, %v2788_v0 }
 0x30c   : > { %v9213_v60 = vadd.f32 %v9116_v33, %v2784_v58  ;;  %v2910_v47 = vmax.f32 %v9182_v39, %v2878_v6  ;;  %v2911_v27 = vmax.f32 %v9185_v30, %v2879_v23  ;;  %v2984_v44 = vmax.f32 %v9204_v2, %v9210_v53  ;;  %v11363_v23 = vld [vmem:[#allocation8_spill] sm:$0xff] }
 0x30d   : > { %v2913_v59 = vmax.f32 %v9189_v35, %v2881_v29  ;;  %v9223_v1 = vadd.f32 %v9118_v34, %v2784_v58  ;;  %2988 = vmax.xlane.f32.xlu0 %v2987_v31  ;;  %v1688_v40 = vadd.f32 %v6300_v12, %v9136_v45  ;;  %v9229_v39 = vadd.f32 %v9118_v34, %v2788_v0  ;;  %v11364_v58 = vld [vmem:[#allocation9_spill] sm:$0xff]  ;;  %v11365_v31 = vld [vmem:[#allocation27_spill] sm:$0xff] }
 0x30e   : > { %v2882_v26 = vmul.f32 0.2, %v9213_v60  ;;  %v2796_v5 = vpop.permute.xlu0 %2795  ;;  %v6303_v30 = vadd.f32 %v6302_v32, %v6301_v46  ;;  %2985 = vmax.xlane.f32.xlu1 %v2984_v44  ;;  %v9234_v24 = vadd.f32 %v2906_v63, %v11363_v23  ;;  %v9237_v29 = vadd.f32 %v2907_v50, %v11364_v58  ;;  %v11366_v63 = vld [vmem:[#allocation28_spill] sm:$0xff]  ;;  %v11369_v23 = vld [vmem:[#allocation30_spill] sm:$0xff] }
 0x30f   : > { %v2792_v35 = vpop.permute.xlu1 %2791  ;;  %v2883_v56 = vmul.f32 0.2, %v9223_v1  ;;  %1705 = vst.msk [vmem:[#allocation4 + $0x70] sm:$0xff] %vm459_vm1, %v1688_v40  ;;  %v2884_v45 = vmul.f32 0.2, %v2852_v48  ;;  %v9243_v12 = vadd.f32 %v2908_v36, %v11365_v31  ;;  %v9249_v44 = vadd.f32 %v2909_v14, %v11366_v63  ;;  %v11368_v31 = vld [vmem:[#allocation11_spill] sm:$0xff] }
 0x310   : > { %v2914_v6 = vmax.f32 %v9213_v60, %v2882_v26  ;;  %v2885_v16 = vmul.f32 0.2, %v9229_v39  ;;  %v1689_v0 = vadd.f32 %v6303_v30, %v9145_v62  ;;  %v2990_v60 = vmax.f32 %v9234_v24, %v9237_v29 }
 0x311   : > { %v2915_v46 = vmax.f32 %v9223_v1, %v2883_v56  ;;  %v9252_v50 = vadd.f32 %v9116_v33, %v2792_v35  ;;  %v2916_v32 = vmax.f32 %v2852_v48, %v2884_v45  ;;  %v2855_v62 = vadd.f32 %v9118_v34, %v2792_v35  ;;  %v11367_v48 = vld [vmem:[#allocation10_spill] sm:$0xff] }
 0x312   : > { %v6320_v26 = vpop.f32.mrb[0].mxu1  ;;  %v2917_v40 = vmax.f32 %v9229_v39, %v2885_v16  ;;  %1706 = vst.msk [vmem:[#allocation4 + $0x78] sm:$0xff] %vm459_vm1, %v1689_v0  ;;  %v9258_v36 = vadd.f32 %v9116_v33, %v2796_v5  ;;  %2991 = vmax.xlane.f32.xlu0 %v2990_v60  ;;  %v2993_v14 = vmax.f32 %v9243_v12, %v9249_v44  ;;  %v2804_v39 = vpop.permute.xlu0 %2803 }
 0x313   : > { %v6321_v1 = vpop.f32.mrb[1].mxu1  ;;  %v2800_v30 = vpop.permute.xlu1 %2799  ;;  %v2886_v56 = vmul.f32 0.2, %v9252_v50  ;;  %v2857_v63 = vadd.f32 %v9118_v34, %v2796_v5  ;;  %v9265_v45 = vadd.f32 %v2910_v47, %v11367_v48  ;;  %v2887_v0 = vmul.f32 0.2, %v2855_v62  ;;  %v11371_v5 = vld [vmem:[#allocation32_spill] sm:$0xff] }
 0x314   : > { %v6323_v16 = vpop.f32.mrb[2].mxu1  ;;  %v2888_v35 = vmul.f32 0.2, %v9258_v36  ;;  %v9269_v58 = vadd.f32 %v2911_v27, %v11368_v31  ;;  %v9272_v60 = vadd.f32 %v2912_v15, %v11369_v23  ;;  %2994 = vmax.xlane.f32.xlu1 %v2993_v14  ;;  %v9276_v10 = vadd.f32 %v2913_v59, %v11371_v5  ;;  %v11377_v5 = vld [vmem:[#allocation33_spill] sm:$0xff] }
 0x315   : > { %v6324_v11 = vpop.f32.mrb[3].mxu1  ;;  %v2918_v13 = vmax.f32 %v9252_v50, %v2886_v56  ;;  %v2889_v20 = vmul.f32 0.2, %v2857_v63  ;;  %v9278_v47 = vadd.f32 %v6321_v1, %v6320_v26  ;;  %v2919_v48 = vmax.f32 %v2855_v62, %v2887_v0 }
 0x316   : > { %11370 = vst [vmem:[#allocation59_spill] sm:$0xff] %v9272_v60  ;;  %11372 = vst [vmem:[#allocation69_spill] sm:$0xff] %v9276_v10  ;;  %v2920_v28 = vmax.f32 %v9258_v36, %v2888_v35  ;;  %v2996_v27 = vmax.f32 %v9265_v45, %v9269_v58  ;;  %v2858_v31 = vadd.f32 %v9116_v33, %v2800_v30  ;;  %v11373_v36 = vld [vmem:[#allocation12_spill] sm:$0xff] }
 0x317   : > { %v2808_v15 = vpop.permute.xlu1 %2807  ;;  %v2921_v23 = vmax.f32 %v2857_v63, %v2889_v20  ;;  %v2999_v14 = vmax.f32 %v9272_v60, %v9276_v10  ;;  %v2859_v50 = vadd.f32 %v9118_v34, %v2800_v30  ;;  %v2860_v59 = vadd.f32 %v9116_v33, %v2804_v39  ;;  %v11375_v20 = vld [vmem:[#allocation13_spill] sm:$0xff]  ;;  %v2812_v30 = vpop.permute.xlu0 %2811 }
 0x318   : > { %2997 = vmax.xlane.f32.xlu0 %v2996_v27  ;;  %v2890_v26 = vmul.f32 0.2, %v2858_v31  ;;  %v2861_v62 = vadd.f32 %v9118_v34, %v2804_v39  ;;  %v9289_v1 = vadd.f32 %v6324_v11, %v6323_v16  ;;  %v9292_v56 = vadd.f32 %v2914_v6, %v11373_v36  ;;  %v11383_v36 = vld [vmem:[#allocation35_spill] sm:$0xff] }
 0x319   : > { %3000 = vmax.xlane.f32.xlu1 %v2999_v14  ;;  %v2891_v0 = vmul.f32 0.2, %v2859_v50  ;;  %v2892_v35 = vmul.f32 0.2, %v2860_v59  ;;  %v9295_v63 = vadd.f32 %v2915_v46, %v11375_v20  ;;  %v9298_v55 = vadd.f32 %v2916_v32, %v11377_v5 }
 0x31a   : > { %11374 = vst [vmem:[#allocation70_spill] sm:$0xff] %v9292_v56  ;;  %v2922_v9 = vmax.f32 %v2858_v31, %v2890_v26  ;;  %v2893_v27 = vmul.f32 0.2, %v2861_v62  ;;  %v9301_v10 = vadd.f32 %v2917_v40, %v11379_v19  ;;  %v2862_v11 = vadd.f32 %v9116_v33, %v2808_v15 }
 0x31b   : > { %11376 = vst [vmem:[#allocation62_spill] sm:$0xff] %v9295_v63  ;;  %11378 = vst [vmem:[#allocation66_spill] sm:$0xff] %v9298_v55  ;;  %v2923_v39 = vmax.f32 %v2859_v50, %v2891_v0  ;;  %v2924_v6 = vmax.f32 %v2860_v59, %v2892_v35  ;;  %v3002_v16 = vmax.f32 %v9292_v56, %v9295_v63  ;;  %v2816_v26 = vpop.permute.xlu1 %2815  ;;  %v11381_v50 = vld [vmem:[#allocation14_spill] sm:$0xff]  ;;  %v11382_v0 = vld [vmem:[#allocation15_spill] sm:$0xff] }
 0x31c   : > { %11380 = vst [vmem:[#allocation71_spill] sm:$0xff] %v9301_v10  ;;  %v2863_v14 = vadd.f32 %v9118_v34, %v2808_v15  ;;  %v2925_v46 = vmax.f32 %v2861_v62, %v2893_v27  ;;  %v3005_v32 = vmax.f32 %v9298_v55, %v9301_v10  ;;  %v2894_v5 = vmul.f32 0.2, %v2862_v11  ;;  %v11384_v55 = vld [vmem:[#allocation41_spill] sm:$0xff] }
 0x31d   : > { %v2864_v31 = vadd.f32 %v9116_v33, %v2812_v30  ;;  %v6326_v20 = vpop.f32.mrb[4].mxu1  ;;  %3003 = vmax.xlane.f32.xlu0 %v3002_v16  ;;  %v2865_v19 = vadd.f32 %v9118_v34, %v2812_v30  ;;  %v9312_v59 = vadd.f32 %v2918_v13, %v11381_v50  ;;  %v9315_v35 = vadd.f32 %v2919_v48, %v11382_v0 }
 0x31e   : > { %v2895_v40 = vmul.f32 0.2, %v2863_v14  ;;  %v6327_v15 = vpop.f32.mrb[5].mxu1  ;;  %3006 = vmax.xlane.f32.xlu1 %v3005_v32  ;;  %v2926_v62 = vmax.f32 %v2862_v11, %v2894_v5  ;;  %v9318_v10 = vadd.f32 %v2920_v28, %v11383_v36  ;;  %v9321_v63 = vadd.f32 %v2921_v23, %v11384_v55  ;;  %v11386_v28 = vld [vmem:[#allocation16_spill] sm:$0xff]  ;;  %v11388_v36 = vld [vmem:[#allocation42_spill] sm:$0xff] }
 0x31f   : > { %v2896_v27 = vmul.f32 0.2, %v2864_v31  ;;  %v6329_v16 = vpop.f32.mrb[6].mxu1  ;;  %v2897_v60 = vmul.f32 0.2, %v2865_v19  ;;  %v3008_v13 = vmax.f32 %v9312_v59, %v9315_v35  ;;  %v2866_v30 = vadd.f32 %v9116_v33, %v2816_v26 }
 0x320   : > { %11385 = vst [vmem:[#allocation72_spill] sm:$0xff] %v9321_v63  ;;  %v2927_v56 = vmax.f32 %v2863_v14, %v2895_v40  ;;  %v6330_v48 = vpop.f32.mrb[7].mxu1  ;;  %v3011_v5 = vmax.f32 %v9318_v10, %v9321_v63  ;;  %v2867_v11 = vadd.f32 %v9118_v34, %v2816_v26  ;;  %v9330_v32 = vadd.f32 %v2922_v9, %v11386_v28  ;;  %v11387_v14 = vld [vmem:[#allocation17_spill] sm:$0xff] }
 0x321   : > { %v2928_v0 = vmax.f32 %v2864_v31, %v2896_v27  ;;  %v2929_v23 = vmax.f32 %v2865_v19, %v2897_v60  ;;  %3009 = vmax.xlane.f32.xlu0 %v3008_v13  ;;  %v2898_v55 = vmul.f32 0.2, %v2866_v30  ;;  %v9333_v40 = vadd.f32 %v2923_v39, %v11387_v14  ;;  %v11389_v31 = vld [vmem:[#allocation43_spill] sm:$0xff]  ;;  %v11390_v60 = vld [vmem:[#allocation18_spill] sm:$0xff] }
 0x322   : > { %v9336_v50 = vadd.f32 %v2924_v6, %v11388_v36  ;;  %3012 = vmax.xlane.f32.xlu1 %v3011_v5  ;;  %v2899_v33 = vmul.f32 0.2, %v2867_v11  ;;  %v9339_v27 = vadd.f32 %v2925_v46, %v11389_v31  ;;  %v9341_v63 = vadd.f32 %v6327_v15, %v6326_v20  ;;  %v11391_v39 = vld [vmem:[#allocation19_spill] sm:$0xff]  ;;  %v11392_v46 = vld [vmem:[#allocation44_spill] sm:$0xff]  ;;  %v11393_v20 = vld [vmem:[#allocation49_spill] sm:$0xff] }
 0x323   : > { %v9343_v34 = vadd.f32 %v6330_v48, %v6329_v16  ;;  %v2930_v9 = vmax.f32 %v2866_v30, %v2898_v55  ;;  %v3014_v19 = vmax.f32 %v9330_v32, %v9333_v40  ;;  %v9348_v26 = vadd.f32 %v2926_v62, %v11390_v60  ;;  %v11394_v62 = vld [vmem:[#allocation20_spill] sm:$0xff] }
 0x324   : > { %v9351_v13 = vadd.f32 %v2927_v56, %v11391_v39  ;;  %v2931_v6 = vmax.f32 %v2867_v11, %v2899_v33  ;;  %v3017_v5 = vmax.f32 %v9336_v50, %v9339_v27  ;;  %v9356_v31 = vadd.f32 %v2928_v0, %v11392_v46  ;;  %v11395_v11 = vld [vmem:[#allocation22_spill] sm:$0xff] }
 0x325   : > { %v9359_v15 = vadd.f32 %v2929_v23, %v11393_v20  ;;  %v6332_v55 = vpop.f32.mrb[8].mxu1  ;;  %3015 = vmax.xlane.f32.xlu0 %v3014_v19  ;;  %v9364_v30 = vadd.f32 %v2930_v9, %v11394_v62 }
 0x326   : > { %v3020_v16 = vmax.f32 %v9348_v26, %v9351_v13  ;;  %v6333_v56 = vpop.f32.mrb[9].mxu1  ;;  %3018 = vmax.xlane.f32.xlu1 %v3017_v5  ;;  %v9369_v33 = vadd.f32 %v2931_v6, %v11395_v11 }
 0x327   : > { %v3023_v48 = vmax.f32 %v9356_v31, %v9359_v15  ;;  %v9371_v0 = vadd.f32 %v6333_v56, %v6332_v55  ;;  %v6335_v23 = vpop.f32.mrb[10].mxu1 }
 0x328   : > { %v6336_v20 = vpop.f32.mrb[11].mxu1  ;;  %v3026_v19 = vmax.f32 %v9364_v30, %v9369_v33 }
 0x329   : > { %v9373_v46 = vadd.f32 %v6336_v20, %v6335_v23  ;;  %3021 = vmax.xlane.f32.xlu0 %v3020_v16 }
 0x32a   : > { %3024 = vmax.xlane.f32.xlu1 %v3023_v48 }
 0x32d   : > { %v6338_v9 = vpop.f32.mrb[12].mxu1  ;;  %3027 = vmax.xlane.f32.xlu0 %v3026_v19 }
 0x32e   : > { %v6339_v5 = vpop.f32.mrb[13].mxu1 }
 0x32f   : > { %v9377_v62 = vadd.f32 %v6339_v5, %v6338_v9  ;;  %v6341_v39 = vpop.f32.mrb[14].mxu1 }
 0x330   : > { %v6342_v60 = vpop.f32.mrb[15].mxu1 }
 0x331   : > { %v9379_v6 = vadd.f32 %v6342_v60, %v6341_v39 }
 0x335   : > { %v6344_v55 = vpop.f32.mrb[16].mxu1 }
 0x336   : > { %v6345_v56 = vpop.f32.mrb[17].mxu1 }
 0x337   : > { %v9381_v11 = vadd.f32 %v6345_v56, %v6344_v55  ;;  %v6347_v20 = vpop.f32.mrb[18].mxu1 }
 0x338   : > { %v6348_v23 = vpop.f32.mrb[19].mxu1 }
 0x339   : > { %v9383_v16 = vadd.f32 %v6348_v23, %v6347_v20 }
 0x33b   : > { %2375 = vperm.xlu1 %6536, %v8998_v3  }
 0x33d   : > { %v6350_v48 = vpop.f32.mrb[20].mxu1 }
 0x33e   : > { %v6351_v36 = vpop.f32.mrb[21].mxu1 }
 0x33f   : > { %v9386_v19 = vadd.f32 %v6351_v36, %v6350_v48  ;;  %v6353_v9 = vpop.f32.mrb[22].mxu1  ;;  %2380 = vperm.xlu1 %6536, %v9005_v25  }
 0x340   : > { %v6354_v5 = vpop.f32.mrb[23].mxu1 }
 0x341   : > { %v9389_v60 = vadd.f32 %v6354_v5, %v6353_v9  ;;  %v9443_v9 = vld [vmem:[#allocation2 + $0x108] sm:$0xff] }
 0x343   : > { %2390 = vperm.xlu1 %6536, %v9022_v21   ;;  %2370 = vperm.xlu0 %6537, %v8992_v42  }
 0x345   : > { %v6356_v39 = vpop.f32.mrb[24].mxu1 }
 0x346   : > { %v6357_v55 = vpop.f32.mrb[25].mxu1 }
 0x347   : > { %v9393_v56 = vadd.f32 %v6357_v55, %v6356_v39  ;;  %v6359_v20 = vpop.f32.mrb[26].mxu1  ;;  %2400 = vperm.xlu1 %6536, %v9046_v22   ;;  %2385 = vperm.xlu0 %6537, %v9016_v51   ;;  %v6574_v51 = vld [vmem:[%s10868_s1 + $0x140] sm:$0xff]  }
 0x348   : > { %v6360_v3 = vpop.f32.mrb[27].mxu1  ;;  %6368 = vmatprep.subr.bf16.mxu0 %v6574_v51  ;;  %v9469_v51 = vld [vmem:[#allocation2 + $0x120] sm:$0xff] }
 0x349   : > { %v9397_v36 = vadd.f32 %v6360_v3, %v6359_v20  ;;  %11396 = vst [vmem:[#allocation67_spill] sm:$0xff] %v9469_v51 }
 0x34b   : > { %2410 = vperm.xlu1 %6536, %v9070_v7   ;;  %2395 = vperm.xlu0 %6537, %v9035_v52   ;;  %v6575_v52 = vld [vmem:[%s10868_s1 + $0x100] sm:$0xff]   ;;  %v6577_v7 = vld [vmem:[%s10868_s1 + $0x108] sm:$0xff]  }
 0x34c   : > { %6369 = vmatpush3.bf16.msra.mxu0 %v6575_v52 }
 0x34d   : > { %v6362_v25 = vpop.f32.mrb[28].mxu1 }
 0x34e   : > { %v6363_v21 = vpop.f32.mrb[29].mxu1 }
 0x34f   : > { %v9401_v23 = vadd.f32 %v6363_v21, %v6362_v25  ;;  %v6365_v42 = vpop.f32.mrb[30].mxu1  ;;  %2420 = vperm.xlu1 %6536, %v9078_v41   ;;  %2405 = vperm.xlu0 %6537, %v9059_v57   ;;  %v6576_v57 = vld [vmem:[%s10868_s1 + $0x148] sm:$0xff]   ;;  %v6579_v41 = vld [vmem:[%s10868_s1 + $0x110] sm:$0xff]   ;;  %v9456_v25 = vld [vmem:[#allocation2 + $0x118] sm:$0xff] }
 0x350   : > { %v6366_v48 = vpop.f32.mrb[31].mxu1  ;;  %6370 = vmatprep.subr.bf16.mxu0 %v6576_v57  ;;  %v6580_v21 = vld [vmem:[%s10868_s1 + $0x158] sm:$0xff]  }
 0x351   : > { %v9405_v22 = vadd.f32 %v6366_v48, %v6365_v42  ;;  %6371 = vmatpush3.bf16.msra.mxu0 %v6577_v7  ;;  %v6581_v42 = vld [vmem:[%s10868_s1 + $0x118] sm:$0xff]  }
 0x352   : > { %v9507_v48 = vld [vmem:[#allocation2 + $0x138] sm:$0xff] }
 0x353   : > { %2430 = vperm.xlu1 %6536, %v9088_v54   ;;  %2415 = vperm.xlu0 %6537, %v9073_v43   ;;  %v6578_v43 = vld [vmem:[%s10868_s1 + $0x150] sm:$0xff]   ;;  %11402 = vst [vmem:[#allocation77_spill] sm:$0xff] %v9507_v48 }
 0x354   : > { %6372 = vmatprep.subr.bf16.mxu0 %v6578_v43 }
 0x355   : > { %6373 = vmatpush3.bf16.msra.mxu0 %v6579_v41 }
 0x356   : > { %6374 = vmatprep.subr.bf16.mxu0 %v6580_v21 }
 0x357   : > { %2440 = vperm.xlu1 %6536, %v9100_v49   ;;  %2425 = vperm.xlu0 %6537, %v9082_v8   ;;  %v9431_v8 = vld [vmem:[#allocation2 + $0x100] sm:$0xff] }
 0x359   : > { %6375 = vmatpush3.bf16.msra.mxu0 %v6581_v42  ;;  %v6582_v42 = vld [vmem:[%s10868_s1 + $0x160] sm:$0xff]  }
 0x35a   : > { %6376 = vmatprep.subr.bf16.mxu0 %v6582_v42  ;;  %v6586_v42 = vld [vmem:[%s10868_s1 + $0x170] sm:$0xff]  }
 0x35b   : > { %2435 = vperm.xlu0 %6537, %v9092_v17  }
 0x35f   : > { %2445 = vperm.xlu0 %6537, %v9104_v4   ;;  %v9441_v4 = vld [vmem:[#allocation2 + $0x110] sm:$0xff] }
 0x395   : > { %v2983_v54 = vpop.xlane.xlu0 %2982 }
 0x396   : > { %v9434_v17 = vmax.f32 %v9431_v8, %v2983_v54  ;;  %v9482_v54 = vld [vmem:[#allocation2 + $0x128] sm:$0xff] }
 0x397   : > { %11398 = vst [vmem:[#allocation75_spill] sm:$0xff] %v9482_v54 }
 0x398   : > { %3769 = vst.msk [vmem:[#allocation2 + $0x100] sm:$0xff] %vm330_vm0, %v9434_v17  ;;  %3095 = vperm.xlu1 %6536, %v9434_v17  }
 0x39a   : > { %v2989_v5 = vpop.xlane.xlu0 %2988 }
 0x39b   : > { %v2986_v39 = vpop.xlane.xlu1 %2985  ;;  %v9446_v55 = vmax.f32 %v9441_v4, %v2989_v5  ;;  %v9484_v5 = vld [vmem:[#allocation2 + $0x130] sm:$0xff] }
 0x39c   : > { %v9449_v20 = vmax.f32 %v9443_v9, %v2986_v39  ;;  %11399 = vst [vmem:[#allocation76_spill] sm:$0xff] %v9484_v5  ;;  %v9519_v39 = vld [vmem:[#allocation2 + $0x140] sm:$0xff] }
 0x39d   : > { %3771 = vst.msk [vmem:[#allocation2 + $0x110] sm:$0xff] %vm330_vm0, %v9446_v55  ;;  %3105 = vperm.xlu1 %6536, %v9446_v55   ;;  %11403 = vst [vmem:[#allocation78_spill] sm:$0xff] %v9519_v39 }
 0x39e   : > { %3770 = vst.msk [vmem:[#allocation2 + $0x108] sm:$0xff] %vm330_vm0, %v9449_v20  ;;  %3100 = vperm.xlu0 %6537, %v9449_v20  }
 0x39f   : > { %v2992_v52 = vpop.xlane.xlu0 %2991 }
 0x3a0   : > { %v9472_v57 = vmax.f32 %v9456_v25, %v2992_v52  ;;  %v6583_v52 = vld [vmem:[%s10868_s1 + $0x120] sm:$0xff]  }
 0x3a1   : > { %v2995_v7 = vpop.xlane.xlu1 %2994  ;;  %6377 = vmatpush3.bf16.msra.mxu0 %v6583_v52 }
 0x3a2   : > { %v9475_v43 = vmax.f32 %v9469_v51, %v2995_v7  ;;  %3772 = vst.msk [vmem:[#allocation2 + $0x118] sm:$0xff] %vm330_vm0, %v9472_v57  ;;  %3110 = vperm.xlu1 %6536, %v9472_v57  }
 0x3a4   : > { %11397 = vst [vmem:[#allocation68_spill] sm:$0xff] %v9475_v43  ;;  %3773 = vst.msk [vmem:[#allocation2 + $0x120] sm:$0xff] %vm330_vm0, %v9475_v43 }
 0x3a5   : > { %v2998_v21 = vpop.xlane.xlu0 %2997 }
 0x3a6   : > { %v3001_v7 = vpop.xlane.xlu1 %3000  ;;  %v9497_v3 = vmax.f32 %v9482_v54, %v2998_v21  ;;  %3115 = vperm.xlu1 %6536, %v9475_v43   ;;  %v6584_v21 = vld [vmem:[%s10868_s1 + $0x168] sm:$0xff]  }
 0x3a7   : > { %v9500_v41 = vmax.f32 %v9484_v5, %v3001_v7  ;;  %v6585_v7 = vld [vmem:[%s10868_s1 + $0x128] sm:$0xff]   ;;  %6378 = vmatprep.subr.bf16.mxu0 %v6584_v21  ;;  %v6587_v21 = vld [vmem:[%s10868_s1 + $0x130] sm:$0xff]  }
 0x3a8   : > { %11400 = vst [vmem:[#allocation73_spill] sm:$0xff] %v9497_v3  ;;  %3774 = vst.msk [vmem:[#allocation2 + $0x128] sm:$0xff] %vm330_vm0, %v9497_v3  ;;  %v9528_v54 = vld [vmem:[#allocation2 + $0x148] sm:$0xff]  ;;  %6379 = vmatpush3.bf16.msra.mxu0 %v6585_v7  ;;  %v9540_v5 = vld [vmem:[#allocation2 + $0x150] sm:$0xff] }
 0x3a9   : > { %11401 = vst [vmem:[#allocation74_spill] sm:$0xff] %v9500_v41  ;;  %3775 = vst.msk [vmem:[#allocation2 + $0x130] sm:$0xff] %vm330_vm0, %v9500_v41  ;;  %6380 = vmatprep.subr.bf16.mxu0 %v6586_v42  ;;  %v6589_v42 = vld [vmem:[%s10868_s1 + $0x138] sm:$0xff]  }
 0x3aa   : > { %v3004_v49 = vpop.xlane.xlu0 %3003  ;;  %3120 = vperm.xlu1 %6536, %v9497_v3   ;;  %11406 = vst [vmem:[#allocation81_spill] sm:$0xff] %v9528_v54  ;;  %11407 = vst [vmem:[#allocation82_spill] sm:$0xff] %v9540_v5 }
 0x3ab   : > { %v3007_v14 = vpop.xlane.xlu1 %3006  ;;  %v9522_v52 = vmax.f32 %v9507_v48, %v3004_v49  ;;  %v9553_v48 = vld [vmem:[#allocation2 + $0x158] sm:$0xff] }
 0x3ac   : > { %v9526_v28 = vmax.f32 %v9519_v39, %v3007_v14  ;;  %11410 = vst [vmem:[#allocation50_spill] sm:$0xff] %v9553_v48  ;;  %6381 = vmatpush3.bf16.msra.mxu0 %v6587_v21  ;;  %v6588_v14 = vld [vmem:[%s10868_s1 + $0x178] sm:$0xff]  }
 0x3ad   : > { %11404 = vst [vmem:[#allocation79_spill] sm:$0xff] %v9522_v52  ;;  %3776 = vst.msk [vmem:[#allocation2 + $0x138] sm:$0xff] %vm330_vm0, %v9522_v52  ;;  %6382 = vmatprep.subr.bf16.mxu0 %v6588_v14  ;;  %v9586_v14 = vld [vmem:[#allocation2 + $0x170] sm:$0xff] }
 0x3ae   : > { %11405 = vst [vmem:[#allocation80_spill] sm:$0xff] %v9526_v28  ;;  %3777 = vst.msk [vmem:[#allocation2 + $0x140] sm:$0xff] %vm330_vm0, %v9526_v28  ;;  %v3010_v7 = vpop.xlane.xlu0 %3009  ;;  %3125 = vperm.xlu1 %6536, %v9500_v41  }
 0x3af   : > { %v3013_v3 = vpop.xlane.xlu1 %3012  ;;  %v9547_v43 = vmax.f32 %v9528_v54, %v3010_v7  ;;  %11415 = vst [vmem:[#allocation89_spill] sm:$0xff] %v9586_v14 }
 0x3b0   : > { %v9551_v49 = vmax.f32 %v9540_v5, %v3013_v3  ;;  %v9566_v3 = vld [vmem:[#allocation2 + $0x160] sm:$0xff]  ;;  %6383 = vmatpush3.bf16.msra.mxu0 %v6589_v42 }
 0x3b1   : > { %11408 = vst [vmem:[#allocation26_spill] sm:$0xff] %v9547_v43  ;;  %3778 = vst.msk [vmem:[#allocation2 + $0x148] sm:$0xff] %vm330_vm0, %v9547_v43  ;;  %3140 = vperm.xlu0 %6537, %v9547_v43   ;;  %v9579_v43 = vld [vmem:[#allocation2 + $0x168] sm:$0xff] }
 0x3b2   : > { %11409 = vst [vmem:[#allocation83_spill] sm:$0xff] %v9551_v49  ;;  %11411 = vst [vmem:[#allocation38_spill] sm:$0xff] %v9566_v3  ;;  %v3016_v39 = vpop.xlane.xlu0 %3015  ;;  %3130 = vperm.xlu1 %6536, %v9522_v52   ;;  %v2355_v52 = vld [vmem:[#allocation4 + $0x98] sm:$0xff] }
 0x3b3   : > { %3779 = vst.msk [vmem:[#allocation2 + $0x150] sm:$0xff] %vm330_vm0, %v9551_v49  ;;  %v3019_v41 = vpop.xlane.xlu1 %3018  ;;  %v9573_v51 = vmax.f32 %v9553_v48, %v3016_v39  ;;  %11414 = vst [vmem:[#allocation29_spill] sm:$0xff] %v9579_v43  ;;  %v9599_v48 = vld [vmem:[#allocation2 + $0x178] sm:$0xff]  ;;  %v2353_v39 = vld [vmem:[#allocation4 + $0x88] sm:$0xff] }
 0x3b4   : > { %v9577_v7 = vmax.f32 %v9566_v3, %v3019_v41  ;;  %11417 = vst [vmem:[#allocation94_spill] sm:$0xff] %v9599_v48 }
 0x3b5   : > { %11412 = vst [vmem:[#allocation57_spill] sm:$0xff] %v9573_v51  ;;  %3780 = vst.msk [vmem:[#allocation2 + $0x158] sm:$0xff] %vm330_vm0, %v9573_v51  ;;  %3150 = vperm.xlu0 %6537, %v9573_v51  }
 0x3b6   : > { %11413 = vst [vmem:[#allocation63_spill] sm:$0xff] %v9577_v7  ;;  %3781 = vst.msk [vmem:[#allocation2 + $0x160] sm:$0xff] %vm330_vm0, %v9577_v7  ;;  %v3022_v41 = vpop.xlane.xlu0 %3021  ;;  %3135 = vperm.xlu1 %6536, %v9526_v28   ;;  %v2352_v28 = vld [vmem:[#allocation4 + $0x80] sm:$0xff] }
 0x3b7   : > { %v3025_v5 = vpop.xlane.xlu1 %3024  ;;  %v9593_v42 = vmax.f32 %v9579_v43, %v3022_v41  ;;  %v2354_v41 = vld [vmem:[#allocation4 + $0x90] sm:$0xff] }
 0x3b8   : > { %v9597_v21 = vmax.f32 %v9586_v14, %v3025_v5 }
 0x3b9   : > { %11416 = vst [vmem:[#allocation102_spill] sm:$0xff] %v9593_v42  ;;  %3782 = vst.msk [vmem:[#allocation2 + $0x168] sm:$0xff] %vm330_vm0, %v9593_v42  ;;  %3160 = vperm.xlu0 %6537, %v9593_v42  }
 0x3ba   : > { %3783 = vst.msk [vmem:[#allocation2 + $0x170] sm:$0xff] %vm330_vm0, %v9597_v21  ;;  %v3028_v3 = vpop.xlane.xlu0 %3027  ;;  %3145 = vperm.xlu1 %6536, %v9551_v49   ;;  %v2356_v49 = vld [vmem:[#allocation4 + $0xa0] sm:$0xff] }
 0x3bb   : > { %v2376_v5 = vpop.permute.xlu1 %2375  ;;  %v9611_v54 = vmax.f32 %v9599_v48, %v3028_v3 }
 0x3bc   : > { %v2449_v51 = vmul.f32 %v2376_v5, %v2353_v39 }
 0x3bd   : > { %11418 = vst [vmem:[#allocation108_spill] sm:$0xff] %v9611_v54  ;;  %3784 = vst.msk [vmem:[#allocation2 + $0x178] sm:$0xff] %vm330_vm0, %v9611_v54  ;;  %3170 = vperm.xlu0 %6537, %v9611_v54  }
 0x3be   : > { %v2707_v14 = vadd.f32 %v9289_v1, %v2449_v51  ;;  %3155 = vperm.xlu1 %6536, %v9577_v7   ;;  %v2358_v51 = vld [vmem:[#allocation4 + $0xb0] sm:$0xff] }
 0x3bf   : > { %v2381_v42 = vpop.permute.xlu1 %2380 }
 0x3c0   : > { %2723 = vst.msk [vmem:[#allocation4 + $0x88] sm:$0xff] %vm459_vm1, %v2707_v14  ;;  %v2450_v3 = vmul.f32 %v2381_v42, %v2354_v41 }
 0x3c2   : > { %v2708_v39 = vadd.f32 %v9341_v63, %v2450_v3  ;;  %v2371_v5 = vpop.permute.xlu0 %2370  ;;  %3165 = vperm.xlu1 %6536, %v9597_v21  }
 0x3c3   : > { %v2391_v43 = vpop.permute.xlu1 %2390  ;;  %v2448_v48 = vmul.f32 %v2371_v5, %v2352_v28  ;;  %v2357_v28 = vld [vmem:[#allocation4 + $0xa8] sm:$0xff]  ;;  %v2360_v5 = vld [vmem:[#allocation4 + $0xc0] sm:$0xff] }
 0x3c4   : > { %2724 = vst.msk [vmem:[#allocation4 + $0x90] sm:$0xff] %vm459_vm1, %v2708_v39  ;;  %v2452_v54 = vmul.f32 %v2391_v43, %v2356_v49  ;;  %v2362_v39 = vld [vmem:[#allocation4 + $0xd0] sm:$0xff] }
 0x3c5   : > { %v2706_v1 = vadd.f32 %v9278_v47, %v2448_v48 }
 0x3c6   : > { %v2710_v7 = vadd.f32 %v9371_v0, %v2452_v54  ;;  %v2386_v14 = vpop.permute.xlu0 %2385  ;;  %v2359_v54 = vld [vmem:[#allocation4 + $0xb8] sm:$0xff] }
 0x3c7   : > { %2722 = vst.msk [vmem:[#allocation4 + $0x80] sm:$0xff] %vm459_vm1, %v2706_v1  ;;  %v2401_v42 = vpop.permute.xlu1 %2400  ;;  %v2451_v41 = vmul.f32 %v2386_v14, %v2355_v52  ;;  %v2361_v14 = vld [vmem:[#allocation4 + $0xc8] sm:$0xff] }
 0x3c8   : > { %2726 = vst.msk [vmem:[#allocation4 + $0xa0] sm:$0xff] %vm459_vm1, %v2710_v7  ;;  %v2454_v63 = vmul.f32 %v2401_v42, %v2358_v51 }
 0x3c9   : > { %v2709_v3 = vadd.f32 %v9343_v34, %v2451_v41  ;;  %v2364_v41 = vld [vmem:[#allocation4 + $0xe0] sm:$0xff] }
 0x3ca   : > { %v2712_v43 = vadd.f32 %v9377_v62, %v2454_v63  ;;  %v2396_v49 = vpop.permute.xlu0 %2395 }
 0x3cb   : > { %2725 = vst.msk [vmem:[#allocation4 + $0x98] sm:$0xff] %vm459_vm1, %v2709_v3  ;;  %v2411_v47 = vpop.permute.xlu1 %2410  ;;  %v2453_v48 = vmul.f32 %v2396_v49, %v2357_v28  ;;  %v2366_v49 = vld [vmem:[#allocation4 + $0xf0] sm:$0xff] }
 0x3cc   : > { %2728 = vst.msk [vmem:[#allocation4 + $0xb0] sm:$0xff] %vm459_vm1, %v2712_v43  ;;  %v2456_v0 = vmul.f32 %v2411_v47, %v2360_v5  ;;  %v2363_v5 = vld [vmem:[#allocation4 + $0xd8] sm:$0xff] }
 0x3cd   : > { %v2711_v52 = vadd.f32 %v9373_v46, %v2453_v48 }
 0x3ce   : > { %v2714_v7 = vadd.f32 %v9381_v11, %v2456_v0  ;;  %v2406_v1 = vpop.permute.xlu0 %2405 }
 0x3cf   : > { %2727 = vst.msk [vmem:[#allocation4 + $0xa8] sm:$0xff] %vm459_vm1, %v2711_v52  ;;  %v2421_v34 = vpop.permute.xlu1 %2420  ;;  %v2455_v51 = vmul.f32 %v2406_v1, %v2359_v54  ;;  %v2365_v54 = vld [vmem:[#allocation4 + $0xe8] sm:$0xff] }
 0x3d0   : > { %2730 = vst.msk [vmem:[#allocation4 + $0xc0] sm:$0xff] %vm459_vm1, %v2714_v7  ;;  %v2458_v62 = vmul.f32 %v2421_v34, %v2362_v39 }
 0x3d1   : > { %v2713_v42 = vadd.f32 %v9379_v6, %v2455_v51 }
 0x3d2   : > { %v2716_v63 = vadd.f32 %v9386_v19, %v2458_v62  ;;  %v2416_v28 = vpop.permute.xlu0 %2415 }
 0x3d3   : > { %2729 = vst.msk [vmem:[#allocation4 + $0xb8] sm:$0xff] %vm459_vm1, %v2713_v42  ;;  %v2431_v46 = vpop.permute.xlu1 %2430  ;;  %v2457_v3 = vmul.f32 %v2416_v28, %v2361_v14 }
 0x3d4   : > { %2732 = vst.msk [vmem:[#allocation4 + $0xd0] sm:$0xff] %vm459_vm1, %v2716_v63  ;;  %v2460_v11 = vmul.f32 %v2431_v46, %v2364_v41 }
 0x3d5   : > { %v2715_v43 = vadd.f32 %v9383_v16, %v2457_v3 }
 0x3d6   : > { %v2718_v47 = vadd.f32 %v9393_v56, %v2460_v11  ;;  %v2426_v48 = vpop.permute.xlu0 %2425  ;;  %v2367_v56 = vld [vmem:[#allocation4 + $0xf8] sm:$0xff] }
 0x3d7   : > { %2731 = vst.msk [vmem:[#allocation4 + $0xc8] sm:$0xff] %vm459_vm1, %v2715_v43  ;;  %v2441_v6 = vpop.permute.xlu1 %2440  ;;  %v2459_v0 = vmul.f32 %v2426_v48, %v2363_v5 }
 0x3d8   : > { %2734 = vst.msk [vmem:[#allocation4 + $0xe0] sm:$0xff] %vm459_vm1, %v2718_v47  ;;  %v2462_v19 = vmul.f32 %v2441_v6, %v2366_v49 }
 0x3d9   : > { %v2717_v52 = vadd.f32 %v9389_v60, %v2459_v0  ;;  %v7213_v60 = vmov 3  }
 0x3da   : > { %v2720_v39 = vadd.f32 %v9401_v23, %v2462_v19  ;;  %v2436_v7 = vpop.permute.xlu0 %2435  ;;  %6538 = vset.pattern.permute.xlu1 %v7213_v60  ;;  %6539 = vset.pattern.permute.xlu0 %v7213_v60  ;;  %v11420_v60 = vld [vmem:[#allocation69_spill] sm:$0xff] }
 0x3db   : > { %2733 = vst.msk [vmem:[#allocation4 + $0xd8] sm:$0xff] %vm459_vm1, %v2717_v52  ;;  %v2461_v16 = vmul.f32 %v2436_v7, %v2365_v54 }
 0x3dc   : > { %2736 = vst.msk [vmem:[#allocation4 + $0xf0] sm:$0xff] %vm459_vm1, %v2720_v39 }
 0x3dd   : > { %v2719_v1 = vadd.f32 %v9397_v36, %v2461_v16 }
 0x3de   : > { %v2446_v34 = vpop.permute.xlu0 %2445 }
 0x3df   : > { %2735 = vst.msk [vmem:[#allocation4 + $0xe8] sm:$0xff] %vm459_vm1, %v2719_v1  ;;  %v2463_v51 = vmul.f32 %v2446_v34, %v2367_v56 }
 0x3e1   : > { %v2721_v62 = vadd.f32 %v9405_v22, %v2463_v51  ;;  %v11419_v51 = vld [vmem:[#allocation59_spill] sm:$0xff] }
 0x3e3   : > { %2737 = vst.msk [vmem:[#allocation4 + $0xf8] sm:$0xff] %vm459_vm1, %v2721_v62 }
 0x417   : > { %v3096_v23 = vpop.permute.xlu1 %3095 }
 0x418   : > { %v3173_v14 = vsub.f32 %v9148_v61, %v3096_v23  ;;  %v3174_v42 = vsub.f32 %v9168_v18, %v3096_v23 }
 0x41a   : > { %v3205_v41 = vmul.f32 1.442695, %v3173_v14  ;;  %v3207_v63 = vmul.f32 1.442695, %v3174_v42 }
 0x41c   : > { %6798 = vpow2.f32 %v3205_v41  ;;  %v3106_v36 = vpop.permute.xlu1 %3105 }
 0x41d   : > { %6800 = vpow2.f32 %v3207_v63  ;;  %v3177_v28 = vsub.f32 %v9195_v38, %v3106_v36  ;;  %v3178_v46 = vsub.f32 %v9201_v37, %v3106_v36  ;;  %v3101_v22 = vpop.permute.xlu0 %3100 }
 0x41e   : > { %v3175_v3 = vsub.f32 %v9204_v2, %v3101_v22  ;;  %v3176_v11 = vsub.f32 %v9210_v53, %v3101_v22 }
 0x41f   : > { %v3213_v5 = vmul.f32 1.442695, %v3177_v28  ;;  %v3215_v61 = vmul.f32 1.442695, %v3178_v46 }
 0x420   : > { %v3209_v43 = vmul.f32 1.442695, %v3175_v3  ;;  %v3211_v49 = vmul.f32 1.442695, %v3176_v11 }
 0x421   : > { %v3111_v47 = vpop.permute.xlu1 %3110  ;;  %6802 = vpow2.f32 %v3213_v5  ;;  %v11421_v5 = vld [vmem:[#allocation70_spill] sm:$0xff] }
 0x422   : > { %v3179_v18 = vsub.f32 %v9234_v24, %v3111_v47  ;;  %v3180_v48 = vsub.f32 %v9237_v29, %v3111_v47  ;;  %6804 = vpow2.f32 %v3209_v43 }
 0x423   : > { %6806 = vpow2.f32 %v3211_v49  ;;  %v11422_v49 = vld [vmem:[#allocation62_spill] sm:$0xff] }
 0x424   : > { %v3217_v38 = vmul.f32 1.442695, %v3179_v18  ;;  %v3219_v6 = vmul.f32 1.442695, %v3180_v48  ;;  %6808 = vpow2.f32 %v3215_v61 }
 0x425   : > { %v3116_v37 = vpop.permute.xlu1 %3115 }
 0x426   : > { %v6799_v0 = vpop.eup %6798  ;;  %6810 = vpow2.f32 %v3217_v38  ;;  %v3181_v2 = vsub.f32 %v9243_v12, %v3116_v37  ;;  %v3182_v53 = vsub.f32 %v9249_v44, %v3116_v37 }
 0x427   : > { %v6801_v19 = vpop.eup %6800  ;;  %6812 = vpow2.f32 %v3219_v6 }
 0x428   : > { %v3221_v54 = vmul.f32 1.442695, %v3181_v2  ;;  %v3223_v52 = vmul.f32 1.442695, %v3182_v53  ;;  %v3302_v39 = vadd.f32 %v6801_v19, %v6799_v0 }
 0x429   : > { %v3121_v24 = vpop.permute.xlu1 %3120 }
 0x42a   : > { %6814 = vpow2.f32 %v3221_v54  ;;  %v3183_v29 = vsub.f32 %v9265_v45, %v3121_v24  ;;  %v3184_v7 = vsub.f32 %v9269_v58, %v3121_v24  ;;  %3303 = vadd.xlane.f32.xlu1 %v3302_v39  ;;  %v11424_v24 = vld [vmem:[#allocation71_spill] sm:$0xff] }
 0x42b   : > { %6816 = vpow2.f32 %v3223_v52  ;;  %v9665_v16 = vpop.eup %6802  ;;  %v11423_v52 = vld [vmem:[#allocation66_spill] sm:$0xff] }
 0x42c   : > { %v3225_v56 = vmul.f32 1.442695, %v3183_v29  ;;  %v3227_v1 = vmul.f32 1.442695, %v3184_v7  ;;  %v6805_v12 = vpop.eup %6804 }
 0x42d   : > { %v3126_v34 = vpop.permute.xlu1 %3125  ;;  %v6807_v44 = vpop.eup %6806  ;;  %v3495_v14 = vpack.c.bf16 %v6805_v12, %v6799_v0 }
 0x42e   : > { %6818 = vpow2.f32 %v3225_v56  ;;  %v3185_v62 = vsub.f32 %v11419_v51, %v3126_v34  ;;  %v3186_v23 = vsub.f32 %v11420_v60, %v3126_v34  ;;  %v6809_v42 = vpop.eup %6808  ;;  %v3496_v41 = vpack.c.bf16 %v6807_v44, %v6801_v19 }
 0x42f   : > { %6820 = vpow2.f32 %v3227_v1  ;;  %v3305_v58 = vadd.f32 %v6807_v44, %v6805_v12 }
 0x430   : > { %v3141_v45 = vpop.permute.xlu0 %3140  ;;  %v6811_v63 = vpop.eup %6810  ;;  %v3229_v36 = vmul.f32 1.442695, %v3185_v62  ;;  %v3231_v28 = vmul.f32 1.442695, %v3186_v23  ;;  %3672 = vmatprep.mubr.bf16.mxu0 %v3496_v41 }
 0x431   : > { %v3191_v46 = vsub.f32 %v9312_v59, %v3141_v45  ;;  %v6813_v22 = vpop.eup %6812  ;;  %v3192_v3 = vsub.f32 %v9315_v35, %v3141_v45  ;;  %3306 = vadd.xlane.f32.xlu0 %v3305_v58  ;;  %v3131_v11 = vpop.permute.xlu1 %3130  ;;  %3673 = vmatmul.mubr.bf16.vlgmr.msra.gmra.mrb[32].mxu0 %v3495_v14  ;;  %v3308_v35 = vadd.f32 %v6809_v42, %v9665_v16 }
 0x432   : > { %6822 = vpow2.f32 %v3229_v36  ;;  %v3187_v43 = vsub.f32 %v11421_v5, %v3131_v11  ;;  %v3188_v61 = vsub.f32 %v11422_v49, %v3131_v11  ;;  %v3311_v18 = vadd.f32 %v6813_v22, %v6811_v63 }
 0x433   : > { %6824 = vpow2.f32 %v3231_v28  ;;  %v3498_v48 = vpack.c.bf16 %v6813_v22, %v6809_v42  ;;  %v3241_v6 = vmul.f32 1.442695, %v3191_v46  ;;  %v3243_v2 = vmul.f32 1.442695, %v3192_v3 }
 0x434   : > { %v3151_v47 = vpop.permute.xlu0 %3150  ;;  %v9673_v38 = vpop.eup %6814  ;;  %v3233_v59 = vmul.f32 1.442695, %v3187_v43  ;;  %v3235_v53 = vmul.f32 1.442695, %v3188_v61  ;;  %3312 = vadd.xlane.f32.xlu1 %v3311_v18  ;;  %v3497_v56 = vpack.c.bf16 %v6811_v63, %v9665_v16  ;;  %v11425_v16 = vld [vmem:[#allocation72_spill] sm:$0xff] }
 0x435   : > { %v3195_v37 = vsub.f32 %v9330_v32, %v3151_v47  ;;  %v6817_v0 = vpop.eup %6816  ;;  %v3196_v19 = vsub.f32 %v9333_v40, %v3151_v47  ;;  %3680 = vmatprep.mubr.bf16.mxu0 %v3498_v48  ;;  %v3136_v54 = vpop.permute.xlu1 %3135  ;;  %3309 = vadd.xlane.f32.xlu0 %v3308_v35 }
 0x436   : > { %6826 = vpow2.f32 %v3233_v59  ;;  %v3189_v39 = vsub.f32 %v11423_v52, %v3136_v54  ;;  %v3190_v29 = vsub.f32 %v11424_v24, %v3136_v54  ;;  %v3314_v32 = vadd.f32 %v6817_v0, %v9673_v38 }
 0x437   : > { %6828 = vpow2.f32 %v3235_v53  ;;  %v3249_v12 = vmul.f32 1.442695, %v3195_v37  ;;  %v3251_v51 = vmul.f32 1.442695, %v3196_v19 }
 0x438   : > { %v3161_v7 = vpop.permute.xlu0 %3160  ;;  %v6819_v1 = vpop.eup %6818  ;;  %6830 = vpow2.f32 %v3241_v6  ;;  %v3237_v34 = vmul.f32 1.442695, %v3189_v39  ;;  %v3239_v62 = vmul.f32 1.442695, %v3190_v29 }
 0x439   : > { %v3199_v40 = vsub.f32 %v9348_v26, %v3161_v7  ;;  %v6821_v44 = vpop.eup %6820  ;;  %6832 = vpow2.f32 %v3243_v2  ;;  %v3200_v60 = vsub.f32 %v9351_v13, %v3161_v7  ;;  %v3146_v23 = vpop.permute.xlu1 %3145  ;;  %3315 = vadd.xlane.f32.xlu0 %v3314_v32  ;;  %3681 = vmatmul.mubr.bf16.gmra.mrb[36].mxu0 %v3497_v56  ;;  %v3499_v47 = vpack.c.bf16 %v6819_v1, %v9673_v38 }
 0x43a   : > { %6834 = vpow2.f32 %v3237_v34  ;;  %v3193_v14 = vsub.f32 %v9318_v10, %v3146_v23  ;;  %v3194_v42 = vsub.f32 %v11425_v16, %v3146_v23  ;;  %v3317_v41 = vadd.f32 %v6821_v44, %v6819_v1 }
 0x43b   : > { %6836 = vpow2.f32 %v3239_v62  ;;  %v3500_v58 = vpack.c.bf16 %v6821_v44, %v6817_v0  ;;  %v3257_v26 = vmul.f32 1.442695, %v3199_v40  ;;  %v3259_v13 = vmul.f32 1.442695, %v3200_v60 }
 0x43c   : > { %v3171_v45 = vpop.permute.xlu0 %3170  ;;  %v6823_v63 = vpop.eup %6822  ;;  %6838 = vpow2.f32 %v3249_v12  ;;  %v3245_v36 = vmul.f32 1.442695, %v3193_v14  ;;  %v3247_v22 = vmul.f32 1.442695, %v3194_v42  ;;  %3318 = vadd.xlane.f32.xlu1 %v3317_v41 }
 0x43d   : > { %v3203_v28 = vsub.f32 %v9364_v30, %v3171_v45  ;;  %v6825_v46 = vpop.eup %6824  ;;  %6840 = vpow2.f32 %v3251_v51  ;;  %v3204_v3 = vsub.f32 %v9369_v33, %v3171_v45  ;;  %3688 = vmatprep.mubr.bf16.mxu0 %v3500_v58  ;;  %v3156_v10 = vpop.permute.xlu1 %3155 }
 0x43e   : > { %6842 = vpow2.f32 %v3245_v36  ;;  %v3197_v11 = vsub.f32 %v9336_v50, %v3156_v10  ;;  %v3198_v5 = vsub.f32 %v9339_v27, %v3156_v10  ;;  %v3320_v43 = vadd.f32 %v6825_v46, %v6823_v63  ;;  %v7171_v10 = vld [vmem:[%s7277_s26 + $0x20] sm:$0xff] }
 0x43f   : > { %6844 = vpow2.f32 %v3247_v22  ;;  %v3265_v61 = vmul.f32 1.442695, %v3203_v28  ;;  %v3267_v48 = vmul.f32 1.442695, %v3204_v3  ;;  %v7167_v28 = vld [vmem:[%s7277_s26] sm:$0xff]  ;;  %v7169_v22 = vld [vmem:[%s7277_s26 + $0x8] sm:$0xff] }
 0x440   : > { %v6827_v49 = vpop.eup %6826  ;;  %6846 = vpow2.f32 %v3257_v26  ;;  %v3253_v30 = vmul.f32 1.442695, %v3197_v11  ;;  %v3255_v33 = vmul.f32 1.442695, %v3198_v5  ;;  %3321 = vadd.xlane.f32.xlu0 %v3320_v43  ;;  %v7170_v3 = vld [vmem:[%s7277_s26 + $0x18] sm:$0xff]  ;;  %v7172_v11 = vld [vmem:[%s7277_s26 + $0x28] sm:$0xff] }
 0x441   : > { %v6829_v18 = vpop.eup %6828  ;;  %6848 = vpow2.f32 %v3259_v13  ;;  %v3166_v6 = vpop.permute.xlu1 %3165  ;;  %3689 = vmatmul.mubr.bf16.gmra.mrb[40].mxu0 %v3499_v47  ;;  %v7168_v13 = vld [vmem:[%s7277_s26 + $0x10] sm:$0xff]  ;;  %v7174_v43 = vld [vmem:[%s7277_s26 + $0x38] sm:$0xff] }
 0x442   : > { %v6831_v59 = vpop.eup %6830  ;;  %6850 = vpow2.f32 %v3253_v30  ;;  %v3201_v50 = vsub.f32 %v9356_v31, %v3166_v6  ;;  %v3202_v27 = vsub.f32 %v9359_v15, %v3166_v6  ;;  %v3323_v37 = vadd.f32 %v6829_v18, %v6827_v49  ;;  %v7173_v5 = vld [vmem:[%s7277_s26 + $0x30] sm:$0xff]  ;;  %v7178_v47 = vld [vmem:[%s7277_s26 + $0x58] sm:$0xff] }
 0x443   : > { %v6833_v35 = vpop.eup %6832  ;;  %6852 = vpow2.f32 %v3255_v33  ;;  %v3502_v0 = vpack.c.bf16 %v6829_v18, %v6825_v46  ;;  %v3501_v15 = vpack.c.bf16 %v6827_v49, %v6823_v63  ;;  %v7175_v49 = vld [vmem:[%s7277_s26 + $0x40] sm:$0xff]  ;;  %v7177_v30 = vld [vmem:[%s7277_s26 + $0x50] sm:$0xff]  ;;  %v7182_v6 = vld [vmem:[%s7277_s26 + $0x78] sm:$0xff] }
 0x444   : > { %v6835_v2 = vpop.eup %6834  ;;  %6854 = vpow2.f32 %v3265_v61  ;;  %v3261_v38 = vmul.f32 1.442695, %v3201_v50  ;;  %v3263_v53 = vmul.f32 1.442695, %v3202_v27  ;;  %3324 = vadd.xlane.f32.xlu1 %v3323_v37  ;;  %v3329_v39 = vadd.f32 %v6833_v35, %v6831_v59  ;;  %v7176_v61 = vld [vmem:[%s7277_s26 + $0x48] sm:$0xff]  ;;  %v7179_v18 = vld [vmem:[%s7277_s26 + $0x60] sm:$0xff] }
 0x445   : > { %v6837_v19 = vpop.eup %6836  ;;  %6856 = vpow2.f32 %v3267_v48  ;;  %3696 = vmatprep.mubr.bf16.mxu0 %v3502_v0  ;;  %v3503_v14 = vpack.c.bf16 %v6831_v59, %v6835_v2  ;;  %v7180_v48 = vld [vmem:[%s7277_s26 + $0x68] sm:$0xff]  ;;  %v7181_v33 = vld [vmem:[%s7277_s26 + $0x70] sm:$0xff]  ;;  %v11426_v59 = vmov 0   ;;  %v11427_v50 = vsub.f32 %v9431_v8, %v9434_v17  ;;  %v11432_v17 = vld [vmem:[#allocation68_spill] sm:$0xff] }
 0x446   : > { %v6839_v54 = vpop.eup %6838  ;;  %6858 = vpow2.f32 %v3261_v38  ;;  %v3326_v52 = vadd.f32 %v6837_v19, %v6835_v2  ;;  %v3504_v7 = vpack.c.bf16 %v6833_v35, %v6837_v19  ;;  %v11428_v37 = vsub.f32 %v9443_v9, %v9449_v20  ;;  %v11431_v8 = vld [vmem:[#allocation67_spill] sm:$0xff] }
 0x447   : > { %v6841_v24 = vpop.eup %6840  ;;  %6860 = vpow2.f32 %v3263_v53  ;;  %v3061_v27 = vmul.f32 1.442695, %v11427_v50  ;;  %v11429_v0 = vsub.f32 %v9456_v25, %v9472_v57  ;;  %v11430_v38 = vsub.f32 %v9441_v4, %v9446_v55  ;;  %v3271_v55 = vld [vmem:[#allocation3 + $0x108] sm:$0xff] }
 0x448   : > { %v6843_v31 = vpop.eup %6842  ;;  %3327 = vadd.xlane.f32.xlu0 %v3326_v52  ;;  %3330 = vadd.xlane.f32.xlu1 %v3329_v39  ;;  %v3335_v1 = vadd.f32 %v6841_v24, %v6839_v54  ;;  %v3063_v35 = vmul.f32 1.442695, %v11428_v37  ;;  %v11433_v52 = vsub.f32 %v11431_v8, %v11432_v17 }
 0x449   : > { %v6845_v29 = vpop.eup %6844  ;;  %3697 = vmatmul.mubr.bf16.gmra.mrb[44].mxu0 %v3501_v15  ;;  %v3505_v58 = vpack.c.bf16 %v6839_v54, %v6843_v31  ;;  %6862 = vpow2.f32 %v3061_v27  ;;  %v3067_v2 = vmul.f32 1.442695, %v11429_v0  ;;  %v3065_v53 = vmul.f32 1.442695, %v11430_v38  ;;  %v3270_v54 = vld [vmem:[#allocation3 + $0x100] sm:$0xff]  ;;  %v11455_v38 = vld [vmem:[#allocation38_spill] sm:$0xff] }
 0x44a   : > { %v6847_v32 = vpop.eup %6846  ;;  %v3332_v56 = vadd.f32 %v6845_v29, %v6843_v31  ;;  %3704 = vmatprep.mubr.bf16.mxu0 %v3504_v7  ;;  %v3506_v42 = vpack.c.bf16 %v6841_v24, %v6845_v29  ;;  %6864 = vpow2.f32 %v3063_v35  ;;  %v3069_v39 = vmul.f32 1.442695, %v11433_v52  ;;  %v11434_v24 = vld [vmem:[#allocation75_spill] sm:$0xff]  ;;  %v11435_v31 = vld [vmem:[#allocation73_spill] sm:$0xff]  ;;  %v11437_v29 = vld [vmem:[#allocation76_spill] sm:$0xff] }
 0x44b   : > { %v6849_v12 = vpop.eup %6848  ;;  %6866 = vpow2.f32 %v3067_v2  ;;  %v11436_v25 = vsub.f32 %v11434_v24, %v11435_v31  ;;  %v11438_v7 = vld [vmem:[#allocation74_spill] sm:$0xff]  ;;  %v3276_v52 = vld [vmem:[#allocation3 + $0x130] sm:$0xff] }
 0x44c   : > { %v6851_v34 = vpop.eup %6850  ;;  %3333 = vadd.xlane.f32.xlu0 %v3332_v56  ;;  %3336 = vadd.xlane.f32.xlu1 %v3335_v1  ;;  %v3341_v62 = vadd.f32 %v6849_v12, %v6847_v32  ;;  %6868 = vpow2.f32 %v3065_v53  ;;  %v11456_v53 = vld [vmem:[#allocation63_spill] sm:$0xff] }
 0x44d   : > { %v6853_v40 = vpop.eup %6852  ;;  %v3507_v26 = vpack.c.bf16 %v6847_v32, %v6851_v34  ;;  %v3071_v57 = vmul.f32 1.442695, %v11436_v25  ;;  %6870 = vpow2.f32 %v3069_v39  ;;  %v11439_v32 = vsub.f32 %v11437_v29, %v11438_v7  ;;  %v11458_v39 = vld [vmem:[#allocation29_spill] sm:$0xff] }
 0x44e   : > { %v6855_v44 = vpop.eup %6854  ;;  %v3338_v51 = vadd.f32 %v6853_v40, %v6851_v34  ;;  %v3508_v63 = vpack.c.bf16 %v6849_v12, %v6853_v40  ;;  %v3273_v40 = vld [vmem:[#allocation3 + $0x118] sm:$0xff] }
 0x44f   : > { %v6857_v60 = vpop.eup %6856  ;;  %v3073_v56 = vmul.f32 1.442695, %v11439_v32  ;;  %6872 = vpow2.f32 %v3071_v57 }
 0x450   : > { %v6859_v23 = vpop.eup %6858  ;;  %3339 = vadd.xlane.f32.xlu0 %v3338_v51  ;;  %3342 = vadd.xlane.f32.xlu1 %v3341_v62  ;;  %v3347_v41 = vadd.f32 %v6857_v60, %v6855_v44  ;;  %v11440_v51 = vld [vmem:[#allocation77_spill] sm:$0xff]  ;;  %v11441_v62 = vld [vmem:[#allocation79_spill] sm:$0xff] }
 0x451   : > { %v6861_v16 = vpop.eup %6860  ;;  %3705 = vmatmul.mubr.bf16.gmra.mrb[48].mxu0 %v3503_v14  ;;  %v3509_v46 = vpack.c.bf16 %v6855_v44, %v6859_v23  ;;  %6874 = vpow2.f32 %v3073_v56  ;;  %v11463_v56 = vld [vmem:[#allocation94_spill] sm:$0xff] }
 0x452   : > { %v3344_v45 = vadd.f32 %v6861_v16, %v6859_v23  ;;  %3712 = vmatprep.mubr.bf16.mxu0 %v3506_v42  ;;  %v3510_v36 = vpack.c.bf16 %v6857_v60, %v6861_v16  ;;  %v11442_v60 = vsub.f32 %v11440_v51, %v11441_v62  ;;  %v3272_v16 = vld [vmem:[#allocation3 + $0x110] sm:$0xff] }
 0x453   : > { %v9723_v19 = vpop.eup %6862 }
 0x454   : > { %3345 = vadd.xlane.f32.xlu0 %v3344_v45  ;;  %3348 = vadd.xlane.f32.xlu1 %v3347_v41  ;;  %v3286_v9 = vmul.f32 %v9723_v19, %v3270_v54  ;;  %v9732_v4 = vpop.eup %6864  ;;  %v3075_v23 = vmul.f32 1.442695, %v11442_v60  ;;  %v11443_v45 = vld [vmem:[#allocation78_spill] sm:$0xff]  ;;  %v11444_v41 = vld [vmem:[#allocation80_spill] sm:$0xff]  ;;  %v11457_v54 = vsub.f32 %v11455_v38, %v11456_v53 }
 0x455   : > { %v3287_v1 = vmul.f32 %v9732_v4, %v3271_v55  ;;  %v9739_v12 = vpop.eup %6866  ;;  %v11461_v55 = vld [vmem:[#allocation89_spill] sm:$0xff] }
 0x456   : > { %v9741_v44 = vpop.eup %6868  ;;  %v3289_v42 = vmul.f32 %v9739_v12, %v3273_v40  ;;  %6876 = vpow2.f32 %v3075_v23  ;;  %v3085_v8 = vmul.f32 1.442695, %v11457_v54  ;;  %v11462_v29 = vsub.f32 %v11461_v55, %v9597_v21  ;;  %v3285_v54 = vld [vmem:[#allocation3 + $0x178] sm:$0xff] }
 0x458   : > { %v3089_v7 = vmul.f32 1.442695, %v11462_v29 }
 0x459   : > { %3713 = vmatmul.mubr.bf16.gmra.mrb[52].mxu0 %v3505_v58  ;;  %v11445_v58 = vsub.f32 %v11443_v45, %v11444_v41 }
 0x45a   : > { %3720 = vmatprep.mubr.bf16.mxu0 %v3508_v63 }
 0x45b   : > { %v3077_v63 = vmul.f32 1.442695, %v11445_v58 }
 0x45d   : > { %6878 = vpow2.f32 %v3077_v63 }
 0x461   : > { %3721 = vmatmul.mubr.bf16.gmra.mrb[56].mxu0 %v3507_v26 }
 0x462   : > { %3728 = vmatprep.mubr.bf16.mxu0 %v3510_v36  ;;  %v3288_v36 = vmul.f32 %v9741_v44, %v3272_v16  ;;  %v3279_v16 = vld [vmem:[#allocation3 + $0x148] sm:$0xff] }
 0x465   : > { %3786 = vperm.xlu1 %6538, %v7167_v28   ;;  %v9752_v28 = vpop.eup %6870 }
 0x469   : > { %3794 = vperm.xlu1 %6538, %v7168_v13   ;;  %3729 = vmatmul.mubr.bf16.gmra.mrb[60].mxu0 %v3509_v46  ;;  %v11446_v46 = vld [vmem:[#allocation81_spill] sm:$0xff]  ;;  %v11447_v13 = vld [vmem:[#allocation26_spill] sm:$0xff] }
 0x46a   : > { %3790 = vperm.xlu0 %6539, %v7169_v22   ;;  %v11448_v22 = vsub.f32 %v11446_v46, %v11447_v13  ;;  %v3281_v46 = vld [vmem:[#allocation3 + $0x158] sm:$0xff]  ;;  %v3280_v13 = vld [vmem:[#allocation3 + $0x150] sm:$0xff] }
 0x46d   : > { %3798 = vperm.xlu1 %6538, %v7170_v3   ;;  %v3079_v3 = vmul.f32 1.442695, %v11448_v22 }
 0x46e   : > { %3802 = vperm.xlu0 %6539, %v7171_v10  }
 0x46f   : > { %6880 = vpow2.f32 %v3079_v3 }
 0x471   : > { %3806 = vperm.xlu1 %6538, %v7172_v11  }
 0x472   : > { %3810 = vperm.xlu0 %6539, %v7173_v5   ;;  %v3274_v5 = vld [vmem:[#allocation3 + $0x120] sm:$0xff] }
 0x475   : > { %3814 = vperm.xlu1 %6538, %v7174_v43  }
 0x476   : > { %3818 = vperm.xlu0 %6539, %v7175_v49   ;;  %v9758_v49 = vpop.eup %6872 }
 0x477   : > { %v9769_v2 = vpop.eup %6874 }
 0x478   : > { %v9778_v25 = vpop.eup %6876  ;;  %v3292_v57 = vmul.f32 %v9769_v2, %v3276_v52 }
 0x479   : > { %3822 = vperm.xlu1 %6538, %v7176_v61   ;;  %v11449_v61 = vld [vmem:[#allocation82_spill] sm:$0xff]  ;;  %v9788_v62 = vpop.eup %6878 }
 0x47a   : > { %3826 = vperm.xlu0 %6539, %v7177_v30   ;;  %v11450_v30 = vld [vmem:[#allocation83_spill] sm:$0xff]  ;;  %v9791_v23 = vpop.eup %6880 }
 0x47b   : > { %v3295_v41 = vmul.f32 %v9791_v23, %v3279_v16 }
 0x47d   : > { %3830 = vperm.xlu1 %6538, %v7178_v47   ;;  %v11451_v47 = vsub.f32 %v11449_v61, %v11450_v30 }
 0x47e   : > { %3834 = vperm.xlu0 %6539, %v7179_v18  }
 0x47f   : > { %v3081_v18 = vmul.f32 1.442695, %v11451_v47  ;;  %v3283_v47 = vld [vmem:[#allocation3 + $0x168] sm:$0xff] }
 0x481   : > { %3838 = vperm.xlu1 %6538, %v7180_v48   ;;  %v3290_v48 = vmul.f32 %v9752_v28, %v3274_v5  ;;  %6882 = vpow2.f32 %v3081_v18  ;;  %v3282_v18 = vld [vmem:[#allocation3 + $0x160] sm:$0xff] }
 0x482   : > { %3842 = vperm.xlu0 %6539, %v7181_v33   ;;  %v3275_v33 = vld [vmem:[#allocation3 + $0x128] sm:$0xff] }
 0x483   : > { %v3291_v0 = vmul.f32 %v9758_v49, %v3275_v33 }
 0x485   : > { %3846 = vperm.xlu1 %6538, %v7182_v6   ;;  %v11452_v6 = vld [vmem:[#allocation50_spill] sm:$0xff] }
 0x486   : > { %6541 = vset.pattern.permute.xlu0 %v11426_v59 }
 0x489   : > { %6540 = vset.pattern.permute.xlu1 %v11426_v59  ;;  %v11453_v59 = vld [vmem:[#allocation57_spill] sm:$0xff] }
 0x48a   : > { %v11454_v50 = vsub.f32 %v11452_v6, %v11453_v59  ;;  %v11466_v6 = vld [vmem:[#allocation5_spill] sm:$0xff] }
 0x48b   : > { %v9794_v45 = vpop.eup %6882  ;;  %v3851_v59 = vsub.s32 3, %v11466_v6 }
 0x48c   : > { %v3083_v27 = vmul.f32 1.442695, %v11454_v50  ;;  %v3296_v5 = vmul.f32 %v9794_v45, %v3280_v13  ;;  %v3855_v50 = vsub.s32 7, %v11466_v6 }
 0x48e   : > { %6884 = vpow2.f32 %v3083_v27 }
 0x48f   : > { %6886 = vpow2.f32 %v3085_v8  ;;  %v3284_v8 = vld [vmem:[#allocation3 + $0x170] sm:$0xff] }
 0x498   : > { %v9799_v63 = vpop.eup %6884 }
 0x4b7   : > { %v3304_v20 = vpop.xlane.xlu1 %3303 }
 0x4b8   : > { %v3350_v15 = vadd.f32 %v3304_v20, %v3286_v9  ;;  %v11459_v9 = vld [vmem:[#allocation102_spill] sm:$0xff] }
 0x4b9   : > { %v11460_v20 = vsub.f32 %v11458_v39, %v11459_v9  ;;  %v7183_v39 = vld [vmem:[%s10869_s2] sm:$0xff] }
 0x4ba   : > { %3366 = vst.msk [vmem:[#allocation3 + $0x100] sm:$0xff] %vm330_vm0, %v3350_v15  ;;  %v3277_v15 = vld [vmem:[#allocation3 + $0x138] sm:$0xff]  ;;  %v3852_v9 = vrot.slane %v7183_v39, %v3851_v59 }
 0x4bb   : > { %v3087_v24 = vmul.f32 1.442695, %v11460_v20  ;;  %v3293_v60 = vmul.f32 %v9778_v25, %v3277_v15  ;;  %v3856_v20 = vrot.slane %v7183_v39, %v3855_v50 }
 0x4bd   : > { %6888 = vpow2.f32 %v3087_v24 }
 0x4be   : > { %v3307_v34 = vpop.xlane.xlu0 %3306  ;;  %6890 = vpow2.f32 %v3089_v7  ;;  %v9826_v7 = vrot.slane %v3852_v9, %v3851_v59  ;;  %v11470_v9 = vld [vmem:[#allocation25_spill] sm:$0xff] }
 0x4bf   : > { %v3351_v14 = vadd.f32 %v3307_v34, %v3287_v1  ;;  %v11464_v1 = vld [vmem:[#allocation108_spill] sm:$0xff] }
 0x4c0   : > { %v11465_v34 = vsub.f32 %v11463_v56, %v11464_v1 }
 0x4c1   : > { %3367 = vst.msk [vmem:[#allocation3 + $0x108] sm:$0xff] %vm330_vm0, %v3351_v14  ;;  %v3313_v26 = vpop.xlane.xlu1 %3312 }
 0x4c2   : > { %v3353_v10 = vadd.f32 %v3313_v26, %v3289_v42  ;;  %v3310_v11 = vpop.xlane.xlu0 %3309  ;;  %v3091_v40 = vmul.f32 1.442695, %v11465_v34  ;;  %v3278_v42 = vld [vmem:[#allocation3 + $0x140] sm:$0xff] }
 0x4c3   : > { %v3352_v43 = vadd.f32 %v3310_v11, %v3288_v36  ;;  %v3294_v58 = vmul.f32 %v9788_v62, %v3278_v42  ;;  %v3297_v11 = vmul.f32 %v9799_v63, %v3281_v46  ;;  %v11467_v46 = vld [vmem:[#allocation6_spill] sm:$0xff] }
 0x4c4   : > { %3369 = vst.msk [vmem:[#allocation3 + $0x118] sm:$0xff] %vm330_vm0, %v3353_v10  ;;  %6892 = vpow2.f32 %v3091_v40  ;;  %v9801_v10 = vpop.eup %6886 }
 0x4c5   : > { %3368 = vst.msk [vmem:[#allocation3 + $0x110] sm:$0xff] %vm330_vm0, %v3352_v43 }
 0x4c6   : > { %v3316_v37 = vpop.xlane.xlu0 %3315 }
 0x4c7   : > { %v3354_v35 = vadd.f32 %v3316_v37, %v3290_v48  ;;  %v9807_v43 = vpop.eup %6888 }
 0x4c8   : > { %v9811_v27 = vpop.eup %6890  ;;  %v3299_v37 = vmul.f32 %v9807_v43, %v3283_v47 }
 0x4c9   : > { %3370 = vst.msk [vmem:[#allocation3 + $0x120] sm:$0xff] %vm330_vm0, %v3354_v35  ;;  %v3319_v17 = vpop.xlane.xlu1 %3318  ;;  %v3298_v35 = vmul.f32 %v9801_v10, %v3282_v18 }
 0x4ca   : > { %v3355_v31 = vadd.f32 %v3319_v17, %v3291_v0 }
 0x4cc   : > { %3371 = vst.msk [vmem:[#allocation3 + $0x128] sm:$0xff] %vm330_vm0, %v3355_v31  ;;  %v3300_v31 = vmul.f32 %v9811_v27, %v3284_v8 }
 0x4cd   : > { %v3322_v32 = vpop.xlane.xlu0 %3321 }
 0x4ce   : > { %v3356_v51 = vadd.f32 %v3322_v32, %v3292_v57  ;;  %v9817_v0 = vpop.eup %6892  ;;  %v9828_v32 = vrot.slane %v3856_v20, %v3851_v59 }
 0x4cf   : > { %v3301_v24 = vmul.f32 %v9817_v0, %v3285_v54 }
 0x4d0   : > { %3372 = vst.msk [vmem:[#allocation3 + $0x130] sm:$0xff] %vm330_vm0, %v3356_v51 }
 0x4d1   : > { %v3325_v14 = vpop.xlane.xlu1 %3324 }
 0x4d2   : > { %v3357_v21 = vadd.f32 %v3325_v14, %v3293_v60 }
 0x4d4   : > { %3373 = vst.msk [vmem:[#allocation3 + $0x138] sm:$0xff] %vm330_vm0, %v3357_v21 }
 0x4d5   : > { %v3331_v26 = vpop.xlane.xlu1 %3330  ;;  %v3328_v36 = vpop.xlane.xlu0 %3327 }
 0x4d6   : > { %v3359_v22 = vadd.f32 %v3331_v26, %v3295_v41  ;;  %v3358_v3 = vadd.f32 %v3328_v36, %v3294_v58 }
 0x4d8   : > { %3375 = vst.msk [vmem:[#allocation3 + $0x148] sm:$0xff] %vm330_vm0, %v3359_v22  ;;  %3374 = vst.msk [vmem:[#allocation3 + $0x140] sm:$0xff] %vm330_vm0, %v3358_v3 }
 0x4d9   : > { %v3337_v61 = vpop.xlane.xlu1 %3336  ;;  %v3334_v30 = vpop.xlane.xlu0 %3333 }
 0x4da   : > { %v3361_v48 = vadd.f32 %v3337_v61, %v3297_v11  ;;  %v3360_v33 = vadd.f32 %v3334_v30, %v3296_v5  ;;  %v11468_v30 = vld [vmem:[#allocation7_spill] sm:$0xff] }
 0x4dc   : > { %3377 = vst.msk [vmem:[#allocation3 + $0x158] sm:$0xff] %vm330_vm0, %v3361_v48  ;;  %3376 = vst.msk [vmem:[#allocation3 + $0x150] sm:$0xff] %vm330_vm0, %v3360_v33 }
 0x4dd   : > { %v3343_v38 = vpop.xlane.xlu1 %3342  ;;  %v3340_v53 = vpop.xlane.xlu0 %3339 }
 0x4de   : > { %v3363_v17 = vadd.f32 %v3343_v38, %v3299_v37  ;;  %v3362_v52 = vadd.f32 %v3340_v53, %v3298_v35 }
 0x4e0   : > { %3379 = vst.msk [vmem:[#allocation3 + $0x168] sm:$0xff] %vm330_vm0, %v3363_v17  ;;  %3378 = vst.msk [vmem:[#allocation3 + $0x160] sm:$0xff] %vm330_vm0, %v3362_v52  ;;  %v11469_v52 = vld [vmem:[#allocation21_spill] sm:$0xff] }
 0x4e1   : > { %v3349_v57 = vpop.xlane.xlu1 %3348  ;;  %v3346_v15 = vpop.xlane.xlu0 %3345 }
 0x4e2   : > { %v3365_v55 = vadd.f32 %v3349_v57, %v3301_v24  ;;  %v3364_v29 = vadd.f32 %v3346_v15, %v3300_v31  ;;  %v11471_v24 = vld [vmem:[#allocation23_spill] sm:$0xff] }
 0x4e4   : > { %3381 = vst.msk [vmem:[#allocation3 + $0x178] sm:$0xff] %vm330_vm0, %v3365_v55  ;;  %3380 = vst.msk [vmem:[#allocation3 + $0x170] sm:$0xff] %vm330_vm0, %v3364_v29 }
 0x4e5   : > { %v3787_v56 = vpop.permute.xlu1 %3786 }
 0x4e6   : > { %v3867_v1 = vadd.f32 %v9826_v7, %v3787_v56  ;;  %v3868_v34 = vadd.f32 %v9828_v32, %v3787_v56 }
 0x4e8   : > { %v3899_v40 = vmul.f32 0.2, %v3867_v1  ;;  %v3900_v51 = vmul.f32 0.2, %v3868_v34 }
 0x4e9   : > { %v3795_v60 = vpop.permute.xlu1 %3794  ;;  %v3791_v14 = vpop.permute.xlu0 %3790 }
 0x4ea   : > { %v3931_v16 = vmax.f32 %v3867_v1, %v3899_v40  ;;  %v3871_v42 = vadd.f32 %v9826_v7, %v3795_v60  ;;  %v3872_v21 = vadd.f32 %v9828_v32, %v3795_v60  ;;  %v3932_v41 = vmax.f32 %v3868_v34, %v3900_v51 }
 0x4eb   : > { %v3869_v58 = vadd.f32 %v9826_v7, %v3791_v14  ;;  %v3870_v26 = vadd.f32 %v9828_v32, %v3791_v14 }
 0x4ec   : > { %v3903_v36 = vmul.f32 0.2, %v3871_v42  ;;  %v9839_v13 = vadd.f32 %v3931_v16, %v11467_v46  ;;  %v3904_v22 = vmul.f32 0.2, %v3872_v21  ;;  %v9842_v47 = vadd.f32 %v3932_v41, %v11468_v30  ;;  %v11472_v16 = vld [vmem:[#allocation24_spill] sm:$0xff] }
 0x4ed   : > { %v3901_v3 = vmul.f32 0.2, %v3869_v58  ;;  %v3902_v11 = vmul.f32 0.2, %v3870_v26  ;;  %v3799_v5 = vpop.permute.xlu1 %3798  ;;  %v3803_v61 = vpop.permute.xlu0 %3802  ;;  %v11473_v46 = vld [vmem:[#allocation8_spill] sm:$0xff] }
 0x4ee   : > { %v3935_v18 = vmax.f32 %v3871_v42, %v3903_v36  ;;  %v3873_v48 = vadd.f32 %v9826_v7, %v3799_v5  ;;  %v3874_v33 = vadd.f32 %v9828_v32, %v3799_v5  ;;  %v3936_v6 = vmax.f32 %v3872_v21, %v3904_v22 }
 0x4ef   : > { %v3933_v59 = vmax.f32 %v3869_v58, %v3901_v3  ;;  %v3934_v50 = vmax.f32 %v3870_v26, %v3902_v11  ;;  %v3875_v38 = vadd.f32 %v9826_v7, %v3803_v61  ;;  %v3876_v53 = vadd.f32 %v9828_v32, %v3803_v61 }
 0x4f0   : > { %v3905_v37 = vmul.f32 0.2, %v3873_v48  ;;  %v3906_v35 = vmul.f32 0.2, %v3874_v33  ;;  %v4012_v54 = vmax.f32 %v9839_v13, %v9842_v47  ;;  %v9851_v39 = vadd.f32 %v3935_v18, %v11469_v52 }
 0x4f1   : > { %v3807_v8 = vpop.permute.xlu1 %3806  ;;  %v3811_v17 = vpop.permute.xlu0 %3810  ;;  %v9854_v20 = vadd.f32 %v3936_v6, %v11470_v9  ;;  %v9857_v31 = vadd.f32 %v3933_v59, %v11471_v24  ;;  %v3907_v55 = vmul.f32 0.2, %v3875_v38  ;;  %v3908_v29 = vmul.f32 0.2, %v3876_v53 }
 0x4f2   : > { %v3937_v57 = vmax.f32 %v3873_v48, %v3905_v37  ;;  %v3938_v15 = vmax.f32 %v3874_v33, %v3906_v35  ;;  %4013 = vmax.xlane.f32.xlu0 %v4012_v54  ;;  %v3877_v56 = vadd.f32 %v9826_v7, %v3807_v8  ;;  %v3878_v1 = vadd.f32 %v9828_v32, %v3807_v8  ;;  %v11475_v54 = vld [vmem:[#allocation27_spill] sm:$0xff] }
 0x4f3   : > { %v3879_v34 = vadd.f32 %v9826_v7, %v3811_v17  ;;  %v3880_v40 = vadd.f32 %v9828_v32, %v3811_v17  ;;  %v3939_v51 = vmax.f32 %v3875_v38, %v3907_v55  ;;  %v3940_v60 = vmax.f32 %v3876_v53, %v3908_v29  ;;  %v11474_v38 = vld [vmem:[#allocation9_spill] sm:$0xff]  ;;  %v11476_v17 = vld [vmem:[#allocation28_spill] sm:$0xff] }
 0x4f4   : > { %v4018_v14 = vmax.f32 %v9851_v39, %v9854_v20  ;;  %v9866_v42 = vadd.f32 %v3934_v50, %v11472_v16  ;;  %v3909_v21 = vmul.f32 0.2, %v3877_v56  ;;  %v3910_v41 = vmul.f32 0.2, %v3878_v1 }
 0x4f5   : > { %v3911_v58 = vmul.f32 0.2, %v3879_v34  ;;  %v3815_v26 = vpop.permute.xlu1 %3814  ;;  %v3819_v36 = vpop.permute.xlu0 %3818  ;;  %v9869_v22 = vadd.f32 %v3937_v57, %v11473_v46  ;;  %v3912_v3 = vmul.f32 0.2, %v3880_v40  ;;  %v9878_v53 = vadd.f32 %v3938_v15, %v11474_v38  ;;  %v11479_v46 = vld [vmem:[#allocation30_spill] sm:$0xff] }
 0x4f6   : > { %v4015_v11 = vmax.f32 %v9857_v31, %v9866_v42  ;;  %v3881_v5 = vadd.f32 %v9826_v7, %v3815_v26  ;;  %v3882_v61 = vadd.f32 %v9828_v32, %v3815_v26  ;;  %v3941_v30 = vmax.f32 %v3877_v56, %v3909_v21  ;;  %4019 = vmax.xlane.f32.xlu0 %v4018_v14  ;;  %v11478_v26 = vld [vmem:[#allocation11_spill] sm:$0xff] }
 0x4f7   : > { %v3942_v18 = vmax.f32 %v3878_v1, %v3910_v41  ;;  %v3943_v48 = vmax.f32 %v3879_v34, %v3911_v58  ;;  %v3883_v33 = vadd.f32 %v9826_v7, %v3819_v36  ;;  %v3944_v6 = vmax.f32 %v3880_v40, %v3912_v3  ;;  %v11477_v41 = vld [vmem:[#allocation10_spill] sm:$0xff] }
 0x4f8   : > { %4016 = vmax.xlane.f32.xlu1 %v4015_v11  ;;  %v3913_v59 = vmul.f32 0.2, %v3881_v5  ;;  %v3914_v50 = vmul.f32 0.2, %v3882_v61  ;;  %v3884_v37 = vadd.f32 %v9828_v32, %v3819_v36  ;;  %v9881_v8 = vadd.f32 %v3939_v51, %v11475_v54 }
 0x4f9   : > { %v3915_v35 = vmul.f32 0.2, %v3883_v33  ;;  %v9884_v52 = vadd.f32 %v3940_v60, %v11476_v17  ;;  %v3823_v9 = vpop.permute.xlu1 %3822  ;;  %v3827_v24 = vpop.permute.xlu0 %3826  ;;  %v4021_v34 = vmax.f32 %v9869_v22, %v9878_v53  ;;  %v9895_v58 = vadd.f32 %v3941_v30, %v11477_v41  ;;  %v11486_v41 = vld [vmem:[#allocation34_spill] sm:$0xff] }
 0x4fa   : > { %v3945_v57 = vmax.f32 %v3881_v5, %v3913_v59  ;;  %v3946_v55 = vmax.f32 %v3882_v61, %v3914_v50  ;;  %v3916_v29 = vmul.f32 0.2, %v3884_v37  ;;  %v3885_v56 = vadd.f32 %v9826_v7, %v3823_v9  ;;  %v11480_v50 = vld [vmem:[#allocation32_spill] sm:$0xff] }
 0x4fb   : > { %v3947_v1 = vmax.f32 %v3883_v33, %v3915_v35  ;;  %v4024_v15 = vmax.f32 %v9881_v8, %v9884_v52  ;;  %v3886_v40 = vadd.f32 %v9828_v32, %v3823_v9  ;;  %v3887_v60 = vadd.f32 %v9826_v7, %v3827_v24  ;;  %4022 = vmax.xlane.f32.xlu0 %v4021_v34 }
 0x4fc   : > { %v3948_v51 = vmax.f32 %v3884_v37, %v3916_v29  ;;  %v3917_v14 = vmul.f32 0.2, %v3885_v56  ;;  %v3888_v16 = vadd.f32 %v9828_v32, %v3827_v24  ;;  %v9898_v36 = vadd.f32 %v3942_v18, %v11478_v26 }
 0x4fd   : > { %4025 = vmax.xlane.f32.xlu1 %v4024_v15  ;;  %v3918_v21 = vmul.f32 0.2, %v3886_v40  ;;  %v9901_v3 = vadd.f32 %v3943_v48, %v11479_v46  ;;  %v3831_v11 = vpop.permute.xlu1 %3830  ;;  %v3835_v5 = vpop.permute.xlu0 %3834  ;;  %v3919_v33 = vmul.f32 0.2, %v3887_v60  ;;  %v9904_v37 = vadd.f32 %v3944_v6, %v11480_v50 }
 0x4fe   : > { %v3949_v61 = vmax.f32 %v3885_v56, %v3917_v14  ;;  %v3920_v59 = vmul.f32 0.2, %v3888_v16  ;;  %v4027_v38 = vmax.f32 %v9895_v58, %v9898_v36  ;;  %v3889_v30 = vadd.f32 %v9826_v7, %v3831_v11  ;;  %v11481_v56 = vld [vmem:[#allocation12_spill] sm:$0xff]  ;;  %v11482_v14 = vld [vmem:[#allocation13_spill] sm:$0xff] }
 0x4ff   : > { %v3950_v35 = vmax.f32 %v3886_v40, %v3918_v21  ;;  %v3890_v18 = vadd.f32 %v9828_v32, %v3831_v11  ;;  %v3951_v54 = vmax.f32 %v3887_v60, %v3919_v33  ;;  %v4030_v48 = vmax.f32 %v9901_v3, %v9904_v37  ;;  %v11484_v60 = vld [vmem:[#allocation33_spill] sm:$0xff] }
 0x500   : > { %v3952_v17 = vmax.f32 %v3888_v16, %v3920_v59  ;;  %v3891_v9 = vadd.f32 %v9826_v7, %v3835_v5  ;;  %4028 = vmax.xlane.f32.xlu0 %v4027_v38  ;;  %v3921_v24 = vmul.f32 0.2, %v3889_v30  ;;  %v3892_v6 = vadd.f32 %v9828_v32, %v3835_v5 }
 0x501   : > { %v3922_v29 = vmul.f32 0.2, %v3890_v18  ;;  %v9915_v34 = vadd.f32 %v3945_v57, %v11481_v56  ;;  %v3839_v15 = vpop.permute.xlu1 %3838  ;;  %4031 = vmax.xlane.f32.xlu1 %v4030_v48  ;;  %v9918_v21 = vadd.f32 %v3946_v55, %v11482_v14  ;;  %v9921_v16 = vadd.f32 %v3947_v1, %v11484_v60  ;;  %v3843_v46 = vpop.permute.xlu0 %3842  ;;  %v11490_v60 = vld [vmem:[#allocation35_spill] sm:$0xff] }
 0x502   : > { %v3923_v40 = vmul.f32 0.2, %v3891_v9  ;;  %v9924_v26 = vadd.f32 %v3948_v51, %v11486_v41  ;;  %v3953_v11 = vmax.f32 %v3889_v30, %v3921_v24  ;;  %v3924_v59 = vmul.f32 0.2, %v3892_v6 }
 0x503   : > { %11483 = vst [vmem:[#allocation99_spill] sm:$0xff] %v9918_v21  ;;  %11485 = vst [vmem:[#allocation112_spill] sm:$0xff] %v9921_v16  ;;  %v3954_v33 = vmax.f32 %v3890_v18, %v3922_v29  ;;  %v3893_v5 = vadd.f32 %v9826_v7, %v3839_v15  ;;  %v4033_v50 = vmax.f32 %v9915_v34, %v9918_v21 }
 0x504   : > { %11487 = vst [vmem:[#allocation105_spill] sm:$0xff] %v9924_v26  ;;  %v3955_v57 = vmax.f32 %v3891_v9, %v3923_v40  ;;  %v4036_v55 = vmax.f32 %v9921_v16, %v9924_v26  ;;  %v3894_v38 = vadd.f32 %v9828_v32, %v3839_v15  ;;  %v3956_v1 = vmax.f32 %v3892_v6, %v3924_v59  ;;  %v6384_v30 = vpop.f32.mrb[32].mxu0  ;;  %v11488_v9 = vld [vmem:[#allocation14_spill] sm:$0xff]  ;;  %v11489_v40 = vld [vmem:[#allocation15_spill] sm:$0xff]  ;;  %v11491_v16 = vld [vmem:[#allocation41_spill] sm:$0xff] }
 0x505   : > { %v3925_v48 = vmul.f32 0.2, %v3893_v5  ;;  %v3895_v51 = vadd.f32 %v9826_v7, %v3843_v46  ;;  %v3896_v56 = vadd.f32 %v9828_v32, %v3843_v46  ;;  %v3847_v18 = vpop.permute.xlu1 %3846  ;;  %4034 = vmax.xlane.f32.xlu0 %v4033_v50  ;;  %v9935_v29 = vadd.f32 %v3949_v61, %v11488_v9  ;;  %v6385_v6 = vpop.f32.mrb[33].mxu0 }
 0x506   : > { %4037 = vmax.xlane.f32.xlu1 %v4036_v55  ;;  %v3926_v24 = vmul.f32 0.2, %v3894_v38  ;;  %v9938_v14 = vadd.f32 %v3950_v35, %v11489_v40  ;;  %v9941_v41 = vadd.f32 %v3951_v54, %v11490_v60  ;;  %v9944_v46 = vadd.f32 %v3952_v17, %v11491_v16  ;;  %v6387_v21 = vpop.f32.mrb[34].mxu0  ;;  %v11493_v60 = vld [vmem:[#allocation17_spill] sm:$0xff] }
 0x507   : > { %v3957_v15 = vmax.f32 %v3893_v5, %v3925_v48  ;;  %v3927_v59 = vmul.f32 0.2, %v3895_v51  ;;  %v3928_v26 = vmul.f32 0.2, %v3896_v56  ;;  %v9948_v61 = vadd.f32 %v6385_v6, %v6384_v30  ;;  %v6388_v9 = vpop.f32.mrb[35].mxu0  ;;  %v11494_v6 = vld [vmem:[#allocation42_spill] sm:$0xff] }
 0x508   : > { %v3958_v50 = vmax.f32 %v3894_v38, %v3926_v24  ;;  %v4039_v55 = vmax.f32 %v9935_v29, %v9938_v14  ;;  %v3897_v35 = vadd.f32 %v9826_v7, %v3847_v18  ;;  %v4042_v5 = vmax.f32 %v9941_v41, %v9944_v46  ;;  %v11492_v38 = vld [vmem:[#allocation16_spill] sm:$0xff] }
 0x509   : > { %v3959_v40 = vmax.f32 %v3895_v51, %v3927_v59  ;;  %v3960_v54 = vmax.f32 %v3896_v56, %v3928_v26  ;;  %v3898_v48 = vadd.f32 %v9828_v32, %v3847_v18  ;;  %v9954_v16 = vadd.f32 %v6388_v9, %v6387_v21  ;;  %v11495_v26 = vld [vmem:[#allocation43_spill] sm:$0xff]  ;;  %v11496_v59 = vld [vmem:[#allocation18_spill] sm:$0xff] }
 0x50a   : > { %4040 = vmax.xlane.f32.xlu0 %v4039_v55  ;;  %v3929_v17 = vmul.f32 0.2, %v3897_v35  ;;  %v9957_v24 = vadd.f32 %v3953_v11, %v11492_v38  ;;  %v9960_v30 = vadd.f32 %v3954_v33, %v11493_v60  ;;  %4043 = vmax.xlane.f32.xlu1 %v4042_v5  ;;  %v9963_v51 = vadd.f32 %v3955_v57, %v11494_v6  ;;  %v11497_v11 = vld [vmem:[#allocation19_spill] sm:$0xff]  ;;  %v11498_v33 = vld [vmem:[#allocation44_spill] sm:$0xff] }
 0x50b   : > { %v3930_v7 = vmul.f32 0.2, %v3898_v48  ;;  %v9966_v56 = vadd.f32 %v3956_v1, %v11495_v26  ;;  %v9969_v32 = vadd.f32 %v3957_v15, %v11496_v59  ;;  %v9974_v55 = vadd.f32 %v3958_v50, %v11497_v11  ;;  %v11499_v1 = vld [vmem:[#allocation49_spill] sm:$0xff] }
 0x50c   : > { %v3961_v18 = vmax.f32 %v3897_v35, %v3929_v17  ;;  %v4045_v21 = vmax.f32 %v9957_v24, %v9960_v30  ;;  %v9977_v9 = vadd.f32 %v3959_v40, %v11498_v33  ;;  %v6390_v38 = vpop.f32.mrb[36].mxu0  ;;  %v9982_v60 = vadd.f32 %v3960_v54, %v11499_v1  ;;  %v11500_v17 = vld [vmem:[#allocation20_spill] sm:$0xff] }
 0x50d   : > { %v3962_v5 = vmax.f32 %v3898_v48, %v3930_v7  ;;  %v4048_v57 = vmax.f32 %v9963_v51, %v9966_v56  ;;  %v4051_v15 = vmax.f32 %v9969_v32, %v9974_v55  ;;  %v6391_v35 = vpop.f32.mrb[37].mxu0  ;;  %v11501_v7 = vld [vmem:[#allocation22_spill] sm:$0xff] }
 0x50e   : > { %4046 = vmax.xlane.f32.xlu0 %v4045_v21  ;;  %v9987_v6 = vadd.f32 %v3961_v18, %v11500_v17  ;;  %v4054_v50 = vmax.f32 %v9977_v9, %v9982_v60  ;;  %v9991_v40 = vadd.f32 %v6391_v35, %v6390_v38  ;;  %v6393_v48 = vpop.f32.mrb[38].mxu0 }
 0x50f   : > { %4049 = vmax.xlane.f32.xlu1 %v4048_v57  ;;  %v9994_v26 = vadd.f32 %v3962_v5, %v11501_v7  ;;  %v6394_v54 = vpop.f32.mrb[39].mxu0 }
 0x510   : > { %v9996_v59 = vadd.f32 %v6394_v54, %v6393_v48 }
 0x511   : > { %v4057_v21 = vmax.f32 %v9987_v6, %v9994_v26 }
 0x512   : > { %4052 = vmax.xlane.f32.xlu0 %v4051_v15 }
 0x513   : > { %4055 = vmax.xlane.f32.xlu1 %v4054_v50 }
 0x514   : > { %v6396_v18 = vpop.f32.mrb[40].mxu0 }
 0x515   : > { %v6397_v11 = vpop.f32.mrb[41].mxu0 }
 0x516   : > { %4058 = vmax.xlane.f32.xlu0 %v4057_v21  ;;  %v10000_v33 = vadd.f32 %v6397_v11, %v6396_v18  ;;  %v6399_v57 = vpop.f32.mrb[42].mxu0 }
 0x517   : > { %v6400_v38 = vpop.f32.mrb[43].mxu0 }
 0x518   : > { %v10002_v1 = vadd.f32 %v6400_v38, %v6399_v57 }
 0x51c   : > { %v6402_v35 = vpop.f32.mrb[44].mxu0 }
 0x51d   : > { %v6403_v5 = vpop.f32.mrb[45].mxu0 }
 0x51e   : > { %v10004_v17 = vadd.f32 %v6403_v5, %v6402_v35  ;;  %v6405_v48 = vpop.f32.mrb[46].mxu0 }
 0x51f   : > { %v6406_v7 = vpop.f32.mrb[47].mxu0 }
 0x520   : > { %v10006_v15 = vadd.f32 %v6406_v7, %v6405_v48 }
 0x524   : > { %3406 = vperm.xlu1 %6540, %v9732_v4   ;;  %v6408_v50 = vpop.f32.mrb[48].mxu0 }
 0x525   : > { %v6409_v54 = vpop.f32.mrb[49].mxu0 }
 0x526   : > { %v10009_v21 = vadd.f32 %v6409_v54, %v6408_v50  ;;  %v6411_v18 = vpop.f32.mrb[50].mxu0 }
 0x527   : > { %v6412_v11 = vpop.f32.mrb[51].mxu0 }
 0x528   : > { %3411 = vperm.xlu1 %6540, %v9741_v44   ;;  %v10012_v57 = vadd.f32 %v6412_v11, %v6411_v18 }
 0x52c   : > { %3421 = vperm.xlu1 %6540, %v9752_v28   ;;  %3401 = vperm.xlu0 %6541, %v9723_v19   ;;  %v6414_v38 = vpop.f32.mrb[52].mxu0 }
 0x52d   : > { %v6415_v35 = vpop.f32.mrb[53].mxu0 }
 0x52e   : > { %v10016_v5 = vadd.f32 %v6415_v35, %v6414_v38  ;;  %v6417_v48 = vpop.f32.mrb[54].mxu0 }
 0x52f   : > { %v6418_v4 = vpop.f32.mrb[55].mxu0 }
 0x530   : > { %3431 = vperm.xlu1 %6540, %v9769_v2   ;;  %3416 = vperm.xlu0 %6541, %v9739_v12   ;;  %v10020_v7 = vadd.f32 %v6418_v4, %v6417_v48  ;;  %v10063_v48 = vld [vmem:[#allocation2 + $0x190] sm:$0xff] }
 0x534   : > { %3441 = vperm.xlu1 %6540, %v9788_v62   ;;  %3426 = vperm.xlu0 %6541, %v9758_v49   ;;  %v6420_v44 = vpop.f32.mrb[56].mxu0 }
 0x535   : > { %v6421_v28 = vpop.f32.mrb[57].mxu0 }
 0x536   : > { %v10024_v50 = vadd.f32 %v6421_v28, %v6420_v44  ;;  %v6423_v19 = vpop.f32.mrb[58].mxu0  ;;  %v10070_v44 = vld [vmem:[#allocation2 + $0x188] sm:$0xff] }
 0x537   : > { %v6424_v54 = vpop.f32.mrb[59].mxu0  ;;  %11502 = vst [vmem:[#allocation113_spill] sm:$0xff] %v10070_v44 }
 0x538   : > { %3451 = vperm.xlu1 %6540, %v9794_v45   ;;  %3436 = vperm.xlu0 %6541, %v9778_v25   ;;  %v10028_v2 = vadd.f32 %v6424_v54, %v6423_v19  ;;  %v6590_v25 = vld [vmem:[%s10868_s1 + $0x1c0] sm:$0xff]  }
 0x539   : > { %6432 = vmatprep.subr.bf16.mxu1 %v6590_v25  ;;  %v10090_v25 = vld [vmem:[#allocation2 + $0x198] sm:$0xff] }
 0x53a   : > { %11506 = vst [vmem:[#allocation54_spill] sm:$0xff] %v10090_v25 }
 0x53c   : > { %3461 = vperm.xlu1 %6540, %v9801_v10   ;;  %3446 = vperm.xlu0 %6541, %v9791_v23   ;;  %v6426_v12 = vpop.f32.mrb[60].mxu0  ;;  %v6591_v23 = vld [vmem:[%s10868_s1 + $0x180] sm:$0xff]   ;;  %v6592_v10 = vld [vmem:[%s10868_s1 + $0x1c8] sm:$0xff]  }
 0x53d   : > { %v6427_v62 = vpop.f32.mrb[61].mxu0  ;;  %6433 = vmatpush3.bf16.msra.mxu1 %v6591_v23  ;;  %v6596_v23 = vld [vmem:[%s10868_s1 + $0x1d8] sm:$0xff]  }
 0x53e   : > { %v10032_v18 = vadd.f32 %v6427_v62, %v6426_v12  ;;  %v6429_v49 = vpop.f32.mrb[62].mxu0  ;;  %6434 = vmatprep.subr.bf16.mxu1 %v6592_v10  ;;  %v6597_v10 = vld [vmem:[%s10868_s1 + $0x198] sm:$0xff]  }
 0x53f   : > { %v6430_v11 = vpop.f32.mrb[63].mxu0 }
 0x540   : > { %3471 = vperm.xlu1 %6540, %v9811_v27   ;;  %3456 = vperm.xlu0 %6541, %v9799_v63   ;;  %v10036_v45 = vadd.f32 %v6430_v11, %v6429_v49  ;;  %v6593_v63 = vld [vmem:[%s10868_s1 + $0x188] sm:$0xff]   ;;  %v6595_v27 = vld [vmem:[%s10868_s1 + $0x190] sm:$0xff]   ;;  %v10083_v49 = vld [vmem:[#allocation2 + $0x1a0] sm:$0xff] }
 0x541   : > { %6435 = vmatpush3.bf16.msra.mxu1 %v6593_v63  ;;  %11505 = vst [vmem:[#allocation45_spill] sm:$0xff] %v10083_v49 }
 0x544   : > { %3466 = vperm.xlu0 %6541, %v9807_v43   ;;  %v6594_v43 = vld [vmem:[%s10868_s1 + $0x1d0] sm:$0xff]  }
 0x545   : > { %6436 = vmatprep.subr.bf16.mxu1 %v6594_v43 }
 0x546   : > { %6437 = vmatpush3.bf16.msra.mxu1 %v6595_v27 }
 0x547   : > { %6438 = vmatprep.subr.bf16.mxu1 %v6596_v23  ;;  %v10115_v23 = vld [vmem:[#allocation2 + $0x1b0] sm:$0xff] }
 0x548   : > { %3476 = vperm.xlu0 %6541, %v9817_v0   ;;  %v10058_v0 = vld [vmem:[#allocation2 + $0x180] sm:$0xff]  ;;  %11510 = vst [vmem:[#allocation52_spill] sm:$0xff] %v10115_v23 }
 0x54a   : > { %6439 = vmatpush3.bf16.msra.mxu1 %v6597_v10  ;;  %v6598_v10 = vld [vmem:[%s10868_s1 + $0x1e0] sm:$0xff]  }
 0x54b   : > { %6440 = vmatprep.subr.bf16.mxu1 %v6598_v10  ;;  %v6601_v10 = vld [vmem:[%s10868_s1 + $0x1a8] sm:$0xff]  }
 0x57f   : > { %v4014_v38 = vpop.xlane.xlu0 %4013 }
 0x580   : > { %v10061_v35 = vmax.f32 %v10058_v0, %v4014_v38 }
 0x582   : > { %4800 = vst.msk [vmem:[#allocation2 + $0x180] sm:$0xff] %vm330_vm0, %v10061_v35  ;;  %4126 = vperm.xlu1 %6540, %v10061_v35  }
 0x583   : > { %v4020_v28 = vpop.xlane.xlu0 %4019 }
 0x584   : > { %v10073_v54 = vmax.f32 %v10063_v48, %v4020_v28  ;;  %v10104_v28 = vld [vmem:[#allocation2 + $0x1a8] sm:$0xff] }
 0x585   : > { %v4017_v19 = vpop.xlane.xlu1 %4016  ;;  %11509 = vst [vmem:[#allocation46_spill] sm:$0xff] %v10104_v28 }
 0x586   : > { %11503 = vst [vmem:[#allocation51_spill] sm:$0xff] %v10073_v54  ;;  %v10076_v12 = vmax.f32 %v10070_v44, %v4017_v19  ;;  %4802 = vst.msk [vmem:[#allocation2 + $0x190] sm:$0xff] %vm330_vm0, %v10073_v54  ;;  %4136 = vperm.xlu1 %6540, %v10073_v54   ;;  %v10206_v44 = vld [vmem:[#allocation2 + $0x1e8] sm:$0xff] }
 0x587   : > { %11525 = vst [vmem:[#allocation98_spill] sm:$0xff] %v10206_v44 }
 0x588   : > { %11504 = vst [vmem:[#allocation40_spill] sm:$0xff] %v10076_v12  ;;  %4801 = vst.msk [vmem:[#allocation2 + $0x188] sm:$0xff] %vm330_vm0, %v10076_v12  ;;  %4131 = vperm.xlu0 %6541, %v10076_v12   ;;  %v4023_v43 = vpop.xlane.xlu0 %4022  ;;  %v10186_v12 = vld [vmem:[#allocation2 + $0x1e0] sm:$0xff] }
 0x589   : > { %v10102_v38 = vmax.f32 %v10090_v25, %v4023_v43  ;;  %v6599_v43 = vld [vmem:[%s10868_s1 + $0x1a0] sm:$0xff]   ;;  %11522 = vst [vmem:[#allocation96_spill] sm:$0xff] %v10186_v12 }
 0x58a   : > { %v4026_v63 = vpop.xlane.xlu1 %4025  ;;  %6441 = vmatpush3.bf16.msra.mxu1 %v6599_v43 }
 0x58b   : > { %v10099_v27 = vmax.f32 %v10083_v49, %v4026_v63  ;;  %11508 = vst [vmem:[#allocation31_spill] sm:$0xff] %v10102_v38  ;;  %4803 = vst.msk [vmem:[#allocation2 + $0x198] sm:$0xff] %vm330_vm0, %v10102_v38  ;;  %4141 = vperm.xlu1 %6540, %v10102_v38   ;;  %v10134_v49 = vld [vmem:[#allocation2 + $0x1c0] sm:$0xff]  ;;  %v10136_v38 = vld [vmem:[#allocation2 + $0x1b8] sm:$0xff] }
 0x58c   : > { %11513 = vst [vmem:[#allocation53_spill] sm:$0xff] %v10134_v49  ;;  %11514 = vst [vmem:[#allocation36_spill] sm:$0xff] %v10136_v38 }
 0x58d   : > { %11507 = vst [vmem:[#allocation56_spill] sm:$0xff] %v10099_v27  ;;  %4804 = vst.msk [vmem:[#allocation2 + $0x1a0] sm:$0xff] %vm330_vm0, %v10099_v27  ;;  %v4029_v63 = vpop.xlane.xlu0 %4028 }
 0x58e   : > { %v4032_v19 = vpop.xlane.xlu1 %4031  ;;  %v10124_v62 = vmax.f32 %v10104_v28, %v4029_v63  ;;  %v10155_v63 = vld [vmem:[#allocation2 + $0x1c8] sm:$0xff] }
 0x58f   : > { %v10127_v11 = vmax.f32 %v10115_v23, %v4032_v19  ;;  %4146 = vperm.xlu1 %6540, %v10099_v27   ;;  %v6600_v19 = vld [vmem:[%s10868_s1 + $0x1e8] sm:$0xff]   ;;  %11517 = vst [vmem:[#allocation85_spill] sm:$0xff] %v10155_v63 }
 0x590   : > { %11511 = vst [vmem:[#allocation84_spill] sm:$0xff] %v10124_v62  ;;  %4805 = vst.msk [vmem:[#allocation2 + $0x1a8] sm:$0xff] %vm330_vm0, %v10124_v62  ;;  %6442 = vmatprep.subr.bf16.mxu1 %v6600_v19  ;;  %v6603_v19 = vld [vmem:[%s10868_s1 + $0x1b0] sm:$0xff]  }
 0x591   : > { %11512 = vst [vmem:[#allocation86_spill] sm:$0xff] %v10127_v11  ;;  %4806 = vst.msk [vmem:[#allocation2 + $0x1b0] sm:$0xff] %vm330_vm0, %v10127_v11  ;;  %6443 = vmatpush3.bf16.msra.mxu1 %v6601_v10 }
 0x592   : > { %v4035_v28 = vpop.xlane.xlu0 %4034 }
 0x593   : > { %v4038_v4 = vpop.xlane.xlu1 %4037  ;;  %v10152_v43 = vmax.f32 %v10136_v38, %v4035_v28  ;;  %4151 = vperm.xlu1 %6540, %v10124_v62   ;;  %v6602_v28 = vld [vmem:[%s10868_s1 + $0x1f0] sm:$0xff]   ;;  %v10180_v38 = vld [vmem:[#allocation2 + $0x1d8] sm:$0xff] }
 0x594   : > { %v10149_v27 = vmax.f32 %v10134_v49, %v4038_v4  ;;  %v10165_v4 = vld [vmem:[#allocation2 + $0x1d0] sm:$0xff]  ;;  %6444 = vmatprep.subr.bf16.mxu1 %v6602_v28  ;;  %11521 = vst [vmem:[#allocation93_spill] sm:$0xff] %v10180_v38  ;;  %v6604_v28 = vld [vmem:[%s10868_s1 + $0x1f8] sm:$0xff]  }
 0x595   : > { %11516 = vst [vmem:[#allocation91_spill] sm:$0xff] %v10152_v43  ;;  %4807 = vst.msk [vmem:[#allocation2 + $0x1b8] sm:$0xff] %vm330_vm0, %v10152_v43  ;;  %6445 = vmatpush3.bf16.msra.mxu1 %v6603_v19 }
 0x596   : > { %11515 = vst [vmem:[#allocation88_spill] sm:$0xff] %v10149_v27  ;;  %4808 = vst.msk [vmem:[#allocation2 + $0x1c0] sm:$0xff] %vm330_vm0, %v10149_v27  ;;  %6446 = vmatprep.subr.bf16.mxu1 %v6604_v28 }
 0x597   : > { %11518 = vst [vmem:[#allocation87_spill] sm:$0xff] %v10165_v4  ;;  %v4041_v10 = vpop.xlane.xlu0 %4040  ;;  %v4044_v23 = vpop.xlane.xlu1 %4043  ;;  %4156 = vperm.xlu1 %6540, %v10127_v11  }
 0x598   : > { %v10174_v49 = vmax.f32 %v10155_v63, %v4041_v10  ;;  %v10177_v25 = vmax.f32 %v10165_v4, %v4044_v23  ;;  %v6605_v23 = vld [vmem:[%s10868_s1 + $0x1b8] sm:$0xff]  }
 0x599   : > { %6447 = vmatpush3.bf16.msra.mxu1 %v6605_v23 }
 0x59a   : > { %11519 = vst [vmem:[#allocation37_spill] sm:$0xff] %v10174_v49  ;;  %11520 = vst [vmem:[#allocation55_spill] sm:$0xff] %v10177_v25  ;;  %4176 = vperm.xlu0 %6541, %v10177_v25  }
 0x59b   : > { %4809 = vst.msk [vmem:[#allocation2 + $0x1c8] sm:$0xff] %vm330_vm0, %v10174_v49  ;;  %4810 = vst.msk [vmem:[#allocation2 + $0x1d0] sm:$0xff] %vm330_vm0, %v10177_v25  ;;  %v4047_v19 = vpop.xlane.xlu0 %4046  ;;  %4161 = vperm.xlu1 %6540, %v10152_v43   ;;  %v10212_v25 = vld [vmem:[#allocation2 + $0x1f0] sm:$0xff]  ;;  %v3387_v43 = vld [vmem:[#allocation4 + $0x120] sm:$0xff] }
 0x59c   : > { %v4050_v62 = vpop.xlane.xlu1 %4049  ;;  %v10200_v63 = vmax.f32 %v10180_v38, %v4047_v19  ;;  %11526 = vst [vmem:[#allocation101_spill] sm:$0xff] %v10212_v25  ;;  %v10226_v38 = vld [vmem:[#allocation2 + $0x1f8] sm:$0xff] }
 0x59d   : > { %v10203_v11 = vmax.f32 %v10186_v12, %v4050_v62  ;;  %11528 = vst [vmem:[#allocation97_spill] sm:$0xff] %v10226_v38  ;;  %v3384_v12 = vld [vmem:[#allocation4 + $0x108] sm:$0xff] }
 0x59e   : > { %11523 = vst [vmem:[#allocation90_spill] sm:$0xff] %v10200_v63  ;;  %4811 = vst.msk [vmem:[#allocation2 + $0x1d8] sm:$0xff] %vm330_vm0, %v10200_v63 }
 0x59f   : > { %11524 = vst [vmem:[#allocation92_spill] sm:$0xff] %v10203_v11  ;;  %4812 = vst.msk [vmem:[#allocation2 + $0x1e0] sm:$0xff] %vm330_vm0, %v10203_v11  ;;  %4186 = vperm.xlu0 %6541, %v10203_v11   ;;  %v4053_v62 = vpop.xlane.xlu0 %4052  ;;  %4166 = vperm.xlu1 %6540, %v10149_v27   ;;  %v3385_v11 = vld [vmem:[#allocation4 + $0x110] sm:$0xff] }
 0x5a0   : > { %v4056_v28 = vpop.xlane.xlu1 %4055  ;;  %v10220_v23 = vmax.f32 %v10206_v44, %v4053_v62 }
 0x5a1   : > { %v10223_v10 = vmax.f32 %v10212_v25, %v4056_v28 }
 0x5a2   : > { %4813 = vst.msk [vmem:[#allocation2 + $0x1e8] sm:$0xff] %vm330_vm0, %v10220_v23 }
 0x5a3   : > { %11527 = vst [vmem:[#allocation95_spill] sm:$0xff] %v10223_v10  ;;  %4814 = vst.msk [vmem:[#allocation2 + $0x1f0] sm:$0xff] %vm330_vm0, %v10223_v10  ;;  %4196 = vperm.xlu0 %6541, %v10223_v10   ;;  %v4059_v62 = vpop.xlane.xlu0 %4058  ;;  %4171 = vperm.xlu1 %6540, %v10174_v49  }
 0x5a4   : > { %v3407_v28 = vpop.permute.xlu1 %3406  ;;  %v10238_v4 = vmax.f32 %v10226_v38, %v4059_v62  ;;  %v3383_v62 = vld [vmem:[#allocation4 + $0x100] sm:$0xff]  ;;  %v3386_v38 = vld [vmem:[#allocation4 + $0x118] sm:$0xff] }
 0x5a5   : > { %v3480_v27 = vmul.f32 %v3407_v28, %v3384_v12 }
 0x5a6   : > { %4815 = vst.msk [vmem:[#allocation2 + $0x1f8] sm:$0xff] %vm330_vm0, %v10238_v4 }
 0x5a7   : > { %v3738_v25 = vadd.f32 %v9954_v16, %v3480_v27  ;;  %4181 = vperm.xlu1 %6540, %v10200_v63   ;;  %v3389_v27 = vld [vmem:[#allocation4 + $0x130] sm:$0xff] }
 0x5a8   : > { %v3412_v44 = vpop.permute.xlu1 %3411 }
 0x5a9   : > { %3754 = vst.msk [vmem:[#allocation4 + $0x108] sm:$0xff] %vm459_vm1, %v3738_v25  ;;  %v3481_v10 = vmul.f32 %v3412_v44, %v3385_v11 }
 0x5ab   : > { %v3739_v12 = vadd.f32 %v9991_v40, %v3481_v10  ;;  %v3402_v28 = vpop.permute.xlu0 %3401  ;;  %4191 = vperm.xlu1 %6540, %v10220_v23   ;;  %v3388_v10 = vld [vmem:[#allocation4 + $0x128] sm:$0xff] }
 0x5ac   : > { %v3422_v49 = vpop.permute.xlu1 %3421  ;;  %v3479_v54 = vmul.f32 %v3402_v28, %v3383_v62  ;;  %v3393_v28 = vld [vmem:[#allocation4 + $0x150] sm:$0xff] }
 0x5ad   : > { %3755 = vst.msk [vmem:[#allocation4 + $0x110] sm:$0xff] %vm459_vm1, %v3739_v12  ;;  %v3483_v19 = vmul.f32 %v3422_v49, %v3387_v43  ;;  %v3391_v43 = vld [vmem:[#allocation4 + $0x140] sm:$0xff] }
 0x5ae   : > { %v3737_v16 = vadd.f32 %v9948_v61, %v3479_v54 }
 0x5af   : > { %v3741_v44 = vadd.f32 %v10000_v33, %v3483_v19  ;;  %v3417_v11 = vpop.permute.xlu0 %3416  ;;  %4201 = vperm.xlu1 %6540, %v10238_v4  }
 0x5b0   : > { %3753 = vst.msk [vmem:[#allocation4 + $0x100] sm:$0xff] %vm459_vm1, %v3737_v16  ;;  %v3432_v25 = vpop.permute.xlu1 %3431  ;;  %v3482_v63 = vmul.f32 %v3417_v11, %v3386_v38  ;;  %v3390_v38 = vld [vmem:[#allocation4 + $0x138] sm:$0xff] }
 0x5b1   : > { %3757 = vst.msk [vmem:[#allocation4 + $0x120] sm:$0xff] %vm459_vm1, %v3741_v44  ;;  %v3485_v40 = vmul.f32 %v3432_v25, %v3389_v27  ;;  %v3392_v44 = vld [vmem:[#allocation4 + $0x148] sm:$0xff]  ;;  %v3395_v25 = vld [vmem:[#allocation4 + $0x160] sm:$0xff] }
 0x5b2   : > { %v3740_v49 = vadd.f32 %v9996_v59, %v3482_v63 }
 0x5b3   : > { %v3743_v62 = vadd.f32 %v10004_v17, %v3485_v40  ;;  %v3427_v61 = vpop.permute.xlu0 %3426 }
 0x5b4   : > { %3756 = vst.msk [vmem:[#allocation4 + $0x118] sm:$0xff] %vm459_vm1, %v3740_v49  ;;  %v3442_v33 = vpop.permute.xlu1 %3441  ;;  %v3484_v54 = vmul.f32 %v3427_v61, %v3388_v10  ;;  %v3397_v61 = vld [vmem:[#allocation4 + $0x170] sm:$0xff] }
 0x5b5   : > { %3759 = vst.msk [vmem:[#allocation4 + $0x130] sm:$0xff] %vm459_vm1, %v3743_v62  ;;  %v3487_v19 = vmul.f32 %v3442_v33, %v3391_v43  ;;  %v3394_v43 = vld [vmem:[#allocation4 + $0x158] sm:$0xff] }
 0x5b6   : > { %v3742_v12 = vadd.f32 %v10002_v1, %v3484_v54 }
 0x5b7   : > { %v3745_v16 = vadd.f32 %v10009_v21, %v3487_v19  ;;  %v3437_v27 = vpop.permute.xlu0 %3436 }
 0x5b8   : > { %3758 = vst.msk [vmem:[#allocation4 + $0x128] sm:$0xff] %vm459_vm1, %v3742_v12  ;;  %v3452_v59 = vpop.permute.xlu1 %3451  ;;  %v3486_v63 = vmul.f32 %v3437_v27, %v3390_v38  ;;  %v3396_v38 = vld [vmem:[#allocation4 + $0x168] sm:$0xff] }
 0x5b9   : > { %3761 = vst.msk [vmem:[#allocation4 + $0x140] sm:$0xff] %vm459_vm1, %v3745_v16  ;;  %v3489_v17 = vmul.f32 %v3452_v59, %v3393_v28 }
 0x5ba   : > { %v3744_v11 = vadd.f32 %v10006_v15, %v3486_v63 }
 0x5bb   : > { %v3747_v40 = vadd.f32 %v10016_v5, %v3489_v17  ;;  %v3447_v10 = vpop.permute.xlu0 %3446 }
 0x5bc   : > { %3760 = vst.msk [vmem:[#allocation4 + $0x138] sm:$0xff] %vm459_vm1, %v3744_v11  ;;  %v3462_v1 = vpop.permute.xlu1 %3461  ;;  %v3488_v49 = vmul.f32 %v3447_v10, %v3392_v44 }
 0x5bd   : > { %3763 = vst.msk [vmem:[#allocation4 + $0x150] sm:$0xff] %vm459_vm1, %v3747_v40  ;;  %v3491_v21 = vmul.f32 %v3462_v1, %v3395_v25 }
 0x5be   : > { %v3746_v62 = vadd.f32 %v10012_v57, %v3488_v49 }
 0x5bf   : > { %v3749_v33 = vadd.f32 %v10024_v50, %v3491_v21  ;;  %v3457_v54 = vpop.permute.xlu0 %3456  ;;  %v3398_v50 = vld [vmem:[#allocation4 + $0x178] sm:$0xff] }
 0x5c0   : > { %3762 = vst.msk [vmem:[#allocation4 + $0x148] sm:$0xff] %vm459_vm1, %v3746_v62  ;;  %v3472_v15 = vpop.permute.xlu1 %3471  ;;  %v3490_v19 = vmul.f32 %v3457_v54, %v3394_v43 }
 0x5c1   : > { %3765 = vst.msk [vmem:[#allocation4 + $0x160] sm:$0xff] %vm459_vm1, %v3749_v33  ;;  %v3493_v5 = vmul.f32 %v3472_v15, %v3397_v61 }
 0x5c2   : > { %v3748_v12 = vadd.f32 %v10020_v7, %v3490_v19 }
 0x5c3   : > { %v3751_v28 = vadd.f32 %v10032_v18, %v3493_v5  ;;  %v3467_v16 = vpop.permute.xlu0 %3466 }
 0x5c4   : > { %3764 = vst.msk [vmem:[#allocation4 + $0x158] sm:$0xff] %vm459_vm1, %v3748_v12  ;;  %v3492_v57 = vmul.f32 %v3467_v16, %v3396_v38 }
 0x5c5   : > { %3767 = vst.msk [vmem:[#allocation4 + $0x170] sm:$0xff] %vm459_vm1, %v3751_v28 }
 0x5c6   : > { %v3750_v27 = vadd.f32 %v10028_v2, %v3492_v57 }
 0x5c7   : > { %v3477_v59 = vpop.permute.xlu0 %3476 }
 0x5c8   : > { %3766 = vst.msk [vmem:[#allocation4 + $0x168] sm:$0xff] %vm459_vm1, %v3750_v27  ;;  %v3494_v63 = vmul.f32 %v3477_v59, %v3398_v50 }
 0x5ca   : > { %v3752_v17 = vadd.f32 %v10036_v45, %v3494_v63 }
 0x5cc   : > { %3768 = vst.msk [vmem:[#allocation4 + $0x178] sm:$0xff] %vm459_vm1, %v3752_v17 }
 0x601   : > { %v4127_v7 = vpop.permute.xlu1 %4126 }
 0x602   : > { %v4204_v18 = vsub.f32 %v9839_v13, %v4127_v7  ;;  %v4205_v44 = vsub.f32 %v9842_v47, %v4127_v7 }
 0x604   : > { %v4236_v11 = vmul.f32 1.442695, %v4204_v18  ;;  %v4238_v25 = vmul.f32 1.442695, %v4205_v44 }
 0x605   : > { %v4137_v40 = vpop.permute.xlu1 %4136 }
 0x606   : > { %6894 = vpow2.f32 %v4236_v11  ;;  %v4208_v10 = vsub.f32 %v9851_v39, %v4137_v40  ;;  %v4209_v2 = vsub.f32 %v9854_v20, %v4137_v40 }
 0x607   : > { %v4132_v1 = vpop.permute.xlu0 %4131  ;;  %6896 = vpow2.f32 %v4238_v25 }
 0x608   : > { %v4206_v49 = vsub.f32 %v9857_v31, %v4132_v1  ;;  %v4207_v45 = vsub.f32 %v9866_v42, %v4132_v1  ;;  %v4244_v21 = vmul.f32 1.442695, %v4208_v10  ;;  %v4246_v43 = vmul.f32 1.442695, %v4209_v2 }
 0x60a   : > { %v4240_v62 = vmul.f32 1.442695, %v4206_v49  ;;  %v4242_v13 = vmul.f32 1.442695, %v4207_v45  ;;  %6898 = vpow2.f32 %v4244_v21  ;;  %v4142_v47 = vpop.permute.xlu1 %4141 }
 0x60b   : > { %6900 = vpow2.f32 %v4246_v43  ;;  %v4210_v61 = vsub.f32 %v9869_v22, %v4142_v47  ;;  %v4211_v39 = vsub.f32 %v9878_v53, %v4142_v47 }
 0x60c   : > { %6902 = vpow2.f32 %v4240_v62 }
 0x60d   : > { %6904 = vpow2.f32 %v4242_v13  ;;  %v4248_v20 = vmul.f32 1.442695, %v4210_v61  ;;  %v4250_v33 = vmul.f32 1.442695, %v4211_v39 }
 0x60e   : > { %v4147_v54 = vpop.permute.xlu1 %4146 }
 0x60f   : > { %6906 = vpow2.f32 %v4248_v20  ;;  %v4212_v31 = vsub.f32 %v9881_v8, %v4147_v54  ;;  %v4213_v42 = vsub.f32 %v9884_v52, %v4147_v54  ;;  %v11531_v54 = vld [vmem:[#allocation105_spill] sm:$0xff] }
 0x610   : > { %v6895_v15 = vpop.eup %6894  ;;  %6908 = vpow2.f32 %v4250_v33  ;;  %v11530_v33 = vld [vmem:[#allocation112_spill] sm:$0xff] }
 0x611   : > { %v6897_v19 = vpop.eup %6896  ;;  %v4252_v5 = vmul.f32 1.442695, %v4212_v31  ;;  %v4254_v38 = vmul.f32 1.442695, %v4213_v42 }
 0x612   : > { %v4333_v12 = vadd.f32 %v6897_v19, %v6895_v15  ;;  %v4152_v28 = vpop.permute.xlu1 %4151 }
 0x613   : > { %6910 = vpow2.f32 %v4252_v5  ;;  %v4214_v22 = vsub.f32 %v9895_v58, %v4152_v28  ;;  %v4215_v53 = vsub.f32 %v9898_v36, %v4152_v28 }
 0x614   : > { %v6899_v16 = vpop.eup %6898  ;;  %4334 = vadd.xlane.f32.xlu0 %v4333_v12  ;;  %6912 = vpow2.f32 %v4254_v38 }
 0x615   : > { %v6901_v57 = vpop.eup %6900  ;;  %v4256_v27 = vmul.f32 1.442695, %v4214_v22  ;;  %v4258_v8 = vmul.f32 1.442695, %v4215_v53 }
 0x616   : > { %v6903_v50 = vpop.eup %6902  ;;  %v4339_v59 = vadd.f32 %v6901_v57, %v6899_v16  ;;  %v4157_v63 = vpop.permute.xlu1 %4156 }
 0x617   : > { %v6905_v52 = vpop.eup %6904  ;;  %v4526_v17 = vpack.c.bf16 %v6903_v50, %v6895_v15  ;;  %6914 = vpow2.f32 %v4256_v27  ;;  %v4216_v7 = vsub.f32 %v9901_v3, %v4157_v63  ;;  %v4217_v18 = vsub.f32 %v9904_v37, %v4157_v63  ;;  %v11529_v3 = vld [vmem:[#allocation99_spill] sm:$0xff] }
 0x618   : > { %4340 = vadd.xlane.f32.xlu0 %v4339_v59  ;;  %v4527_v44 = vpack.c.bf16 %v6905_v52, %v6897_v19  ;;  %6916 = vpow2.f32 %v4258_v8  ;;  %v4336_v36 = vadd.f32 %v6905_v52, %v6903_v50 }
 0x619   : > { %v4177_v58 = vpop.permute.xlu0 %4176  ;;  %v6907_v11 = vpop.eup %6906  ;;  %v4260_v25 = vmul.f32 1.442695, %v4216_v7  ;;  %v4262_v40 = vmul.f32 1.442695, %v4217_v18 }
 0x61a   : > { %4703 = vmatprep.mubr.bf16.mxu1 %v4527_v44  ;;  %v6909_v10 = vpop.eup %6908  ;;  %4337 = vadd.xlane.f32.xlu1 %v4336_v36  ;;  %v4162_v2 = vpop.permute.xlu1 %4161  ;;  %v4224_v62 = vsub.f32 %v9941_v41, %v4177_v58  ;;  %v4225_v61 = vsub.f32 %v9944_v46, %v4177_v58  ;;  %v4528_v42 = vpack.c.bf16 %v6907_v11, %v6899_v16 }
 0x61b   : > { %4704 = vmatmul.mubr.bf16.vlgmr.msra.gmra.mrb[32].mxu1 %v4526_v17  ;;  %6918 = vpow2.f32 %v4260_v25  ;;  %v4218_v1 = vsub.f32 %v9915_v34, %v4162_v2  ;;  %v4219_v49 = vsub.f32 %v11529_v3, %v4162_v2  ;;  %v4342_v45 = vadd.f32 %v6909_v10, %v6907_v11 }
 0x61c   : > { %6920 = vpow2.f32 %v4262_v40  ;;  %v4529_v21 = vpack.c.bf16 %v6909_v10, %v6901_v57  ;;  %v4276_v5 = vmul.f32 1.442695, %v4224_v62  ;;  %v4278_v28 = vmul.f32 1.442695, %v4225_v61 }
 0x61d   : > { %v6911_v43 = vpop.eup %6910  ;;  %v4264_v13 = vmul.f32 1.442695, %v4218_v1  ;;  %v4266_v39 = vmul.f32 1.442695, %v4219_v49  ;;  %4343 = vadd.xlane.f32.xlu0 %v4342_v45 }
 0x61e   : > { %v4187_v37 = vpop.permute.xlu0 %4186  ;;  %v6913_v47 = vpop.eup %6912  ;;  %4711 = vmatprep.mubr.bf16.mxu1 %v4529_v21 }
 0x61f   : > { %v4167_v20 = vpop.permute.xlu1 %4166  ;;  %6922 = vpow2.f32 %v4264_v13  ;;  %v4345_v31 = vadd.f32 %v6913_v47, %v6911_v43  ;;  %v4228_v41 = vsub.f32 %v9963_v51, %v4187_v37  ;;  %v4229_v46 = vsub.f32 %v9966_v56, %v4187_v37 }
 0x620   : > { %v4220_v34 = vsub.f32 %v11530_v33, %v4167_v20  ;;  %6924 = vpow2.f32 %v4266_v39  ;;  %v4221_v15 = vsub.f32 %v11531_v54, %v4167_v20 }
 0x621   : > { %v6915_v19 = vpop.eup %6914  ;;  %4346 = vadd.xlane.f32.xlu1 %v4345_v31  ;;  %v4284_v51 = vmul.f32 1.442695, %v4228_v41  ;;  %v4286_v17 = vmul.f32 1.442695, %v4229_v46 }
 0x622   : > { %v4268_v38 = vmul.f32 1.442695, %v4220_v34  ;;  %v6917_v12 = vpop.eup %6916  ;;  %v4270_v22 = vmul.f32 1.442695, %v4221_v15  ;;  %v4197_v53 = vpop.permute.xlu0 %4196  ;;  %v4530_v36 = vpack.c.bf16 %v6915_v19, %v6911_v43 }
 0x623   : > { %4712 = vmatmul.mubr.bf16.gmra.mrb[36].mxu1 %v4528_v42  ;;  %v4172_v57 = vpop.permute.xlu1 %4171  ;;  %v4348_v27 = vadd.f32 %v6917_v12, %v6915_v19  ;;  %v4531_v8 = vpack.c.bf16 %v6917_v12, %v6913_v47  ;;  %v4232_v52 = vsub.f32 %v9977_v9, %v4197_v53  ;;  %v4233_v7 = vsub.f32 %v9982_v60, %v4197_v53 }
 0x624   : > { %6926 = vpow2.f32 %v4268_v38  ;;  %v4222_v50 = vsub.f32 %v9935_v29, %v4172_v57  ;;  %v4223_v16 = vsub.f32 %v9938_v14, %v4172_v57 }
 0x625   : > { %6928 = vpow2.f32 %v4270_v22  ;;  %v6919_v59 = vpop.eup %6918  ;;  %4349 = vadd.xlane.f32.xlu0 %v4348_v27  ;;  %4719 = vmatprep.mubr.bf16.mxu1 %v4531_v8  ;;  %v4292_v9 = vmul.f32 1.442695, %v4232_v52  ;;  %v4294_v60 = vmul.f32 1.442695, %v4233_v7 }
 0x626   : > { %6930 = vpow2.f32 %v4276_v5  ;;  %v4272_v63 = vmul.f32 1.442695, %v4222_v50  ;;  %v6921_v56 = vpop.eup %6920  ;;  %v4274_v18 = vmul.f32 1.442695, %v4223_v16 }
 0x627   : > { %6932 = vpow2.f32 %v4278_v28  ;;  %v4182_v29 = vpop.permute.xlu1 %4181  ;;  %v4351_v58 = vadd.f32 %v6921_v56, %v6919_v59 }
 0x628   : > { %6934 = vpow2.f32 %v4272_v63  ;;  %v4226_v14 = vsub.f32 %v9957_v24, %v4182_v29  ;;  %v4227_v44 = vsub.f32 %v9960_v30, %v4182_v29  ;;  %v11536_v29 = vld [vmem:[#allocation40_spill] sm:$0xff] }
 0x629   : > { %6936 = vpow2.f32 %v4274_v18  ;;  %v6923_v11 = vpop.eup %6922  ;;  %4352 = vadd.xlane.f32.xlu1 %v4351_v58  ;;  %v11535_v18 = vld [vmem:[#allocation113_spill] sm:$0xff]  ;;  %v11538_v58 = vld [vmem:[#allocation54_spill] sm:$0xff] }
 0x62a   : > { %6938 = vpow2.f32 %v4284_v51  ;;  %v4280_v25 = vmul.f32 1.442695, %v4226_v14  ;;  %v4282_v40 = vmul.f32 1.442695, %v4227_v44  ;;  %v6925_v10 = vpop.eup %6924  ;;  %v4532_v61 = vpack.c.bf16 %v6923_v11, %v6919_v59 }
 0x62b   : > { %6940 = vpow2.f32 %v4286_v17  ;;  %4720 = vmatmul.mubr.bf16.gmra.mrb[40].mxu1 %v4530_v36  ;;  %v4192_v2 = vpop.permute.xlu1 %4191  ;;  %v4354_v30 = vadd.f32 %v6925_v10, %v6923_v11  ;;  %v4533_v3 = vpack.c.bf16 %v6925_v10, %v6921_v56  ;;  %v11532_v59 = vsub.f32 %v10058_v0, %v10061_v35  ;;  %v11533_v56 = vld [vmem:[#allocation51_spill] sm:$0xff] }
 0x62c   : > { %6942 = vpow2.f32 %v4280_v25  ;;  %v4230_v1 = vsub.f32 %v9969_v32, %v4192_v2  ;;  %v4231_v24 = vsub.f32 %v9974_v55, %v4192_v2  ;;  %v11534_v17 = vsub.f32 %v10063_v48, %v11533_v56  ;;  %v11539_v36 = vld [vmem:[#allocation31_spill] sm:$0xff]  ;;  %v11541_v25 = vld [vmem:[#allocation45_spill] sm:$0xff]  ;;  %v11544_v48 = vld [vmem:[#allocation46_spill] sm:$0xff] }
 0x62d   : > { %6944 = vpow2.f32 %v4282_v40  ;;  %4355 = vadd.xlane.f32.xlu0 %v4354_v30  ;;  %4727 = vmatprep.mubr.bf16.mxu1 %v4533_v3  ;;  %v4092_v51 = vmul.f32 1.442695, %v11532_v59  ;;  %v11537_v14 = vsub.f32 %v11535_v18, %v11536_v29  ;;  %v11540_v11 = vsub.f32 %v11538_v58, %v11539_v36  ;;  %v11542_v40 = vld [vmem:[#allocation56_spill] sm:$0xff]  ;;  %v11571_v56 = vld [vmem:[#allocation95_spill] sm:$0xff]  ;;  %v4819_v18 = vld [vmem:[#allocation3] sm:$0xff] }
 0x62e   : > { %v6927_v49 = vpop.eup %6926  ;;  %6946 = vpow2.f32 %v4292_v9  ;;  %v4288_v37 = vmul.f32 1.442695, %v4230_v1  ;;  %v4290_v45 = vmul.f32 1.442695, %v4231_v24  ;;  %v4096_v7 = vmul.f32 1.442695, %v11534_v17 }
 0x62f   : > { %v6929_v21 = vpop.eup %6928  ;;  %6948 = vpow2.f32 %v4294_v60  ;;  %v4202_v43 = vpop.permute.xlu1 %4201  ;;  %v4094_v44 = vmul.f32 1.442695, %v11537_v14  ;;  %v4098_v0 = vmul.f32 1.442695, %v11540_v11  ;;  %v11543_v10 = vsub.f32 %v11541_v25, %v11542_v40  ;;  %v11545_v2 = vld [vmem:[#allocation84_spill] sm:$0xff]  ;;  %v11573_v29 = vld [vmem:[#allocation97_spill] sm:$0xff] }
 0x630   : > { %v6931_v62 = vpop.eup %6930  ;;  %6950 = vpow2.f32 %v4288_v37  ;;  %v4234_v13 = vsub.f32 %v9987_v6, %v4202_v43  ;;  %v4235_v32 = vsub.f32 %v9994_v26, %v4202_v43  ;;  %v4357_v47 = vadd.f32 %v6929_v21, %v6927_v49  ;;  %v11547_v3 = vld [vmem:[#allocation52_spill] sm:$0xff]  ;;  %v11551_v43 = vld [vmem:[#allocation91_spill] sm:$0xff]  ;;  %v4820_v58 = vld [vmem:[#allocation3 + $0x8] sm:$0xff] }
 0x631   : > { %v6933_v55 = vpop.eup %6932  ;;  %6952 = vpow2.f32 %v4290_v45  ;;  %v4100_v60 = vmul.f32 1.442695, %v11543_v10  ;;  %v11546_v1 = vsub.f32 %v11544_v48, %v11545_v2  ;;  %v11574_v14 = vsub.f32 %v11573_v29, %v10238_v4  ;;  %v4822_v25 = vld [vmem:[#allocation3 + $0x18] sm:$0xff]  ;;  %v4823_v10 = vld [vmem:[#allocation3 + $0x20] sm:$0xff]  ;;  %v4824_v2 = vld [vmem:[#allocation3 + $0x28] sm:$0xff] }
 0x632   : > { %v6935_v39 = vpop.eup %6934  ;;  %v4296_v20 = vmul.f32 1.442695, %v4234_v13  ;;  %v4298_v33 = vmul.f32 1.442695, %v4235_v32  ;;  %4358 = vadd.xlane.f32.xlu1 %v4357_v47  ;;  %v4363_v19 = vadd.f32 %v6933_v55, %v6931_v62  ;;  %v4835_v11 = vmax.f32 %v4819_v18, 1e-09 }
 0x633   : > { %v6937_v34 = vpop.eup %6936  ;;  %4728 = vmatmul.mubr.bf16.gmra.mrb[44].mxu1 %v4532_v61  ;;  %v4534_v28 = vpack.c.bf16 %v6935_v39, %v6927_v49  ;;  %v4102_v24 = vmul.f32 1.442695, %v11546_v1  ;;  %v11548_v49 = vld [vmem:[#allocation86_spill] sm:$0xff]  ;;  %v11554_v61 = vld [vmem:[#allocation88_spill] sm:$0xff]  ;;  %v4997_v29 = vld [vmem:[#allocation3 + $0x90] sm:$0xff] }
 0x634   : > { %v6939_v54 = vpop.eup %6938  ;;  %6954 = vpow2.f32 %v4296_v20  ;;  %v4360_v15 = vadd.f32 %v6937_v34, %v6935_v39  ;;  %v4535_v31 = vpack.c.bf16 %v6937_v34, %v6929_v21  ;;  %v11549_v37 = vsub.f32 %v11547_v3, %v11548_v49  ;;  %v11550_v21 = vld [vmem:[#allocation36_spill] sm:$0xff]  ;;  %v11557_v34 = vld [vmem:[#allocation37_spill] sm:$0xff]  ;;  %v4825_v3 = vld [vmem:[#allocation3 + $0x30] sm:$0xff] }
 0x635   : > { %v6941_v42 = vpop.eup %6940  ;;  %6956 = vpow2.f32 %v4298_v33  ;;  %v11556_v33 = vld [vmem:[#allocation85_spill] sm:$0xff]  ;;  %v4840_v49 = vmax.f32 %v4824_v2, 1e-09 }
 0x636   : > { %v6943_v6 = vpop.eup %6942  ;;  %4361 = vadd.xlane.f32.xlu0 %v4360_v15  ;;  %4735 = vmatprep.mubr.bf16.mxu1 %v4535_v31  ;;  %v4369_v12 = vadd.f32 %v6941_v42, %v6939_v54  ;;  %6958 = vpow2.f32 %v4092_v51  ;;  %v4104_v45 = vmul.f32 1.442695, %v11549_v37 }
 0x637   : > { %v6945_v26 = vpop.eup %6944  ;;  %4364 = vadd.xlane.f32.xlu1 %v4363_v19  ;;  %v4536_v52 = vpack.c.bf16 %v6943_v6, %v6931_v62  ;;  %6960 = vpow2.f32 %v4096_v7  ;;  %v11552_v62 = vsub.f32 %v11550_v21, %v11551_v43  ;;  %v11559_v19 = vld [vmem:[#allocation87_spill] sm:$0xff]  ;;  %v4841_v43 = vmax.f32 %v4825_v3, 1e-09 }
 0x638   : > { %v6947_v5 = vpop.eup %6946  ;;  %v4366_v41 = vadd.f32 %v6945_v26, %v6943_v6  ;;  %v4537_v22 = vpack.c.bf16 %v6945_v26, %v6933_v55  ;;  %6962 = vpow2.f32 %v4094_v44  ;;  %v11553_v55 = vld [vmem:[#allocation53_spill] sm:$0xff]  ;;  %v11560_v6 = vld [vmem:[#allocation55_spill] sm:$0xff] }
 0x639   : > { %v6949_v38 = vpop.eup %6948  ;;  %6964 = vpow2.f32 %v4098_v0  ;;  %v4106_v13 = vmul.f32 1.442695, %v11552_v62  ;;  %v11555_v39 = vsub.f32 %v11553_v55, %v11554_v61  ;;  %v11561_v26 = vsub.f32 %v11559_v19, %v11560_v6  ;;  %v4827_v62 = vld [vmem:[#allocation3 + $0x40] sm:$0xff]  ;;  %v4828_v55 = vld [vmem:[#allocation3 + $0x48] sm:$0xff] }
 0x63a   : > { %v6951_v46 = vpop.eup %6950  ;;  %4367 = vadd.xlane.f32.xlu0 %v4366_v41  ;;  %v4375_v50 = vadd.f32 %v6949_v38, %v6947_v5  ;;  %6966 = vpow2.f32 %v4100_v60  ;;  %v11562_v41 = vld [vmem:[#allocation93_spill] sm:$0xff]  ;;  %v4836_v0 = vmax.f32 %v4820_v58, 1e-09  ;;  %v4838_v60 = vmax.f32 %v4822_v25, 1e-09 }
 0x63b   : > { %v6953_v53 = vpop.eup %6952  ;;  %4370 = vadd.xlane.f32.xlu1 %v4369_v12  ;;  %4736 = vmatmul.mubr.bf16.gmra.mrb[48].mxu1 %v4534_v28  ;;  %v4538_v35 = vpack.c.bf16 %v6951_v46, %v6939_v54  ;;  %6968 = vpow2.f32 %v4102_v24  ;;  %v4108_v20 = vmul.f32 1.442695, %v11555_v39  ;;  %v11558_v54 = vsub.f32 %v11556_v33, %v11557_v34  ;;  %v4831_v6 = vld [vmem:[#allocation3 + $0x60] sm:$0xff] }
 0x63c   : > { %4743 = vmatprep.mubr.bf16.mxu1 %v4537_v22  ;;  %v4372_v57 = vadd.f32 %v6953_v53, %v6951_v46  ;;  %v4539_v63 = vpack.c.bf16 %v6953_v53, %v6941_v42  ;;  %6970 = vpow2.f32 %v4104_v45  ;;  %v11565_v53 = vld [vmem:[#allocation96_spill] sm:$0xff]  ;;  %v4839_v24 = vmax.f32 %v4823_v10, 1e-09 }
 0x63d   : > { %6972 = vpow2.f32 %v4106_v13  ;;  %v4110_v15 = vmul.f32 1.442695, %v11558_v54  ;;  %v4826_v45 = vld [vmem:[#allocation3 + $0x38] sm:$0xff]  ;;  %v4843_v39 = vmax.f32 %v4827_v62, 1e-09 }
 0x63e   : > { %v6955_v16 = vpop.eup %6954  ;;  %4373 = vadd.xlane.f32.xlu0 %v4372_v57  ;;  %6974 = vpow2.f32 %v4108_v20  ;;  %v11566_v57 = vld [vmem:[#allocation92_spill] sm:$0xff]  ;;  %v4842_v13 = vmax.f32 %v4826_v45, 1e-09  ;;  %v4829_v20 = vld [vmem:[#allocation3 + $0x50] sm:$0xff]  ;;  %v4844_v33 = vmax.f32 %v4828_v55, 1e-09 }
 0x63f   : > { %v6957_v27 = vpop.eup %6956  ;;  %4376 = vadd.xlane.f32.xlu1 %v4375_v50  ;;  %v4540_v32 = vpack.c.bf16 %v6955_v16, %v6947_v5  ;;  %v4112_v5 = vmul.f32 1.442695, %v11561_v26  ;;  %6976 = vpow2.f32 %v4110_v15  ;;  %v11567_v50 = vsub.f32 %v11565_v53, %v11566_v57  ;;  %v4830_v54 = vld [vmem:[#allocation3 + $0x58] sm:$0xff]  ;;  %v5004_v55 = vld [vmem:[#allocation3 + $0xc8] sm:$0xff] }
 0x640   : > { %v4378_v8 = vadd.f32 %v6957_v27, %v6955_v16  ;;  %v4541_v9 = vpack.c.bf16 %v6957_v27, %v6949_v38  ;;  %v10330_v30 = vpop.eup %6958  ;;  %v11563_v38 = vld [vmem:[#allocation90_spill] sm:$0xff]  ;;  %v4845_v19 = vmax.f32 %v4829_v20, 1e-09  ;;  %v4846_v26 = vmax.f32 %v4830_v54, 1e-09  ;;  %v5006_v54 = vld [vmem:[#allocation3 + $0xd8] sm:$0xff] }
 0x641   : > { %v10339_v47 = vpop.eup %6960  ;;  %v11564_v12 = vsub.f32 %v11562_v41, %v11563_v38  ;;  %6978 = vpow2.f32 %v4112_v5  ;;  %v4116_v16 = vmul.f32 1.442695, %v11567_v50  ;;  %v11568_v27 = vld [vmem:[#allocation98_spill] sm:$0xff]  ;;  %v4834_v50 = vld [vmem:[#allocation3 + $0x78] sm:$0xff]  ;;  %v5020_v20 = vmax.f32 %v5004_v55, 1e-09 }
 0x642   : > { %4379 = vadd.xlane.f32.xlu0 %v4378_v8  ;;  %v10348_v31 = vpop.eup %6962  ;;  %v11569_v8 = vsub.f32 %v11568_v27, %v10220_v23  ;;  %v4122_v23 = vmul.f32 1.442695, %v11574_v14  ;;  %v4832_v41 = vld [vmem:[#allocation3 + $0x68] sm:$0xff] }
 0x643   : > { %4744 = vmatmul.mubr.bf16.gmra.mrb[52].mxu1 %v4536_v52  ;;  %v10350_v42 = vpop.eup %6964  ;;  %v4114_v28 = vmul.f32 1.442695, %v11564_v12  ;;  %v4847_v12 = vmax.f32 %v4831_v6, 1e-09  ;;  %v4848_v53 = vmax.f32 %v4832_v41, 1e-09 }
 0x644   : > { %4751 = vmatprep.mubr.bf16.mxu1 %v4539_v63  ;;  %v10360_v46 = vpop.eup %6966  ;;  %v4118_v59 = vmul.f32 1.442695, %v11569_v8  ;;  %v11570_v63 = vld [vmem:[#allocation101_spill] sm:$0xff]  ;;  %v4850_v8 = vmax.f32 %v4834_v50, 1e-09  ;;  %v5008_v41 = vld [vmem:[#allocation3 + $0xe8] sm:$0xff] }
 0x645   : > { %v10362_v22 = vpop.eup %6968  ;;  %6980 = vpow2.f32 %v4114_v28  ;;  %v11572_v17 = vsub.f32 %v11570_v63, %v11571_v56  ;;  %v4833_v28 = vld [vmem:[#allocation3 + $0x70] sm:$0xff]  ;;  %v4996_v56 = vld [vmem:[#allocation3 + $0x88] sm:$0xff]  ;;  %v5022_v6 = vmax.f32 %v5006_v54, 1e-09 }
 0x646   : > { %v10372_v51 = vpop.eup %6970  ;;  %6982 = vpow2.f32 %v4116_v16  ;;  %v4849_v27 = vmax.f32 %v4833_v28, 1e-09  ;;  %v5012_v18 = vmax.f32 %v4996_v56, 1e-09  ;;  %v5024_v28 = vmax.f32 %v5008_v41, 1e-09 }
 0x647   : > { %v10374_v52 = vpop.eup %6972  ;;  %v4120_v7 = vmul.f32 1.442695, %v11572_v17  ;;  %6984 = vpow2.f32 %v4118_v59  ;;  %v4995_v59 = vld [vmem:[#allocation3 + $0x80] sm:$0xff]  ;;  %v4306_v41 = vld [vmem:[#allocation3 + $0x1a8] sm:$0xff] }
 0x648   : > { %v10384_v44 = vpop.eup %6974  ;;  %v5171_v56 = vld [vmem:[#allocation3 + $0x100] sm:$0xff] }
 0x649   : > { %v10386_v36 = vpop.eup %6976  ;;  %6986 = vpow2.f32 %v4120_v7  ;;  %v5011_v7 = vmax.f32 %v4995_v59, 1e-09 }
 0x64a   : > { %6988 = vpow2.f32 %v4122_v23  ;;  %v4998_v23 = vld [vmem:[#allocation3 + $0x98] sm:$0xff] }
 0x64b   : > { %4752 = vmatmul.mubr.bf16.gmra.mrb[56].mxu1 %v4538_v35  ;;  %v4821_v35 = vld [vmem:[#allocation3 + $0x10] sm:$0xff]  ;;  %6990 = vrcp.f32 %v4835_v11  ;;  %v5013_v11 = vmax.f32 %v4997_v29, 1e-09  ;;  %v5172_v29 = vld [vmem:[#allocation3 + $0x108] sm:$0xff] }
 0x64c   : > { %4759 = vmatprep.mubr.bf16.mxu1 %v4541_v9  ;;  %v10390_v9 = vpop.eup %6978  ;;  %v4837_v4 = vmax.f32 %v4821_v35, 1e-09  ;;  %6992 = vrcp.f32 %v4836_v0  ;;  %v5014_v0 = vmax.f32 %v4998_v23, 1e-09  ;;  %v4999_v35 = vld [vmem:[#allocation3 + $0xa0] sm:$0xff] }
 0x64e   : > { %6994 = vrcp.f32 %v4837_v4  ;;  %v5000_v4 = vld [vmem:[#allocation3 + $0xa8] sm:$0xff] }
 0x64f   : > { %v10392_v40 = vpop.eup %6980  ;;  %6996 = vrcp.f32 %v4838_v60  ;;  %v5015_v60 = vmax.f32 %v4999_v35, 1e-09  ;;  %v5016_v2 = vmax.f32 %v5000_v4, 1e-09  ;;  %v5174_v35 = vld [vmem:[#allocation3 + $0x118] sm:$0xff] }
 0x650   : > { %4432 = vperm.xlu1 %6540, %v10330_v30   ;;  %v10396_v48 = vpop.eup %6982  ;;  %6998 = vrcp.f32 %v4839_v24  ;;  %v5001_v24 = vld [vmem:[#allocation3 + $0xb0] sm:$0xff] }
 0x651   : > { %v10398_v1 = vpop.eup %6984  ;;  %7000 = vrcp.f32 %v4840_v49  ;;  %v5002_v49 = vld [vmem:[#allocation3 + $0xb8] sm:$0xff] }
 0x652   : > { %7002 = vrcp.f32 %v4841_v43  ;;  %v5017_v43 = vmax.f32 %v5001_v24, 1e-09  ;;  %v5018_v62 = vmax.f32 %v5002_v49, 1e-09 }
 0x653   : > { %4760 = vmatmul.mubr.bf16.gmra.mrb[60].mxu1 %v4540_v32  ;;  %v10402_v37 = vpop.eup %6986  ;;  %7004 = vrcp.f32 %v4842_v13  ;;  %v5003_v13 = vld [vmem:[#allocation3 + $0xc0] sm:$0xff] }
 0x654   : > { %4442 = vperm.xlu1 %6540, %v10339_v47   ;;  %v10404_v21 = vpop.eup %6988  ;;  %7006 = vrcp.f32 %v4843_v39  ;;  %v5019_v39 = vmax.f32 %v5003_v13, 1e-09 }
 0x655   : > { %v6991_v32 = vpop.eup %6990  ;;  %7008 = vrcp.f32 %v4844_v33  ;;  %v5005_v33 = vld [vmem:[#allocation3 + $0xd0] sm:$0xff] }
 0x656   : > { %v6993_v61 = vpop.eup %6992  ;;  %7010 = vrcp.f32 %v4845_v19  ;;  %v5021_v19 = vmax.f32 %v5005_v33, 1e-09 }
 0x657   : > { %7012 = vrcp.f32 %v4846_v26  ;;  %v5007_v26 = vld [vmem:[#allocation3 + $0xe0] sm:$0xff] }
 0x658   : > { %4447 = vperm.xlu1 %6540, %v10350_v42   ;;  %4437 = vperm.xlu0 %6541, %v10348_v31   ;;  %v6995_v34 = vpop.eup %6994  ;;  %7014 = vrcp.f32 %v4847_v12  ;;  %v5023_v12 = vmax.f32 %v5007_v26, 1e-09 }
 0x659   : > { %v6997_v15 = vpop.eup %6996  ;;  %7016 = vrcp.f32 %v4848_v53  ;;  %v5009_v53 = vld [vmem:[#allocation3 + $0xf0] sm:$0xff] }
 0x65a   : > { %v6999_v5 = vpop.eup %6998  ;;  %7018 = vrcp.f32 %v4849_v27 }
 0x65b   : > { %v7001_v38 = vpop.eup %7000  ;;  %7020 = vrcp.f32 %v4850_v8  ;;  %v5025_v8 = vmax.f32 %v5009_v53, 1e-09 }
 0x65c   : > { %4457 = vperm.xlu1 %6540, %v10362_v22   ;;  %4452 = vperm.xlu0 %6541, %v10360_v46   ;;  %v7003_v57 = vpop.eup %7002  ;;  %7022 = vrcp.f32 %v5011_v7  ;;  %v4303_v7 = vld [vmem:[#allocation3 + $0x190] sm:$0xff] }
 0x65d   : > { %v7005_v16 = vpop.eup %7004  ;;  %7024 = vrcp.f32 %v5012_v18 }
 0x65e   : > { %v7007_v63 = vpop.eup %7006  ;;  %7026 = vrcp.f32 %v5013_v11  ;;  %v4302_v11 = vld [vmem:[#allocation3 + $0x188] sm:$0xff] }
 0x65f   : > { %v7009_v17 = vpop.eup %7008  ;;  %7028 = vrcp.f32 %v5014_v0  ;;  %v4319_v0 = vmul.f32 %v10339_v47, %v4303_v7  ;;  %v4318_v24 = vmul.f32 %v10348_v31, %v4302_v11  ;;  %v5181_v7 = vld [vmem:[#allocation3 + $0x150] sm:$0xff] }
 0x660   : > { %4467 = vperm.xlu1 %6540, %v10374_v52   ;;  %4462 = vperm.xlu0 %6541, %v10372_v51   ;;  %v7011_v14 = vpop.eup %7010  ;;  %7030 = vrcp.f32 %v5015_v60  ;;  %v5197_v11 = vmax.f32 %v5181_v7, 1e-09 }
 0x661   : > { %v7013_v58 = vpop.eup %7012  ;;  %7032 = vrcp.f32 %v5016_v2 }
 0x662   : > { %v7015_v25 = vpop.eup %7014  ;;  %7034 = vrcp.f32 %v5017_v43  ;;  %v5175_v43 = vld [vmem:[#allocation3 + $0x120] sm:$0xff] }
 0x663   : > { %v7017_v10 = vpop.eup %7016  ;;  %7036 = vrcp.f32 %v5018_v62  ;;  %v5191_v31 = vmax.f32 %v5175_v43, 1e-09 }
 0x664   : > { %4477 = vperm.xlu1 %6540, %v10386_v36   ;;  %4472 = vperm.xlu0 %6541, %v10384_v44   ;;  %v7019_v3 = vpop.eup %7018  ;;  %7038 = vrcp.f32 %v5019_v39 }
 0x665   : > { %v7021_v45 = vpop.eup %7020  ;;  %7040 = vrcp.f32 %v5020_v20  ;;  %v4305_v20 = vld [vmem:[#allocation3 + $0x1a0] sm:$0xff] }
 0x666   : > { %7042 = vrcp.f32 %v5021_v19  ;;  %v5178_v19 = vld [vmem:[#allocation3 + $0x138] sm:$0xff]  ;;  %v4321_v26 = vmul.f32 %v10360_v46, %v4305_v20 }
 0x667   : > { %7044 = vrcp.f32 %v5022_v6 }
 0x668   : > { %4487 = vperm.xlu1 %6540, %v10392_v40   ;;  %4482 = vperm.xlu0 %6541, %v10390_v9   ;;  %7046 = vrcp.f32 %v5023_v12  ;;  %v5180_v12 = vld [vmem:[#allocation3 + $0x148] sm:$0xff] }
 0x669   : > { %7048 = vrcp.f32 %v5024_v28  ;;  %v5196_v46 = vmax.f32 %v5180_v12, 1e-09 }
 0x66a   : > { %7050 = vrcp.f32 %v5025_v8 }
 0x66c   : > { %4497 = vperm.xlu1 %6540, %v10398_v1   ;;  %4492 = vperm.xlu0 %6541, %v10396_v48  }
 0x670   : > { %4507 = vperm.xlu1 %6540, %v10404_v21   ;;  %4502 = vperm.xlu0 %6541, %v10402_v37  }
 0x674   : > { %4906 = vperm.xlu1 %6540, %v6993_v61   ;;  %4901 = vperm.xlu0 %6541, %v6991_v32   ;;  %v7023_v32 = vpop.eup %7022 }
 0x675   : > { %v7025_v61 = vpop.eup %7024 }
 0x678   : > { %4916 = vperm.xlu1 %6540, %v6997_v15   ;;  %4911 = vperm.xlu0 %6541, %v6995_v34   ;;  %v7027_v34 = vpop.eup %7026 }
 0x679   : > { %v7029_v15 = vpop.eup %7028 }
 0x67c   : > { %4926 = vperm.xlu1 %6540, %v7001_v38   ;;  %4921 = vperm.xlu0 %6541, %v6999_v5   ;;  %v7031_v5 = vpop.eup %7030 }
 0x67d   : > { %v7033_v38 = vpop.eup %7032 }
 0x67e   : > { %v7035_v50 = vpop.eup %7034 }
 0x67f   : > { %v7037_v27 = vpop.eup %7036 }
 0x680   : > { %4936 = vperm.xlu1 %6540, %v7005_v16   ;;  %4931 = vperm.xlu0 %6541, %v7003_v57   ;;  %v4301_v57 = vld [vmem:[#allocation3 + $0x180] sm:$0xff]  ;;  %v5010_v16 = vld [vmem:[#allocation3 + $0xf8] sm:$0xff]  ;;  %v7039_v18 = vpop.eup %7038 }
 0x681   : > { %v4317_v59 = vmul.f32 %v10330_v30, %v4301_v57  ;;  %v7041_v23 = vpop.eup %7040  ;;  %v5188_v30 = vmax.f32 %v5172_v29, 1e-09  ;;  %v5179_v57 = vld [vmem:[#allocation3 + $0x140] sm:$0xff] }
 0x682   : > { %v7043_v4 = vpop.eup %7042 }
 0x683   : > { %v7045_v2 = vpop.eup %7044 }
 0x684   : > { %4946 = vperm.xlu1 %6540, %v7009_v17   ;;  %4941 = vperm.xlu0 %6541, %v7007_v63   ;;  %v5026_v63 = vmax.f32 %v5010_v16, 1e-09  ;;  %v7047_v13 = vpop.eup %7046  ;;  %v4322_v16 = vmul.f32 %v10362_v22, %v4306_v41 }
 0x685   : > { %v7049_v55 = vpop.eup %7048 }
 0x686   : > { %7052 = vrcp.f32 %v5026_v63  ;;  %v5182_v63 = vld [vmem:[#allocation3 + $0x158] sm:$0xff] }
 0x687   : > { %v5198_v22 = vmax.f32 %v5182_v63, 1e-09 }
 0x688   : > { %4956 = vperm.xlu1 %6540, %v7013_v58   ;;  %4951 = vperm.xlu0 %6541, %v7011_v14   ;;  %v5187_v58 = vmax.f32 %v5171_v56, 1e-09 }
 0x68a   : > { %7054 = vrcp.f32 %v5187_v58 }
 0x68b   : > { %7056 = vrcp.f32 %v5188_v30 }
 0x68c   : > { %4966 = vperm.xlu1 %6540, %v7017_v10   ;;  %4961 = vperm.xlu0 %6541, %v7015_v25   ;;  %v5173_v10 = vld [vmem:[#allocation3 + $0x110] sm:$0xff] }
 0x68d   : > { %v5189_v47 = vmax.f32 %v5173_v10, 1e-09  ;;  %v4309_v10 = vld [vmem:[#allocation3 + $0x1c0] sm:$0xff] }
 0x690   : > { %4976 = vperm.xlu1 %6540, %v7021_v45   ;;  %4971 = vperm.xlu0 %6541, %v7019_v3   ;;  %v5190_v3 = vmax.f32 %v5174_v35, 1e-09  ;;  %v4304_v45 = vld [vmem:[#allocation3 + $0x198] sm:$0xff]  ;;  %v5183_v35 = vld [vmem:[#allocation3 + $0x160] sm:$0xff] }
 0x692   : > { %7058 = vrcp.f32 %v5190_v3  ;;  %v5186_v3 = vld [vmem:[#allocation3 + $0x178] sm:$0xff] }
 0x693   : > { %7060 = vrcp.f32 %v5189_v47  ;;  %v4325_v47 = vmul.f32 %v10384_v44, %v4309_v10 }
 0x694   : > { %5082 = vperm.xlu1 %6540, %v7025_v61   ;;  %5077 = vperm.xlu0 %6541, %v7023_v32   ;;  %v5176_v32 = vld [vmem:[#allocation3 + $0x128] sm:$0xff]  ;;  %v4320_v61 = vmul.f32 %v10350_v42, %v4304_v45  ;;  %7062 = vrcp.f32 %v5191_v31  ;;  %v5185_v45 = vld [vmem:[#allocation3 + $0x170] sm:$0xff] }
 0x695   : > { %v5192_v33 = vmax.f32 %v5176_v32, 1e-09 }
 0x697   : > { %7064 = vrcp.f32 %v5192_v33 }
 0x698   : > { %5092 = vperm.xlu1 %6540, %v7029_v15   ;;  %5087 = vperm.xlu0 %6541, %v7027_v34   ;;  %v5177_v34 = vld [vmem:[#allocation3 + $0x130] sm:$0xff]  ;;  %v7051_v15 = vpop.eup %7050 }
 0x699   : > { %v7053_v6 = vpop.eup %7052 }
 0x69a   : > { %v7055_v53 = vpop.eup %7054 }
 0x69c   : > { %5102 = vperm.xlu1 %6540, %v7033_v38   ;;  %5097 = vperm.xlu0 %6541, %v7031_v5   ;;  %v5193_v5 = vmax.f32 %v5177_v34, 1e-09  ;;  %v5194_v38 = vmax.f32 %v5178_v19, 1e-09 }
 0x69e   : > { %7066 = vrcp.f32 %v5193_v5  ;;  %v4313_v5 = vld [vmem:[#allocation3 + $0x1e0] sm:$0xff] }
 0x69f   : > { %7068 = vrcp.f32 %v5194_v38 }
 0x6a0   : > { %5112 = vperm.xlu1 %6540, %v7037_v27   ;;  %5107 = vperm.xlu0 %6541, %v7035_v50   ;;  %v7057_v50 = vpop.eup %7056  ;;  %v4307_v27 = vld [vmem:[#allocation3 + $0x1b0] sm:$0xff]  ;;  %7070 = vrcp.f32 %v5196_v46 }
 0x6a1   : > { %v4335_v17 = vpop.xlane.xlu0 %4334 }
 0x6a2   : > { %v4381_v14 = vadd.f32 %v4335_v17, %v4317_v59  ;;  %v5195_v59 = vmax.f32 %v5179_v57, 1e-09  ;;  %v7059_v17 = vpop.eup %7058 }
 0x6a3   : > { %v7061_v29 = vpop.eup %7060 }
 0x6a4   : > { %5122 = vperm.xlu1 %6540, %v7041_v23   ;;  %4397 = vst.msk [vmem:[#allocation3 + $0x180] sm:$0xff] %vm330_vm0, %v4381_v14  ;;  %5117 = vperm.xlu0 %6541, %v7039_v18   ;;  %v4323_v18 = vmul.f32 %v10372_v51, %v4307_v27  ;;  %v4308_v23 = vld [vmem:[#allocation3 + $0x1b8] sm:$0xff]  ;;  %7072 = vrcp.f32 %v5195_v59  ;;  %v7063_v30 = vpop.eup %7062 }
 0x6a5   : > { %v4341_v25 = vpop.xlane.xlu0 %4340  ;;  %v7065_v51 = vpop.eup %7064  ;;  %7074 = vrcp.f32 %v5198_v22 }
 0x6a6   : > { %v4383_v60 = vadd.f32 %v4341_v25, %v4319_v0  ;;  %v5184_v0 = vld [vmem:[#allocation3 + $0x168] sm:$0xff]  ;;  %v4324_v25 = vmul.f32 %v10374_v52, %v4308_v23  ;;  %7076 = vrcp.f32 %v5197_v11 }
 0x6a7   : > { %v4338_v49 = vpop.xlane.xlu1 %4337  ;;  %v4310_v52 = vld [vmem:[#allocation3 + $0x1c8] sm:$0xff] }
 0x6a8   : > { %5132 = vperm.xlu1 %6540, %v7045_v2   ;;  %4399 = vst.msk [vmem:[#allocation3 + $0x190] sm:$0xff] %vm330_vm0, %v4383_v60  ;;  %5127 = vperm.xlu0 %6541, %v7043_v4   ;;  %v4382_v62 = vadd.f32 %v4338_v49, %v4318_v24  ;;  %v5200_v60 = vmax.f32 %v5184_v0, 1e-09  ;;  %v5199_v24 = vmax.f32 %v5183_v35, 1e-09  ;;  %v7067_v49 = vpop.eup %7066  ;;  %v4326_v33 = vmul.f32 %v10386_v36, %v4310_v52 }
 0x6a9   : > { %v7069_v43 = vpop.eup %7068 }
 0x6aa   : > { %4398 = vst.msk [vmem:[#allocation3 + $0x188] sm:$0xff] %vm330_vm0, %v4382_v62  ;;  %v4344_v39 = vpop.xlane.xlu0 %4343  ;;  %7078 = vrcp.f32 %v5200_v60 }
 0x6ab   : > { %v4384_v54 = vadd.f32 %v4344_v39, %v4320_v61  ;;  %7080 = vrcp.f32 %v5199_v24  ;;  %v5201_v61 = vmax.f32 %v5185_v45, 1e-09  ;;  %v5347_v31 = vld [vmem:[#allocation3 + $0x180] sm:$0xff]  ;;  %v7071_v39 = vpop.eup %7070 }
 0x6ac   : > { %5142 = vperm.xlu1 %6540, %v7049_v55   ;;  %5137 = vperm.xlu0 %6541, %v7047_v13   ;;  %v5202_v13 = vmax.f32 %v5186_v3, 1e-09  ;;  %v4311_v55 = vld [vmem:[#allocation3 + $0x1d0] sm:$0xff]  ;;  %v5363_v19 = vmax.f32 %v5347_v31, 1e-09 }
 0x6ad   : > { %4400 = vst.msk [vmem:[#allocation3 + $0x198] sm:$0xff] %vm330_vm0, %v4384_v54  ;;  %v4327_v44 = vmul.f32 %v10390_v9, %v4311_v55 }
 0x6ae   : > { %v4347_v42 = vpop.xlane.xlu1 %4346  ;;  %v7073_v34 = vpop.eup %7072  ;;  %7082 = vrcp.f32 %v5202_v13 }
 0x6af   : > { %v4385_v28 = vadd.f32 %v4347_v42, %v4321_v26  ;;  %7084 = vrcp.f32 %v5201_v61  ;;  %v5349_v41 = vld [vmem:[#allocation3 + $0x190] sm:$0xff]  ;;  %v7075_v12 = vpop.eup %7074 }
 0x6b0   : > { %5152 = vperm.xlu1 %6540, %v7053_v6   ;;  %5147 = vperm.xlu0 %6541, %v7051_v15   ;;  %v4312_v15 = vld [vmem:[#allocation3 + $0x1d8] sm:$0xff]  ;;  %v7077_v9 = vpop.eup %7076  ;;  %7086 = vrcp.f32 %v5363_v19 }
 0x6b1   : > { %4401 = vst.msk [vmem:[#allocation3 + $0x1a0] sm:$0xff] %vm330_vm0, %v4385_v28  ;;  %v5348_v20 = vld [vmem:[#allocation3 + $0x188] sm:$0xff]  ;;  %v4328_v36 = vmul.f32 %v10392_v40, %v4312_v15 }
 0x6b2   : > { %v4350_v8 = vpop.xlane.xlu0 %4349  ;;  %v5364_v42 = vmax.f32 %v5348_v20, 1e-09 }
 0x6b3   : > { %v4386_v56 = vadd.f32 %v4350_v8, %v4322_v16  ;;  %v5365_v16 = vmax.f32 %v5349_v41, 1e-09  ;;  %v4315_v8 = vld [vmem:[#allocation3 + $0x1f0] sm:$0xff] }
 0x6b4   : > { %5258 = vperm.xlu1 %6540, %v7057_v50   ;;  %5253 = vperm.xlu0 %6541, %v7055_v53   ;;  %v5350_v28 = vld [vmem:[#allocation3 + $0x198] sm:$0xff]  ;;  %v4329_v53 = vmul.f32 %v10396_v48, %v4313_v5  ;;  %v4314_v50 = vld [vmem:[#allocation3 + $0x1e8] sm:$0xff]  ;;  %7088 = vrcp.f32 %v5364_v42 }
 0x6b5   : > { %4402 = vst.msk [vmem:[#allocation3 + $0x1a8] sm:$0xff] %vm330_vm0, %v4386_v56  ;;  %v5366_v59 = vmax.f32 %v5350_v28, 1e-09  ;;  %v4330_v7 = vmul.f32 %v10398_v1, %v4314_v50  ;;  %7090 = vrcp.f32 %v5365_v16 }
 0x6b6   : > { %v4353_v14 = vpop.xlane.xlu1 %4352 }
 0x6b7   : > { %v4387_v58 = vadd.f32 %v4353_v14, %v4323_v18  ;;  %v4331_v18 = vmul.f32 %v10402_v37, %v4315_v8  ;;  %v4316_v14 = vld [vmem:[#allocation3 + $0x1f8] sm:$0xff]  ;;  %7092 = vrcp.f32 %v5366_v59 }
 0x6b8   : > { %5268 = vperm.xlu1 %6540, %v7059_v17   ;;  %5263 = vperm.xlu0 %6541, %v7061_v29   ;;  %v5351_v63 = vld [vmem:[#allocation3 + $0x1a0] sm:$0xff]  ;;  %v7079_v17 = vpop.eup %7078  ;;  %v4332_v1 = vmul.f32 %v10404_v21, %v4316_v14 }
 0x6b9   : > { %4403 = vst.msk [vmem:[#allocation3 + $0x1b0] sm:$0xff] %vm330_vm0, %v4387_v58  ;;  %v7081_v48 = vpop.eup %7080  ;;  %v5367_v23 = vmax.f32 %v5351_v63, 1e-09 }
 0x6ba   : > { %v4356_v4 = vpop.xlane.xlu0 %4355  ;;  %v7083_v35 = vpop.eup %7082 }
 0x6bb   : > { %v4388_v2 = vadd.f32 %v4356_v4, %v4324_v25  ;;  %7094 = vrcp.f32 %v5367_v23 }
 0x6bc   : > { %5278 = vperm.xlu1 %6540, %v7065_v51   ;;  %5273 = vperm.xlu0 %6541, %v7063_v30   ;;  %v5352_v40 = vld [vmem:[#allocation3 + $0x1a8] sm:$0xff]  ;;  %v7085_v51 = vpop.eup %7084 }
 0x6bd   : > { %4404 = vst.msk [vmem:[#allocation3 + $0x1b8] sm:$0xff] %vm330_vm0, %v4388_v2  ;;  %v5368_v11 = vmax.f32 %v5352_v40, 1e-09  ;;  %v7087_v3 = vpop.eup %7086  ;;  %v4414_v40 = vld [vmem:[#allocation4 + $0x180] sm:$0xff] }
 0x6be   : > { %v7089_v45 = vpop.eup %7088 }
 0x6bf   : > { %v4359_v62 = vpop.xlane.xlu1 %4358  ;;  %7096 = vrcp.f32 %v5368_v11  ;;  %v7091_v52 = vpop.eup %7090 }
 0x6c0   : > { %v4389_v32 = vadd.f32 %v4359_v62, %v4325_v47  ;;  %5288 = vperm.xlu1 %6540, %v7069_v43   ;;  %5283 = vperm.xlu0 %6541, %v7067_v49   ;;  %v5353_v0 = vld [vmem:[#allocation3 + $0x1b0] sm:$0xff] }
 0x6c1   : > { %v5369_v4 = vmax.f32 %v5353_v0, 1e-09 }
 0x6c2   : > { %4405 = vst.msk [vmem:[#allocation3 + $0x1c0] sm:$0xff] %vm330_vm0, %v4389_v32  ;;  %v7093_v32 = vpop.eup %7092 }
 0x6c3   : > { %v4362_v54 = vpop.xlane.xlu0 %4361  ;;  %7098 = vrcp.f32 %v5369_v4 }
 0x6c4   : > { %v4365_v6 = vpop.xlane.xlu1 %4364  ;;  %5298 = vperm.xlu1 %6540, %v7071_v39   ;;  %v4390_v26 = vadd.f32 %v4362_v54, %v4326_v33  ;;  %5293 = vperm.xlu0 %6541, %v7073_v34   ;;  %v5354_v25 = vld [vmem:[#allocation3 + $0x1b8] sm:$0xff] }
 0x6c5   : > { %v4391_v38 = vadd.f32 %v4365_v6, %v4327_v44  ;;  %v5370_v2 = vmax.f32 %v5354_v25, 1e-09  ;;  %v7095_v33 = vpop.eup %7094 }
 0x6c6   : > { %4406 = vst.msk [vmem:[#allocation3 + $0x1c8] sm:$0xff] %vm330_vm0, %v4390_v26 }
 0x6c7   : > { %4407 = vst.msk [vmem:[#allocation3 + $0x1d0] sm:$0xff] %vm330_vm0, %v4391_v38  ;;  %v4368_v57 = vpop.xlane.xlu0 %4367  ;;  %7100 = vrcp.f32 %v5370_v2  ;;  %v4417_v2 = vld [vmem:[#allocation4 + $0x198] sm:$0xff] }
 0x6c8   : > { %v4371_v27 = vpop.xlane.xlu1 %4370  ;;  %5308 = vperm.xlu1 %6540, %v7075_v12   ;;  %v4392_v46 = vadd.f32 %v4368_v57, %v4328_v36  ;;  %5303 = vperm.xlu0 %6541, %v7077_v9  }
 0x6c9   : > { %v4393_v56 = vadd.f32 %v4371_v27, %v4329_v53  ;;  %v5355_v24 = vld [vmem:[#allocation3 + $0x1c0] sm:$0xff]  ;;  %v7097_v44 = vpop.eup %7096 }
 0x6ca   : > { %4408 = vst.msk [vmem:[#allocation3 + $0x1d8] sm:$0xff] %vm330_vm0, %v4392_v46  ;;  %v5371_v21 = vmax.f32 %v5355_v24, 1e-09 }
 0x6cb   : > { %4409 = vst.msk [vmem:[#allocation3 + $0x1e0] sm:$0xff] %vm330_vm0, %v4393_v56  ;;  %v4374_v29 = vpop.xlane.xlu0 %4373 }
 0x6cc   : > { %5318 = vperm.xlu1 %6540, %v7079_v17   ;;  %v4377_v22 = vpop.xlane.xlu1 %4376  ;;  %v4394_v58 = vadd.f32 %v4374_v29, %v4330_v7  ;;  %5313 = vperm.xlu0 %6541, %v7081_v48   ;;  %7102 = vrcp.f32 %v5371_v21  ;;  %v4415_v29 = vld [vmem:[#allocation4 + $0x188] sm:$0xff] }
 0x6cd   : > { %v4395_v30 = vadd.f32 %v4377_v22, %v4331_v18  ;;  %v5356_v49 = vld [vmem:[#allocation3 + $0x1c8] sm:$0xff]  ;;  %v7099_v5 = vpop.eup %7098 }
 0x6ce   : > { %4410 = vst.msk [vmem:[#allocation3 + $0x1e8] sm:$0xff] %vm330_vm0, %v4394_v58  ;;  %v5357_v43 = vld [vmem:[#allocation3 + $0x1d0] sm:$0xff]  ;;  %v5372_v62 = vmax.f32 %v5356_v49, 1e-09 }
 0x6cf   : > { %4411 = vst.msk [vmem:[#allocation3 + $0x1f0] sm:$0xff] %vm330_vm0, %v4395_v30  ;;  %v4380_v37 = vpop.xlane.xlu0 %4379  ;;  %v5373_v61 = vmax.f32 %v5357_v43, 1e-09 }
 0x6d0   : > { %5328 = vperm.xlu1 %6540, %v7083_v35   ;;  %v10439_v10 = vpop.permute.xlu1 %4432  ;;  %v4396_v60 = vadd.f32 %v4380_v37, %v4332_v1  ;;  %5323 = vperm.xlu0 %6541, %v7085_v51   ;;  %7104 = vrcp.f32 %v5372_v62 }
 0x6d1   : > { %v5358_v13 = vld [vmem:[#allocation3 + $0x1d8] sm:$0xff]  ;;  %7106 = vrcp.f32 %v5373_v61  ;;  %v7101_v41 = vpop.eup %7100  ;;  %v4510_v22 = vmul.f32 %v10439_v10, %v4414_v40 }
 0x6d2   : > { %4412 = vst.msk [vmem:[#allocation3 + $0x1f8] sm:$0xff] %vm330_vm0, %v4396_v60  ;;  %v5359_v39 = vld [vmem:[#allocation3 + $0x1e0] sm:$0xff]  ;;  %v5374_v20 = vmax.f32 %v5358_v13, 1e-09  ;;  %v4416_v60 = vld [vmem:[#allocation4 + $0x190] sm:$0xff] }
 0x6d3   : > { %v5375_v15 = vmax.f32 %v5359_v39, 1e-09 }
 0x6d4   : > { %5434 = vperm.xlu1 %6540, %v7089_v45   ;;  %v10442_v47 = vpop.permute.xlu1 %4442  ;;  %5429 = vperm.xlu0 %6541, %v7087_v3   ;;  %7108 = vrcp.f32 %v5374_v20  ;;  %v4418_v20 = vld [vmem:[#allocation4 + $0x1a0] sm:$0xff] }
 0x6d5   : > { %v5360_v34 = vld [vmem:[#allocation3 + $0x1e8] sm:$0xff]  ;;  %7110 = vrcp.f32 %v5375_v15  ;;  %v4512_v49 = vmul.f32 %v10442_v47, %v4416_v60 }
 0x6d6   : > { %v5361_v6 = vld [vmem:[#allocation3 + $0x1f0] sm:$0xff]  ;;  %v5376_v26 = vmax.f32 %v5360_v34, 1e-09  ;;  %v7103_v9 = vpop.eup %7102 }
 0x6d7   : > { %v10444_v55 = vpop.permute.xlu0 %4437  ;;  %v5377_v12 = vmax.f32 %v5361_v6, 1e-09 }
 0x6d8   : > { %v10446_v31 = vpop.permute.xlu1 %4447  ;;  %5444 = vperm.xlu1 %6540, %v7093_v32   ;;  %5439 = vperm.xlu0 %6541, %v7091_v52   ;;  %7112 = vrcp.f32 %v5376_v26  ;;  %v4511_v35 = vmul.f32 %v10444_v55, %v4415_v29 }
 0x6d9   : > { %v5362_v42 = vld [vmem:[#allocation3 + $0x1f8] sm:$0xff]  ;;  %7114 = vrcp.f32 %v5377_v12  ;;  %v4513_v52 = vmul.f32 %v10446_v31, %v4417_v2 }
 0x6da   : > { %v5378_v36 = vmax.f32 %v5362_v42, 1e-09  ;;  %v7105_v53 = vpop.eup %7104 }
 0x6db   : > { %v10448_v54 = vpop.permute.xlu0 %4452  ;;  %v7107_v16 = vpop.eup %7106 }
 0x6dc   : > { %v10450_v19 = vpop.permute.xlu1 %4457  ;;  %5454 = vperm.xlu1 %6540, %v7097_v44   ;;  %5449 = vperm.xlu0 %6541, %v7095_v33   ;;  %7116 = vrcp.f32 %v5378_v36  ;;  %v4419_v33 = vld [vmem:[#allocation4 + $0x1a8] sm:$0xff]  ;;  %v4514_v15 = vmul.f32 %v10448_v54, %v4418_v20 }
 0x6dd   : > { %v4515_v42 = vmul.f32 %v10450_v19, %v4419_v33 }
 0x6de   : > { %v7109_v27 = vpop.eup %7108 }
 0x6df   : > { %v10452_v38 = vpop.permute.xlu0 %4462  ;;  %v7111_v59 = vpop.eup %7110 }
 0x6e0   : > { %v10454_v28 = vpop.permute.xlu1 %4467  ;;  %5464 = vperm.xlu1 %6540, %v7101_v41   ;;  %5459 = vperm.xlu0 %6541, %v7099_v5  }
 0x6e2   : > { %v7113_v63 = vpop.eup %7112 }
 0x6e3   : > { %v10456_v57 = vpop.permute.xlu0 %4472  ;;  %v7115_v7 = vpop.eup %7114 }
 0x6e4   : > { %v10458_v50 = vpop.permute.xlu1 %4477  ;;  %5474 = vperm.xlu1 %6540, %v7105_v53   ;;  %5469 = vperm.xlu0 %6541, %v7103_v9  }
 0x6e6   : > { %v7117_v18 = vpop.eup %7116 }
 0x6e7   : > { %v10460_v46 = vpop.permute.xlu0 %4482 }
 0x6e8   : > { %v10462_v8 = vpop.permute.xlu1 %4487  ;;  %5484 = vperm.xlu1 %6540, %v7109_v27   ;;  %5479 = vperm.xlu0 %6541, %v7107_v16   ;;  %v4420_v16 = vld [vmem:[#allocation4 + $0x1b0] sm:$0xff]  ;;  %v4421_v27 = vld [vmem:[#allocation4 + $0x1b8] sm:$0xff] }
 0x6e9   : > { %v4516_v40 = vmul.f32 %v10452_v38, %v4420_v16  ;;  %v4517_v29 = vmul.f32 %v10454_v28, %v4421_v27 }
 0x6eb   : > { %v10464_v56 = vpop.permute.xlu0 %4492 }
 0x6ec   : > { %v10466_v17 = vpop.permute.xlu1 %4497  ;;  %5494 = vperm.xlu1 %6540, %v7113_v63   ;;  %5489 = vperm.xlu0 %6541, %v7111_v59  }
 0x6ee   : > { %v6448_v48 = vpop.f32.mrb[32].mxu1 }
 0x6ef   : > { %v6449_v14 = vpop.f32.mrb[33].mxu1  ;;  %v10468_v23 = vpop.permute.xlu0 %4502 }
 0x6f0   : > { %v6450_v58 = vadd.f32 %v6449_v14, %v6448_v48  ;;  %v10471_v11 = vpop.permute.xlu1 %4507  ;;  %5504 = vperm.xlu1 %6540, %v7117_v18   ;;  %v6451_v0 = vpop.f32.mrb[34].mxu1  ;;  %5499 = vperm.xlu0 %6541, %v7115_v7  }
 0x6f1   : > { %v6452_v30 = vpop.f32.mrb[35].mxu1 }
 0x6f2   : > { %v4768_v25 = vadd.f32 %v6450_v58, %v4510_v22  ;;  %v6453_v1 = vadd.f32 %v6452_v30, %v6451_v0 }
 0x6f3   : > { %v10474_v51 = vpop.permute.xlu0 %4901 }
 0x6f4   : > { %4784 = vst.msk [vmem:[#allocation4 + $0x180] sm:$0xff] %vm459_vm1, %v4768_v25  ;;  %v4769_v37 = vadd.f32 %v6453_v1, %v4511_v35  ;;  %v10477_v4 = vpop.permute.xlu1 %4906  ;;  %v4422_v35 = vld [vmem:[#allocation4 + $0x1c0] sm:$0xff]  ;;  %v4423_v25 = vld [vmem:[#allocation4 + $0x1c8] sm:$0xff] }
 0x6f5   : > { %v4518_v60 = vmul.f32 %v10456_v57, %v4422_v35 }
 0x6f6   : > { %4785 = vst.msk [vmem:[#allocation4 + $0x188] sm:$0xff] %vm459_vm1, %v4769_v37  ;;  %v6454_v10 = vpop.f32.mrb[36].mxu1 }
 0x6f7   : > { %v6455_v24 = vpop.f32.mrb[37].mxu1  ;;  %v10480_v3 = vpop.permute.xlu0 %4911 }
 0x6f8   : > { %v6456_v45 = vadd.f32 %v6455_v24, %v6454_v10  ;;  %v10483_v21 = vpop.permute.xlu1 %4916  ;;  %v6457_v43 = vpop.f32.mrb[38].mxu1 }
 0x6f9   : > { %v6458_v62 = vpop.f32.mrb[39].mxu1 }
 0x6fa   : > { %v4770_v13 = vadd.f32 %v6456_v45, %v4512_v49  ;;  %v6459_v32 = vadd.f32 %v6458_v62, %v6457_v43  ;;  %v4519_v49 = vmul.f32 %v10458_v50, %v4423_v25  ;;  %v5059_v62 = vld [vmem:[#allocation4 + $0x80] sm:$0xff]  ;;  %v5065_v25 = vld [vmem:[#allocation4 + $0xb0] sm:$0xff] }
 0x6fb   : > { %v10486_v55 = vpop.permute.xlu0 %4921 }
 0x6fc   : > { %4786 = vst.msk [vmem:[#allocation4 + $0x190] sm:$0xff] %vm459_vm1, %v4770_v13  ;;  %v4771_v61 = vadd.f32 %v6459_v32, %v4513_v52  ;;  %v10489_v39 = vpop.permute.xlu1 %4926  ;;  %v5060_v32 = vld [vmem:[#allocation4 + $0x88] sm:$0xff] }
 0x6fe   : > { %4787 = vst.msk [vmem:[#allocation4 + $0x198] sm:$0xff] %vm459_vm1, %v4771_v61  ;;  %v6460_v47 = vpop.f32.mrb[40].mxu1 }
 0x6ff   : > { %v6461_v34 = vpop.f32.mrb[41].mxu1  ;;  %v10492_v44 = vpop.permute.xlu0 %4931 }
 0x700   : > { %v6462_v31 = vadd.f32 %v6461_v34, %v6460_v47  ;;  %v10495_v6 = vpop.permute.xlu1 %4936  ;;  %v6463_v26 = vpop.f32.mrb[42].mxu1  ;;  %v4424_v47 = vld [vmem:[#allocation4 + $0x1d0] sm:$0xff]  ;;  %v4425_v34 = vld [vmem:[#allocation4 + $0x1d8] sm:$0xff] }
 0x701   : > { %v6464_v5 = vpop.f32.mrb[43].mxu1  ;;  %v4521_v27 = vmul.f32 %v10462_v8, %v4425_v34  ;;  %v4427_v8 = vld [vmem:[#allocation4 + $0x1e8] sm:$0xff]  ;;  %v4428_v34 = vld [vmem:[#allocation4 + $0x1f0] sm:$0xff] }
 0x702   : > { %v4772_v41 = vadd.f32 %v6462_v31, %v4514_v15  ;;  %v6465_v12 = vadd.f32 %v6464_v5, %v6463_v26  ;;  %v5061_v15 = vld [vmem:[#allocation4 + $0x90] sm:$0xff]  ;;  %v4520_v26 = vmul.f32 %v10460_v46, %v4424_v47  ;;  %v5068_v47 = vld [vmem:[#allocation4 + $0xc8] sm:$0xff] }
 0x703   : > { %v10498_v36 = vpop.permute.xlu0 %4941 }
 0x704   : > { %4788 = vst.msk [vmem:[#allocation4 + $0x1a0] sm:$0xff] %vm459_vm1, %v4772_v41  ;;  %v4773_v9 = vadd.f32 %v6465_v12, %v4515_v42  ;;  %v10501_v53 = vpop.permute.xlu1 %4946  ;;  %v5062_v42 = vld [vmem:[#allocation4 + $0x98] sm:$0xff] }
 0x706   : > { %4789 = vst.msk [vmem:[#allocation4 + $0x1a8] sm:$0xff] %vm459_vm1, %v4773_v9  ;;  %v6466_v54 = vpop.f32.mrb[44].mxu1 }
 0x707   : > { %v6467_v59 = vpop.f32.mrb[45].mxu1  ;;  %v10504_v63 = vpop.permute.xlu0 %4951 }
 0x708   : > { %v6468_v19 = vadd.f32 %v6467_v59, %v6466_v54  ;;  %v10507_v7 = vpop.permute.xlu1 %4956  ;;  %v6469_v48 = vpop.f32.mrb[46].mxu1 }
 0x709   : > { %v6470_v18 = vpop.f32.mrb[47].mxu1 }
 0x70a   : > { %v4774_v14 = vadd.f32 %v6468_v19, %v4516_v40  ;;  %v6471_v22 = vadd.f32 %v6470_v18, %v6469_v48  ;;  %v5063_v19 = vld [vmem:[#allocation4 + $0xa0] sm:$0xff]  ;;  %v5064_v18 = vld [vmem:[#allocation4 + $0xa8] sm:$0xff] }
 0x70b   : > { %v10510_v58 = vpop.permute.xlu0 %4961 }
 0x70c   : > { %4790 = vst.msk [vmem:[#allocation4 + $0x1b0] sm:$0xff] %vm459_vm1, %v4774_v14  ;;  %v4775_v0 = vadd.f32 %v6471_v22, %v4517_v29  ;;  %v10513_v30 = vpop.permute.xlu1 %4966  ;;  %v4426_v22 = vld [vmem:[#allocation4 + $0x1e0] sm:$0xff] }
 0x70e   : > { %4791 = vst.msk [vmem:[#allocation4 + $0x1b8] sm:$0xff] %vm459_vm1, %v4775_v0  ;;  %v6472_v38 = vpop.f32.mrb[48].mxu1 }
 0x70f   : > { %v6473_v1 = vpop.f32.mrb[49].mxu1  ;;  %v10516_v37 = vpop.permute.xlu0 %4971 }
 0x710   : > { %v6474_v28 = vadd.f32 %v6473_v1, %v6472_v38  ;;  %v10519_v10 = vpop.permute.xlu1 %4976  ;;  %v6475_v2 = vpop.f32.mrb[50].mxu1 }
 0x711   : > { %v6476_v24 = vpop.f32.mrb[51].mxu1 }
 0x712   : > { %v4776_v45 = vadd.f32 %v6474_v28, %v4518_v60  ;;  %v6477_v43 = vadd.f32 %v6476_v24, %v6475_v2  ;;  %v4522_v60 = vmul.f32 %v10464_v56, %v4426_v22  ;;  %v5066_v2 = vld [vmem:[#allocation4 + $0xb8] sm:$0xff] }
 0x713   : > { %v5078_v52 = vpop.permute.xlu0 %5077 }
 0x714   : > { %4792 = vst.msk [vmem:[#allocation4 + $0x1c0] sm:$0xff] %vm459_vm1, %v4776_v45  ;;  %v4777_v13 = vadd.f32 %v6477_v43, %v4519_v49  ;;  %v5083_v61 = vpop.permute.xlu1 %5082  ;;  %v5155_v20 = vmul.f32 %v5078_v52, %v5059_v62  ;;  %v4523_v52 = vmul.f32 %v10466_v17, %v4427_v8  ;;  %v4429_v17 = vld [vmem:[#allocation4 + $0x1f8] sm:$0xff] }
 0x715   : > { %v5156_v33 = vmul.f32 %v5083_v61, %v5060_v32  ;;  %v5067_v61 = vld [vmem:[#allocation4 + $0xc0] sm:$0xff]  ;;  %v5074_v8 = vld [vmem:[#allocation4 + $0xf8] sm:$0xff] }
 0x716   : > { %4793 = vst.msk [vmem:[#allocation4 + $0x1c8] sm:$0xff] %vm459_vm1, %v4777_v13  ;;  %v6478_v57 = vpop.f32.mrb[52].mxu1  ;;  %5539 = vrot.lane.b32.xlu0 %v5155_v20, %s7214_s6 }
 0x717   : > { %5541 = vrot.lane.b32.xlu1 %v5156_v33, %s7214_s6  ;;  %v6479_v50 = vpop.f32.mrb[53].mxu1  ;;  %v5088_v31 = vpop.permute.xlu0 %5087 }
 0x718   : > { %v6480_v5 = vadd.f32 %v6479_v50, %v6478_v57  ;;  %v5093_v41 = vpop.permute.xlu1 %5092  ;;  %v5157_v12 = vmul.f32 %v5088_v31, %v5061_v15  ;;  %v6481_v9 = vpop.f32.mrb[54].mxu1 }
 0x719   : > { %v5158_v16 = vmul.f32 %v5093_v41, %v5062_v42  ;;  %v6482_v54 = vpop.f32.mrb[55].mxu1  ;;  %v4524_v42 = vmul.f32 %v10468_v23, %v4428_v34 }
 0x71a   : > { %v4778_v59 = vadd.f32 %v6480_v5, %v4520_v26  ;;  %v6483_v40 = vadd.f32 %v6482_v54, %v6481_v9  ;;  %5543 = vrot.lane.b32.xlu0 %v5157_v12, %s7214_s6  ;;  %v5069_v26 = vld [vmem:[#allocation4 + $0xd0] sm:$0xff]  ;;  %v5070_v12 = vld [vmem:[#allocation4 + $0xd8] sm:$0xff] }
 0x71b   : > { %5545 = vrot.lane.b32.xlu1 %v5158_v16, %s7214_s6  ;;  %v5098_v48 = vpop.permute.xlu0 %5097 }
 0x71c   : > { %4794 = vst.msk [vmem:[#allocation4 + $0x1d0] sm:$0xff] %vm459_vm1, %v4778_v59  ;;  %v4779_v46 = vadd.f32 %v6483_v40, %v4521_v27  ;;  %v5103_v29 = vpop.permute.xlu1 %5102  ;;  %v5159_v14 = vmul.f32 %v5098_v48, %v5063_v19  ;;  %v4525_v40 = vmul.f32 %v10471_v11, %v4429_v17  ;;  %v5073_v11 = vld [vmem:[#allocation4 + $0xf0] sm:$0xff]  ;;  %v5242_v17 = vld [vmem:[#allocation4 + $0x138] sm:$0xff] }
 0x71d   : > { %v5160_v0 = vmul.f32 %v5103_v29, %v5064_v18  ;;  %v5072_v29 = vld [vmem:[#allocation4 + $0xe8] sm:$0xff] }
 0x71e   : > { %4795 = vst.msk [vmem:[#allocation4 + $0x1d8] sm:$0xff] %vm459_vm1, %v4779_v46  ;;  %v6484_v35 = vpop.f32.mrb[56].mxu1  ;;  %5547 = vrot.lane.b32.xlu0 %v5159_v14, %s7214_s6  ;;  %v5071_v46 = vld [vmem:[#allocation4 + $0xe0] sm:$0xff] }
 0x71f   : > { %5549 = vrot.lane.b32.xlu1 %v5160_v0, %s7214_s6  ;;  %v6485_v38 = vpop.f32.mrb[57].mxu1  ;;  %v5108_v1 = vpop.permute.xlu0 %5107 }
 0x720   : > { %v6486_v28 = vadd.f32 %v6485_v38, %v6484_v35  ;;  %v5113_v24 = vpop.permute.xlu1 %5112  ;;  %v5161_v49 = vmul.f32 %v5108_v1, %v5065_v25  ;;  %v6487_v45 = vpop.f32.mrb[58].mxu1 }
 0x721   : > { %v5162_v43 = vmul.f32 %v5113_v24, %v5066_v2  ;;  %v6488_v62 = vpop.f32.mrb[59].mxu1  ;;  %v5236_v2 = vld [vmem:[#allocation4 + $0x108] sm:$0xff] }
 0x722   : > { %v4780_v13 = vadd.f32 %v6486_v28, %v4522_v60  ;;  %v6489_v32 = vadd.f32 %v6488_v62, %v6487_v45  ;;  %5551 = vrot.lane.b32.xlu0 %v5161_v49, %s7214_s6  ;;  %v5235_v60 = vld [vmem:[#allocation4 + $0x100] sm:$0xff] }
 0x723   : > { %5553 = vrot.lane.b32.xlu1 %v5162_v43, %s7214_s6  ;;  %v5118_v20 = vpop.permute.xlu0 %5117  ;;  %v5237_v43 = vld [vmem:[#allocation4 + $0x110] sm:$0xff] }
 0x724   : > { %4796 = vst.msk [vmem:[#allocation4 + $0x1e0] sm:$0xff] %vm459_vm1, %v4780_v13  ;;  %v4781_v56 = vadd.f32 %v6489_v32, %v4523_v52  ;;  %v5123_v33 = vpop.permute.xlu1 %5122  ;;  %v5163_v57 = vmul.f32 %v5118_v20, %v5067_v61  ;;  %v5238_v52 = vld [vmem:[#allocation4 + $0x118] sm:$0xff]  ;;  %v5239_v20 = vld [vmem:[#allocation4 + $0x120] sm:$0xff] }
 0x725   : > { %v5164_v50 = vmul.f32 %v5123_v33, %v5068_v47  ;;  %v5240_v47 = vld [vmem:[#allocation4 + $0x128] sm:$0xff] }
 0x726   : > { %4797 = vst.msk [vmem:[#allocation4 + $0x1e8] sm:$0xff] %vm459_vm1, %v4781_v56  ;;  %v6490_v15 = vpop.f32.mrb[60].mxu1  ;;  %5555 = vrot.lane.b32.xlu0 %v5163_v57, %s7214_s6 }
 0x727   : > { %5557 = vrot.lane.b32.xlu1 %v5164_v50, %s7214_s6  ;;  %v6491_v31 = vpop.f32.mrb[61].mxu1  ;;  %v5128_v5 = vpop.permute.xlu0 %5127  ;;  %v5241_v50 = vld [vmem:[#allocation4 + $0x130] sm:$0xff] }
 0x728   : > { %v6492_v41 = vadd.f32 %v6491_v31, %v6490_v15  ;;  %v5133_v9 = vpop.permute.xlu1 %5132  ;;  %v5165_v16 = vmul.f32 %v5128_v5, %v5069_v26  ;;  %v6493_v54 = vpop.f32.mrb[62].mxu1 }
 0x729   : > { %v5166_v27 = vmul.f32 %v5133_v9, %v5070_v12  ;;  %v6494_v59 = vpop.f32.mrb[63].mxu1  ;;  %v5244_v12 = vld [vmem:[#allocation4 + $0x148] sm:$0xff] }
 0x72a   : > { %v4782_v19 = vadd.f32 %v6492_v41, %v4524_v42  ;;  %v6495_v48 = vadd.f32 %v6494_v59, %v6493_v54  ;;  %5559 = vrot.lane.b32.xlu0 %v5165_v16, %s7214_s6  ;;  %v5243_v42 = vld [vmem:[#allocation4 + $0x140] sm:$0xff] }
 0x72b   : > { %5561 = vrot.lane.b32.xlu1 %v5166_v27, %s7214_s6  ;;  %v5138_v18 = vpop.permute.xlu0 %5137  ;;  %v5245_v27 = vld [vmem:[#allocation4 + $0x150] sm:$0xff] }
 0x72c   : > { %4798 = vst.msk [vmem:[#allocation4 + $0x1f0] sm:$0xff] %vm459_vm1, %v4782_v19  ;;  %v4783_v23 = vadd.f32 %v6495_v48, %v4525_v40  ;;  %v5143_v14 = vpop.permute.xlu1 %5142  ;;  %v5167_v22 = vmul.f32 %v5138_v18, %v5071_v46  ;;  %v5246_v40 = vld [vmem:[#allocation4 + $0x158] sm:$0xff]  ;;  %v5247_v18 = vld [vmem:[#allocation4 + $0x160] sm:$0xff] }
 0x72d   : > { %v5168_v0 = vmul.f32 %v5143_v14, %v5072_v29  ;;  %v5248_v29 = vld [vmem:[#allocation4 + $0x168] sm:$0xff] }
 0x72e   : > { %4799 = vst.msk [vmem:[#allocation4 + $0x1f8] sm:$0xff] %vm459_vm1, %v4783_v23  ;;  %5563 = vrot.lane.b32.xlu0 %v5167_v22, %s7214_s6 }
 0x72f   : > { %5565 = vrot.lane.b32.xlu1 %v5168_v0, %s7214_s6  ;;  %v5148_v35 = vpop.permute.xlu0 %5147 }
 0x730   : > { %v5153_v38 = vpop.permute.xlu1 %5152  ;;  %v5169_v25 = vmul.f32 %v5148_v35, %v5073_v11  ;;  %v5249_v11 = vld [vmem:[#allocation4 + $0x170] sm:$0xff] }
 0x731   : > { %v5170_v1 = vmul.f32 %v5153_v38, %v5074_v8  ;;  %v5250_v8 = vld [vmem:[#allocation4 + $0x178] sm:$0xff] }
 0x732   : > { %5567 = vrot.lane.b32.xlu0 %v5169_v25, %s7214_s6 }
 0x733   : > { %5569 = vrot.lane.b32.xlu1 %v5170_v1, %s7214_s6  ;;  %v5254_v28 = vpop.permute.xlu0 %5253 }
 0x734   : > { %v5259_v24 = vpop.permute.xlu1 %5258  ;;  %v5331_v49 = vmul.f32 %v5254_v28, %v5235_v60  ;;  %v5411_v60 = vld [vmem:[#allocation4 + $0x180] sm:$0xff] }
 0x735   : > { %v5332_v45 = vmul.f32 %v5259_v24, %v5236_v2  ;;  %v5412_v24 = vld [vmem:[#allocation4 + $0x188] sm:$0xff] }
 0x736   : > { %5603 = vrot.lane.b32.xlu0 %v5331_v49, %s7215_s7 }
 0x737   : > { %5605 = vrot.lane.b32.xlu1 %v5332_v45, %s7215_s7  ;;  %v5264_v62 = vpop.permute.xlu0 %5263 }
 0x738   : > { %v5269_v13 = vpop.permute.xlu1 %5268  ;;  %v5333_v32 = vmul.f32 %v5264_v62, %v5237_v43  ;;  %v5413_v43 = vld [vmem:[#allocation4 + $0x190] sm:$0xff] }
 0x739   : > { %v5334_v61 = vmul.f32 %v5269_v13, %v5238_v52  ;;  %v5414_v52 = vld [vmem:[#allocation4 + $0x198] sm:$0xff] }
 0x73a   : > { %5607 = vrot.lane.b32.xlu0 %v5333_v32, %s7215_s7 }
 0x73b   : > { %5609 = vrot.lane.b32.xlu1 %v5334_v61, %s7215_s7  ;;  %v5274_v56 = vpop.permute.xlu0 %5273 }
 0x73c   : > { %v5279_v33 = vpop.permute.xlu1 %5278  ;;  %v5335_v57 = vmul.f32 %v5274_v56, %v5239_v20  ;;  %v5415_v20 = vld [vmem:[#allocation4 + $0x1a0] sm:$0xff] }
 0x73d   : > { %v5336_v34 = vmul.f32 %v5279_v33, %v5240_v47  ;;  %v5416_v47 = vld [vmem:[#allocation4 + $0x1a8] sm:$0xff] }
 0x73e   : > { %5611 = vrot.lane.b32.xlu0 %v5335_v57, %s7215_s7 }
 0x73f   : > { %5613 = vrot.lane.b32.xlu1 %v5336_v34, %s7215_s7  ;;  %v5284_v15 = vpop.permute.xlu0 %5283 }
 0x740   : > { %v5289_v31 = vpop.permute.xlu1 %5288  ;;  %v5337_v26 = vmul.f32 %v5284_v15, %v5241_v50  ;;  %v5417_v50 = vld [vmem:[#allocation4 + $0x1b0] sm:$0xff] }
 0x741   : > { %v5338_v5 = vmul.f32 %v5289_v31, %v5242_v17  ;;  %v5418_v17 = vld [vmem:[#allocation4 + $0x1b8] sm:$0xff] }
 0x742   : > { %5615 = vrot.lane.b32.xlu0 %v5337_v26, %s7215_s7 }
 0x743   : > { %5617 = vrot.lane.b32.xlu1 %v5338_v5, %s7215_s7  ;;  %v5294_v41 = vpop.permute.xlu0 %5293 }
 0x744   : > { %v5299_v9 = vpop.permute.xlu1 %5298  ;;  %v5339_v16 = vmul.f32 %v5294_v41, %v5243_v42  ;;  %v5419_v42 = vld [vmem:[#allocation4 + $0x1c0] sm:$0xff] }
 0x745   : > { %v5340_v54 = vmul.f32 %v5299_v9, %v5244_v12  ;;  %v5420_v12 = vld [vmem:[#allocation4 + $0x1c8] sm:$0xff] }
 0x746   : > { %5619 = vrot.lane.b32.xlu0 %v5339_v16, %s7215_s7 }
 0x747   : > { %5621 = vrot.lane.b32.xlu1 %v5340_v54, %s7215_s7  ;;  %v5304_v59 = vpop.permute.xlu0 %5303 }
 0x748   : > { %v5309_v19 = vpop.permute.xlu1 %5308  ;;  %v5341_v48 = vmul.f32 %v5304_v59, %v5245_v27  ;;  %v5421_v27 = vld [vmem:[#allocation4 + $0x1d0] sm:$0xff] }
 0x749   : > { %v5342_v46 = vmul.f32 %v5309_v19, %v5246_v40  ;;  %v5422_v40 = vld [vmem:[#allocation4 + $0x1d8] sm:$0xff] }
 0x74a   : > { %5623 = vrot.lane.b32.xlu0 %v5341_v48, %s7215_s7 }
 0x74b   : > { %5625 = vrot.lane.b32.xlu1 %v5342_v46, %s7215_s7  ;;  %v5314_v23 = vpop.permute.xlu0 %5313 }
 0x74c   : > { %v5319_v14 = vpop.permute.xlu1 %5318  ;;  %v5343_v22 = vmul.f32 %v5314_v23, %v5247_v18  ;;  %v5423_v18 = vld [vmem:[#allocation4 + $0x1e0] sm:$0xff] }
 0x74d   : > { %v5344_v0 = vmul.f32 %v5319_v14, %v5248_v29  ;;  %v5424_v29 = vld [vmem:[#allocation4 + $0x1e8] sm:$0xff] }
 0x74e   : > { %5627 = vrot.lane.b32.xlu0 %v5343_v22, %s7215_s7 }
 0x74f   : > { %5629 = vrot.lane.b32.xlu1 %v5344_v0, %s7215_s7  ;;  %v5324_v35 = vpop.permute.xlu0 %5323 }
 0x750   : > { %v5329_v38 = vpop.permute.xlu1 %5328  ;;  %v5345_v25 = vmul.f32 %v5324_v35, %v5249_v11  ;;  %v5425_v11 = vld [vmem:[#allocation4 + $0x1f0] sm:$0xff] }
 0x751   : > { %v5346_v1 = vmul.f32 %v5329_v38, %v5250_v8  ;;  %v5426_v8 = vld [vmem:[#allocation4 + $0x1f8] sm:$0xff] }
 0x752   : > { %5631 = vrot.lane.b32.xlu0 %v5345_v25, %s7215_s7 }
 0x753   : > { %5633 = vrot.lane.b32.xlu1 %v5346_v1, %s7215_s7  ;;  %v5430_v28 = vpop.permute.xlu0 %5429 }
 0x754   : > { %v5435_v2 = vpop.permute.xlu1 %5434  ;;  %v5507_v49 = vmul.f32 %v5430_v28, %v5411_v60 }
 0x755   : > { %v5508_v45 = vmul.f32 %v5435_v2, %v5412_v24 }
 0x756   : > { %5667 = vrot.lane.b32.xlu0 %v5507_v49, %s7216_s8 }
 0x757   : > { %5669 = vrot.lane.b32.xlu1 %v5508_v45, %s7216_s8  ;;  %v5440_v62 = vpop.permute.xlu0 %5439 }
 0x758   : > { %v5445_v13 = vpop.permute.xlu1 %5444  ;;  %v5509_v32 = vmul.f32 %v5440_v62, %v5413_v43 }
 0x759   : > { %v5510_v61 = vmul.f32 %v5445_v13, %v5414_v52 }
 0x75a   : > { %5671 = vrot.lane.b32.xlu0 %v5509_v32, %s7216_s8 }
 0x75b   : > { %5673 = vrot.lane.b32.xlu1 %v5510_v61, %s7216_s8  ;;  %v5450_v56 = vpop.permute.xlu0 %5449 }
 0x75c   : > { %v5455_v33 = vpop.permute.xlu1 %5454  ;;  %v5511_v57 = vmul.f32 %v5450_v56, %v5415_v20 }
 0x75d   : > { %v5512_v34 = vmul.f32 %v5455_v33, %v5416_v47  ;;  %v4897_v47 = vld [vmem:[#allocation4 + $0x70] sm:$0xff] }
 0x75e   : > { %5675 = vrot.lane.b32.xlu0 %v5511_v57, %s7216_s8  ;;  %v4993_v33 = vmul.f32 %v10516_v37, %v4897_v47 }
 0x75f   : > { %5677 = vrot.lane.b32.xlu1 %v5512_v34, %s7216_s8  ;;  %v5460_v15 = vpop.permute.xlu0 %5459 }
 0x760   : > { %v5465_v31 = vpop.permute.xlu1 %5464  ;;  %v5513_v26 = vmul.f32 %v5460_v15, %v5417_v50 }
 0x761   : > { %v5514_v5 = vmul.f32 %v5465_v31, %v5418_v17 }
 0x762   : > { %5679 = vrot.lane.b32.xlu0 %v5513_v26, %s7216_s8 }
 0x763   : > { %5681 = vrot.lane.b32.xlu1 %v5514_v5, %s7216_s8  ;;  %v5470_v41 = vpop.permute.xlu0 %5469 }
 0x764   : > { %v5475_v9 = vpop.permute.xlu1 %5474  ;;  %v5515_v16 = vmul.f32 %v5470_v41, %v5419_v42 }
 0x765   : > { %v5516_v54 = vmul.f32 %v5475_v9, %v5420_v12 }
 0x766   : > { %5683 = vrot.lane.b32.xlu0 %v5515_v16, %s7216_s8 }
 0x767   : > { %5685 = vrot.lane.b32.xlu1 %v5516_v54, %s7216_s8  ;;  %v5480_v59 = vpop.permute.xlu0 %5479 }
 0x768   : > { %v5485_v19 = vpop.permute.xlu1 %5484  ;;  %v5517_v48 = vmul.f32 %v5480_v59, %v5421_v27 }
 0x769   : > { %v5518_v46 = vmul.f32 %v5485_v19, %v5422_v40  ;;  %v4883_v40 = vld [vmem:[#allocation4] sm:$0xff] }
 0x76a   : > { %5687 = vrot.lane.b32.xlu0 %v5517_v48, %s7216_s8  ;;  %v4884_v48 = vld [vmem:[#allocation4 + $0x8] sm:$0xff] }
 0x76b   : > { %5689 = vrot.lane.b32.xlu1 %v5518_v46, %s7216_s8  ;;  %v5490_v23 = vpop.permute.xlu0 %5489  ;;  %v4979_v46 = vmul.f32 %v10474_v51, %v4883_v40  ;;  %v10646_v51 = vld [vmem:[%s10871_s4] ss:$0 sm:$0xff] }
 0x76c   : > { %v5495_v14 = vpop.permute.xlu1 %5494  ;;  %v5519_v22 = vmul.f32 %v5490_v23, %v5423_v18  ;;  %v4980_v23 = vmul.f32 %v10477_v4, %v4884_v48  ;;  %v4891_v40 = vld [vmem:[#allocation4 + $0x40] sm:$0xff] }
 0x76d   : > { %v5520_v0 = vmul.f32 %v5495_v14, %v5424_v29  ;;  %v4886_v29 = vld [vmem:[#allocation4 + $0x18] sm:$0xff]  ;;  %v4885_v14 = vld [vmem:[#allocation4 + $0x10] sm:$0xff] }
 0x76e   : > { %5691 = vrot.lane.b32.xlu0 %v5519_v22, %s7216_s8  ;;  %v4982_v22 = vmul.f32 %v10483_v21, %v4886_v29  ;;  %v4987_v29 = vmul.f32 %v10498_v36, %v4891_v40 }
 0x76f   : > { %5693 = vrot.lane.b32.xlu1 %v5520_v0, %s7216_s8  ;;  %v5500_v35 = vpop.permute.xlu0 %5499  ;;  %v4981_v0 = vmul.f32 %v10480_v3, %v4885_v14  ;;  %v4894_v14 = vld [vmem:[#allocation4 + $0x58] sm:$0xff] }
 0x770   : > { %v5505_v38 = vpop.permute.xlu1 %5504  ;;  %v5521_v25 = vmul.f32 %v5500_v35, %v5425_v11  ;;  %v4888_v11 = vld [vmem:[#allocation4 + $0x28] sm:$0xff]  ;;  %v4887_v35 = vld [vmem:[#allocation4 + $0x20] sm:$0xff] }
 0x771   : > { %v5522_v1 = vmul.f32 %v5505_v38, %v5426_v8  ;;  %v4984_v38 = vmul.f32 %v10489_v39, %v4888_v11  ;;  %v4983_v4 = vmul.f32 %v10486_v55, %v4887_v35  ;;  %v4895_v11 = vld [vmem:[#allocation4 + $0x60] sm:$0xff] }
 0x772   : > { %5695 = vrot.lane.b32.xlu0 %v5521_v25, %s7216_s8  ;;  %v4890_v25 = vld [vmem:[#allocation4 + $0x38] sm:$0xff]  ;;  %v4991_v36 = vmul.f32 %v10510_v58, %v4895_v11 }
 0x773   : > { %5697 = vrot.lane.b32.xlu1 %v5522_v1, %s7216_s8  ;;  %v4889_v1 = vld [vmem:[#allocation4 + $0x30] sm:$0xff] }
 0x788   : > { %v5540_v60 = vpop.permute.xlu0 %5539 }
 0x789   : > { %v5542_v28 = vpop.permute.xlu1 %5541  ;;  %v5715_v8 = vsel %vm459_vm1, %v4979_v46, %v5540_v60  ;;  %v4985_v60 = vmul.f32 %v10492_v44, %v4889_v1  ;;  %v4990_v44 = vmul.f32 %v10507_v7, %v4894_v14 }
 0x78a   : > { %v5716_v47 = vsel %vm459_vm1, %v4980_v23, %v5542_v28  ;;  %v4893_v28 = vld [vmem:[#allocation4 + $0x50] sm:$0xff] }
 0x78c   : > { %v10584_v2 = vpop.permute.xlu0 %5543 }
 0x78d   : > { %v10586_v24 = vpop.permute.xlu1 %5545 }
 0x790   : > { %v10588_v49 = vpop.permute.xlu0 %5547 }
 0x791   : > { %v10590_v45 = vpop.permute.xlu1 %5549 }
 0x794   : > { %v10592_v43 = vpop.permute.xlu0 %5551 }
 0x795   : > { %v10594_v62 = vpop.permute.xlu1 %5553 }
 0x798   : > { %v10596_v52 = vpop.permute.xlu0 %5555 }
 0x799   : > { %v10598_v13 = vpop.permute.xlu1 %5557 }
 0x79c   : > { %v10600_v32 = vpop.permute.xlu0 %5559 }
 0x79d   : > { %v10602_v61 = vpop.permute.xlu1 %5561 }
 0x7a0   : > { %v10604_v20 = vpop.permute.xlu0 %5563 }
 0x7a1   : > { %v10606_v56 = vpop.permute.xlu1 %5565 }
 0x7a4   : > { %v5568_v57 = vpop.permute.xlu0 %5567 }
 0x7a5   : > { %v10609_v34 = vpop.permute.xlu1 %5569  ;;  %v10612_v50 = vsel %vm459_vm1, %v4993_v33, %v5568_v57  ;;  %v4986_v33 = vmul.f32 %v10495_v6, %v4890_v25  ;;  %v4892_v57 = vld [vmem:[#allocation4 + $0x48] sm:$0xff]  ;;  %v4989_v6 = vmul.f32 %v10504_v63, %v4893_v28 }
 0x7a6   : > { %v4988_v55 = vmul.f32 %v10501_v53, %v4892_v57  ;;  %v4896_v53 = vld [vmem:[#allocation4 + $0x68] sm:$0xff] }
 0x7a7   : > { %v4992_v63 = vmul.f32 %v10513_v30, %v4896_v53  ;;  %v5719_v30 = vsel %vm459_vm1, %v4983_v4, %v10588_v49  ;;  %v5722_v57 = vsel %vm459_vm1, %v4986_v33, %v10594_v62 }
 0x7a8   : > { %v5604_v15 = vpop.permute.xlu0 %5603 }
 0x7a9   : > { %v5606_v17 = vpop.permute.xlu1 %5605  ;;  %v5732_v21 = vsel %vm5731_vm2, %v5715_v8, %v5604_v15  ;;  %v5718_v8 = vsel %vm459_vm1, %v4982_v22, %v10586_v24  ;;  %v5720_v22 = vsel %vm459_vm1, %v4984_v38, %v10590_v45  ;;  %v5723_v45 = vsel %vm459_vm1, %v4987_v29, %v10596_v52 }
 0x7aa   : > { %v5733_v48 = vsel %vm5731_vm2, %v5716_v47, %v5606_v17  ;;  %v5717_v17 = vsel %vm459_vm1, %v4981_v0, %v10584_v2  ;;  %v4898_v47 = vld [vmem:[#allocation4 + $0x78] sm:$0xff]  ;;  %v5726_v52 = vsel %vm459_vm1, %v4990_v44, %v10602_v61 }
 0x7ab   : > { %v4994_v58 = vmul.f32 %v10519_v10, %v4898_v47  ;;  %v5721_v10 = vsel %vm459_vm1, %v4985_v60, %v10592_v43  ;;  %v5724_v43 = vsel %vm459_vm1, %v4988_v55, %v10598_v13  ;;  %v5727_v13 = vsel %vm459_vm1, %v4991_v36, %v10604_v20 }
 0x7ac   : > { %v5608_v31 = vpop.permute.xlu0 %5607 }
 0x7ad   : > { %v5610_v26 = vpop.permute.xlu1 %5609  ;;  %v5734_v25 = vsel %vm5731_vm2, %v5717_v17, %v5608_v31  ;;  %v5730_v61 = vsel %vm459_vm1, %v4994_v58, %v10609_v34 }
 0x7b0   : > { %v10614_v5 = vpop.permute.xlu0 %5611 }
 0x7b1   : > { %v10616_v42 = vpop.permute.xlu1 %5613  ;;  %v5736_v40 = vsel %vm5731_vm2, %v5719_v30, %v10614_v5 }
 0x7b2   : > { %v5737_v49 = vsel %vm5731_vm2, %v5720_v22, %v10616_v42  ;;  %v5725_v42 = vsel %vm459_vm1, %v4989_v6, %v10600_v32 }
 0x7b4   : > { %v10618_v41 = vpop.permute.xlu0 %5615 }
 0x7b5   : > { %v10620_v12 = vpop.permute.xlu1 %5617  ;;  %v5738_v55 = vsel %vm5731_vm2, %v5721_v10, %v10618_v41 }
 0x7b6   : > { %v5739_v32 = vsel %vm5731_vm2, %v5722_v57, %v10620_v12 }
 0x7b8   : > { %v10622_v9 = vpop.permute.xlu0 %5619 }
 0x7b9   : > { %v10624_v37 = vpop.permute.xlu1 %5621  ;;  %v5740_v20 = vsel %vm5731_vm2, %v5723_v45, %v10622_v9 }
 0x7ba   : > { %v5741_v34 = vsel %vm5731_vm2, %v5724_v43, %v10624_v37 }
 0x7bc   : > { %v10626_v16 = vpop.permute.xlu0 %5623 }
 0x7bd   : > { %v10628_v54 = vpop.permute.xlu1 %5625  ;;  %v5742_v12 = vsel %vm5731_vm2, %v5725_v42, %v10626_v16 }
 0x7be   : > { %v5743_v9 = vsel %vm5731_vm2, %v5726_v52, %v10628_v54 }
 0x7c0   : > { %v10630_v27 = vpop.permute.xlu0 %5627 }
 0x7c1   : > { %v10632_v59 = vpop.permute.xlu1 %5629  ;;  %v5744_v53 = vsel %vm5731_vm2, %v5727_v13, %v10630_v27 }
 0x7c4   : > { %v10634_v19 = vpop.permute.xlu0 %5631 }
 0x7c5   : > { %v10637_v18 = vpop.permute.xlu1 %5633 }
 0x7c8   : > { %v5668_v3 = vpop.permute.xlu0 %5667 }
 0x7c9   : > { %v5670_v46 = vpop.permute.xlu1 %5669  ;;  %v5749_v39 = vsel %vm5748_vm3, %v5732_v21, %v5668_v3  ;;  %v5735_v21 = vsel %vm5731_vm2, %v5718_v8, %v5610_v26 }
 0x7ca   : > { %v5750_v15 = vsel %vm5748_vm3, %v5733_v48, %v5670_v46  ;;  %v10660_v23 = vadd.f32 %v10646_v51, %v5749_v39  ;;  %v5728_v39 = vsel %vm459_vm1, %v4992_v63, %v10606_v56 }
 0x7cb   : > { %v10667_v35 = vadd.f32 %v10646_v51, %v5750_v15  ;;  %v5745_v17 = vsel %vm5731_vm2, %v5728_v39, %v10632_v59 }
 0x7cc   : > { %v5804_v1 = vmul.f32 1.442695, %v10660_v23  ;;  %v5672_v7 = vpop.permute.xlu0 %5671  ;;  %vm5788_vm5 = vcmp.gt.f32.partialorder %v10660_v23, 0.0 }
 0x7cd   : > { %v5806_v2 = vmul.f32 1.442695, %v10667_v35  ;;  %v5674_v0 = vpop.permute.xlu1 %5673  ;;  %v5751_v3 = vsel %vm5748_vm3, %v5734_v25, %v5672_v7  ;;  %vm5789_vm6 = vcmp.gt.f32.partialorder %v10667_v35, 0.0 }
 0x7ce   : > { %7118 = vpow2.f32 %v5804_v1  ;;  %v5752_v24 = vsel %vm5748_vm3, %v5735_v21, %v5674_v0  ;;  %v10681_v31 = vadd.f32 %v10646_v51, %v5751_v3 }
 0x7cf   : > { %7120 = vpow2.f32 %v5806_v2  ;;  %v10688_v26 = vadd.f32 %v10646_v51, %v5752_v24 }
 0x7d0   : > { %v5808_v48 = vmul.f32 1.442695, %v10681_v31  ;;  %v5676_v46 = vpop.permute.xlu0 %5675  ;;  %vm5790_vm7 = vcmp.gt.f32.partialorder %v10681_v31, 0.0 }
 0x7d1   : > { %v5810_v38 = vmul.f32 1.442695, %v10688_v26  ;;  %v5678_v4 = vpop.permute.xlu1 %5677  ;;  %v5753_v62 = vsel %vm5748_vm3, %v5736_v40, %v5676_v46  ;;  %vm5791_vm8 = vcmp.gt.f32.partialorder %v10688_v26, 0.0 }
 0x7d2   : > { %7122 = vpow2.f32 %v5808_v48  ;;  %v5754_v5 = vsel %vm5748_vm3, %v5737_v49, %v5678_v4  ;;  %v10707_v33 = vadd.f32 %v10646_v51, %v5753_v62  ;;  %v5746_v4 = vsel %vm5731_vm2, %v10612_v50, %v10634_v19 }
 0x7d3   : > { %7124 = vpow2.f32 %v5810_v38  ;;  %v10714_v60 = vadd.f32 %v10646_v51, %v5754_v5  ;;  %v5747_v38 = vsel %vm5731_vm2, %v5730_v61, %v10637_v18 }
 0x7d4   : > { %v5812_v29 = vmul.f32 1.442695, %v10707_v33  ;;  %v5680_v14 = vpop.permute.xlu0 %5679  ;;  %vm5792_vm9 = vcmp.gt.f32.partialorder %v10707_v33, 0.0 }
 0x7d5   : > { %v5814_v28 = vmul.f32 1.442695, %v10714_v60  ;;  %v5682_v15 = vpop.permute.xlu1 %5681  ;;  %v5755_v56 = vsel %vm5748_vm3, %v5738_v55, %v5680_v14  ;;  %vm5793_vm10 = vcmp.gt.f32.partialorder %v10714_v60, 0.0 }
 0x7d6   : > { %7126 = vpow2.f32 %v5812_v29  ;;  %v5756_v41 = vsel %vm5748_vm3, %v5739_v32, %v5682_v15  ;;  %v10733_v44 = vadd.f32 %v10646_v51, %v5755_v56 }
 0x7d7   : > { %7128 = vpow2.f32 %v5814_v28  ;;  %v10740_v6 = vadd.f32 %v10646_v51, %v5756_v41 }
 0x7d8   : > { %v7119_v11 = vpop.eup %7118  ;;  %v5816_v37 = vmul.f32 1.442695, %v10733_v44  ;;  %v5684_v36 = vpop.permute.xlu0 %5683  ;;  %vm5794_vm11 = vcmp.gt.f32.partialorder %v10733_v44, 0.0 }
 0x7d9   : > { %v7121_v8 = vpop.eup %7120  ;;  %v6221_v16 = vadd.f32 -1.0, %v7119_v11  ;;  %v5818_v25 = vmul.f32 1.442695, %v10740_v6  ;;  %v5686_v1 = vpop.permute.xlu1 %5685  ;;  %v5757_v7 = vsel %vm5748_vm3, %v5740_v20, %v5684_v36  ;;  %vm5795_vm12 = vcmp.gt.f32.partialorder %v10740_v6, 0.0 }
 0x7da   : > { %v6222_v54 = vadd.f32 -1.0, %v7121_v8  ;;  %7130 = vpow2.f32 %v5816_v37  ;;  %v5758_v27 = vsel %vm5748_vm3, %v5741_v34, %v5686_v1  ;;  %v10761_v59 = vadd.f32 %v10646_v51, %v5757_v7 }
 0x7db   : > { %v5852_v63 = vsel %vm5788_vm5, %v10660_v23, %v6221_v16  ;;  %7132 = vpow2.f32 %v5818_v25  ;;  %v10766_v47 = vadd.f32 %v10646_v51, %v5758_v27 }
 0x7dc   : > { %v7123_v21 = vpop.eup %7122  ;;  %v5853_v2 = vsel %vm5789_vm6, %v10667_v35, %v6222_v54  ;;  %v5869_v0 = vsel %vm5868_vm4, %v5852_v63, 0.0  ;;  %v5820_v3 = vmul.f32 1.442695, %v10761_v59  ;;  %v5688_v58 = vpop.permute.xlu0 %5687  ;;  %vm5796_vm13 = vcmp.gt.f32.partialorder %v10761_v59, 0.0 }
 0x7dd   : > { %v7125_v24 = vpop.eup %7124  ;;  %v5870_v22 = vsel %vm5868_vm4, %v5853_v2, 0.0  ;;  %5885 = vst [vmem:[%s10757_s12] sm:$0xff] %v5869_v0  ;;  %v6223_v23 = vadd.f32 -1.0, %v7123_v21  ;;  %v5822_v30 = vmul.f32 1.442695, %v10766_v47  ;;  %v5690_v57 = vpop.permute.xlu1 %5689  ;;  %v5759_v40 = vsel %vm5748_vm3, %v5742_v12, %v5688_v58 }
 0x7de   : > { %5886 = vst [vmem:[%s10757_s12 + $0x8] sm:$0xff] %v5870_v22  ;;  %v6224_v10 = vadd.f32 -1.0, %v7125_v24  ;;  %7134 = vpow2.f32 %v5820_v3  ;;  %v5760_v35 = vsel %vm5748_vm3, %v5743_v9, %v5690_v57  ;;  %v10784_v45 = vadd.f32 %v10646_v51, %v5759_v40 }
 0x7df   : > { %v5854_v48 = vsel %vm5790_vm7, %v10681_v31, %v6223_v23  ;;  %7136 = vpow2.f32 %v5822_v30  ;;  %v10781_v46 = vadd.f32 %v10646_v51, %v5760_v35  ;;  %vm5797_vm14 = vcmp.gt.f32.partialorder %v10766_v47, 0.0 }
 0x7e0   : > { %v7127_v49 = vpop.eup %7126  ;;  %v5855_v31 = vsel %vm5791_vm8, %v10688_v26, %v6224_v10  ;;  %v5871_v62 = vsel %vm5868_vm4, %v5854_v48, 0.0  ;;  %v5692_v43 = vpop.permute.xlu0 %5691  ;;  %v5824_v19 = vmul.f32 1.442695, %v10784_v45  ;;  %vm5798_vm0 = vcmp.gt.f32.partialorder %v10784_v45, 0.0 }
 0x7e1   : > { %v7129_v5 = vpop.eup %7128  ;;  %v5872_v52 = vsel %vm5868_vm4, %v5855_v31, 0.0  ;;  %5887 = vst [vmem:[%s10757_s12 + $0x10] sm:$0xff] %v5871_v62  ;;  %v6225_v42 = vadd.f32 -1.0, %v7127_v49  ;;  %v5826_v18 = vmul.f32 1.442695, %v10781_v46  ;;  %v5694_v39 = vpop.permute.xlu1 %5693  ;;  %v5761_v29 = vsel %vm5748_vm3, %v5744_v53, %v5692_v43 }
 0x7e2   : > { %5888 = vst [vmem:[%s10757_s12 + $0x18] sm:$0xff] %v5872_v52  ;;  %v6226_v50 = vadd.f32 -1.0, %v7129_v5  ;;  %v5762_v26 = vsel %vm5748_vm3, %v5745_v17, %v5694_v39  ;;  %v10811_v28 = vadd.f32 %v10646_v51, %v5761_v29  ;;  %vm5799_vm15 = vcmp.gt.f32.partialorder %v10781_v46, 0.0 }
 0x7e3   : > { %v5856_v13 = vsel %vm5792_vm9, %v10707_v33, %v6225_v42  ;;  %7138 = vpow2.f32 %v5826_v18  ;;  %v10805_v55 = vadd.f32 %v10646_v51, %v5762_v26 }
 0x7e4   : > { %v7131_v14 = vpop.eup %7130  ;;  %v5857_v61 = vsel %vm5793_vm10, %v10714_v60, %v6226_v50  ;;  %v5873_v32 = vsel %vm5868_vm4, %v5856_v13, 0.0  ;;  %7140 = vpow2.f32 %v5824_v19  ;;  %v5696_v15 = vpop.permute.xlu0 %5695  ;;  %v5828_v12 = vmul.f32 1.442695, %v10811_v28 }
 0x7e5   : > { %v7133_v56 = vpop.eup %7132  ;;  %v5874_v33 = vsel %vm5868_vm4, %v5857_v61, 0.0  ;;  %5889 = vst [vmem:[%s10757_s12 + $0x20] sm:$0xff] %v5873_v32  ;;  %v6227_v20 = vadd.f32 -1.0, %v7131_v14  ;;  %v5830_v41 = vmul.f32 1.442695, %v10805_v55  ;;  %v5698_v34 = vpop.permute.xlu1 %5697  ;;  %v5763_v53 = vsel %vm5748_vm3, %v5746_v4, %v5696_v15 }
 0x7e6   : > { %5890 = vst [vmem:[%s10757_s12 + $0x28] sm:$0xff] %v5874_v33  ;;  %v6228_v60 = vadd.f32 -1.0, %v7133_v56  ;;  %v5764_v11 = vsel %vm5748_vm3, %v5747_v38, %v5698_v34  ;;  %v5786_v16 = vadd.f32 %v10646_v51, %v5763_v53  ;;  %vm5801_vm1 = vcmp.gt.f32.partialorder %v10805_v55, 0.0 }
 0x7e7   : > { %v5858_v9 = vsel %vm5794_vm11, %v10733_v44, %v6227_v20  ;;  %7142 = vpow2.f32 %v5830_v41  ;;  %v5787_v17 = vadd.f32 %v10646_v51, %v5764_v11  ;;  %vm5800_vm2 = vcmp.gt.f32.partialorder %v10811_v28, 0.0 }
 0x7e8   : > { %v7135_v37 = vpop.eup %7134  ;;  %v5859_v36 = vsel %vm5795_vm12, %v10740_v6, %v6228_v60  ;;  %v5875_v8 = vsel %vm5868_vm4, %v5858_v9, 0.0  ;;  %7144 = vpow2.f32 %v5828_v12  ;;  %v5832_v27 = vmul.f32 1.442695, %v5786_v16 }
 0x7e9   : > { %v7137_v25 = vpop.eup %7136  ;;  %v5876_v1 = vsel %vm5868_vm4, %v5859_v36, 0.0  ;;  %5891 = vst [vmem:[%s10757_s12 + $0x30] sm:$0xff] %v5875_v8  ;;  %v6229_v7 = vadd.f32 -1.0, %v7135_v37  ;;  %v5834_v44 = vmul.f32 1.442695, %v5787_v17  ;;  %vm5803_vm3 = vcmp.gt.f32.partialorder %v5787_v17, 0.0 }
 0x7ea   : > { %5892 = vst [vmem:[%s10757_s12 + $0x38] sm:$0xff] %v5876_v1  ;;  %v6230_v54 = vadd.f32 -1.0, %v7137_v25  ;;  %vm5802_vm5 = vcmp.gt.f32.partialorder %v5786_v16, 0.0 }
 0x7eb   : > { %v5860_v6 = vsel %vm5796_vm13, %v10761_v59, %v6229_v7  ;;  %7146 = vpow2.f32 %v5834_v44 }
 0x7ec   : > { %v5861_v51 = vsel %vm5797_vm14, %v10766_v47, %v6230_v54  ;;  %v5877_v63 = vsel %vm5868_vm4, %v5860_v6, 0.0  ;;  %7148 = vpow2.f32 %v5832_v27 }
 0x7ed   : > { %v7139_v21 = vpop.eup %7138  ;;  %v5878_v2 = vsel %vm5868_vm4, %v5861_v51, 0.0  ;;  %5893 = vst [vmem:[%s10757_s12 + $0x40] sm:$0xff] %v5877_v63 }
 0x7ee   : > { %v7141_v0 = vpop.eup %7140  ;;  %5894 = vst [vmem:[%s10757_s12 + $0x48] sm:$0xff] %v5878_v2  ;;  %v6232_v3 = vadd.f32 -1.0, %v7139_v21 }
 0x7ef   : > { %v6231_v58 = vadd.f32 -1.0, %v7141_v0 }
 0x7f0   : > { %v5863_v59 = vsel %vm5799_vm15, %v10781_v46, %v6232_v3 }
 0x7f1   : > { %v7143_v47 = vpop.eup %7142  ;;  %v5880_v24 = vsel %vm5868_vm4, %v5863_v59, 0.0  ;;  %v5862_v22 = vsel %vm5798_vm0, %v10784_v45, %v6231_v58 }
 0x7f2   : > { %v7145_v23 = vpop.eup %7144  ;;  %5896 = vst [vmem:[%s10757_s12 + $0x58] sm:$0xff] %v5880_v24  ;;  %v5879_v30 = vsel %vm5868_vm4, %v5862_v22, 0.0  ;;  %v6234_v57 = vadd.f32 -1.0, %v7143_v47 }
 0x7f3   : > { %5895 = vst [vmem:[%s10757_s12 + $0x50] sm:$0xff] %v5879_v30  ;;  %v6233_v10 = vadd.f32 -1.0, %v7145_v23 }
 0x7f4   : > { %v5865_v35 = vsel %vm5801_vm1, %v10805_v55, %v6234_v57 }
 0x7f5   : > { %v7147_v40 = vpop.eup %7146  ;;  %v5882_v48 = vsel %vm5868_vm4, %v5865_v35, 0.0  ;;  %v5864_v46 = vsel %vm5800_vm2, %v10811_v28, %v6233_v10 }
 0x7f6   : > { %v7149_v45 = vpop.eup %7148  ;;  %5898 = vst [vmem:[%s10757_s12 + $0x68] sm:$0xff] %v5882_v48  ;;  %v5881_v49 = vsel %vm5868_vm4, %v5864_v46, 0.0  ;;  %v6236_v38 = vadd.f32 -1.0, %v7147_v40 }
 0x7f7   : > { %5897 = vst [vmem:[%s10757_s12 + $0x60] sm:$0xff] %v5881_v49  ;;  %v6235_v4 = vadd.f32 -1.0, %v7149_v45 }
 0x7f8   : > { %v5867_v31 = vsel %vm5803_vm3, %v5787_v17, %v6236_v38 }
 0x7f9   : > { %v5884_v62 = vsel %vm5868_vm4, %v5867_v31, 0.0  ;;  %v5866_v43 = vsel %vm5802_vm5, %v5786_v16, %v6235_v4 }
 0x7fa   : > { %5900 = vst [vmem:[%s10757_s12 + $0x78] sm:$0xff] %v5884_v62  ;;  %v5883_v5 = vsel %vm5868_vm4, %v5866_v43, 0.0 }
 0x7fb   : > { %5899 = vst [vmem:[%s10757_s12 + $0x70] sm:$0xff] %v5883_v5 }
 0x7fc PF: > { %s15_s20 = sadd.s32 1, %s7206_s20   ;;  %s11575_s18 = smov %s7202_s19 }
 0x7fd   : > { %p12_p6 = scmp.ge.s32.totalorder %s15_s20, 4   ;;  %s11576_s19 = smov %s11578_s21 }
 0x7ff   :  { %14 = sbr.rel (!%p12_p6) target bundleno = 2 (0x2), region = 99 }

</bundles_post_ra>
